<compile_context>
chip_gen: v7x
topology: tpu7x:2x2x1
jax: 0.10.0
libtpu: 0.0.40
codegen_flags: <defaults>
</compile_context>

<pallas_src>
import math

import jax
import jax.numpy as jnp
from jax.experimental import pallas as pl
from jax.experimental.pallas import tpu as pltpu

_BF16 = jnp.bfloat16
_VMEM_LIMIT = 32 * 1024 * 1024   # explicit scoped-VMEM budget (safe on v5e/v6e/v7x)


def _pick_tile(dim, candidates):
    for c in candidates:
        if dim % c == 0:
            return c
    return dim


# ----------------------------------------------------------------------------
# Generic tiled matmul with fused LayerNorm prologue / activation / residual
# ----------------------------------------------------------------------------

def _make_matmul_kernel(has_ln, has_res, activation, ln_eps):
    def kernel(*refs):
        x_ref, w_ref, b_ref = refs[0:3]
        idx = 3
        if has_ln:
            lg_ref, lb_ref = refs[idx:idx + 2]
            idx += 2
        if has_res:
            r_ref = refs[idx]
            idx += 1
        o_ref = refs[idx]
        acc_ref = refs[idx + 1]

        @pl.when(pl.program_id(2) == 0)
        def _():
            acc_ref[...] = jnp.zeros_like(acc_ref)

        x = x_ref[...]
        if has_ln:
            mu = jnp.mean(x, axis=-1, keepdims=True)
            xc = x - mu
            var = jnp.mean(xc * xc, axis=-1, keepdims=True)
            x = xc * jax.lax.rsqrt(var + ln_eps) * lg_ref[...] + lb_ref[...]
        acc_ref[...] += jnp.dot(x.astype(_BF16), w_ref[...].astype(_BF16),
                                preferred_element_type=jnp.float32)

        @pl.when(pl.program_id(2) == pl.num_programs(2) - 1)
        def _():
            y = acc_ref[...] + b_ref[...]
            if activation == "silu":
                y = y * jax.nn.sigmoid(y)
            elif activation == "gelu":       # exact erf GELU (nn.GELU default)
                y = 0.5 * y * (1.0 + jax.lax.erf(y * (1.0 / math.sqrt(2.0))))
            if has_res:
                y = y + r_ref[...]
            o_ref[...] = y.astype(o_ref.dtype)

    return kernel


def fused_matmul(x, w, b, *, ln=None, residual=None, activation=None, ln_eps=1e-5):
    """(M,K)@(K,N)+b with optional fused LayerNorm (over K), SiLU/GELU, residual add."""
    M, K = x.shape
    _, N = w.shape
    tm = _pick_tile(M, (512, 256, 128))
    tn = _pick_tile(N, (512, 256, 128))
    tk = K if ln is not None else _pick_tile(K, (512, 256, 128))
    grid = (M // tm, N // tn, K // tk)

    in_specs = [pl.BlockSpec((tm, tk), lambda i, j, k: (i, k)),
                pl.BlockSpec((tk, tn), lambda i, j, k: (k, j)),
                pl.BlockSpec((1, tn), lambda i, j, k: (0, j))]
    args = [x, w, b.reshape(1, N)]
    if ln is not None:
        lg, lb = ln
        in_specs += [pl.BlockSpec((1, tk), lambda i, j, k: (0, k)),
                     pl.BlockSpec((1, tk), lambda i, j, k: (0, k))]
        args += [lg.reshape(1, K), lb.reshape(1, K)]
    if residual is not None:
        in_specs.append(pl.BlockSpec((tm, tn), lambda i, j, k: (i, j)))
        args.append(residual)

    kern = _make_matmul_kernel(ln is not None, residual is not None, activation, ln_eps)
    return pl.pallas_call(
        kern,
        grid=grid,
        in_specs=in_specs,
        out_specs=pl.BlockSpec((tm, tn), lambda i, j, k: (i, j)),
        out_shape=jax.ShapeDtypeStruct((M, N), jnp.float32),
        scratch_shapes=[pltpu.VMEM((tm, tn), jnp.float32)],
        compiler_params=pltpu.CompilerParams(
            dimension_semantics=("parallel", "parallel", "arbitrary"),
            vmem_limit_bytes=_VMEM_LIMIT),
    )(*args)


# ----------------------------------------------------------------------------
# GroupNorm helper (used inside kernels; two-pass variance)
# ----------------------------------------------------------------------------

def _group_norm_silu(x, g, b, m, mt, inv_denom, eps, silu):
    s = jnp.sum(x, axis=0, keepdims=True)                                   # (1,C)
    mean_g = jnp.dot(s, m, preferred_element_type=jnp.float32) * inv_denom  # (1,G)
    mean_c = jnp.dot(mean_g, mt, preferred_element_type=jnp.float32)        # (1,C)
    xc = x - mean_c
    ssq = jnp.sum(xc * xc, axis=0, keepdims=True)
    var_g = jnp.dot(ssq, m, preferred_element_type=jnp.float32) * inv_denom
    rstd_c = jnp.dot(jax.lax.rsqrt(var_g + eps), mt,
                     preferred_element_type=jnp.float32)
    y = xc * rstd_c * g + b
    if silu:
        y = y * jax.nn.sigmoid(y)
    return y


# ----------------------------------------------------------------------------
# Fused ResNet conv kernel: GN + SiLU + zero-pad + 3x3 conv (+ time-emb / residual)
# ----------------------------------------------------------------------------

def _make_resnet_conv_kernel(H, W, Cin, Cout, G, eps, P, mode, has_proj):
    HW = H * W
    inv_denom = 1.0 / float(HW * (Cin // G))

    def kernel(*refs):
        x_ref, g_ref, be_ref, m_ref, mt_ref, em_ref, w_ref, b_ref = refs[:8]
        idx = 8
        if mode == "first":
            t_ref, tw_ref, tb_ref = refs[idx:idx + 3]
            idx += 3
            if has_proj:
                rw_ref, rb_ref = refs[idx:idx + 2]
                idx += 2
        else:
            res_ref = refs[idx]
            idx += 1
        o_ref = refs[idx]
        idx += 1
        ro_ref = refs[idx] if (mode == "first" and has_proj) else None
        pad_ref = refs[-1]

        x = x_ref[0]                                          # (HW, Cin) raw input
        y = _group_norm_silu(x, g_ref[...], be_ref[...], m_ref[...], mt_ref[...],
                             inv_denom, eps, silu=True)

        # zero-padded token buffer (padding applied AFTER GN+SiLU, like PyTorch)
        pad_ref[...] = jnp.zeros(pad_ref.shape, pad_ref.dtype)
        pad_ref[pl.ds(P, HW), :] = y

        ml = em_ref[:, 0:1]     # 1.0 where pixel is not at the left image edge
        mr = em_ref[:, 1:2]     # 1.0 where pixel is not at the right image edge
        acc = jnp.zeros((HW, Cout), jnp.float32)
        for dy in range(3):
            for dx in range(3):
                start = P + (dy - 1) * W + (dx - 1)
                slab = pad_ref[pl.ds(start, HW), :]
                if dx == 0:
                    slab = slab * ml
                elif dx == 2:
                    slab = slab * mr
                tap = w_ref[pl.ds((dy * 3 + dx) * Cin, Cin), :]
                acc = acc + jnp.dot(slab.astype(_BF16), tap.astype(_BF16),
                                    preferred_element_type=jnp.float32)
        out = acc + b_ref[...]

        if mode == "first":
            te = jnp.dot(t_ref[0], tw_ref[...],
                         preferred_element_type=jnp.float32) + tb_ref[...]
            te = te * jax.nn.sigmoid(te)                       # Linear + SiLU
            out = out + te                                     # broadcast over tokens
            if has_proj:
                ro_ref[0] = (jnp.dot(x.astype(_BF16), rw_ref[...].astype(_BF16),
                                     preferred_element_type=jnp.float32)
                             + rb_ref[...])
        else:
            out = out + res_ref[0]
        o_ref[0] = out

    return kernel


def _resnet_conv_call(x_tok, gn_g, gn_b, w9, b, *, H, W, Cout, G, eps, mode,
                      t_emb=None, tw=None, tb=None, rw=None, rb=None, res_tok=None):
    B, HW, Cin = x_tok.shape
    P = ((W + 1 + 7) // 8) * 8                       # 8-aligned leading zero rows
    Tp = ((P + HW + W + 1 + 7) // 8) * 8             # padded token buffer length
    gid = jnp.arange(Cin) // (Cin // G)
    m = jax.nn.one_hot(gid, G, dtype=jnp.float32)    # channel->group map (Cin, G)
    mt = m.T
    col = jnp.arange(HW, dtype=jnp.int32) % W
    emask = jnp.stack([(col != 0), (col != W - 1)], axis=1).astype(jnp.float32)

    has_proj = rw is not None
    in_specs = [pl.BlockSpec((1, HW, Cin), lambda bb: (bb, 0, 0)),
                pl.BlockSpec((1, Cin), lambda bb: (0, 0)),
                pl.BlockSpec((1, Cin), lambda bb: (0, 0)),
                pl.BlockSpec((Cin, G), lambda bb: (0, 0)),
                pl.BlockSpec((G, Cin), lambda bb: (0, 0)),
                pl.BlockSpec((HW, 2), lambda bb: (0, 0)),
                pl.BlockSpec((9 * Cin, Cout), lambda bb: (0, 0)),
                pl.BlockSpec((1, Cout), lambda bb: (0, 0))]
    args = [x_tok, gn_g.reshape(1, Cin), gn_b.reshape(1, Cin), m, mt, emask,
            w9, b.reshape(1, Cout)]
    if mode == "first":
        E = t_emb.shape[-1]
        in_specs += [pl.BlockSpec((1, 1, E), lambda bb: (bb, 0, 0)),
                     pl.BlockSpec((E, Cout), lambda bb: (0, 0)),
                     pl.BlockSpec((1, Cout), lambda bb: (0, 0))]
        args += [t_emb.reshape(B, 1, E), tw, tb.reshape(1, Cout)]
        if has_proj:
            in_specs += [pl.BlockSpec((Cin, Cout), lambda bb: (0, 0)),
                         pl.BlockSpec((1, Cout), lambda bb: (0, 0))]
            args += [rw, rb.reshape(1, Cout)]
    else:
        in_specs.append(pl.BlockSpec((1, HW, Cout), lambda bb: (bb, 0, 0)))
        args.append(res_tok)

    out_spec = pl.BlockSpec((1, HW, Cout), lambda bb: (bb, 0, 0))
    if mode == "first" and has_proj:
        out_specs = (out_spec, pl.BlockSpec((1, HW, Cout), lambda bb: (bb, 0, 0)))
        out_shape = (jax.ShapeDtypeStruct((B, HW, Cout), jnp.float32),
                     jax.ShapeDtypeStruct((B, HW, Cout), jnp.float32))
    else:
        out_specs = out_spec
        out_shape = jax.ShapeDtypeStruct((B, HW, Cout), jnp.float32)

    kern = _make_resnet_conv_kernel(H, W, Cin, Cout, G, eps, P, mode, has_proj)
    return pl.pallas_call(
        kern,
        grid=(B,),
        in_specs=in_specs,
        out_specs=out_specs,
        out_shape=out_shape,
        scratch_shapes=[pltpu.VMEM((Tp, Cin), jnp.float32)],
        compiler_params=pltpu.CompilerParams(
            dimension_semantics=("parallel",),
            vmem_limit_bytes=_VMEM_LIMIT),
    )(*args)


# ----------------------------------------------------------------------------
# GroupNorm(eps=1e-6) + 1x1 conv (transformer front)
# ----------------------------------------------------------------------------

def _make_gn_conv1x1_kernel(G, eps, HW, C):
    inv_denom = 1.0 / float(HW * (C // G))

    def kernel(x_ref, g_ref, be_ref, m_ref, mt_ref, w_ref, b_ref, o_ref):
        x = x_ref[0]
        y = _group_norm_silu(x, g_ref[...], be_ref[...], m_ref[...], mt_ref[...],
                             inv_denom, eps, silu=False)
        o_ref[0] = (jnp.dot(y.astype(_BF16), w_ref[...].astype(_BF16),
                            preferred_element_type=jnp.float32) + b_ref[...])

    return kernel


def gn_conv1x1(x_tok, gn_g, gn_b, w, b, *, G=32, eps=1e-6):
    B, HW, C = x_tok.shape
    gid = jnp.arange(C) // (C // G)
    m = jax.nn.one_hot(gid, G, dtype=jnp.float32)
    mt = m.T
    return pl.pallas_call(
        _make_gn_conv1x1_kernel(G, eps, HW, C),
        grid=(B,),
        in_specs=[pl.BlockSpec((1, HW, C), lambda bb: (bb, 0, 0)),
                  pl.BlockSpec((1, C), lambda bb: (0, 0)),
                  pl.BlockSpec((1, C), lambda bb: (0, 0)),
                  pl.BlockSpec((C, G), lambda bb: (0, 0)),
                  pl.BlockSpec((G, C), lambda bb: (0, 0)),
                  pl.BlockSpec((C, C), lambda bb: (0, 0)),
                  pl.BlockSpec((1, C), lambda bb: (0, 0))],
        out_specs=pl.BlockSpec((1, HW, C), lambda bb: (bb, 0, 0)),
        out_shape=jax.ShapeDtypeStruct((B, HW, C), jnp.float32),
        compiler_params=pltpu.CompilerParams(
            dimension_semantics=("parallel",),
            vmem_limit_bytes=_VMEM_LIMIT),
    )(x_tok, gn_g.reshape(1, C), gn_b.reshape(1, C), m, mt, w, b.reshape(1, C))


# ----------------------------------------------------------------------------
# Multi-head attention: all heads per batch element, fused out-proj + residual
# ----------------------------------------------------------------------------

def _make_attention_kernel(C, num_heads, packed):
    d = C // num_heads
    scale = 1.0 / math.sqrt(d)

    def kernel(*refs):
        if packed:
            qkv_ref, wo_ref, bo_ref, r_ref, o_ref = refs
            qkv = qkv_ref[0]
            q = qkv[:, 0:C]
            k = qkv[:, C:2 * C]
            v = qkv[:, 2 * C:3 * C]
        else:
            q_ref, kv_ref, wo_ref, bo_ref, r_ref, o_ref = refs
            q = q_ref[0]
            kv = kv_ref[0]
            k = kv[:, 0:C]
            v = kv[:, C:2 * C]

        S = q.shape[0]
        acc = jnp.zeros((S, C), jnp.float32)
        for h in range(num_heads):
            qh = q[:, h * d:(h + 1) * d].astype(_BF16)
            kh = k[:, h * d:(h + 1) * d].astype(_BF16)
            vh = v[:, h * d:(h + 1) * d].astype(_BF16)
            s = jax.lax.dot_general(qh, kh, (((1,), (1,)), ((), ())),
                                    preferred_element_type=jnp.float32) * scale
            mx = jnp.max(s, axis=-1, keepdims=True)
            p = jnp.exp(s - mx)
            denom = jnp.sum(p, axis=-1, keepdims=True)
            p = p * pl.reciprocal(denom, approx=True)
            oh = jnp.dot(p.astype(_BF16), vh, preferred_element_type=jnp.float32)
            wo_h = wo_ref[pl.ds(h * d, d), :]          # out-proj rows of this head
            acc = acc + jnp.dot(oh.astype(_BF16), wo_h.astype(_BF16),
                                preferred_element_type=jnp.float32)
        o_ref[0] = acc + bo_ref[...] + r_ref[0]

    return kernel


def attention_block(q_or_qkv, kv, wo, bo, residual, num_heads, *, packed):
    B, S, _ = q_or_qkv.shape
    C = residual.shape[-1]
    if packed:
        in_specs = [pl.BlockSpec((1, S, 3 * C), lambda bb: (bb, 0, 0))]
        args = [q_or_qkv]
    else:
        T = kv.shape[1]
        in_specs = [pl.BlockSpec((1, S, C), lambda bb: (bb, 0, 0)),
                    pl.BlockSpec((1, T, 2 * C), lambda bb: (bb, 0, 0))]
        args = [q_or_qkv, kv]
    in_specs += [pl.BlockSpec((C, C), lambda bb: (0, 0)),
                 pl.BlockSpec((1, C), lambda bb: (0, 0)),
                 pl.BlockSpec((1, S, C), lambda bb: (bb, 0, 0))]
    args += [wo, bo.reshape(1, C), residual]
    return pl.pallas_call(
        _make_attention_kernel(C, num_heads, packed),
        grid=(B,),
        in_specs=in_specs,
        out_specs=pl.BlockSpec((1, S, C), lambda bb: (bb, 0, 0)),
        out_shape=jax.ShapeDtypeStruct((B, S, C), jnp.float32),
        compiler_params=pltpu.CompilerParams(
            dimension_semantics=("parallel",),
            vmem_limit_bytes=_VMEM_LIMIT),
    )(*args)


# ----------------------------------------------------------------------------
# Module forwards
# ----------------------------------------------------------------------------

def resnet_forward(p, x_tok, t_emb, H, W):
    Cout = p["conv1_b"].shape[0]
    if "res_w" in p:
        h, res = _resnet_conv_call(
            x_tok, p["gn1_g"], p["gn1_b"], p["conv1_w"], p["conv1_b"],
            H=H, W=W, Cout=Cout, G=32, eps=1e-5, mode="first",
            t_emb=t_emb, tw=p["time_w"], tb=p["time_b"],
            rw=p["res_w"], rb=p["res_b"])
    else:
        h = _resnet_conv_call(
            x_tok, p["gn1_g"], p["gn1_b"], p["conv1_w"], p["conv1_b"],
            H=H, W=W, Cout=Cout, G=32, eps=1e-5, mode="first",
            t_emb=t_emb, tw=p["time_w"], tb=p["time_b"])
        res = x_tok                     # identity residual
    out = _resnet_conv_call(
        h, p["gn2_g"], p["gn2_b"], p["conv2_w"], p["conv2_b"],
        H=H, W=W, Cout=Cout, G=32, eps=1e-5, mode="second", res_tok=res)
    return out


def basic_transformer_forward(p, x_seq, prompt, num_heads):
    # TODO(synk): dropout layers (attn p=0.4, FF p=0.3) are identity (eval-mode).
    B, S, C = x_seq.shape
    T, Dk = prompt.shape[1], prompt.shape[2]

    # self-attention: LN1 fused into QKV projection; out-proj + residual fused
    qkv = fused_matmul(x_seq.reshape(B * S, C), p["sa_w_qkv"], p["sa_b_qkv"],
                       ln=(p["ln1_g"], p["ln1_b"])).reshape(B, S, 3 * C)
    x = attention_block(qkv, None, p["sa_wo"], p["sa_bo"], x_seq, num_heads,
                        packed=True)

    # cross-attention: LN2 fused into Q proj, LN4 fused into fused KV proj
    q2 = fused_matmul(x.reshape(B * S, C), p["ca_wq"], p["ca_bq"],
                      ln=(p["ln2_g"], p["ln2_b"])).reshape(B, S, C)
    kv = fused_matmul(prompt.reshape(B * T, Dk), p["ca_w_kv"], p["ca_b_kv"],
                      ln=(p["ln4_g"], p["ln4_b"])).reshape(B, T, 2 * C)
    x = attention_block(q2, kv, p["ca_wo"], p["ca_bo"], x, num_heads, packed=False)

    # feed-forward: LN3 fused into FF1 (+ exact GELU); FF2 fuses residual add
    h = fused_matmul(x.reshape(B * S, C), p["ff_w1"], p["ff_b1"],
                     ln=(p["ln3_g"], p["ln3_b"]), activation="gelu")
    x = fused_matmul(h, p["ff_w2"], p["ff_b2"],
                     residual=x.reshape(B * S, C)).reshape(B, S, C)
    return x


def transformer2d_forward(p, x_tok, prompt, num_heads):
    B, HW, C = x_tok.shape
    seq = gn_conv1x1(x_tok, p["gn_g"], p["gn_b"], p["conv1_w"], p["conv1_b"],
                     G=32, eps=1e-6)
    seq = basic_transformer_forward(p, seq, prompt, num_heads)
    out = fused_matmul(seq.reshape(B * HW, C), p["conv2_w"], p["conv2_b"],
                       residual=x_tok.reshape(B * HW, C))
    return out.reshape(B, HW, C)


def crossattn_up_block_forward(params, x_nchw, time_embeds, prompt, skips_nchw,
                               num_heads):
    """skips_nchw plays the role of the global SKIP stack: last element popped first."""
    B, C0, H, W = x_nchw.shape
    x = jnp.transpose(x_nchw, (0, 2, 3, 1)).reshape(B, H * W, C0)
    stack = [jnp.transpose(s, (0, 2, 3, 1)).reshape(B, H * W, s.shape[1])
             for s in skips_nchw]
    for i in range(3):
        s = stack.pop()
        x = jnp.concatenate([x, s], axis=-1)    # == torch.cat(dim=1) in NCHW
        x = resnet_forward(params["resnets"][i], x, time_embeds, H, W)
        x = transformer2d_forward(params["transformers"][i], x, prompt, num_heads)
    C = x.shape[-1]
    return jnp.transpose(x.reshape(B, H, W, C), (0, 3, 1, 2))


# ----------------------------------------------------------------------------
# Deterministic parameter initialization
# ----------------------------------------------------------------------------

def _dense_init(key, fan_in, fan_out, scale=0.02):
    kw, kb = jax.random.split(key)
    w = scale * jax.random.normal(kw, (fan_in, fan_out), jnp.float32)
    b = scale * jax.random.normal(kb, (fan_out,), jnp.float32)
    return w, b


def init_resnet_params(key, cin, cout, emb):
    ks = jax.random.split(key, 4)
    p = {"gn1_g": jnp.ones((cin,), jnp.float32), "gn1_b": jnp.zeros((cin,), jnp.float32),
         "gn2_g": jnp.ones((cout,), jnp.float32), "gn2_b": jnp.zeros((cout,), jnp.float32)}
    # 3x3 conv weights flattened as (9*Cin, Cout); tap rows ordered (dy, dx, cin).
    p["conv1_w"], p["conv1_b"] = _dense_init(ks[0], 9 * cin, cout)
    p["conv2_w"], p["conv2_b"] = _dense_init(ks[1], 9 * cout, cout)
    p["time_w"], p["time_b"] = _dense_init(ks[2], emb, cout)
    if cin != cout:
        p["res_w"], p["res_b"] = _dense_init(ks[3], cin, cout)   # 1x1 residual conv
    return p


def init_transformer_params(key, c, prompt_dim):
    ks = jax.random.split(key, 9)
    p = {"gn_g": jnp.ones((c,), jnp.float32), "gn_b": jnp.zeros((c,), jnp.float32),
         "ln1_g": jnp.ones((c,), jnp.float32), "ln1_b": jnp.zeros((c,), jnp.float32),
         "ln2_g": jnp.ones((c,), jnp.float32), "ln2_b": jnp.zeros((c,), jnp.float32),
         "ln3_g": jnp.ones((c,), jnp.float32), "ln3_b": jnp.zeros((c,), jnp.float32),
         "ln4_g": jnp.ones((prompt_dim,), jnp.float32),
         "ln4_b": jnp.zeros((prompt_dim,), jnp.float32)}
    p["conv1_w"], p["conv1_b"] = _dense_init(ks[0], c, c)
    p["conv2_w"], p["conv2_b"] = _dense_init(ks[1], c, c)
    p["sa_w_qkv"], p["sa_b_qkv"] = _dense_init(ks[2], c, 3 * c)      # fused QKV
    p["sa_wo"], p["sa_bo"] = _dense_init(ks[3], c, c)
    p["ca_wq"], p["ca_bq"] = _dense_init(ks[4], c, c)
    p["ca_w_kv"], p["ca_b_kv"] = _dense_init(ks[5], prompt_dim, 2 * c)  # fused KV
    p["ca_wo"], p["ca_bo"] = _dense_init(ks[6], c, c)
    p["ff_w1"], p["ff_b1"] = _dense_init(ks[7], c, 4 * c)
    p["ff_w2"], p["ff_b2"] = _dense_init(ks[8], 4 * c, c)
    return p


def init_crossattn_up_block(key, out_channels, embedd_length, prompt_embed_length):
    ks = jax.random.split(key, 6)
    resnet_in = (384, 384, 256)   # fixed in the PyTorch module
    return {"resnets": [init_resnet_params(ks[2 * i], resnet_in[i], out_channels,
                                           embedd_length) for i in range(3)],
            "transformers": [init_transformer_params(ks[2 * i + 1], out_channels,
                                                     prompt_embed_length)
                             for i in range(3)]}


# ----------------------------------------------------------------------------
# Main
# ----------------------------------------------------------------------------

if __name__ == "__main__":
    key = jax.random.PRNGKey(0)
    B, H, W = 2, 8, 8
    out_channels = 128          # multiple of 32 (GroupNorm) and of num_heads
    num_heads = 4
    embedd_length = 32
    prompt_embed_length = 64
    prompt_seq = 8

    k_param, k_x, k_t, k_p, k_s1, k_s2, k_s3 = jax.random.split(key, 7)
    params = init_crossattn_up_block(k_param, out_channels, embedd_length,
                                     prompt_embed_length)

    x = jax.random.normal(k_x, (B, out_channels, H, W), jnp.float32)          # NCHW
    time_embeds = jax.random.normal(k_t, (B, embedd_length), jnp.float32)
    prompt = jax.random.normal(k_p, (B, prompt_seq, prompt_embed_length), jnp.float32)
    # Skip stack (channels chosen so concat hits RESNETBLOCK2D in_channels 384/384/256):
    skips = [
        jax.random.normal(k_s1, (B, 256 - out_channels, H, W), jnp.float32),  # popped 3rd
        jax.random.normal(k_s2, (B, 384 - out_channels, H, W), jnp.float32),  # popped 2nd
        jax.random.normal(k_s3, (B, 384 - out_channels, H, W), jnp.float32),  # popped 1st
    ]

    out = crossattn_up_block_forward(params, x, time_embeds, prompt, skips, num_heads)
    out = jax.block_until_ready(out)
    assert out.shape == (B, out_channels, H, W), out.shape
    assert jnp.all(jnp.isfinite(out))
    print("KERNEL_OK")
</pallas_src>

<mosaic_0001>
module attributes {stable_mosaic.version = 11 : i64} {
  func.func @kernel(%arg0: i32, %arg1: memref<1x64x384xf32, #tpu.memory_space<vmem>>, %arg2: memref<1x384xf32, #tpu.memory_space<vmem>>, %arg3: memref<1x384xf32, #tpu.memory_space<vmem>>, %arg4: memref<384x32xf32, #tpu.memory_space<vmem>>, %arg5: memref<32x384xf32, #tpu.memory_space<vmem>>, %arg6: memref<64x2xf32, #tpu.memory_space<vmem>>, %arg7: memref<3456x128xf32, #tpu.memory_space<vmem>>, %arg8: memref<1x128xf32, #tpu.memory_space<vmem>>, %arg9: memref<1x1x32xf32, #tpu.memory_space<vmem>>, %arg10: memref<32x128xf32, #tpu.memory_space<vmem>>, %arg11: memref<1x128xf32, #tpu.memory_space<vmem>>, %arg12: memref<384x128xf32, #tpu.memory_space<vmem>>, %arg13: memref<1x128xf32, #tpu.memory_space<vmem>>, %arg14: memref<1x64x128xf32, #tpu.memory_space<vmem>>, %arg15: memref<1x64x128xf32, #tpu.memory_space<vmem>>, %arg16: memref<96x384xf32, #tpu.memory_space<vmem>>) attributes {dimension_semantics = [#tpu.dimension_semantics<parallel>], iteration_bounds = array<i64: 2>, scalar_prefetch = 0 : i64, scratch_operands = 1 : i64, tpu.core_type = #tpu.core_type<tc>, window_params = [{transform_indices = @transform_0, window_bounds = array<i64: 1, 64, 384>}, {pipeline_mode = #tpu.pipeline_mode<synchronous>, transform_indices = @transform_1, window_bounds = array<i64: 1, 384>}, {pipeline_mode = #tpu.pipeline_mode<synchronous>, transform_indices = @transform_2, window_bounds = array<i64: 1, 384>}, {pipeline_mode = #tpu.pipeline_mode<synchronous>, transform_indices = @transform_3, window_bounds = array<i64: 384, 32>}, {pipeline_mode = #tpu.pipeline_mode<synchronous>, transform_indices = @transform_4, window_bounds = array<i64: 32, 384>}, {pipeline_mode = #tpu.pipeline_mode<synchronous>, transform_indices = @transform_5, window_bounds = array<i64: 64, 2>}, {pipeline_mode = #tpu.pipeline_mode<synchronous>, transform_indices = @transform_6, window_bounds = array<i64: 3456, 128>}, {pipeline_mode = #tpu.pipeline_mode<synchronous>, transform_indices = @transform_7, window_bounds = array<i64: 1, 128>}, {transform_indices = @transform_8, window_bounds = array<i64: 1, 1, 32>}, {pipeline_mode = #tpu.pipeline_mode<synchronous>, transform_indices = @transform_9, window_bounds = array<i64: 32, 128>}, {pipeline_mode = #tpu.pipeline_mode<synchronous>, transform_indices = @transform_10, window_bounds = array<i64: 1, 128>}, {pipeline_mode = #tpu.pipeline_mode<synchronous>, transform_indices = @transform_11, window_bounds = array<i64: 384, 128>}, {pipeline_mode = #tpu.pipeline_mode<synchronous>, transform_indices = @transform_12, window_bounds = array<i64: 1, 128>}, {transform_indices = @transform_13, window_bounds = array<i64: 1, 64, 128>}, {transform_indices = @transform_14, window_bounds = array<i64: 1, 64, 128>}]} {
    %c0 = arith.constant 0 : index
    %c0_0 = arith.constant 0 : index
    %c0_1 = arith.constant 0 : index
    %0 = vector.load %arg1[%c0, %c0_0, %c0_1] : memref<1x64x384xf32, #tpu.memory_space<vmem>>, vector<1x64x384xf32>
    %1 = vector.shape_cast %0 : vector<1x64x384xf32> to vector<64x384xf32>
    %c0_2 = arith.constant 0 : index
    %c0_3 = arith.constant 0 : index
    %2 = vector.load %arg2[%c0_2, %c0_3] : memref<1x384xf32, #tpu.memory_space<vmem>>, vector<1x384xf32>
    %c0_4 = arith.constant 0 : index
    %c0_5 = arith.constant 0 : index
    %3 = vector.load %arg3[%c0_4, %c0_5] : memref<1x384xf32, #tpu.memory_space<vmem>>, vector<1x384xf32>
    %c0_6 = arith.constant 0 : index
    %c0_7 = arith.constant 0 : index
    %4 = vector.load %arg4[%c0_6, %c0_7] : memref<384x32xf32, #tpu.memory_space<vmem>>, vector<384x32xf32>
    %c0_8 = arith.constant 0 : index
    %c0_9 = arith.constant 0 : index
    %5 = vector.load %arg5[%c0_8, %c0_9] : memref<32x384xf32, #tpu.memory_space<vmem>>, vector<32x384xf32>
    %cst = arith.constant dense<0.000000e+00> : vector<384xf32>
    %6 = vector.multi_reduction <add>, %1, %cst [0] : vector<64x384xf32> to vector<384xf32>
    %7 = vector.shape_cast %6 : vector<384xf32> to vector<1x384xf32>
    %cst_10 = arith.constant dense<0.000000e+00> : vector<1x32xf32>
    %8 = tpu.matmul %7, %4, %cst_10 {dimension_numbers = #tpu.dot_dimension_numbers<[1], [0], [0], [1], [0, 0, 1, 1], [], []>} : vector<1x384xf32>, vector<384x32xf32>, vector<1x32xf32> -> vector<1x32xf32>
    %cst_11 = arith.constant 0.00130208337 : f32
    %9 = vector.broadcast %cst_11 : f32 to vector<1x32xf32>
    %10 = arith.mulf %8, %9 : vector<1x32xf32>
    %cst_12 = arith.constant dense<0.000000e+00> : vector<1x384xf32>
    %11 = tpu.matmul %10, %5, %cst_12 {dimension_numbers = #tpu.dot_dimension_numbers<[1], [0], [0], [1], [0, 0, 1, 1], [], []>} : vector<1x32xf32>, vector<32x384xf32>, vector<1x384xf32> -> vector<1x384xf32>
    %12 = vector.broadcast %11 : vector<1x384xf32> to vector<64x384xf32>
    %13 = arith.subf %1, %12 : vector<64x384xf32>
    %14 = arith.mulf %13, %13 : vector<64x384xf32>
    %cst_13 = arith.constant dense<0.000000e+00> : vector<384xf32>
    %15 = vector.multi_reduction <add>, %14, %cst_13 [0] : vector<64x384xf32> to vector<384xf32>
    %16 = vector.shape_cast %15 : vector<384xf32> to vector<1x384xf32>
    %cst_14 = arith.constant dense<0.000000e+00> : vector<1x32xf32>
    %17 = tpu.matmul %16, %4, %cst_14 {dimension_numbers = #tpu.dot_dimension_numbers<[1], [0], [0], [1], [0, 0, 1, 1], [], []>} : vector<1x384xf32>, vector<384x32xf32>, vector<1x32xf32> -> vector<1x32xf32>
    %cst_15 = arith.constant 0.00130208337 : f32
    %18 = vector.broadcast %cst_15 : f32 to vector<1x32xf32>
    %19 = arith.mulf %17, %18 : vector<1x32xf32>
    %cst_16 = arith.constant 9.99999974E-6 : f32
    %20 = vector.broadcast %cst_16 : f32 to vector<1x32xf32>
    %21 = arith.addf %19, %20 : vector<1x32xf32>
    %22 = math.rsqrt %21 : vector<1x32xf32>
    %cst_17 = arith.constant dense<0.000000e+00> : vector<1x384xf32>
    %23 = tpu.matmul %22, %5, %cst_17 {dimension_numbers = #tpu.dot_dimension_numbers<[1], [0], [0], [1], [0, 0, 1, 1], [], []>} : vector<1x32xf32>, vector<32x384xf32>, vector<1x384xf32> -> vector<1x384xf32>
    %24 = vector.broadcast %23 : vector<1x384xf32> to vector<64x384xf32>
    %25 = arith.mulf %13, %24 : vector<64x384xf32>
    %26 = vector.broadcast %2 : vector<1x384xf32> to vector<64x384xf32>
    %27 = arith.mulf %25, %26 : vector<64x384xf32>
    %28 = vector.broadcast %3 : vector<1x384xf32> to vector<64x384xf32>
    %29 = arith.addf %27, %28 : vector<64x384xf32>
    %30 = arith.negf %29 : vector<64x384xf32>
    %31 = math.exp %30 : vector<64x384xf32>
    %cst_18 = arith.constant 1.000000e+00 : f32
    %32 = vector.broadcast %cst_18 : f32 to vector<64x384xf32>
    %33 = arith.addf %32, %31 : vector<64x384xf32>
    %34 = arith.divf %32, %33 : vector<64x384xf32>
    %35 = arith.mulf %29, %34 : vector<64x384xf32>
    %cst_19 = arith.constant 0.000000e+00 : f32
    %36 = vector.broadcast %cst_19 : f32 to vector<96x384xf32>
    %c0_20 = arith.constant 0 : index
    %c0_21 = arith.constant 0 : index
    %37 = vector.load %arg16[%c0_20, %c0_21] : memref<96x384xf32, #tpu.memory_space<vmem>>, vector<96x384xf32>
    tpu.vector_store %arg16[%c0_20, %c0_21], %36 {strides = array<i32>} : memref<96x384xf32, #tpu.memory_space<vmem>>, vector<96x384xf32>,
    %c16 = arith.constant 16 : index
    %c0_22 = arith.constant 0 : index
    %38 = vector.load %arg16[%c16, %c0_22] : memref<96x384xf32, #tpu.memory_space<vmem>>, vector<64x384xf32>
    tpu.vector_store %arg16[%c16, %c0_22], %35 {strides = array<i32>} : memref<96x384xf32, #tpu.memory_space<vmem>>, vector<64x384xf32>,
    %c0_23 = arith.constant 0 : index
    %c0_24 = arith.constant 0 : index
    %39 = vector.load %arg6[%c0_23, %c0_24] : memref<64x2xf32, #tpu.memory_space<vmem>>, vector<64x1xf32>
    %c0_25 = arith.constant 0 : index
    %c1 = arith.constant 1 : index
    %40 = vector.load %arg6[%c0_25, %c1] : memref<64x2xf32, #tpu.memory_space<vmem>>, vector<64x1xf32>
    %cst_26 = arith.constant 0.000000e+00 : f32
    %41 = vector.broadcast %cst_26 : f32 to vector<64x128xf32>
    %c7 = arith.constant 7 : index
    %c0_27 = arith.constant 0 : index
    %42 = vector.load %arg16[%c7, %c0_27] : memref<96x384xf32, #tpu.memory_space<vmem>>, vector<64x384xf32>
    %43 = vector.broadcast %39 : vector<64x1xf32> to vector<64x384xf32>
    %44 = arith.mulf %42, %43 : vector<64x384xf32>
    %c0_28 = arith.constant 0 : index
    %c0_29 = arith.constant 0 : index
    %45 = vector.load %arg7[%c0_28, %c0_29] : memref<3456x128xf32, #tpu.memory_space<vmem>>, vector<384x128xf32>
    %46 = arith.truncf %44 : vector<64x384xf32> to vector<64x384xbf16>
    %47 = arith.truncf %45 : vector<384x128xf32> to vector<384x128xbf16>
    %cst_30 = arith.constant dense<0.000000e+00> : vector<64x128xf32>
    %48 = tpu.matmul %46, %47, %cst_30 {dimension_numbers = #tpu.dot_dimension_numbers<[1], [0], [0], [1], [0, 0, 1, 1], [], []>} : vector<64x384xbf16>, vector<384x128xbf16>, vector<64x128xf32> -> vector<64x128xf32>
    %49 = arith.addf %41, %48 : vector<64x128xf32>
    %c8 = arith.constant 8 : index
    %c0_31 = arith.constant 0 : index
    %50 = vector.load %arg16[%c8, %c0_31] : memref<96x384xf32, #tpu.memory_space<vmem>>, vector<64x384xf32>
    %c384 = arith.constant 384 : index
    %c0_32 = arith.constant 0 : index
    %51 = vector.load %arg7[%c384, %c0_32] : memref<3456x128xf32, #tpu.memory_space<vmem>>, vector<384x128xf32>
    %52 = arith.truncf %50 : vector<64x384xf32> to vector<64x384xbf16>
    %53 = arith.truncf %51 : vector<384x128xf32> to vector<384x128xbf16>
    %cst_33 = arith.constant dense<0.000000e+00> : vector<64x128xf32>
    %54 = tpu.matmul %52, %53, %cst_33 {dimension_numbers = #tpu.dot_dimension_numbers<[1], [0], [0], [1], [0, 0, 1, 1], [], []>} : vector<64x384xbf16>, vector<384x128xbf16>, vector<64x128xf32> -> vector<64x128xf32>
    %55 = arith.addf %49, %54 : vector<64x128xf32>
    %c9 = arith.constant 9 : index
    %c0_34 = arith.constant 0 : index
    %56 = vector.load %arg16[%c9, %c0_34] : memref<96x384xf32, #tpu.memory_space<vmem>>, vector<64x384xf32>
    %57 = vector.broadcast %40 : vector<64x1xf32> to vector<64x384xf32>
    %58 = arith.mulf %56, %57 : vector<64x384xf32>
    %c768 = arith.constant 768 : index
    %c0_35 = arith.constant 0 : index
    %59 = vector.load %arg7[%c768, %c0_35] : memref<3456x128xf32, #tpu.memory_space<vmem>>, vector<384x128xf32>
    %60 = arith.truncf %58 : vector<64x384xf32> to vector<64x384xbf16>
    %61 = arith.truncf %59 : vector<384x128xf32> to vector<384x128xbf16>
    %cst_36 = arith.constant dense<0.000000e+00> : vector<64x128xf32>
    %62 = tpu.matmul %60, %61, %cst_36 {dimension_numbers = #tpu.dot_dimension_numbers<[1], [0], [0], [1], [0, 0, 1, 1], [], []>} : vector<64x384xbf16>, vector<384x128xbf16>, vector<64x128xf32> -> vector<64x128xf32>
    %63 = arith.addf %55, %62 : vector<64x128xf32>
    %c15 = arith.constant 15 : index
    %c0_37 = arith.constant 0 : index
    %64 = vector.load %arg16[%c15, %c0_37] : memref<96x384xf32, #tpu.memory_space<vmem>>, vector<64x384xf32>
    %65 = vector.broadcast %39 : vector<64x1xf32> to vector<64x384xf32>
    %66 = arith.mulf %64, %65 : vector<64x384xf32>
    %c1152 = arith.constant 1152 : index
    %c0_38 = arith.constant 0 : index
    %67 = vector.load %arg7[%c1152, %c0_38] : memref<3456x128xf32, #tpu.memory_space<vmem>>, vector<384x128xf32>
    %68 = arith.truncf %66 : vector<64x384xf32> to vector<64x384xbf16>
    %69 = arith.truncf %67 : vector<384x128xf32> to vector<384x128xbf16>
    %cst_39 = arith.constant dense<0.000000e+00> : vector<64x128xf32>
    %70 = tpu.matmul %68, %69, %cst_39 {dimension_numbers = #tpu.dot_dimension_numbers<[1], [0], [0], [1], [0, 0, 1, 1], [], []>} : vector<64x384xbf16>, vector<384x128xbf16>, vector<64x128xf32> -> vector<64x128xf32>
    %71 = arith.addf %63, %70 : vector<64x128xf32>
    %c16_40 = arith.constant 16 : index
    %c0_41 = arith.constant 0 : index
    %72 = vector.load %arg16[%c16_40, %c0_41] : memref<96x384xf32, #tpu.memory_space<vmem>>, vector<64x384xf32>
    %c1536 = arith.constant 1536 : index
    %c0_42 = arith.constant 0 : index
    %73 = vector.load %arg7[%c1536, %c0_42] : memref<3456x128xf32, #tpu.memory_space<vmem>>, vector<384x128xf32>
    %74 = arith.truncf %72 : vector<64x384xf32> to vector<64x384xbf16>
    %75 = arith.truncf %73 : vector<384x128xf32> to vector<384x128xbf16>
    %cst_43 = arith.constant dense<0.000000e+00> : vector<64x128xf32>
    %76 = tpu.matmul %74, %75, %cst_43 {dimension_numbers = #tpu.dot_dimension_numbers<[1], [0], [0], [1], [0, 0, 1, 1], [], []>} : vector<64x384xbf16>, vector<384x128xbf16>, vector<64x128xf32> -> vector<64x128xf32>
    %77 = arith.addf %71, %76 : vector<64x128xf32>
    %c17 = arith.constant 17 : index
    %c0_44 = arith.constant 0 : index
    %78 = vector.load %arg16[%c17, %c0_44] : memref<96x384xf32, #tpu.memory_space<vmem>>, vector<64x384xf32>
    %79 = vector.broadcast %40 : vector<64x1xf32> to vector<64x384xf32>
    %80 = arith.mulf %78, %79 : vector<64x384xf32>
    %c1920 = arith.constant 1920 : index
    %c0_45 = arith.constant 0 : index
    %81 = vector.load %arg7[%c1920, %c0_45] : memref<3456x128xf32, #tpu.memory_space<vmem>>, vector<384x128xf32>
    %82 = arith.truncf %80 : vector<64x384xf32> to vector<64x384xbf16>
    %83 = arith.truncf %81 : vector<384x128xf32> to vector<384x128xbf16>
    %cst_46 = arith.constant dense<0.000000e+00> : vector<64x128xf32>
    %84 = tpu.matmul %82, %83, %cst_46 {dimension_numbers = #tpu.dot_dimension_numbers<[1], [0], [0], [1], [0, 0, 1, 1], [], []>} : vector<64x384xbf16>, vector<384x128xbf16>, vector<64x128xf32> -> vector<64x128xf32>
    %85 = arith.addf %77, %84 : vector<64x128xf32>
    %c23 = arith.constant 23 : index
    %c0_47 = arith.constant 0 : index
    %86 = vector.load %arg16[%c23, %c0_47] : memref<96x384xf32, #tpu.memory_space<vmem>>, vector<64x384xf32>
    %87 = vector.broadcast %39 : vector<64x1xf32> to vector<64x384xf32>
    %88 = arith.mulf %86, %87 : vector<64x384xf32>
    %c2304 = arith.constant 2304 : index
    %c0_48 = arith.constant 0 : index
    %89 = vector.load %arg7[%c2304, %c0_48] : memref<3456x128xf32, #tpu.memory_space<vmem>>, vector<384x128xf32>
    %90 = arith.truncf %88 : vector<64x384xf32> to vector<64x384xbf16>
    %91 = arith.truncf %89 : vector<384x128xf32> to vector<384x128xbf16>
    %cst_49 = arith.constant dense<0.000000e+00> : vector<64x128xf32>
    %92 = tpu.matmul %90, %91, %cst_49 {dimension_numbers = #tpu.dot_dimension_numbers<[1], [0], [0], [1], [0, 0, 1, 1], [], []>} : vector<64x384xbf16>, vector<384x128xbf16>, vector<64x128xf32> -> vector<64x128xf32>
    %93 = arith.addf %85, %92 : vector<64x128xf32>
    %c24 = arith.constant 24 : index
    %c0_50 = arith.constant 0 : index
    %94 = vector.load %arg16[%c24, %c0_50] : memref<96x384xf32, #tpu.memory_space<vmem>>, vector<64x384xf32>
    %c2688 = arith.constant 2688 : index
    %c0_51 = arith.constant 0 : index
    %95 = vector.load %arg7[%c2688, %c0_51] : memref<3456x128xf32, #tpu.memory_space<vmem>>, vector<384x128xf32>
    %96 = arith.truncf %94 : vector<64x384xf32> to vector<64x384xbf16>
    %97 = arith.truncf %95 : vector<384x128xf32> to vector<384x128xbf16>
    %cst_52 = arith.constant dense<0.000000e+00> : vector<64x128xf32>
    %98 = tpu.matmul %96, %97, %cst_52 {dimension_numbers = #tpu.dot_dimension_numbers<[1], [0], [0], [1], [0, 0, 1, 1], [], []>} : vector<64x384xbf16>, vector<384x128xbf16>, vector<64x128xf32> -> vector<64x128xf32>
    %99 = arith.addf %93, %98 : vector<64x128xf32>
    %c25 = arith.constant 25 : index
    %c0_53 = arith.constant 0 : index
    %100 = vector.load %arg16[%c25, %c0_53] : memref<96x384xf32, #tpu.memory_space<vmem>>, vector<64x384xf32>
    %101 = vector.broadcast %40 : vector<64x1xf32> to vector<64x384xf32>
    %102 = arith.mulf %100, %101 : vector<64x384xf32>
    %c3072 = arith.constant 3072 : index
    %c0_54 = arith.constant 0 : index
    %103 = vector.load %arg7[%c3072, %c0_54] : memref<3456x128xf32, #tpu.memory_space<vmem>>, vector<384x128xf32>
    %104 = arith.truncf %102 : vector<64x384xf32> to vector<64x384xbf16>
    %105 = arith.truncf %103 : vector<384x128xf32> to vector<384x128xbf16>
    %cst_55 = arith.constant dense<0.000000e+00> : vector<64x128xf32>
    %106 = tpu.matmul %104, %105, %cst_55 {dimension_numbers = #tpu.dot_dimension_numbers<[1], [0], [0], [1], [0, 0, 1, 1], [], []>} : vector<64x384xbf16>, vector<384x128xbf16>, vector<64x128xf32> -> vector<64x128xf32>
    %107 = arith.addf %99, %106 : vector<64x128xf32>
    %c0_56 = arith.constant 0 : index
    %c0_57 = arith.constant 0 : index
    %108 = vector.load %arg8[%c0_56, %c0_57] : memref<1x128xf32, #tpu.memory_space<vmem>>, vector<1x128xf32>
    %109 = vector.broadcast %108 : vector<1x128xf32> to vector<64x128xf32>
    %110 = arith.addf %107, %109 : vector<64x128xf32>
    %c0_58 = arith.constant 0 : index
    %c0_59 = arith.constant 0 : index
    %c0_60 = arith.constant 0 : index
    %111 = vector.load %arg9[%c0_58, %c0_59, %c0_60] : memref<1x1x32xf32, #tpu.memory_space<vmem>>, vector<1x1x32xf32>
    %112 = vector.shape_cast %111 : vector<1x1x32xf32> to vector<1x32xf32>
    %c0_61 = arith.constant 0 : index
    %c0_62 = arith.constant 0 : index
    %113 = vector.load %arg10[%c0_61, %c0_62] : memref<32x128xf32, #tpu.memory_space<vmem>>, vector<32x128xf32>
    %cst_63 = arith.constant dense<0.000000e+00> : vector<1x128xf32>
    %114 = tpu.matmul %112, %113, %cst_63 {dimension_numbers = #tpu.dot_dimension_numbers<[1], [0], [0], [1], [0, 0, 1, 1], [], []>} : vector<1x32xf32>, vector<32x128xf32>, vector<1x128xf32> -> vector<1x128xf32>
    %c0_64 = arith.constant 0 : index
    %c0_65 = arith.constant 0 : index
    %115 = vector.load %arg11[%c0_64, %c0_65] : memref<1x128xf32, #tpu.memory_space<vmem>>, vector<1x128xf32>
    %116 = arith.addf %114, %115 : vector<1x128xf32>
    %117 = arith.negf %116 : vector<1x128xf32>
    %118 = math.exp %117 : vector<1x128xf32>
    %cst_66 = arith.constant 1.000000e+00 : f32
    %119 = vector.broadcast %cst_66 : f32 to vector<1x128xf32>
    %120 = arith.addf %119, %118 : vector<1x128xf32>
    %121 = arith.divf %119, %120 : vector<1x128xf32>
    %122 = arith.mulf %116, %121 : vector<1x128xf32>
    %123 = vector.broadcast %122 : vector<1x128xf32> to vector<64x128xf32>
    %124 = arith.addf %110, %123 : vector<64x128xf32>
    %125 = arith.truncf %1 : vector<64x384xf32> to vector<64x384xbf16>
    %c0_67 = arith.constant 0 : index
    %c0_68 = arith.constant 0 : index
    %126 = vector.load %arg12[%c0_67, %c0_68] : memref<384x128xf32, #tpu.memory_space<vmem>>, vector<384x128xf32>
    %127 = arith.truncf %126 : vector<384x128xf32> to vector<384x128xbf16>
    %cst_69 = arith.constant dense<0.000000e+00> : vector<64x128xf32>
    %128 = tpu.matmul %125, %127, %cst_69 {dimension_numbers = #tpu.dot_dimension_numbers<[1], [0], [0], [1], [0, 0, 1, 1], [], []>} : vector<64x384xbf16>, vector<384x128xbf16>, vector<64x128xf32> -> vector<64x128xf32>
    %c0_70 = arith.constant 0 : index
    %c0_71 = arith.constant 0 : index
    %129 = vector.load %arg13[%c0_70, %c0_71] : memref<1x128xf32, #tpu.memory_space<vmem>>, vector<1x128xf32>
    %130 = vector.broadcast %129 : vector<1x128xf32> to vector<64x128xf32>
    %131 = arith.addf %128, %130 : vector<64x128xf32>
    %c0_72 = arith.constant 0 : index
    %c0_73 = arith.constant 0 : index
    %c0_74 = arith.constant 0 : index
    %132 = vector.load %arg15[%c0_72, %c0_73, %c0_74] : memref<1x64x128xf32, #tpu.memory_space<vmem>>, vector<1x64x128xf32>
    %133 = vector.shape_cast %132 : vector<1x64x128xf32> to vector<64x128xf32>
    %134 = vector.shape_cast %131 : vector<64x128xf32> to vector<1x64x128xf32>
    tpu.vector_store %arg15[%c0_72, %c0_73, %c0_74], %134 {strides = array<i32>} : memref<1x64x128xf32, #tpu.memory_space<vmem>>, vector<1x64x128xf32>,
    %c0_75 = arith.constant 0 : index
    %c0_76 = arith.constant 0 : index
    %c0_77 = arith.constant 0 : index
    %135 = vector.load %arg14[%c0_75, %c0_76, %c0_77] : memref<1x64x128xf32, #tpu.memory_space<vmem>>, vector<1x64x128xf32>
    %136 = vector.shape_cast %135 : vector<1x64x128xf32> to vector<64x128xf32>
    %137 = vector.shape_cast %124 : vector<64x128xf32> to vector<1x64x128xf32>
    tpu.vector_store %arg14[%c0_75, %c0_76, %c0_77], %137 {strides = array<i32>} : memref<1x64x128xf32, #tpu.memory_space<vmem>>, vector<1x64x128xf32>,
    return
  }
  func.func @transform_0(%arg0: i32) -> (i32, i32, i32) {
    %c0_i32 = arith.constant 0 : i32
    %c0_i32_0 = arith.constant 0 : i32
    %c0_i32_1 = arith.constant 0 : i32
    return %arg0, %c0_i32, %c0_i32_0 : i32, i32, i32
  }
  func.func @transform_1(%arg0: i32) -> (i32, i32) {
    %c0_i32 = arith.constant 0 : i32
    %c0_i32_0 = arith.constant 0 : i32
    %c0_i32_1 = arith.constant 0 : i32
    return %c0_i32, %c0_i32_0 : i32, i32
  }
  func.func @transform_2(%arg0: i32) -> (i32, i32) {
    %c0_i32 = arith.constant 0 : i32
    %c0_i32_0 = arith.constant 0 : i32
    %c0_i32_1 = arith.constant 0 : i32
    return %c0_i32, %c0_i32_0 : i32, i32
  }
  func.func @transform_3(%arg0: i32) -> (i32, i32) {
    %c0_i32 = arith.constant 0 : i32
    %c0_i32_0 = arith.constant 0 : i32
    %c0_i32_1 = arith.constant 0 : i32
    return %c0_i32, %c0_i32_0 : i32, i32
  }
  func.func @transform_4(%arg0: i32) -> (i32, i32) {
    %c0_i32 = arith.constant 0 : i32
    %c0_i32_0 = arith.constant 0 : i32
    %c0_i32_1 = arith.constant 0 : i32
    return %c0_i32, %c0_i32_0 : i32, i32
  }
  func.func @transform_5(%arg0: i32) -> (i32, i32) {
    %c0_i32 = arith.constant 0 : i32
    %c0_i32_0 = arith.constant 0 : i32
    %c0_i32_1 = arith.constant 0 : i32
    return %c0_i32, %c0_i32_0 : i32, i32
  }
  func.func @transform_6(%arg0: i32) -> (i32, i32) {
    %c0_i32 = arith.constant 0 : i32
    %c0_i32_0 = arith.constant 0 : i32
    %c0_i32_1 = arith.constant 0 : i32
    return %c0_i32, %c0_i32_0 : i32, i32
  }
  func.func @transform_7(%arg0: i32) -> (i32, i32) {
    %c0_i32 = arith.constant 0 : i32
    %c0_i32_0 = arith.constant 0 : i32
    %c0_i32_1 = arith.constant 0 : i32
    return %c0_i32, %c0_i32_0 : i32, i32
  }
  func.func @transform_8(%arg0: i32) -> (i32, i32, i32) {
    %c0_i32 = arith.constant 0 : i32
    %c0_i32_0 = arith.constant 0 : i32
    %c0_i32_1 = arith.constant 0 : i32
    return %arg0, %c0_i32, %c0_i32_0 : i32, i32, i32
  }
  func.func @transform_9(%arg0: i32) -> (i32, i32) {
    %c0_i32 = arith.constant 0 : i32
    %c0_i32_0 = arith.constant 0 : i32
    %c0_i32_1 = arith.constant 0 : i32
    return %c0_i32, %c0_i32_0 : i32, i32
  }
  func.func @transform_10(%arg0: i32) -> (i32, i32) {
    %c0_i32 = arith.constant 0 : i32
    %c0_i32_0 = arith.constant 0 : i32
    %c0_i32_1 = arith.constant 0 : i32
    return %c0_i32, %c0_i32_0 : i32, i32
  }
  func.func @transform_11(%arg0: i32) -> (i32, i32) {
    %c0_i32 = arith.constant 0 : i32
    %c0_i32_0 = arith.constant 0 : i32
    %c0_i32_1 = arith.constant 0 : i32
    return %c0_i32, %c0_i32_0 : i32, i32
  }
  func.func @transform_12(%arg0: i32) -> (i32, i32) {
    %c0_i32 = arith.constant 0 : i32
    %c0_i32_0 = arith.constant 0 : i32
    %c0_i32_1 = arith.constant 0 : i32
    return %c0_i32, %c0_i32_0 : i32, i32
  }
  func.func @transform_13(%arg0: i32) -> (i32, i32, i32) {
    %c0_i32 = arith.constant 0 : i32
    %c0_i32_0 = arith.constant 0 : i32
    %c0_i32_1 = arith.constant 0 : i32
    return %arg0, %c0_i32, %c0_i32_0 : i32, i32, i32
  }
  func.func @transform_14(%arg0: i32) -> (i32, i32, i32) {
    %c0_i32 = arith.constant 0 : i32
    %c0_i32_0 = arith.constant 0 : i32
    %c0_i32_1 = arith.constant 0 : i32
    return %arg0, %c0_i32, %c0_i32_0 : i32, i32, i32
  }
}

</mosaic_0001>

<bundles_post_ra>
// kernel: tpu_custom_call.1
= control target key start
LH: loop header
LB: loop body
LE: loop exit
PB: predicated region body
PF: predicated region fallthrough
CT: control target
= control target key end

     0   :  { %s10831_s0 = inlined_call_operand.hbm [shape: f32[2,64,384], index: 0, kind: input, shape index: {}]   ;;  %s10832_s1 = inlined_call_operand.hbm [shape: f32[1,384], index: 1, kind: input, shape index: {}]   ;;  %s10833_s2 = inlined_call_operand.hbm [shape: f32[1,384], index: 2, kind: input, shape index: {}]   ;;  %s10834_s3 = inlined_call_operand.vmem [shape: f32[384,32], index: 3, kind: input, shape index: {}]   ;;  %s10835_s4 = inlined_call_operand.hbm [shape: f32[32,384], index: 4, kind: input, shape index: {}]   ;;  %s10836_s5 = inlined_call_operand.vmem [shape: f32[64,2], index: 5, kind: input, shape index: {}]   ;;  %s10837_s6 = inlined_call_operand.hbm [shape: f32[3456,128], index: 6, kind: input, shape index: {}]   ;;  %s10838_s7 = inlined_call_operand.hbm [shape: f32[1,128], index: 7, kind: input, shape index: {}]   ;;  %s10839_s8 = inlined_call_operand.hbm [shape: f32[2,1,32], index: 8, kind: input, shape index: {}]   ;;  %s10840_s9 = inlined_call_operand.hbm [shape: f32[32,128], index: 9, kind: input, shape index: {}]   ;;  %s10841_s10 = inlined_call_operand.hbm [shape: f32[1,128], index: 10, kind: input, shape index: {}]   ;;  %s10842_s11 = inlined_call_operand.hbm [shape: f32[384,128], index: 11, kind: input, shape index: {}]   ;;  %s10843_s12 = inlined_call_operand.hbm [shape: f32[1,128], index: 12, kind: input, shape index: {}]   ;;  %s10844_s13 = inlined_call_operand.hbm [shape: f32[2,64,128], index: 13, kind: output, shape index: {0}]   ;;  %s10845_s14 = inlined_call_operand.hbm [shape: f32[2,64,128], index: 14, kind: output, shape index: {1}]  }
   0x1   :  { %10999 = sst [smem:[#allocation77_spill]] %s10831_s0 }
   0x2   :  { %11000 = sst [smem:[#allocation78_spill]] %s10832_s1 }
   0x3   :  { %11001 = sst [smem:[#allocation79_spill]] %s10833_s2 }
   0x4   :  { %11002 = sst [smem:[#allocation80_spill]] %s10834_s3 }
   0x5   :  { %11003 = sst [smem:[#allocation81_spill]] %s10835_s4 }
   0x6   :  { %11004 = sst [smem:[#allocation82_spill]] %s10836_s5 }
   0x7   :  { %11005 = sst [smem:[#allocation83_spill]] %s10837_s6 }
   0x8   :  { %11006 = sst [smem:[#allocation84_spill]] %s10838_s7 }
   0x9   :  { %11007 = sst [smem:[#allocation85_spill]] %s10840_s9 }
   0xa   :  { %11008 = sst [smem:[#allocation86_spill]] %s10841_s10 }
   0xb   :  { %11009 = sst [smem:[#allocation87_spill]] %s10844_s13 }
   0xc   :  { %11010 = sst [smem:[#allocation88_spill]] %s10845_s14 }
   0xd   :  { %20 = vsyncpa [#allocation4], 0 }
   0xe   :  { %22 = vsyncpa [#allocation4 + $0x1], 0 }
   0xf   :  { %23 = vsyncpa [#allocation7], 0 }
  0x10   :  { %24 = vsyncpa [#allocation10], 0 }
  0x11   :  { %25 = vsyncpa [#allocation13], 0 }
  0x12   :  { %26 = vsyncpa [#allocation19], 0 }
  0x13   :  { %27 = vsyncpa [#allocation5], 0 }
  0x14   :  { %29 = vsyncpa [#allocation5 + $0x1], 0 }
  0x15   :  { %30 = vsyncpa [#allocation22], 0 }
  0x16   :  { %32 = vsyncpa [#allocation22 + $0x1], 0  ;;  %s7780_s29 = smov 0   ;;  %s7782_s30 = smov 0  }
  0x17   :  { %s7784_s15 = smov 0   ;;  %s7786_s16 = smov 0  }
  0x18 LB: > { %s7681_s17 = smov [#allocation6]   ;;  %s7801_s19 = sadd.s32 4294967295, %s7679_s16   ;;  %s7679_s16 = sphi %s7786_s16, %s11343_s16   ;;  %s7675_s15 = sphi %s7784_s15, %s11347_s15   ;;  %s7671_s30 = sphi %s7782_s30, %s11346_s30   ;;  %s7667_s29 = sphi %s7780_s29, %s11345_s29  }
  0x19   : > { %s391_s18 = sshll.u32 %s7681_s17, 4  ;;  %p5582_p0 = scmp.ge.s32.totalorder %s7679_s16, 1  ;;  %s7806_s18 = int_to_ptr.vmem [resolvable:$true] %s391_s18 }
  0x1a   : > { %p10851_p1 = scmp.eq.s32.totalorder %s7801_s19, 0  ;;  %p378_p2 = scmp.lt.s32.totalorder %s7679_s16, 3 }
  0x1b   : > { %s7682_s21 = smov [#allocation9]   ;;  %s7683_s24 = smov [#allocation8]  }
  0x1c   : > { %p7808_p3 = pnand %p5582_p0, %p378_p2  ;;  %s415_s22 = sshll.u32 %s7682_s21, 4  ;;  %s7815_s22 = int_to_ptr.vmem [resolvable:$true] %s415_s22 }
  0x1d   : > { %s402_s25 = sshll.u32 %s7683_s24, 4  ;;  %s11013_s1 = sld [smem:[#allocation78_spill]]  ;;  %s7823_s25 = int_to_ptr.vmem [resolvable:$true] %s402_s25 }
  0x1e   : > { %s11011_s20 = scalar_select %p7808_p3, 1, 0 }
  0x1f   : > { %p6960_p5 = pneg %p7808_p3 }
  0x21   : > { %p7819_p6 = pnand %p6960_p5, %p10851_p1 }
  0x23   : > { %s11012_s23 = scalar_select %p7819_p6, 1, 0 }
  0x24   : > { %s7237_s28 = scalar_lea.hbm %s11013_s1, 48  ;;  %p7833_p8 = pneg %p7819_p6 }
  0x25   : > { %p7238_p7 = scmp.ne.s32.totalorder %s11013_s1, %s7237_s28  ;;  %p7244_p11 = scmp.lt.u32.totalorder %s7237_s28, %s11013_s1 }
  0x27   : > { %p7240_p9 = pnand %p7833_p8, %p7238_p7 }
  0x29   : > { %p7241_p10 = pneg %p7240_p9 }
  0x2b   : > { %p7246_p12 = pnand %p7244_p11, %p7241_p10 }
  0x2d   : > { %7249 = shalt.err (!%p7246_p12)
}
  0x2e   : > { %s7250_s14 = scalar_lea.vmem %s7806_s18, 48  ;;  %s7257_s26 = scalar_lea.vmem %s7806_s18, 64 }
  0x2f   : > { %p7251_p13 = scmp.ne.s32.totalorder %s7806_s18, %s7250_s14  ;;  %p7258_p5 = scmp.lt.s32.totalorder %s7806_s18, %s7806_s18 }
  0x30   : > { %p7259_p7 = scmp.lt.s32.totalorder %s7257_s26, %s7250_s14 }
  0x31   : > { %p7253_p0 = pnand %p7251_p13, %p7833_p8 }
  0x32   : > { %p7260_p9 = por %p7259_p7, %p7258_p5 }
  0x33   : > { %p7254_p2 = pneg %p7253_p0 }
  0x35   : > { %p7261_p4 = pnand %p7260_p9, %p7254_p2 }
  0x37   : > { %7264 = shalt.err (!%p7261_p4)
}
  0x38   : > { %6963 = dma.hbm_to_vmem [thread:$0]  (!%p7819_p6), %s11013_s1, 48, %s7806_s18, [#allocation7]  }
  0x39   : > { %s11015_s4 = sld [smem:[#allocation81_spill]] }
  0x3f   : > { %s7265_s24 = scalar_lea.hbm %s11015_s4, 1536 }
  0x40   : > { %p7266_p10 = scmp.ne.s32.totalorder %s11015_s4, %s7265_s24  ;;  %p7272_p4 = scmp.lt.u32.totalorder %s7265_s24, %s11015_s4 }
  0x42   : > { %p7268_p11 = pnand %p7266_p10, %p7833_p8 }
  0x44   : > { %p7269_p12 = pneg %p7268_p11 }
  0x46   : > { %p7274_p13 = pnand %p7272_p4, %p7269_p12 }
  0x48   : > { %7277 = shalt.err (!%p7274_p13)
}
  0x49   : > { %s7278_s18 = scalar_lea.vmem %s7815_s22, 1536  ;;  %p7286_p7 = scmp.lt.s32.totalorder %s7815_s22, %s7815_s22 }
  0x4a   : > { %p7279_p0 = scmp.ne.s32.totalorder %s7815_s22, %s7278_s18  ;;  %p7287_p9 = scmp.lt.s32.totalorder %s7278_s18, %s7278_s18 }
  0x4c   : > { %p7281_p2 = pnand %p7279_p0, %p7833_p8  ;;  %p7288_p10 = por %p7287_p9, %p7286_p7 }
  0x4e   : > { %p7282_p5 = pneg %p7281_p2 }
  0x50   : > { %p7289_p11 = pnand %p7288_p10, %p7282_p5 }
  0x52   : > { %7292 = shalt.err (!%p7289_p11)
}
  0x53   : > { %s10850_s3 = smov 384   ;;  %s10853_s5 = smov 24  }
  0x54   : > { %6969 = dma.hbm_to_vmem [thread:$0]  (!%p7819_p6), %s11015_s4, 1536, %s7815_s22, [#allocation10], %s10850_s3, %s10850_s3, %s10853_s5  }
  0x55   : > { %s11016_s2 = sld [smem:[#allocation79_spill]] }
  0x5b   : > { %s7293_s24 = scalar_lea.hbm %s11016_s2, 48 }
  0x5c   : > { %p7294_p12 = scmp.ne.s32.totalorder %s11016_s2, %s7293_s24  ;;  %p7300_p0 = scmp.lt.u32.totalorder %s7293_s24, %s11016_s2 }
  0x5e   : > { %p7296_p4 = pnand %p7294_p12, %p7833_p8 }
  0x60   : > { %p7297_p13 = pneg %p7296_p4 }
  0x62   : > { %p7302_p2 = pnand %p7300_p0, %p7297_p13 }
  0x64   : > { %7305 = shalt.err (!%p7302_p2)
}
  0x65   : > { %s7306_s22 = scalar_lea.vmem %s7823_s25, 48  ;;  %s7313_s13 = scalar_lea.vmem %s7823_s25, 64 }
  0x66   : > { %p7307_p5 = scmp.ne.s32.totalorder %s7823_s25, %s7306_s22  ;;  %p7314_p10 = scmp.lt.s32.totalorder %s7823_s25, %s7823_s25 }
  0x67   : > { %p7315_p11 = scmp.lt.s32.totalorder %s7313_s13, %s7306_s22 }
  0x68   : > { %p7309_p7 = pnand %p7307_p5, %p7833_p8 }
  0x69   : > { %p7316_p12 = por %p7315_p11, %p7314_p10 }
  0x6a   : > { %p7310_p9 = pneg %p7309_p7 }
  0x6c   : > { %p7317_p4 = pnand %p7316_p12, %p7310_p9 }
  0x6e   : > { %7320 = shalt.err (!%p7317_p4)
}
  0x6f   : > { %6966 = dma.hbm_to_vmem [thread:$0]  (!%p7819_p6), %s11016_s2, 48, %s7823_s25, [#allocation7]  }
  0x70   : > { %s7686_s28 = smov [#allocation11]   ;;  %s11017_s6 = sld [smem:[#allocation83_spill]] }
  0x71   : > { %s431_s17 = sshll.u32 %s7686_s28, 4  ;;  %s432_s17 = int_to_ptr.vmem [resolvable:$true] %s431_s17 }
  0x76   : > { %s7321_s26 = scalar_lea.hbm %s11017_s6, 55296 }
  0x77   : > { %p7322_p13 = scmp.ne.s32.totalorder %s11017_s6, %s7321_s26  ;;  %p7328_p5 = scmp.lt.u32.totalorder %s7321_s26, %s11017_s6 }
  0x79   : > { %p7324_p0 = pnand %p7322_p13, %p7833_p8 }
  0x7b   : > { %p7325_p2 = pneg %p7324_p0 }
  0x7d   : > { %p7330_p7 = pnand %p7328_p5, %p7325_p2 }
  0x7f   : > { %7333 = shalt.err (!%p7330_p7)
}
  0x80   : > { %s7334_s25 = scalar_lea.vmem %s432_s17, 55296  ;;  %p7342_p12 = scmp.lt.s32.totalorder %s432_s17, %s432_s17 }
  0x81   : > { %p7335_p9 = scmp.ne.s32.totalorder %s432_s17, %s7334_s25  ;;  %p7343_p4 = scmp.lt.s32.totalorder %s7334_s25, %s7334_s25 }
  0x83   : > { %p7337_p10 = pnand %p7335_p9, %p7833_p8  ;;  %p7344_p1 = por %p7343_p4, %p7342_p12 }
  0x85   : > { %p7338_p11 = pneg %p7337_p10 }
  0x87   : > { %p7345_p3 = pnand %p7344_p1, %p7338_p11 }
  0x89   : > { %7348 = shalt.err (!%p7345_p3)
}
  0x8a   : > { %s10854_s1 = smov 128   ;;  %s10856_s27 = smov 8  }
  0x8b   : > { %6972 = dma.hbm_to_vmem [thread:$0]  (!%p7819_p6), %s11017_s6, 55296, %s432_s17, [#allocation10], %s10854_s1, %s10854_s1, %s10856_s27  }
  0x8c   : > { %s7689_s24 = smov [#allocation12]   ;;  %s11018_s7 = sld [smem:[#allocation84_spill]] }
  0x8d   : > { %s445_s14 = sshll.u32 %s7689_s24, 4  ;;  %s446_s14 = int_to_ptr.vmem [resolvable:$true] %s445_s14 }
  0x92   : > { %s7349_s22 = scalar_lea.hbm %s11018_s7, 16 }
  0x93   : > { %p7350_p1 = scmp.ne.s32.totalorder %s11018_s7, %s7349_s22  ;;  %p7356_p0 = scmp.lt.u32.totalorder %s7349_s22, %s11018_s7 }
  0x95   : > { %p7352_p3 = pnand %p7350_p1, %p7833_p8 }
  0x97   : > { %p7353_p13 = pneg %p7352_p3 }
  0x99   : > { %p7358_p2 = pnand %p7356_p0, %p7353_p13 }
  0x9b   : > { %7361 = shalt.err (!%p7358_p2)
}
  0x9c   : > { %s7362_s17 = scalar_lea.vmem %s446_s14, 16  ;;  %s7369_s3 = scalar_lea.vmem %s446_s14, 32 }
  0x9d   : > { %p7363_p5 = scmp.ne.s32.totalorder %s446_s14, %s7362_s17  ;;  %p7370_p10 = scmp.lt.s32.totalorder %s446_s14, %s446_s14 }
  0x9e   : > { %p7371_p11 = scmp.lt.s32.totalorder %s7369_s3, %s7362_s17 }
  0x9f   : > { %p7365_p7 = pnand %p7363_p5, %p7833_p8 }
  0xa0   : > { %p7372_p12 = por %p7371_p11, %p7370_p10 }
  0xa1   : > { %p7366_p9 = pneg %p7365_p7 }
  0xa3   : > { %p7373_p4 = pnand %p7372_p12, %p7366_p9 }
  0xa5   : > { %7376 = shalt.err (!%p7373_p4)
}
  0xa6   : > { %6975 = dma.hbm_to_vmem [thread:$0]  (!%p7819_p6), %s11018_s7, 16, %s446_s14, [#allocation13]  }
  0xa7   : > { %s5581_s2 = sadd.s32 4294967294, %s7679_s16   ;;  %s7946_s5 = sadd.s32 1, %s7679_s16  }
  0xa8   : > { %11019 = sst [smem:[#allocation34_spill]] %s7946_s5  ;;  %s45_s26 = sadd.s32 1, %s7675_s15 }
  0xa9   : > { %s42_s18 = ssub.s32 %s7679_s16, %s7946_s5  ;;  %p52_p1 = scmp.ne.s32.totalorder %s7675_s15, %s7671_s30 }
  0xaa   : > { %p43_p3 = scmp.eq.s32.totalorder %s42_s18, 0  ;;  %p53_p13 = scmp.eq.s32.totalorder %s7679_s16, 0 }
  0xab   : > { %p58_p0 = scmp.ne.s32.totalorder %s7671_s30, %s7667_s29  ;;  %p339_p2 = scmp.eq.s32.totalorder %s7801_s19, 1 }
  0xac   : > { %s7958_s22 = scalar_select %p43_p3, %s7675_s15, %s45_s26  }
  0xad   : > { %p54_p5 = por %p53_p13, %p52_p1  ;;  %p11021_p7 = scmp.eq.s32.totalorder %s7801_s19, 0 }
  0xae   : > { %11020 = sst [smem:[#allocation35_spill]] %s7958_s22  ;;  %p7966_p10 = por %p339_p2, %p52_p1 }
  0xaf   : > { %p7962_p9 = por %p11021_p7, %p58_p0  ;;  %p345_p11 = scmp.eq.s32.totalorder %s5581_s2, 1 }
  0xb0   : > { %s11023_s13 = scalar_select %p7966_p10, 1, 0 }
  0xb1   : > { %s11022_s14 = scalar_select %p7962_p9, 1, 0 }
  0xb2   : > { %p7011_p12 = scmp.lt.s32.totalorder %s7679_s16, 2  ;;  %s504_s25 = sand.u32 1, %s7679_s16  }
  0xb3   : > { %p7972_p4 = por %p345_p11, %p58_p0  ;;  %s10858_s3 = sand.u32 1, %s7675_s15  }
  0xb4   : > { %s6914_s28 = smul.u32 3072, %s7679_s16  ;;  %p7980_p3 = pnand %p7011_p12, %p54_p5 }
  0xb5   : > { %s11024_s17 = scalar_select %p7972_p4, 1, 0 }
  0xb6   : > { %s6913_s24 = smul.u32 192, %s10858_s3  ;;  %s11027_s0 = sld [smem:[#allocation77_spill]] }
  0xb7   : > { %11025 = sst [smem:[#allocation36_spill]] %s11024_s17  ;;  %s7690_s6 = smov [#allocation15]  }
  0xb8   : > { %s11026_s26 = scalar_select %p7980_p3, 1, 0 }
  0xb9   : > { %s508_s27 = scalar_lea.vmem [#allocation3], %s6913_s24  ;;  %s455_s7 = sshll.u32 %s7690_s6, 4  ;;  %s7991_s7 = int_to_ptr.vmem [resolvable:$true] %s455_s7 }
  0xba   : > { %s515_s4 = sshll.u32 %s508_s27, 4  ;;  %s7993_s3 = scalar_lea.sflag [#allocation4], %s504_s25  ;;  %s7989_s4 = int_to_ptr.vmem [resolvable:$true] %s515_s4 }
  0xbb   : > { %p10866_p13 = pneg %p7980_p3 }
  0xbc   : > { %s7987_s2 = scalar_lea.hbm %s11027_s0, %s6914_s28  ;;  %s7382_s27 = scalar_lea.hbm %s11027_s0, 6144 }
  0xbd   : > { %s7377_s22 = scalar_lea.hbm %s7987_s2, 3072  ;;  %p7383_p5 = scmp.lt.u32.totalorder %s7987_s2, %s11027_s0 }
  0xbe   : > { %p7378_p1 = scmp.ne.s32.totalorder %s7987_s2, %s7377_s22  ;;  %p7384_p7 = scmp.lt.u32.totalorder %s7382_s27, %s7377_s22 }
  0xbf   : > { %p7386_p12 = scmp.lt.u32.totalorder %s7377_s22, %s7987_s2 }
  0xc0   : > { %p7380_p0 = pnand %p10866_p13, %p7378_p1  ;;  %p7385_p11 = por %p7384_p7, %p7383_p5 }
  0xc2   : > { %p7381_p2 = pneg %p7380_p0  ;;  %p7387_p4 = por %p7386_p12, %p7385_p11 }
  0xc4   : > { %p7388_p10 = pnand %p7387_p4, %p7381_p2 }
  0xc6   : > { %7391 = shalt.err (!%p7388_p10)
}
  0xc7   : > { %s7392_s25 = scalar_lea.vmem %s7989_s4, 3072  ;;  %s7691_s18 = smov [#allocation3]  }
  0xc8   : > { %p7393_p1 = scmp.ne.s32.totalorder %s7989_s4, %s7392_s25  ;;  %s7397_s1 = sshll.u32 %s7691_s18, 4  ;;  %s7398_s1 = int_to_ptr.vmem [resolvable:$false] %s7397_s1 }
  0xc9   : > { %s7399_s28 = scalar_lea.vmem %s7398_s1, 6144  ;;  %p7400_p6 = scmp.lt.s32.totalorder %s7989_s4, %s7398_s1 }
  0xca   : > { %p7395_p0 = pnand %p7393_p1, %p10866_p13  ;;  %p7401_p5 = scmp.lt.s32.totalorder %s7399_s28, %s7392_s25 }
  0xcc   : > { %p7396_p9 = pneg %p7395_p0  ;;  %p7402_p7 = por %p7401_p5, %p7400_p6 }
  0xce   : > { %p7403_p11 = pnand %p7402_p7, %p7396_p9 }
  0xd0   : > { %7406 = shalt.err (!%p7403_p11)
}
  0xd1   : > { %s11028_s22 = smov 24   ;;  %s11029_s27 = smov 384  }
  0xd2   : > { %6991 = dma.hbm_to_vmem [thread:$0]  (!%p7980_p3), %s7987_s2, 3072, %s7989_s4, %s7993_s3, %s11029_s27, %s11029_s27, %s11028_s22  }
  0xd3   : > { %s11030_s9 = sld [smem:[#allocation85_spill]] }
  0xd9   : > { %s7407_s18 = scalar_lea.hbm %s11030_s9, 512 }
  0xda   : > { %p7408_p6 = scmp.ne.s32.totalorder %s11030_s9, %s7407_s18  ;;  %p7414_p4 = scmp.lt.u32.totalorder %s7407_s18, %s11030_s9 }
  0xdc   : > { %p7410_p9 = pnand %p7408_p6, %p7833_p8 }
  0xde   : > { %p7411_p10 = pneg %p7410_p9 }
  0xe0   : > { %p7416_p2 = pnand %p7414_p4, %p7411_p10 }
  0xe2   : > { %7419 = shalt.err (!%p7416_p2)
}
  0xe3   : > { %s7420_s4 = scalar_lea.vmem %s7991_s7, 512  ;;  %p7428_p5 = scmp.lt.s32.totalorder %s7991_s7, %s7991_s7 }
  0xe4   : > { %p7421_p12 = scmp.ne.s32.totalorder %s7991_s7, %s7420_s4  ;;  %p7429_p7 = scmp.lt.s32.totalorder %s7420_s4, %s7420_s4 }
  0xe6   : > { %p7423_p1 = pnand %p7421_p12, %p7833_p8  ;;  %p7430_p11 = por %p7429_p7, %p7428_p5 }
  0xe8   : > { %p7424_p0 = pneg %p7423_p1 }
  0xea   : > { %p7431_p6 = pnand %p7430_p11, %p7424_p0 }
  0xec   : > { %7434 = shalt.err (!%p7431_p6)
}
  0xed   : > { %p11031_p9 = scmp.ne.s32.totalorder %s11012_s23, 0  ;;  %s11032_s0 = smov 8  }
  0xee   : > { %s11033_s2 = smov 128   ;;  %s7692_s24 = smov [#allocation16]  }
  0xef   : > { %6978 = dma.hbm_to_vmem [thread:$0]  (!%p11031_p9), %s11030_s9, 512, %s7991_s7, [#allocation7], %s11033_s2, %s11033_s2, %s11032_s0  }
  0xf0   : > { %s469_s6 = sshll.u32 %s7692_s24, 4  ;;  %s7693_s18 = smov [#allocation17]   ;;  %s470_s6 = int_to_ptr.vmem [resolvable:$true] %s469_s6 }
  0xf1   : > { %s479_s1 = sshll.u32 %s7693_s18, 4  ;;  %s11034_s10 = sld [smem:[#allocation86_spill]]  ;;  %s8050_s1 = int_to_ptr.vmem [resolvable:$true] %s479_s1 }
  0xf7   : > { %s7435_s4 = scalar_lea.hbm %s11034_s10, 16 }
  0xf8   : > { %p7436_p10 = scmp.ne.s32.totalorder %s11034_s10, %s7435_s4  ;;  %p7442_p12 = scmp.lt.u32.totalorder %s7435_s4, %s11034_s10 }
  0xfa   : > { %p7438_p4 = pnand %p7436_p10, %p7833_p8 }
  0xfc   : > { %p7439_p2 = pneg %p7438_p4 }
  0xfe   : > { %p7444_p1 = pnand %p7442_p12, %p7439_p2 }
 0x100   : > { %7447 = shalt.err (!%p7444_p1)
}
 0x101   : > { %s7448_s27 = scalar_lea.vmem %s470_s6, 16  ;;  %s7455_s24 = scalar_lea.vmem %s470_s6, 32 }
 0x102   : > { %p7449_p0 = scmp.ne.s32.totalorder %s470_s6, %s7448_s27  ;;  %p7456_p11 = scmp.lt.s32.totalorder %s470_s6, %s470_s6 }
 0x103   : > { %p7457_p6 = scmp.lt.s32.totalorder %s7455_s24, %s7448_s27 }
 0x104   : > { %p7451_p5 = pnand %p7449_p0, %p7833_p8 }
 0x105   : > { %p7458_p13 = por %p7457_p6, %p7456_p11 }
 0x106   : > { %p7452_p7 = pneg %p7451_p5 }
 0x108   : > { %p7459_p3 = pnand %p7458_p13, %p7452_p7 }
 0x10a   : > { %7462 = shalt.err (!%p7459_p3)
}
 0x10b   : > { %6981 = dma.hbm_to_vmem [thread:$0]  (!%p11031_p9), %s11034_s10, 16, %s470_s6, [#allocation10]  }
 0x10c   : > { %s7463_s28 = scalar_lea.hbm %s10842_s11, 6144 }
 0x10d   : > { %p7464_p10 = scmp.ne.s32.totalorder %s10842_s11, %s7463_s28  ;;  %p7470_p3 = scmp.lt.u32.totalorder %s7463_s28, %s10842_s11 }
 0x10f   : > { %p7466_p4 = pnand %p7464_p10, %p7833_p8 }
 0x111   : > { %p7467_p2 = pneg %p7466_p4 }
 0x113   : > { %p7472_p13 = pnand %p7470_p3, %p7467_p2 }
 0x115   : > { %7475 = shalt.err (!%p7472_p13)
}
 0x116   : > { %s7476_s6 = scalar_lea.vmem %s8050_s1, 6144  ;;  %p7484_p5 = scmp.lt.s32.totalorder %s8050_s1, %s8050_s1 }
 0x117   : > { %p7477_p12 = scmp.ne.s32.totalorder %s8050_s1, %s7476_s6  ;;  %p7485_p7 = scmp.lt.s32.totalorder %s7476_s6, %s7476_s6 }
 0x119   : > { %p7479_p1 = pnand %p7477_p12, %p7833_p8  ;;  %p7486_p11 = por %p7485_p7, %p7484_p5 }
 0x11b   : > { %p7480_p0 = pneg %p7479_p1 }
 0x11d   : > { %p7487_p6 = pnand %p7486_p11, %p7480_p0 }
 0x11f   : > { %7490 = shalt.err (!%p7487_p6)
}
 0x120   : > { %6984 = dma.hbm_to_vmem [thread:$0]  (!%p11031_p9), %s10842_s11, 6144, %s8050_s1, [#allocation13], %s11033_s2, %s11033_s2, %s11032_s0  }
 0x121   : > { %s7694_s17 = smov [#allocation18]   ;;  %s5594_s25 = sshll.u32 %s7679_s16, 4 }
 0x122   : > { %s493_s18 = sshll.u32 %s7694_s17, 4  ;;  %s8100_s22 = scalar_lea.hbm %s10839_s8, %s5594_s25  ;;  %s494_s18 = int_to_ptr.vmem [resolvable:$true] %s493_s18 }
 0x123   : > { %s7491_s6 = scalar_lea.hbm %s10843_s12, 16 }
 0x124   : > { %p7492_p10 = scmp.ne.s32.totalorder %s10843_s12, %s7491_s6  ;;  %p7498_p3 = scmp.lt.u32.totalorder %s7491_s6, %s10843_s12 }
 0x126   : > { %p7494_p4 = pnand %p7492_p10, %p7833_p8 }
 0x128   : > { %p7495_p2 = pneg %p7494_p4 }
 0x12a   : > { %p7500_p13 = pnand %p7498_p3, %p7495_p2 }
 0x12c   : > { %7503 = shalt.err (!%p7500_p13)
}
 0x12d   : > { %s7504_s1 = scalar_lea.vmem %s494_s18, 16  ;;  %s7511_s24 = scalar_lea.vmem %s494_s18, 32 }
 0x12e   : > { %p7505_p12 = scmp.ne.s32.totalorder %s494_s18, %s7504_s1  ;;  %p7512_p5 = scmp.lt.s32.totalorder %s494_s18, %s494_s18 }
 0x12f   : > { %p7513_p7 = scmp.lt.s32.totalorder %s7511_s24, %s7504_s1 }
 0x130   : > { %p7507_p1 = pnand %p7505_p12, %p7833_p8 }
 0x131   : > { %p7514_p11 = por %p7513_p7, %p7512_p5 }
 0x132   : > { %p7508_p0 = pneg %p7507_p1 }
 0x134   : > { %p7515_p6 = pnand %p7514_p11, %p7508_p0 }
 0x136   : > { %7518 = shalt.err (!%p7515_p6)
}
 0x137   : > { %6987 = dma.hbm_to_vmem [thread:$0]  (!%p11031_p9), %s10843_s12, 16, %s494_s18, [#allocation19]  }
 0x138   : > { %s11035_s21 = sand.u32 1, %s7675_s15   ;;  %s7519_s25 = scalar_lea.hbm %s8100_s22, 16 }
 0x139   : > { %s528_s5 = scalar_lea.vmem [#allocation14], %s11035_s21  ;;  %p7520_p8 = scmp.ne.s32.totalorder %s8100_s22, %s7519_s25 }
 0x13a   : > { %s535_s17 = sshll.u32 %s528_s5, 4  ;;  %p11036_p10 = scmp.ne.s32.totalorder %s11026_s26, 0  ;;  %s536_s17 = int_to_ptr.vmem [resolvable:$true] %s535_s17 }
 0x13b   : > { %s7524_s4 = scalar_lea.hbm %s10839_s8, 32  ;;  %p7525_p13 = scmp.lt.u32.totalorder %s8100_s22, %s10839_s8 }
 0x13c   : > { %p11037_p4 = pneg %p11036_p10  ;;  %p7526_p12 = scmp.lt.u32.totalorder %s7524_s4, %s7519_s25 }
 0x13d   : > { %p7528_p1 = scmp.lt.u32.totalorder %s7519_s25, %s8100_s22 }
 0x13e   : > { %p7522_p2 = pnand %p7520_p8, %p11037_p4  ;;  %p7527_p9 = por %p7526_p12, %p7525_p13 }
 0x140   : > { %p7523_p3 = pneg %p7522_p2  ;;  %p7529_p0 = por %p7528_p1, %p7527_p9 }
 0x142   : > { %p7530_p5 = pnand %p7529_p0, %p7523_p3 }
 0x144   : > { %7533 = shalt.err (!%p7530_p5)
}
 0x145   : > { %s7534_s18 = scalar_lea.vmem %s536_s17, 16  ;;  %p11038_p11 = pmov %p11037_p4 }
 0x146   : > { %p7535_p7 = scmp.ne.s32.totalorder %s536_s17, %s7534_s18  ;;  %s7695_s6 = smov [#allocation14]  }
 0x147   : > { %s7539_s0 = sshll.u32 %s7695_s6, 4  ;;  %s7540_s0 = int_to_ptr.vmem [resolvable:$false] %s7539_s0 }
 0x148   : > { %p7537_p6 = pnand %p7535_p7, %p11038_p11  ;;  %s7541_s2 = scalar_lea.vmem %s7540_s0, 32 }
 0x149   : > { %p7542_p4 = scmp.lt.s32.totalorder %s536_s17, %s7540_s0  ;;  %p7543_p2 = scmp.lt.s32.totalorder %s7541_s2, %s7534_s18 }
 0x14a   : > { %p7538_p8 = pneg %p7537_p6 }
 0x14b   : > { %p7544_p12 = por %p7543_p2, %p7542_p4 }
 0x14d   : > { %p7545_p13 = pnand %p7544_p12, %p7538_p8 }
 0x14f   : > { %7548 = shalt.err (!%p7545_p13)
}
 0x150   : > { %6994 = dma.hbm_to_vmem [thread:$0]  (!%p11036_p10), %s8100_s22, 16, %s536_s17, %s7993_s3  }
 0x151   : > { %p11039_p3 = scmp.ne.s32.totalorder %s11011_s20, 0 }
 0x153   : > { %544 = sbr.rel (%p11039_p3) target bundleno = 1971 (0x7b3), region = 72 }
 0x15a   : > { %s546_s1 = sand.u32 1, %s7801_s19   ;;  %s8146_s24 = sand.u32 1, %s7671_s30  }
 0x15b   : > { %s6915_s9 = smul.u32 192, %s8146_s24  ;;  %s547_s10 = scalar_lea.sflag [#allocation4], %s546_s1 }
 0x15c   : > { %p11040_p9 = scmp.ne.s32.totalorder %s11022_s14, 0 }
 0x15d   : > { %s8149_s21 = scalar_lea.vmem [#allocation3], %s6915_s9 }
 0x15e   : > { %7622 = dma.done.wait (%p11040_p9), %s547_s10, 3072  }
 0x15f   : > { %7624 = vsyncadd (%p11040_p9), %s547_s10, 4294964224  ;;  %p11041_p10 = scmp.eq.s32.totalorder %s7801_s19, 0 }
 0x161   : > { %7626 = dma.done.wait (%p11041_p10), [#allocation7], 96   ;;  %p11042_p1 = pmov %p11041_p10 }
 0x163   : > { %7628 = vsyncadd (%p11042_p1), [#allocation7], 4294967200  ;;  %p11043_p0 = pmov %p11042_p1 }
 0x165   : > { %7630 = dma.done.wait (%p11043_p0), [#allocation10], 56832   ;;  %p11044_p5 = pmov %p11043_p0 }
 0x166   : > { %p11045_p7 = pmov %p11043_p0 }
 0x167   : > { %7632 = vsyncadd (%p11044_p5), [#allocation10], 4294910464 }
 0x168   : > { %7634 = dma.done.wait (%p11045_p7), [#allocation13], 16   ;;  %p11046_p11 = pmov %p11043_p0 }
 0x169   : > { %s578_s20 = scalar_lea.vmem [#allocation14], %s8146_s24 }
 0x16a   : > { %7636 = vsyncadd (%p11046_p11), [#allocation13], 4294967280 }
 0x16b   : > { %7638 = dma.done.wait (%p11040_p9), %s547_s10, 16  }
 0x16c   : > { %7640 = vsyncadd (%p11040_p9), %s547_s10, 4294967280  ;;  %p11047_p6 = pmov %p11043_p0 }
 0x16d   : > { %p11048_p8 = pmov %p11043_p0 }
 0x16e   : > { %7642 = dma.done.wait (%p11047_p6), [#allocation7], 512  }
 0x16f   : > { %7644 = vsyncadd (%p11048_p8), [#allocation7], 4294966784  ;;  %p11049_p4 = pmov %p11043_p0 }
 0x170   : > { %p11050_p2 = pmov %p11043_p0 }
 0x171   : > { %7646 = dma.done.wait (%p11049_p4), [#allocation10], 16  }
 0x172   : > { %7648 = vsyncadd (%p11050_p2), [#allocation10], 4294967280  ;;  %p11051_p12 = pmov %p11043_p0 }
 0x173   : > { %p11052_p13 = pmov %p11043_p0 }
 0x174   : > { %7650 = dma.done.wait (%p11051_p12), [#allocation13], 6144  }
 0x175   : > { %7652 = vsyncadd (%p11052_p13), [#allocation13], 4294961152  ;;  %p11053_p3 = pmov %p11043_p0 }
 0x176   : > { %p11054_p9 = pmov %p11043_p0 }
 0x177   : > { %7654 = dma.done.wait (%p11053_p3), [#allocation19], 16  }
 0x178   : > { %7656 = vsyncadd (%p11054_p9), [#allocation19], 4294967280  ;;  %v10875_v0 = vmov 0.0|0.0   ;;  %vm7697_vm0 = vmmov 0   ;;  %v10869_v1 = vmov 0.0   ;;  %s11055_s26 = sld [smem:[#allocation80_spill]] }
 0x179   : > { %6663 = vmatprep.subr.bf16.mxu1 %v10875_v0  ;;  %6320 = vmatprep.mubr.msk.f32.mxu1 %vm7697_vm0, %v10869_v1  ;;  %1730 = vst [vmem:[#allocation2] sm:$0xff] %v10869_v1  ;;  %1731 = vst [vmem:[#allocation2 + $0x8] sm:$0xff] %v10869_v1  ;;  %v8345_v49 = vld [vmem:[%s8149_s21 + $0x8] sm:$0xff]  ;;  %v8348_v50 = vld [vmem:[%s8149_s21 + $0x20] sm:$0xff]  ;;  %vm915_vm1 = vcmask 261120   ;;  %s11069_s4 = sld [smem:[#allocation82_spill]] }
 0x17a   : > { %1732 = vst [vmem:[#allocation2 + $0x10] sm:$0xff] %v10869_v1  ;;  %1733 = vst [vmem:[#allocation2 + $0x18] sm:$0xff] %v10869_v1  ;;  %v8363_v55 = vld [vmem:[%s8149_s21 + $0x38] sm:$0xff]  ;;  %v748_v56 = vadd.f32 %v8348_v50, %v8345_v49  ;;  %v8378_v60 = vld [vmem:[%s8149_s21 + $0x50] sm:$0xff]  ;;  %vm1857_vm2 = vcmask 1046528   ;;  %vm2539_vm3 = vcmask 1040384  }
 0x17b   : > { %1734 = vst [vmem:[#allocation2 + $0x20] sm:$0xff] %v10869_v1  ;;  %1735 = vst [vmem:[#allocation2 + $0x28] sm:$0xff] %v10869_v1  ;;  %vm2213_vm4 = vsmask.f32 4352  ;;  %vm2678_vm5 = vsmask.f32 7424 }
 0x17c   : > { %1760 = vst [vmem:[#allocation2 + $0xf0] sm:$0xff] %v10869_v1  ;;  %1761 = vst [vmem:[#allocation2 + $0xf8] sm:$0xff] %v10869_v1  ;;  %s11337_s27 = sld [smem:[#allocation87_spill]]  ;;  %s5340_s6 = scalar_lea.sflag [#allocation5], %s8146_s24 }
 0x17d   : > { %1762 = vst [vmem:[#allocation2 + $0x100] sm:$0xff] %v10869_v1  ;;  %1763 = vst [vmem:[#allocation2 + $0x108] sm:$0xff] %v10869_v1  ;;  %p11338_p1 = scmp.ne.s32.totalorder %s11023_s13, 0  ;;  %s7701_s2 = smov [#allocation20]  }
 0x17e   : > { %1764 = vst [vmem:[#allocation2 + $0x110] sm:$0xff] %v10869_v1  ;;  %1765 = vst [vmem:[#allocation2 + $0x118] sm:$0xff] %v10869_v1  ;;  %v691_v2 = vld [vmem:[%s11055_s26 + $0x80] sm:$0xff]  ;;  %v692_v3 = vld [vmem:[%s11055_s26 + $0x88] sm:$0xff]  ;;  %s7553_s1 = sshll.u32 %s7701_s2, 4  ;;  %s7554_s1 = int_to_ptr.vmem [resolvable:$false] %s7553_s1 }
 0x17f   : > { %v675_v4 = vld [vmem:[%s11055_s26] sm:$0xff]  ;;  %v8212_v5 = vpack.c.bf16 %v692_v3, %v691_v2  ;;  %v676_v6 = vld [vmem:[%s11055_s26 + $0x8] sm:$0xff]  ;;  %v693_v11 = vld [vmem:[%s11055_s26 + $0x90] sm:$0xff]  ;;  %v749_v2 = vadd.f32 %v748_v56, %v8363_v55  ;;  %s7555_s9 = scalar_lea.vmem %s7554_s1, 2048 }
 0x180   : > { %v707_v7 = vld [vmem:[%s11055_s26 + $0x100] sm:$0xff]  ;;  %v708_v8 = vld [vmem:[%s11055_s26 + $0x108] sm:$0xff]  ;;  %v8223_v9 = vpack.c.bf16 %v676_v6, %v675_v4  ;;  %v694_v12 = vld [vmem:[%s11055_s26 + $0x98] sm:$0xff] }
 0x181   : > { %v8225_v10 = vpack.c.bf16 %v708_v8, %v707_v7  ;;  %v677_v13 = vld [vmem:[%s11055_s26 + $0x10] sm:$0xff]  ;;  %6632 = vmatprep.subr.bf16.mxu0 %v8212_v5  ;;  %v8237_v14 = vpack.c.bf16 %v694_v12, %v693_v11  ;;  %v678_v15 = vld [vmem:[%s11055_s26 + $0x18] sm:$0xff]  ;;  %v695_v20 = vld [vmem:[%s11055_s26 + $0xa0] sm:$0xff] }
 0x182   : > { %v709_v16 = vld [vmem:[%s11055_s26 + $0x110] sm:$0xff]  ;;  %v710_v17 = vld [vmem:[%s11055_s26 + $0x118] sm:$0xff]  ;;  %6634 = vmatpush3.bf16.msra.mxu0 %v8223_v9  ;;  %v8250_v18 = vpack.c.bf16 %v678_v15, %v677_v13  ;;  %v696_v21 = vld [vmem:[%s11055_s26 + $0xa8] sm:$0xff] }
 0x183   : > { %6665 = vmatpush3.bf16.msra.mxu1 %v8225_v10  ;;  %v8252_v19 = vpack.c.bf16 %v710_v17, %v709_v16  ;;  %v679_v22 = vld [vmem:[%s11055_s26 + $0x20] sm:$0xff]  ;;  %6636 = vmatprep.subr.bf16.mxu0 %v8237_v14  ;;  %v8265_v23 = vpack.c.bf16 %v696_v21, %v695_v20  ;;  %v680_v24 = vld [vmem:[%s11055_s26 + $0x28] sm:$0xff]  ;;  %v697_v27 = vld [vmem:[%s11055_s26 + $0xb0] sm:$0xff]  ;;  %v750_v16 = vadd.f32 %v749_v2, %v8378_v60 }
 0x184   : > { %6666 = vmatprep.subr.bf16.mxu1 %v10875_v0  ;;  %v711_v25 = vld [vmem:[%s11055_s26 + $0x120] sm:$0xff]  ;;  %v712_v26 = vld [vmem:[%s11055_s26 + $0x128] sm:$0xff]  ;;  %v698_v28 = vld [vmem:[%s11055_s26 + $0xb8] sm:$0xff]  ;;  %v8284_v29 = vpack.c.bf16 %v680_v24, %v679_v22 }
 0x185   : > { %v8286_v30 = vpack.c.bf16 %v712_v26, %v711_v25  ;;  %v681_v31 = vld [vmem:[%s11055_s26 + $0x30] sm:$0xff]  ;;  %v8293_v32 = vpack.c.bf16 %v698_v28, %v697_v27  ;;  %v682_v33 = vld [vmem:[%s11055_s26 + $0x38] sm:$0xff]  ;;  %v699_v36 = vld [vmem:[%s11055_s26 + $0xc0] sm:$0xff] }
 0x186   : > { %6638 = vmatpush3.bf16.msra.mxu0 %v8250_v18  ;;  %v713_v34 = vld [vmem:[%s11055_s26 + $0x130] sm:$0xff]  ;;  %v714_v35 = vld [vmem:[%s11055_s26 + $0x138] sm:$0xff]  ;;  %v700_v37 = vld [vmem:[%s11055_s26 + $0xc8] sm:$0xff]  ;;  %v8312_v38 = vpack.c.bf16 %v682_v33, %v681_v31 }
 0x187   : > { %6668 = vmatpush3.bf16.msra.mxu1 %v8252_v19  ;;  %6640 = vmatprep.subr.bf16.mxu0 %v8265_v23  ;;  %v8314_v39 = vpack.c.bf16 %v714_v35, %v713_v34  ;;  %v683_v40 = vld [vmem:[%s11055_s26 + $0x40] sm:$0xff]  ;;  %v8321_v41 = vpack.c.bf16 %v700_v37, %v699_v36  ;;  %v684_v42 = vld [vmem:[%s11055_s26 + $0x48] sm:$0xff]  ;;  %v701_v45 = vld [vmem:[%s11055_s26 + $0xd0] sm:$0xff] }
 0x188   : > { %6669 = vmatprep.subr.bf16.mxu1 %v10875_v0  ;;  %v715_v43 = vld [vmem:[%s11055_s26 + $0x140] sm:$0xff]  ;;  %v716_v44 = vld [vmem:[%s11055_s26 + $0x148] sm:$0xff]  ;;  %v702_v46 = vld [vmem:[%s11055_s26 + $0xd8] sm:$0xff]  ;;  %v8352_v51 = vpack.c.bf16 %v684_v42, %v683_v40 }
 0x189   : > { %v685_v47 = vld [vmem:[%s11055_s26 + $0x50] sm:$0xff]  ;;  %v686_v48 = vld [vmem:[%s11055_s26 + $0x58] sm:$0xff]  ;;  %v8354_v52 = vpack.c.bf16 %v716_v44, %v715_v43  ;;  %v8369_v57 = vpack.c.bf16 %v702_v46, %v701_v45  ;;  %v703_v58 = vld [vmem:[%s11055_s26 + $0xe0] sm:$0xff] }
 0x18a   : > { %6642 = vmatpush3.bf16.msra.mxu0 %v8284_v29  ;;  %v717_v53 = vld [vmem:[%s11055_s26 + $0x150] sm:$0xff]  ;;  %v718_v54 = vld [vmem:[%s11055_s26 + $0x158] sm:$0xff]  ;;  %v704_v59 = vld [vmem:[%s11055_s26 + $0xe8] sm:$0xff]  ;;  %v8393_v4 = vpack.c.bf16 %v686_v48, %v685_v47 }
 0x18b   : > { %6671 = vmatpush3.bf16.msra.mxu1 %v8286_v30  ;;  %6644 = vmatprep.subr.bf16.mxu0 %v8293_v32  ;;  %v687_v61 = vld [vmem:[%s11055_s26 + $0x60] sm:$0xff]  ;;  %v688_v62 = vld [vmem:[%s11055_s26 + $0x68] sm:$0xff]  ;;  %v8399_v7 = vld [vmem:[%s8149_s21 + $0x18] sm:$0xff]  ;;  %v8406_v11 = vpack.c.bf16 %v718_v54, %v717_v53  ;;  %v8422_v20 = vpack.c.bf16 %v704_v59, %v703_v58 }
 0x18c   : > { %6672 = vmatprep.subr.bf16.mxu1 %v10875_v0  ;;  %v719_v63 = vld [vmem:[%s11055_s26 + $0x160] sm:$0xff]  ;;  %v8396_v6 = vld [vmem:[%s8149_s21 + $0x68] sm:$0xff]  ;;  %v8402_v8 = vld [vmem:[%s8149_s21 + $0x30] sm:$0xff]  ;;  %v8446_v34 = vpack.c.bf16 %v688_v62, %v687_v61 }
 0x18d   : > { %v8391_v3 = vld [vmem:[%s8149_s21] sm:$0xff]  ;;  %v720_v12 = vld [vmem:[%s11055_s26 + $0x168] sm:$0xff]  ;;  %v705_v13 = vld [vmem:[%s11055_s26 + $0xf0] sm:$0xff]  ;;  %v751_v27 = vadd.f32 %v750_v16, %v8396_v6 }
 0x18e   : > { %6646 = vmatpush3.bf16.msra.mxu0 %v8312_v38  ;;  %v8415_v15 = vld [vmem:[%s8149_s21 + $0x80] sm:$0xff]  ;;  %v735_v17 = vadd.f32 %v8399_v7, %v8391_v3  ;;  %v8425_v21 = vld [vmem:[%s8149_s21 + $0x48] sm:$0xff]  ;;  %v8428_v22 = vld [vmem:[%s8149_s21 + $0x10] sm:$0xff]  ;;  %v8448_v35 = vpack.c.bf16 %v720_v12, %v719_v63 }
 0x18f   : > { %6674 = vmatpush3.bf16.msra.mxu1 %v8314_v39  ;;  %6648 = vmatprep.subr.bf16.mxu0 %v8321_v41  ;;  %v8431_v24 = vld [vmem:[%s8149_s21 + $0x28] sm:$0xff]  ;;  %v706_v25 = vld [vmem:[%s11055_s26 + $0xf8] sm:$0xff]  ;;  %v689_v26 = vld [vmem:[%s11055_s26 + $0x70] sm:$0xff]  ;;  %v752_v43 = vadd.f32 %v751_v27, %v8415_v15 }
 0x190   : > { %6675 = vmatprep.subr.bf16.mxu1 %v10875_v0  ;;  %v736_v28 = vadd.f32 %v735_v17, %v8402_v8  ;;  %v8442_v31 = vld [vmem:[%s8149_s21 + $0x40] sm:$0xff]  ;;  %v761_v33 = vadd.f32 %v8431_v24, %v8428_v22  ;;  %v8451_v36 = vld [vmem:[%s8149_s21 + $0x98] sm:$0xff]  ;;  %v721_v44 = vld [vmem:[%s11055_s26 + $0x170] sm:$0xff]  ;;  %v8475_v48 = vpack.c.bf16 %v706_v25, %v705_v13 }
 0x191   : > { %v8454_v37 = vld [vmem:[%s8149_s21 + $0x60] sm:$0xff]  ;;  %v8457_v40 = vld [vmem:[%s8149_s21 + $0x58] sm:$0xff]  ;;  %v8478_v53 = vld [vmem:[%s8149_s21 + $0xb0] sm:$0xff]  ;;  %v753_v58 = vadd.f32 %v752_v43, %v8451_v36 }
 0x192   : > { %6650 = vmatpush3.bf16.msra.mxu0 %v8352_v51  ;;  %11056 = vst [vmem:[#allocation37_spill] sm:$0xff] %v8454_v37  ;;  %v690_v42 = vld [vmem:[%s11055_s26 + $0x78] sm:$0xff]  ;;  %v737_v46 = vadd.f32 %v736_v28, %v8425_v21  ;;  %v762_v47 = vadd.f32 %v761_v33, %v8442_v31  ;;  %11057 = vst [vmem:[#allocation38_spill] sm:$0xff] %v8478_v53  ;;  %v8484_v56 = vld [vmem:[%s8149_s21 + $0x70] sm:$0xff] }
 0x193   : > { %6677 = vmatpush3.bf16.msra.mxu1 %v8354_v52  ;;  %6652 = vmatprep.subr.bf16.mxu0 %v8369_v57  ;;  %v722_v45 = vld [vmem:[%s11055_s26 + $0x178] sm:$0xff]  ;;  %v8489_v62 = vpack.c.bf16 %v690_v42, %v689_v26  ;;  %v8494_v2 = vld [vmem:[%s8149_s21 + $0x90] sm:$0xff]  ;;  %v8497_v12 = vld [vmem:[%s8149_s21 + $0x88] sm:$0xff]  ;;  %v754_v13 = vadd.f32 %v753_v58, %v8478_v53  ;;  %v11061_v53 = vmov 0.0  }
 0x194   : > { %6678 = vmatprep.subr.bf16.mxu1 %v10875_v0  ;;  %v8481_v54 = vld [vmem:[%s8149_s21 + $0x78] sm:$0xff]  ;;  %v738_v59 = vadd.f32 %v737_v46, %v8454_v37  ;;  %v763_v61 = vadd.f32 %v762_v47, %v8457_v40  ;;  %v8491_v63 = vpack.c.bf16 %v722_v45, %v721_v44  ;;  %11059 = vst [vmem:[#allocation40_spill] sm:$0xff] %v8494_v2  ;;  %v8507_v25 = vld [vmem:[%s8149_s21 + $0xa8] sm:$0xff]  ;;  %v8510_v26 = vld [vmem:[%s8149_s21 + $0xa0] sm:$0xff] }
 0x195   : > { %11058 = vst [vmem:[#allocation39_spill] sm:$0xff] %v8481_v54  ;;  %11060 = vst [vmem:[#allocation41_spill] sm:$0xff] %v8507_v25  ;;  %v755_v27 = vrot.slane %v754_v13, 4  ;;  %v8515_v42 = vld [vmem:[%s8149_s21 + $0xb8] sm:$0xff] }
 0x196   : > { %6654 = vmatpush3.bf16.msra.mxu0 %v8393_v4  ;;  %v739_v16 = vadd.f32 %v738_v59, %v8481_v54  ;;  %v764_v17 = vadd.f32 %v763_v61, %v8484_v56 }
 0x197   : > { %6680 = vmatpush3.bf16.msra.mxu1 %v8406_v11  ;;  %6656 = vmatprep.subr.bf16.mxu0 %v8422_v20  ;;  %v756_v43 = vadd.f32 %v755_v27, %v754_v13 }
 0x198   : > { %6681 = vmatprep.subr.bf16.mxu1 %v10875_v0  ;;  %v740_v28 = vadd.f32 %v739_v16, %v8494_v2  ;;  %v765_v33 = vadd.f32 %v764_v17, %v8497_v12 }
 0x199   : > { %v757_v46 = vrot.slane %v756_v43, 2 }
 0x19a   : > { %6658 = vmatpush3.bf16.msra.mxu0 %v8446_v34  ;;  %v741_v44 = vadd.f32 %v740_v28, %v8507_v25  ;;  %v766_v45 = vadd.f32 %v765_v33, %v8510_v26 }
 0x19b   : > { %6683 = vmatpush3.bf16.msra.mxu1 %v8448_v35  ;;  %6660 = vmatprep.subr.bf16.mxu0 %v8475_v48  ;;  %v758_v59 = vadd.f32 %v757_v46, %v756_v43  ;;  %v724_v43 = vld [vmem:[#allocation9 + $0x8] sm:$0xff]  ;;  %v723_v46 = vld [vmem:[#allocation9] sm:$0xff] }
 0x19c   : > { %6684 = vmatprep.subr.bf16.mxu1 %v10875_v0  ;;  %v742_v47 = vrot.slane %v741_v44, 4  ;;  %v767_v58 = vadd.f32 %v766_v45, %v8515_v42 }
 0x19d   : > { %v759_v17 = vrot.slane %v758_v59, 1 }
 0x19e   : > { %6662 = vmatpush3.bf16.msra.mxu0 %v8489_v62  ;;  %v743_v61 = vadd.f32 %v742_v47, %v741_v44  ;;  %v768_v16 = vrot.slane %v767_v58, 4  ;;  %v727_v44 = vld [vmem:[#allocation9 + $0x20] sm:$0xff]  ;;  %v725_v47 = vld [vmem:[#allocation9 + $0x10] sm:$0xff] }
 0x19f   : > { %6686 = vmatpush3.bf16.msra.mxu1 %v8491_v63  ;;  %v760_v54 = vadd.f32 %v759_v17, %v758_v59  ;;  %v8526_v45 = vpack.c.bf16 %v727_v44, %v724_v43  ;;  %v729_v59 = vld [vmem:[#allocation9 + $0x30] sm:$0xff]  ;;  %v11062_v17 = vmov 0.0|0.0  }
 0x1a0   : > { %6695 = vmatprep.subr.bf16.mxu1 %v10875_v0  ;;  %v744_v1 = vrot.slane %v743_v61, 2  ;;  %v769_v2 = vadd.f32 %v768_v16, %v767_v58  ;;  %v731_v16 = vld [vmem:[#allocation9 + $0x40] sm:$0xff] }
 0x1a1   : > { %838 = vmatprep.mubr.f32.mxu0 %v760_v54  ;;  %6688 = vmatprep.subr.bf16.mxu0 %v8526_v45 }
 0x1a2   : > { %v745_v13 = vadd.f32 %v744_v1, %v743_v61  ;;  %v770_v27 = vrot.slane %v769_v2, 2  ;;  %v726_v1 = vld [vmem:[#allocation9 + $0x18] sm:$0xff]  ;;  %v732_v61 = vld [vmem:[#allocation9 + $0x48] sm:$0xff] }
 0x1a3   : > { %v8528_v54 = vpack.c.bf16 %v726_v1, %v723_v46 }
 0x1a4   : > { %v746_v37 = vrot.slane %v745_v13, 1  ;;  %v771_v28 = vadd.f32 %v770_v27, %v769_v2  ;;  %v728_v2 = vld [vmem:[#allocation9 + $0x28] sm:$0xff]  ;;  %v734_v27 = vld [vmem:[#allocation9 + $0x58] sm:$0xff] }
 0x1a6   : > { %v747_v25 = vadd.f32 %v746_v37, %v745_v13  ;;  %v772_v33 = vrot.slane %v771_v28, 1  ;;  %v8531_v37 = vpack.c.bf16 %v728_v2, %v725_v47  ;;  %v8538_v13 = vpack.c.bf16 %v732_v61, %v729_v59 }
 0x1a8   : > { %839 = vmatmul.mubr.f32.vlgmr.msra.gmra.mrb[0].mxu0 %v747_v25  ;;  %v773_v0 = vadd.f32 %v772_v33, %v771_v28  ;;  %v733_v25 = vld [vmem:[#allocation9 + $0x50] sm:$0xff]  ;;  %v8541_v28 = vpack.c.bf16 %v734_v27, %v731_v16 }
 0x1a9   : > { %983 = vmatprep.mubr.f32.mxu0 %v11061_v53  ;;  %6690 = vmatpush1.bf16.msra.mxu0 %v8528_v54 }
 0x1aa   : > { %6321 = vmatmul.mubr.f32.vlgmr.msra.gmra.mrb[0].mxu1 %v773_v0  ;;  %v730_v0 = vld [vmem:[#allocation9 + $0x38] sm:$0xff] }
 0x1ab   : > { %6331 = vmatprep.mubr.msk.f32.mxu1 %vm7697_vm0, %v11061_v53  ;;  %6697 = vmatpush3.bf16.msra.mxu1 %v8531_v37  ;;  %v8535_v58 = vpack.c.bf16 %v733_v25, %v730_v0 }
 0x1ac   : > { %6698 = vmatprep.subr.bf16.mxu1 %v11062_v17 }
 0x1ad   : > { %6692 = vmatprep.subr.bf16.mxu0 %v8535_v58 }
 0x1ae   : > { %6694 = vmatpush1.bf16.msra.mxu0 %v8538_v13 }
 0x1af   : > { %6700 = vmatpush3.bf16.msra.mxu1 %v8541_v28  ;;  %6702 = vmatprep.subr.bf16.mxu0 %v8212_v5  ;;  %v1060_v5 = vlaneseq }
 0x1b0   : > { %6733 = vmatprep.subr.bf16.mxu1 %v11062_v17 }
 0x27b   : > { %v5681_v33 = vpop.f32.mrb[0].mxu0 }
 0x27c   : > { %v5682_v43 = vpop.f32.mrb[1].mxu0 }
 0x27d   : > { %v5683_v44 = vadd.f32 %v5682_v43, %v5681_v33  ;;  %v910_v46 = vpop.f32.mrb[0].mxu1 }
 0x27e   : > { %v6322_v1 = vpop.f32.mrb[1].mxu1 }
 0x27f   : > { %v911_v47 = vadd.f32 %v5683_v44, %v910_v46  ;;  %v11064_v1 = vld [vmem:[#allocation38_spill] sm:$0xff] }
 0x281   : > { %v914_v2 = vmul.f32 0.0013020834, %v911_v47 }
 0x283   : > { %5607 = vmatmul.mubr.msk.f32.vlgmr.msra.gmra.mrb[2].mxu0 %vm915_vm1, %v914_v2  ;;  %6332 = vmatmul.mubr.msk.f32.vlgmr.msra.gmra.mrb[2].mxu1 %vm915_vm1, %v914_v2  ;;  %v11065_v2 = vld [vmem:[#allocation37_spill] sm:$0xff] }
 0x284   : > { %6735 = vmatpush3.bf16.msra.mxu1 %v8225_v10  ;;  %6704 = vmatpush3.bf16.msra.mxu0 %v8223_v9  ;;  %v8583_v9 = vshrl.u32 %v1060_v5, 7 }
 0x285   : > { %6736 = vmatprep.subr.bf16.mxu1 %v11062_v17  ;;  %6706 = vmatprep.subr.bf16.mxu0 %v8237_v14 }
 0x286   : > { %6366 = vmatprep.mubr.msk.f32.mxu1 %vm7697_vm0, %v11061_v53  ;;  %v8586_v10 = vsub.s32 0, %v8583_v9 }
 0x288   : > { %6738 = vmatpush3.bf16.msra.mxu1 %v8252_v19  ;;  %6708 = vmatpush3.bf16.msra.mxu0 %v8250_v18  ;;  %11063 = vst [vmem:[#allocation42_spill] sm:$0xff] %v8586_v10 }
 0x289   : > { %6739 = vmatprep.subr.bf16.mxu1 %v11062_v17  ;;  %6710 = vmatprep.subr.bf16.mxu0 %v8265_v23 }
 0x28c   : > { %6741 = vmatpush3.bf16.msra.mxu1 %v8286_v30  ;;  %6712 = vmatpush3.bf16.msra.mxu0 %v8284_v29 }
 0x28d   : > { %6742 = vmatprep.subr.bf16.mxu1 %v11062_v17  ;;  %6714 = vmatprep.subr.bf16.mxu0 %v8293_v32 }
 0x290   : > { %6744 = vmatpush3.bf16.msra.mxu1 %v8314_v39  ;;  %6716 = vmatpush3.bf16.msra.mxu0 %v8312_v38 }
 0x291   : > { %6745 = vmatprep.subr.bf16.mxu1 %v11062_v17  ;;  %6718 = vmatprep.subr.bf16.mxu0 %v8321_v41 }
 0x294   : > { %6747 = vmatpush3.bf16.msra.mxu1 %v8354_v52  ;;  %6720 = vmatpush3.bf16.msra.mxu0 %v8352_v51 }
 0x295   : > { %6748 = vmatprep.subr.bf16.mxu1 %v11062_v17  ;;  %6722 = vmatprep.subr.bf16.mxu0 %v8369_v57 }
 0x298   : > { %6750 = vmatpush3.bf16.msra.mxu1 %v8406_v11  ;;  %6724 = vmatpush3.bf16.msra.mxu0 %v8393_v4 }
 0x299   : > { %6751 = vmatprep.subr.bf16.mxu1 %v11062_v17  ;;  %6726 = vmatprep.subr.bf16.mxu0 %v8422_v20 }
 0x29c   : > { %6753 = vmatpush3.bf16.msra.mxu1 %v8448_v35  ;;  %6728 = vmatpush3.bf16.msra.mxu0 %v8446_v34 }
 0x29d   : > { %6754 = vmatprep.subr.bf16.mxu1 %v11062_v17  ;;  %6730 = vmatprep.subr.bf16.mxu0 %v8475_v48 }
 0x2a0   : > { %6756 = vmatpush3.bf16.msra.mxu1 %v8491_v63  ;;  %6732 = vmatpush3.bf16.msra.mxu0 %v8489_v62 }
 0x2a1   : > { %6758 = vmatprep.subr.bf16.mxu0 %v8526_v45  ;;  %6765 = vmatprep.subr.bf16.mxu1 %v11062_v17 }
 0x356   : > { %v985_v14 = vpop.f32.mrb[2].mxu0  ;;  %v1056_v18 = vpop.f32.mrb[2].mxu1 }
 0x357   : > { %v1071_v19 = vrot.slane %v1056_v18, %v8586_v10  ;;  %v987_v23 = vpop.f32.mrb[3].mxu0  ;;  %v6333_v29 = vpop.f32.mrb[3].mxu1 }
 0x358   : > { %v1067_v30 = vrot.slane %v987_v23, %v8586_v10  ;;  %v11066_v29 = vld [vmem:[#allocation39_spill] sm:$0xff] }
 0x359   : > { %v8591_v32 = vsub.f32 %v8428_v22, %v1071_v19  ;;  %v8594_v38 = vsub.f32 %v8431_v24, %v1071_v19  ;;  %v8597_v39 = vsub.f32 %v8442_v31, %v1071_v19  ;;  %v8600_v41 = vsub.f32 %v8457_v40, %v1071_v19 }
 0x35a   : > { %v8607_v57 = vsub.f32 %v8484_v56, %v1071_v19  ;;  %v8612_v20 = vsub.f32 %v8345_v49, %v1067_v30  ;;  %v8615_v22 = vsub.f32 %v8348_v50, %v1067_v30  ;;  %v8618_v24 = vsub.f32 %v8363_v55, %v1067_v30 }
 0x35b   : > { %v1098_v51 = vmul.f32 %v8591_v32, %v8591_v32  ;;  %v1101_v52 = vmul.f32 %v8594_v38, %v8594_v38  ;;  %v1104_v4 = vmul.f32 %v8597_v39, %v8597_v39  ;;  %v1063_v31 = vrot.slane %v985_v14, %v8586_v10 }
 0x35c   : > { %v8622_v34 = vsub.f32 %v8497_v12, %v1071_v19  ;;  %v1107_v35 = vmul.f32 %v8600_v41, %v8600_v41  ;;  %v8627_v48 = vsub.f32 %v8378_v60, %v1067_v30  ;;  %v1097_v49 = vmul.f32 %v8612_v20, %v8612_v20 }
 0x35d   : > { %v1146_v11 = vadd.f32 %v1101_v52, %v1098_v51  ;;  %v1100_v50 = vmul.f32 %v8615_v22, %v8615_v22  ;;  %v8634_v55 = vsub.f32 %v8510_v26, %v1071_v19  ;;  %v8637_v56 = vsub.f32 %v8515_v42, %v1071_v19 }
 0x35e   : > { %v1110_v62 = vmul.f32 %v8607_v57, %v8607_v57  ;;  %v8642_v12 = vsub.f32 %v8396_v6, %v1067_v30  ;;  %v1103_v60 = vmul.f32 %v8618_v24, %v8618_v24  ;;  %v1113_v0 = vmul.f32 %v8622_v34, %v8622_v34 }
 0x35f   : > { %v1147_v40 = vadd.f32 %v1146_v11, %v1104_v4  ;;  %v1133_v45 = vadd.f32 %v1100_v50, %v1097_v49  ;;  %v8649_v26 = vsub.f32 %v8415_v15, %v1067_v30  ;;  %v8652_v42 = vsub.f32 %v8391_v3, %v1063_v31 }
 0x360   : > { %v8655_v25 = vsub.f32 %v8399_v7, %v1063_v31  ;;  %v1106_v6 = vmul.f32 %v8627_v48, %v8627_v48  ;;  %v8660_v16 = vsub.f32 %v8402_v8, %v1063_v31  ;;  %v1116_v27 = vmul.f32 %v8634_v55, %v8634_v55 }
 0x361   : > { %v1148_v63 = vadd.f32 %v1147_v40, %v1107_v35  ;;  %v1134_v61 = vadd.f32 %v1133_v45, %v1103_v60  ;;  %v8665_v15 = vsub.f32 %v8451_v36, %v1067_v30  ;;  %v1096_v3 = vmul.f32 %v8652_v42, %v8652_v42  ;;  %v11067_v40 = vld [vmem:[#allocation40_spill] sm:$0xff]  ;;  %v11068_v45 = vld [vmem:[#allocation41_spill] sm:$0xff] }
 0x362   : > { %v1099_v7 = vmul.f32 %v8655_v25, %v8655_v25  ;;  %v1109_v43 = vmul.f32 %v8642_v12, %v8642_v12  ;;  %v8674_v8 = vsub.f32 %v8425_v21, %v1063_v31  ;;  %v1119_v46 = vmul.f32 %v8637_v56, %v8637_v56 }
 0x363   : > { %v1149_v59 = vadd.f32 %v1148_v63, %v1110_v62  ;;  %v1135_v44 = vadd.f32 %v1134_v61, %v1106_v6  ;;  %v8679_v36 = vsub.f32 %v11064_v1, %v1067_v30  ;;  %v1112_v47 = vmul.f32 %v8649_v26, %v8649_v26 }
 0x364   : > { %v8684_v5 = vsub.f32 %v11065_v2, %v1063_v31  ;;  %v1102_v19 = vmul.f32 %v8660_v16, %v8660_v16  ;;  %v1120_v23 = vadd.f32 %v1099_v7, %v1096_v3  ;;  %v1115_v21 = vmul.f32 %v8665_v15, %v8665_v15 }
 0x365   : > { %v1150_v33 = vadd.f32 %v1149_v59, %v1113_v0  ;;  %v1136_v18 = vadd.f32 %v1135_v44, %v1109_v43  ;;  %v8691_v51 = vsub.f32 %v11066_v29, %v1063_v31  ;;  %v1105_v4 = vmul.f32 %v8674_v8, %v8674_v8 }
 0x366   : > { %v1121_v11 = vadd.f32 %v1120_v23, %v1102_v19  ;;  %v1118_v35 = vmul.f32 %v8679_v36, %v8679_v36  ;;  %v8698_v49 = vsub.f32 %v11067_v40, %v1063_v31  ;;  %v1108_v63 = vmul.f32 %v8684_v5, %v8684_v5  ;;  %v1790_v40 = vld [vmem:[%s11069_s4] sm:$0xff] }
 0x367   : > { %v1151_v14 = vadd.f32 %v1150_v33, %v1116_v27  ;;  %v1137_v52 = vadd.f32 %v1136_v18, %v1112_v47  ;;  %v8703_v0 = vsub.f32 %v11068_v45, %v1063_v31  ;;  %v1111_v61 = vmul.f32 %v8691_v51, %v8691_v51 }
 0x368   : > { %v1122_v60 = vadd.f32 %v1121_v11, %v1105_v4  ;;  %v1114_v33 = vmul.f32 %v8698_v49, %v8698_v49 }
 0x369   : > { %v1152_v30 = vadd.f32 %v1151_v14, %v1119_v46  ;;  %v1138_v62 = vadd.f32 %v1137_v52, %v1115_v21  ;;  %v1117_v1 = vmul.f32 %v8703_v0, %v8703_v0 }
 0x36a   : > { %v1123_v27 = vadd.f32 %v1122_v60, %v1108_v63  ;;  %v7700_v63 = vmov 1  }
 0x36b   : > { %v1153_v50 = vrot.slane %v1152_v30, 4  ;;  %v1139_v6 = vadd.f32 %v1138_v62, %v1118_v35  ;;  %v1796_v62 = vld [vmem:[%s11069_s4 + $0x30] sm:$0xff] }
 0x36c   : > { %v1124_v43 = vadd.f32 %v1123_v27, %v1111_v61 }
 0x36d   : > { %v1154_v59 = vadd.f32 %v1153_v50, %v1152_v30  ;;  %v1140_v7 = vrot.slane %v1139_v6, 4  ;;  %v1797_v50 = vld [vmem:[%s11069_s4 + $0x38] sm:$0xff] }
 0x36e   : > { %v1125_v47 = vadd.f32 %v1124_v43, %v1114_v33  ;;  %v2031_v43 = vld [vmem:[#allocation11 + $0x280] sm:$0xff] }
 0x36f   : > { %v1155_v3 = vrot.slane %v1154_v59, 2  ;;  %v1141_v46 = vadd.f32 %v1140_v7, %v1139_v6 }
 0x370   : > { %v1126_v14 = vadd.f32 %v1125_v47, %v1117_v1  ;;  %v2015_v1 = vld [vmem:[#allocation11 + $0x200] sm:$0xff]  ;;  %v2016_v47 = vld [vmem:[#allocation11 + $0x208] sm:$0xff] }
 0x371   : > { %v1156_v44 = vadd.f32 %v1155_v3, %v1154_v59  ;;  %v1142_v2 = vrot.slane %v1141_v46, 2 }
 0x372   : > { %v1127_v23 = vrot.slane %v1126_v14, 4 }
 0x373   : > { %v1157_v31 = vrot.slane %v1156_v44, 1  ;;  %v1143_v19 = vadd.f32 %v1142_v2, %v1141_v46  ;;  %v1999_v2 = vld [vmem:[#allocation11 + $0x180] sm:$0xff] }
 0x374   : > { %v1128_v29 = vadd.f32 %v1127_v23, %v1126_v14  ;;  %v2000_v14 = vld [vmem:[#allocation11 + $0x188] sm:$0xff]  ;;  %v2034_v23 = vld [vmem:[#allocation11 + $0x298] sm:$0xff] }
 0x375   : > { %v1158_v18 = vadd.f32 %v1157_v31, %v1156_v44  ;;  %v1144_v21 = vrot.slane %v1143_v19, 1  ;;  %v2032_v44 = vld [vmem:[#allocation11 + $0x288] sm:$0xff]  ;;  %v2067_v31 = vpack.c.bf16 %v2016_v47, %v2015_v1 }
 0x376   : > { %v1129_v52 = vrot.slane %v1128_v29, 2  ;;  %v2075_v46 = vpack.c.bf16 %v2032_v44, %v2031_v43  ;;  %v2040_v43 = vld [vmem:[#allocation11 + $0x2c8] sm:$0xff] }
 0x377   : > { %6367 = vmatmul.mubr.f32.vlgmr.msra.gmra.mrb[4].mxu1 %v1158_v18  ;;  %v1145_v30 = vadd.f32 %v1144_v21, %v1143_v19  ;;  %v2059_v18 = vpack.c.bf16 %v2000_v14, %v1999_v2  ;;  %v2033_v19 = vld [vmem:[#allocation11 + $0x290] sm:$0xff]  ;;  %v2024_v1 = vld [vmem:[#allocation11 + $0x248] sm:$0xff] }
 0x378   : > { %6767 = vmatpush3.bf16.msra.mxu1 %v8531_v37  ;;  %6377 = vmatprep.mubr.msk.f32.mxu1 %vm7697_vm0, %v11061_v53  ;;  %v1130_v4 = vadd.f32 %v1129_v52, %v1128_v29  ;;  %v1792_v37 = vld [vmem:[%s11069_s4 + $0x10] sm:$0xff]  ;;  %v2076_v21 = vpack.c.bf16 %v2034_v23, %v2033_v19  ;;  %v2017_v29 = vld [vmem:[#allocation11 + $0x210] sm:$0xff]  ;;  %v2042_v19 = vld [vmem:[#allocation11 + $0x2d8] sm:$0xff] }
 0x379   : > { %6768 = vmatprep.subr.bf16.mxu1 %v11062_v17  ;;  %1223 = vmatprep.mubr.f32.mxu0 %v1145_v30  ;;  %v2018_v30 = vld [vmem:[#allocation11 + $0x218] sm:$0xff]  ;;  %v2008_v2 = vld [vmem:[#allocation11 + $0x1c8] sm:$0xff] }
 0x37a   : > { %v1131_v11 = vrot.slane %v1130_v4, 1  ;;  %v2068_v52 = vpack.c.bf16 %v2018_v30, %v2017_v29  ;;  %v2026_v29 = vld [vmem:[#allocation11 + $0x258] sm:$0xff] }
 0x37c   : > { %6770 = vmatpush3.bf16.msra.mxu1 %v8541_v28  ;;  %v1132_v35 = vadd.f32 %v1131_v11, %v1130_v4  ;;  %v7699_v28 = vmov 0   ;;  %v2001_v4 = vld [vmem:[#allocation11 + $0x190] sm:$0xff]  ;;  %v2002_v11 = vld [vmem:[#allocation11 + $0x198] sm:$0xff] }
 0x37d   : > { %7075 = vset.pattern.permute.xlu1 %v7699_v28  ;;  %7074 = vset.pattern.permute.xlu0 %v7699_v28 }
 0x37e   : > { %1224 = vmatmul.mubr.f32.vlgmr.msra.gmra.mrb[4].mxu0 %v1132_v35  ;;  %1835 = vperm.xlu1 %7075, %v1792_v37   ;;  %v2060_v35 = vpack.c.bf16 %v2002_v11, %v2001_v4  ;;  %v2010_v4 = vld [vmem:[#allocation11 + $0x1d8] sm:$0xff] }
 0x37f   : > { %6760 = vmatpush1.bf16.msra.mxu0 %v8528_v54  ;;  %1369 = vmatprep.mubr.f32.mxu0 %v11061_v53  ;;  %v1793_v53 = vld [vmem:[%s11069_s4 + $0x18] sm:$0xff]  ;;  %v1791_v54 = vld [vmem:[%s11069_s4 + $0x8] sm:$0xff] }
 0x380   : > { %6762 = vmatprep.subr.bf16.mxu0 %v8535_v58  ;;  %1827 = vperm.xlu0 %7074, %v1790_v40   ;;  %v1795_v58 = vld [vmem:[%s11069_s4 + $0x28] sm:$0xff] }
 0x381   : > { %6380 = vmatprep.subr.bf16.mxu1 %v2075_v46 }
 0x382   : > { %1839 = vperm.xlu1 %7075, %v1793_v53  }
 0x383   : > { %6764 = vmatpush1.bf16.msra.mxu0 %v8538_v13  ;;  %v1794_v13 = vld [vmem:[%s11069_s4 + $0x20] sm:$0xff] }
 0x384   : > { %1831 = vperm.xlu0 %7074, %v1791_v54   ;;  %5763 = vmatprep.subr.bf16.mxu0 %v2067_v31  ;;  %v2007_v31 = vld [vmem:[#allocation11 + $0x1c0] sm:$0xff] }
 0x385   : > { %v2063_v14 = vpack.c.bf16 %v2008_v2, %v2007_v31 }
 0x386   : > { %1847 = vperm.xlu1 %7075, %v1795_v58  }
 0x388   : > { %1843 = vperm.xlu0 %7074, %v1794_v13  }
 0x38a   : > { %1855 = vperm.xlu1 %7075, %v1797_v50  }
 0x38c   : > { %1851 = vperm.xlu0 %7074, %v1796_v62  }
 0x38e   : > { %7077 = vset.pattern.permute.xlu1 %v7700_v63 }
 0x38f   : > { %2519 = vperm.xlu1 %7077, %v1791_v54   ;;  %v2020_v54 = vld [vmem:[#allocation11 + $0x228] sm:$0xff] }
 0x390   : > { %7076 = vset.pattern.permute.xlu0 %v7700_v63  ;;  %v2037_v63 = vld [vmem:[#allocation11 + $0x2b0] sm:$0xff] }
 0x391   : > { %2516 = vperm.xlu0 %7076, %v1790_v40   ;;  %v2036_v40 = vld [vmem:[#allocation11 + $0x2a8] sm:$0xff] }
 0x393   : > { %2522 = vperm.xlu1 %7077, %v1792_v37   ;;  %v2035_v37 = vld [vmem:[#allocation11 + $0x2a0] sm:$0xff] }
 0x394   : > { %v2077_v28 = vpack.c.bf16 %v2036_v40, %v2035_v37  ;;  %v2044_v37 = vld [vmem:[#allocation11 + $0x2e8] sm:$0xff] }
 0x395   : > { %2525 = vperm.xlu0 %7076, %v1793_v53   ;;  %v2019_v53 = vld [vmem:[#allocation11 + $0x220] sm:$0xff] }
 0x397   : > { %2528 = vperm.xlu1 %7077, %v1794_v13   ;;  %v2003_v13 = vld [vmem:[#allocation11 + $0x1a0] sm:$0xff] }
 0x399   : > { %2531 = vperm.xlu0 %7076, %v1795_v58   ;;  %v2069_v58 = vpack.c.bf16 %v2020_v54, %v2019_v53  ;;  %v2028_v53 = vld [vmem:[#allocation11 + $0x268] sm:$0xff] }
 0x39b   : > { %2534 = vperm.xlu1 %7077, %v1796_v62  }
 0x39d   : > { %2537 = vperm.xlu0 %7076, %v1797_v50   ;;  %v2004_v50 = vld [vmem:[#allocation11 + $0x1a8] sm:$0xff] }
 0x39e   : > { %v2061_v62 = vpack.c.bf16 %v2004_v50, %v2003_v13  ;;  %v2012_v13 = vld [vmem:[#allocation11 + $0x1e8] sm:$0xff] }
 0x3ff   : > { %v1828_v31 = vpop.permute.xlu0 %1827 }
 0x44a   : > { %v1295_v60 = vpop.f32.mrb[4].mxu1 }
 0x44b   : > { %v6368_v45 = vpop.f32.mrb[5].mxu1 }
 0x451   : > { %v5738_v59 = vpop.f32.mrb[4].mxu0 }
 0x452   : > { %v5739_v6 = vpop.f32.mrb[5].mxu0 }
 0x453   : > { %v5740_v61 = vadd.f32 %v5739_v6, %v5738_v59  ;;  %v2021_v59 = vld [vmem:[#allocation11 + $0x230] sm:$0xff]  ;;  %v2022_v6 = vld [vmem:[#allocation11 + $0x238] sm:$0xff] }
 0x455   : > { %v1296_v27 = vadd.f32 %v5740_v61, %v1295_v60  ;;  %v2038_v60 = vld [vmem:[#allocation11 + $0x2b8] sm:$0xff]  ;;  %v2070_v61 = vpack.c.bf16 %v2022_v6, %v2021_v59  ;;  %v2013_v6 = vld [vmem:[#allocation11 + $0x1f0] sm:$0xff] }
 0x456   : > { %v2078_v45 = vpack.c.bf16 %v2038_v60, %v2037_v63  ;;  %v2046_v63 = vld [vmem:[#allocation11 + $0x2f8] sm:$0xff] }
 0x457   : > { %v1299_v3 = vmul.f32 0.0013020834, %v1296_v27  ;;  %v2005_v27 = vld [vmem:[#allocation11 + $0x1b0] sm:$0xff]  ;;  %v2030_v59 = vld [vmem:[#allocation11 + $0x278] sm:$0xff] }
 0x459   : > { %v1300_v7 = vadd.f32 1e-05, %v1299_v3  ;;  %v2006_v3 = vld [vmem:[#allocation11 + $0x1b8] sm:$0xff] }
 0x45b   : > { %7078 = vrsqrt.f32 %v1300_v7  ;;  %v2062_v7 = vpack.c.bf16 %v2006_v3, %v2005_v27 }
 0x465   : > { %v7079_v33 = vpop.eup %7078 }
 0x466   : > { %5609 = vmatmul.mubr.msk.f32.vlgmr.msra.gmra.mrb[6].mxu0 %vm915_vm1, %v7079_v33  ;;  %6378 = vmatmul.mubr.msk.f32.vlgmr.msra.gmra.mrb[6].mxu1 %vm915_vm1, %v7079_v33  ;;  %v2039_v33 = vld [vmem:[#allocation11 + $0x2c0] sm:$0xff] }
 0x467   : > { %6381 = vmatpush3.bf16.msra.mxu1 %v2075_v46  ;;  %5764 = vmatpush3.bf16.msra.mxu0 %v2059_v18  ;;  %v2079_v44 = vpack.c.bf16 %v2040_v43, %v2039_v33  ;;  %v2023_v46 = vld [vmem:[#allocation11 + $0x240] sm:$0xff]  ;;  %v2041_v18 = vld [vmem:[#allocation11 + $0x2d0] sm:$0xff]  ;;  %v1942_v33 = vld [vmem:[#allocation11 + $0x108] sm:$0xff] }
 0x468   : > { %6382 = vmatprep.subr.bf16.mxu1 %v2076_v21  ;;  %5765 = vmatprep.subr.bf16.mxu0 %v2068_v52  ;;  %v2071_v47 = vpack.c.bf16 %v2024_v1, %v2023_v46  ;;  %v2080_v23 = vpack.c.bf16 %v2042_v19, %v2041_v18  ;;  %v2009_v52 = vld [vmem:[#allocation11 + $0x1d0] sm:$0xff]  ;;  %v1925_v43 = vld [vmem:[#allocation11 + $0x80] sm:$0xff] }
 0x469   : > { %v2064_v11 = vpack.c.bf16 %v2010_v4, %v2009_v52  ;;  %v673_v52 = vld [vmem:[#allocation6] sm:$0x7] }
 0x46b   : > { %6383 = vmatpush3.bf16.msra.mxu1 %v2076_v21  ;;  %5766 = vmatpush3.bf16.msra.mxu0 %v2060_v35  ;;  %v2025_v21 = vld [vmem:[#allocation11 + $0x250] sm:$0xff]  ;;  %v2043_v35 = vld [vmem:[#allocation11 + $0x2e0] sm:$0xff] }
 0x46c   : > { %6384 = vmatprep.subr.bf16.mxu1 %v2077_v28  ;;  %5767 = vmatprep.subr.bf16.mxu0 %v2069_v58  ;;  %v2072_v30 = vpack.c.bf16 %v2026_v29, %v2025_v21  ;;  %v2081_v40 = vpack.c.bf16 %v2044_v37, %v2043_v35  ;;  %v2011_v58 = vld [vmem:[#allocation11 + $0x1e0] sm:$0xff]  ;;  %v674_v35 = vld [vmem:[#allocation8] sm:$0x7]  ;;  %v1489_v37 = vsub.s32 1, %v8583_v9 }
 0x46d   : > { %v2065_v50 = vpack.c.bf16 %v2012_v13, %v2011_v58 }
 0x46f   : > { %6385 = vmatpush3.bf16.msra.mxu1 %v2077_v28  ;;  %5768 = vmatpush3.bf16.msra.mxu0 %v2061_v62  ;;  %v2027_v28 = vld [vmem:[#allocation11 + $0x260] sm:$0xff]  ;;  %v2045_v62 = vld [vmem:[#allocation11 + $0x2f0] sm:$0xff] }
 0x470   : > { %6386 = vmatprep.subr.bf16.mxu1 %v2078_v45  ;;  %5769 = vmatprep.subr.bf16.mxu0 %v2070_v61  ;;  %v2073_v54 = vpack.c.bf16 %v2028_v53, %v2027_v28  ;;  %v2082_v60 = vpack.c.bf16 %v2046_v63, %v2045_v62  ;;  %v2014_v61 = vld [vmem:[#allocation11 + $0x1f8] sm:$0xff]  ;;  %v8757_v53 = vrot.slane %v1828_v31, 1 }
 0x471   : > { %v2066_v3 = vpack.c.bf16 %v2014_v61, %v2013_v6 }
 0x472   : > { %11070 = vst [vmem:[#allocation38_spill] sm:$0xff] %v8757_v53 }
 0x473   : > { %6387 = vmatpush3.bf16.msra.mxu1 %v2078_v45  ;;  %5770 = vmatpush3.bf16.msra.mxu0 %v2062_v7  ;;  %v2029_v45 = vld [vmem:[#allocation11 + $0x270] sm:$0xff]  ;;  %v1941_v7 = vld [vmem:[#allocation11 + $0x100] sm:$0xff] }
 0x474   : > { %6388 = vmatprep.subr.bf16.mxu1 %v2079_v44  ;;  %5771 = vmatprep.subr.bf16.mxu0 %v2071_v47  ;;  %v2074_v27 = vpack.c.bf16 %v2030_v59, %v2029_v45  ;;  %v8746_v46 = vpack.c.bf16 %v1942_v33, %v1941_v7  ;;  %v1836_v47 = vpop.permute.xlu1 %1835  ;;  %v1526_v45 = vrot.slane %v674_v35, %v8586_v10 }
 0x475   : > { %v1861_v28 = vrot.slane %v1836_v47, 1  ;;  %v8763_v59 = vrot.slane %v673_v52, %v1489_v37 }
 0x477   : > { %6389 = vmatpush3.bf16.msra.mxu1 %v2079_v44  ;;  %5772 = vmatpush3.bf16.msra.mxu0 %v2063_v14  ;;  %v1926_v44 = vld [vmem:[#allocation11 + $0x88] sm:$0xff]  ;;  %v1832_v14 = vpop.permute.xlu0 %1831 }
 0x478   : > { %6390 = vmatprep.subr.bf16.mxu1 %v2080_v23  ;;  %5773 = vmatprep.subr.bf16.mxu0 %v2072_v30  ;;  %v1980_v1 = vpack.c.bf16 %v1926_v44, %v1925_v43  ;;  %v1840_v2 = vpop.permute.xlu1 %1839  ;;  %v1859_v58 = vrot.slane %v1832_v14, 1 }
 0x47a   : > { %v8779_v7 = vsel %vm1857_vm2, %v1859_v58, %v1861_v28 }
 0x47b   : > { %6391 = vmatpush3.bf16.msra.mxu1 %v2080_v23  ;;  %5774 = vmatpush3.bf16.msra.mxu0 %v2064_v11  ;;  %v1844_v19 = vpop.permute.xlu0 %1843  ;;  %11074 = vst [vmem:[#allocation41_spill] sm:$0xff] %v8779_v7 }
 0x47c   : > { %6392 = vmatprep.subr.bf16.mxu1 %v2081_v40  ;;  %5775 = vmatprep.subr.bf16.mxu0 %v2073_v54  ;;  %v1848_v18 = vpop.permute.xlu1 %1847  ;;  %v1863_v54 = vrot.slane %v1840_v2, 1  ;;  %v1865_v13 = vrot.slane %v1844_v19, 1 }
 0x47e   : > { %v8782_v33 = vsel %vm1857_vm2, %v1863_v54, %v1865_v13 }
 0x47f   : > { %6393 = vmatpush3.bf16.msra.mxu1 %v2081_v40  ;;  %5776 = vmatpush3.bf16.msra.mxu0 %v2065_v50  ;;  %v1852_v21 = vpop.permute.xlu0 %1851  ;;  %v1493_v40 = vsub.s32 2, %v8583_v9  ;;  %v1867_v50 = vrot.slane %v1848_v18, 1  ;;  %v8767_v9 = vrot.slane %v674_v35, %v1489_v37  ;;  %11075 = vst [vmem:[#allocation43_spill] sm:$0xff] %v8782_v33 }
 0x480   : > { %6394 = vmatprep.subr.bf16.mxu1 %v2082_v60  ;;  %5777 = vmatprep.subr.bf16.mxu0 %v2074_v27  ;;  %v1856_v23 = vpop.permute.xlu1 %1855  ;;  %v1869_v63 = vrot.slane %v1852_v21, 1  ;;  %v8772_v27 = vsel %vm1857_vm2, %v1861_v28, %v1863_v54 }
 0x481   : > { %v8759_v62 = vrot.slane %v1856_v23, 1  ;;  %v8765_v6 = vrot.slane %v673_v52, %v1493_v40  ;;  %v8769_v61 = vrot.slane %v674_v35, %v1493_v40  ;;  %11072 = vst [vmem:[#allocation39_spill] sm:$0xff] %v8772_v27  ;;  %v8789_v31 = vsel %vm1857_vm2, %v1865_v13, %v1867_v50 }
 0x482   : > { %11077 = vst [vmem:[#allocation45_spill] sm:$0xff] %v8789_v31  ;;  %v8792_v2 = vsel %vm1857_vm2, %v1867_v50, %v1869_v63 }
 0x483   : > { %6395 = vmatpush3.bf16.msra.mxu1 %v2082_v60  ;;  %5778 = vmatpush3.bf16.msra.mxu0 %v2066_v3  ;;  %v2517_v30 = vpop.permute.xlu0 %2516  ;;  %11071 = vst [vmem:[#allocation37_spill] sm:$0xff] %v8759_v62  ;;  %v1486_v60 = vrot.slane %v673_v52, %v8586_v10  ;;  %v8776_v3 = vsel %vm1857_vm2, %v8757_v53, %v1859_v58  ;;  %11078 = vst [vmem:[#allocation46_spill] sm:$0xff] %v8792_v2 }
 0x484   : > { %6404 = vmatprep.subr.bf16.mxu1 %v8746_v46  ;;  %5815 = vmatprep.subr.bf16.mxu0 %v1980_v1  ;;  %v8749_v29 = vpop.permute.xlu1 %2519  ;;  %11073 = vst [vmem:[#allocation40_spill] sm:$0xff] %v8776_v3  ;;  %v8796_v14 = vsel %vm1857_vm2, %v1869_v63, %v8759_v62  ;;  %v8800_v52 = vrot.slane %v2517_v30, 7 }
 0x485   : > { %11079 = vst [vmem:[#allocation47_spill] sm:$0xff] %v8796_v14 }
 0x486   : > { %11080 = vst [vmem:[#allocation48_spill] sm:$0xff] %v8800_v52 }
 0x487   : > { %v8753_v11 = vpop.permute.xlu0 %2525 }
 0x488   : > { %v8751_v4 = vpop.permute.xlu1 %2522 }
 0x48b   : > { %v8786_v44 = vpop.permute.xlu0 %2531 }
 0x48c   : > { %v8784_v43 = vpop.permute.xlu1 %2528  ;;  %11076 = vst [vmem:[#allocation44_spill] sm:$0xff] %v8786_v44 }
 0x539   : > { %v1371_v1 = vpop.f32.mrb[6].mxu0  ;;  %v1442_v47 = vpop.f32.mrb[6].mxu1 }
 0x53a   : > { %v1449_v19 = vrot.slane %v1371_v1, %v8586_v10  ;;  %v1373_v23 = vpop.f32.mrb[7].mxu0  ;;  %v6379_v21 = vpop.f32.mrb[7].mxu1  ;;  %v1457_v40 = vrot.slane %v1442_v47, %v8586_v10 }
 0x53b   : > { %v8806_v28 = vrot.slane %v1373_v23, %v8586_v10 }
 0x53c   : > { %v1458_v13 = vmul.f32 %v1449_v19, %v8652_v42  ;;  %v1461_v50 = vmul.f32 %v1449_v19, %v8655_v25  ;;  %v1464_v30 = vmul.f32 %v1449_v19, %v8660_v16  ;;  %v1467_v63 = vmul.f32 %v1449_v19, %v8674_v8 }
 0x53d   : > { %v1470_v1 = vmul.f32 %v1449_v19, %v8684_v5  ;;  %v1473_v21 = vmul.f32 %v1449_v19, %v8691_v51  ;;  %v1476_v47 = vmul.f32 %v1449_v19, %v8698_v49  ;;  %v1479_v23 = vmul.f32 %v1449_v19, %v8703_v0 }
 0x53e   : > { %v1498_v37 = vmul.f32 %v1486_v60, %v1458_v13  ;;  %v1501_v54 = vmul.f32 %v1486_v60, %v1461_v50  ;;  %v1504_v35 = vmul.f32 %v1486_v60, %v1464_v30  ;;  %v1507_v58 = vmul.f32 %v1486_v60, %v1467_v63 }
 0x53f   : > { %v1510_v18 = vmul.f32 %v1486_v60, %v1470_v1  ;;  %v1513_v42 = vmul.f32 %v1486_v60, %v1473_v21  ;;  %v1516_v10 = vmul.f32 %v1486_v60, %v1476_v47  ;;  %v1519_v25 = vmul.f32 %v1486_v60, %v1479_v23 }
 0x540   : > { %v8818_v17 = vadd.f32 %v1526_v45, %v1498_v37  ;;  %v8820_v16 = vadd.f32 %v1526_v45, %v1501_v54  ;;  %v8822_v8 = vadd.f32 %v1526_v45, %v1504_v35  ;;  %v8824_v5 = vadd.f32 %v1526_v45, %v1507_v58 }
 0x541   : > { %v8826_v51 = vadd.f32 %v1526_v45, %v1510_v18  ;;  %v8828_v49 = vadd.f32 %v1526_v45, %v1513_v42  ;;  %v8830_v0 = vadd.f32 %v1526_v45, %v1516_v10  ;;  %v8832_v19 = vadd.f32 %v1526_v45, %v1519_v25  ;;  %v1800_v25 = vld [vmem:[#allocation2 + $0x10] sm:$0x80] }
 0x542   : > { %v5611_v13 = vmul.f32 -1.442695, %v8818_v17  ;;  %v5614_v60 = vmul.f32 -1.442695, %v8820_v16  ;;  %v5617_v37 = vmul.f32 -1.442695, %v8822_v8  ;;  %v1460_v54 = vmul.f32 %v1457_v40, %v8591_v32 }
 0x543   : > { %v5620_v35 = vmul.f32 -1.442695, %v8824_v5  ;;  %v5623_v58 = vmul.f32 -1.442695, %v8826_v51  ;;  %v5626_v18 = vmul.f32 -1.442695, %v8828_v49  ;;  %v1463_v50 = vmul.f32 %v1457_v40, %v8594_v38 }
 0x544   : > { %7080 = vpow2.f32 %v5611_v13  ;;  %v5629_v10 = vmul.f32 -1.442695, %v8830_v0  ;;  %v5632_v45 = vmul.f32 -1.442695, %v8832_v19  ;;  %v1466_v30 = vmul.f32 %v1457_v40, %v8597_v39 }
 0x545   : > { %7082 = vpow2.f32 %v5614_v60  ;;  %v1469_v63 = vmul.f32 %v1457_v40, %v8600_v41  ;;  %v1472_v32 = vmul.f32 %v1457_v40, %v8607_v57  ;;  %v1475_v1 = vmul.f32 %v1457_v40, %v8622_v34 }
 0x546   : > { %7084 = vpow2.f32 %v5617_v37  ;;  %v1478_v21 = vmul.f32 %v1457_v40, %v8634_v55  ;;  %v1481_v47 = vmul.f32 %v1457_v40, %v8637_v56  ;;  %v1500_v38 = vmul.f32 %v8765_v6, %v1460_v54 }
 0x547   : > { %7086 = vpow2.f32 %v5620_v35  ;;  %v1503_v23 = vmul.f32 %v8765_v6, %v1463_v50  ;;  %v1506_v42 = vmul.f32 %v8765_v6, %v1466_v30  ;;  %v1509_v39 = vmul.f32 %v8765_v6, %v1469_v63 }
 0x548   : > { %7088 = vpow2.f32 %v5623_v58  ;;  %v1512_v41 = vmul.f32 %v8765_v6, %v1472_v32  ;;  %v1515_v57 = vmul.f32 %v8765_v6, %v1475_v1  ;;  %v1518_v34 = vmul.f32 %v8765_v6, %v1478_v21  ;;  %v8894_v32 = vld [vmem:[#allocation2] sm:$0xff] }
 0x549   : > { %7090 = vpow2.f32 %v5626_v18  ;;  %v1521_v55 = vmul.f32 %v8765_v6, %v1481_v47  ;;  %v8859_v56 = vadd.f32 %v8769_v61, %v1500_v38  ;;  %v8862_v40 = vadd.f32 %v8769_v61, %v1503_v23 }
 0x54a   : > { %7092 = vpow2.f32 %v5629_v10  ;;  %v8865_v13 = vadd.f32 %v8769_v61, %v1506_v42  ;;  %v8868_v60 = vadd.f32 %v8769_v61, %v1509_v39  ;;  %v8871_v37 = vadd.f32 %v8769_v61, %v1512_v41 }
 0x54b   : > { %7094 = vpow2.f32 %v5632_v45  ;;  %v8874_v6 = vadd.f32 %v8769_v61, %v1515_v57  ;;  %v8877_v54 = vadd.f32 %v8769_v61, %v1518_v34  ;;  %v8880_v35 = vadd.f32 %v8769_v61, %v1521_v55 }
 0x54c   : > { %v5613_v58 = vmul.f32 -1.442695, %v8859_v56  ;;  %v5616_v18 = vmul.f32 -1.442695, %v8862_v40  ;;  %v5619_v50 = vmul.f32 -1.442695, %v8865_v13  ;;  %v8886_v10 = vmul.f32 %v8757_v53, %v1800_v25 }
 0x54d   : > { %v5622_v45 = vmul.f32 -1.442695, %v8868_v60  ;;  %v8890_v30 = vmul.f32 -1.442695, %v8871_v37  ;;  %v1459_v63 = vmul.f32 %v8806_v28, %v8612_v20  ;;  %v8898_v61 = vmul.f32 %v8894_v32, %v8776_v3  ;;  %v9004_v3 = vld [vmem:[#allocation11 + $0x90] sm:$0xff] }
 0x54e   : > { %v7081_v1 = vpop.eup %7080  ;;  %7096 = vpow2.f32 %v5613_v58  ;;  %v8901_v21 = vmul.f32 -1.442695, %v8874_v6  ;;  %v1462_v47 = vmul.f32 %v8806_v28, %v8615_v22  ;;  %v1465_v38 = vmul.f32 %v8806_v28, %v8618_v24 }
 0x54f   : > { %v7083_v23 = vpop.eup %7082  ;;  %v1634_v20 = vadd.f32 1.0, %v7081_v1  ;;  %7098 = vpow2.f32 %v5616_v18  ;;  %v1468_v42 = vmul.f32 %v8806_v28, %v8627_v48  ;;  %v1471_v39 = vmul.f32 %v8806_v28, %v8642_v12 }
 0x550   : > { %v7085_v41 = vpop.eup %7084  ;;  %v1637_v57 = vadd.f32 1.0, %v7083_v23  ;;  %7100 = vpow2.f32 %v5619_v50  ;;  %v1474_v34 = vmul.f32 %v8806_v28, %v8649_v26  ;;  %v1477_v22 = vmul.f32 %v8806_v28, %v8665_v15 }
 0x551   : > { %v7087_v24 = vpop.eup %7086  ;;  %v1640_v55 = vadd.f32 1.0, %v7085_v41  ;;  %7102 = vrcp.f32 %v1634_v20  ;;  %v1480_v25 = vmul.f32 %v8806_v28, %v8679_v36  ;;  %v1499_v48 = vmul.f32 %v8763_v59, %v1459_v63 }
 0x552   : > { %v7089_v58 = vpop.eup %7088  ;;  %v1643_v18 = vadd.f32 1.0, %v7087_v24  ;;  %7104 = vrcp.f32 %v1637_v57  ;;  %v1502_v12 = vmul.f32 %v8763_v59, %v1462_v47  ;;  %v1505_v50 = vmul.f32 %v8763_v59, %v1465_v38 }
 0x553   : > { %v7091_v1 = vpop.eup %7090  ;;  %v1646_v26 = vadd.f32 1.0, %v7089_v58  ;;  %7106 = vrcp.f32 %v1640_v55  ;;  %v1508_v15 = vmul.f32 %v8763_v59, %v1468_v42  ;;  %v1511_v23 = vmul.f32 %v8763_v59, %v1471_v39 }
 0x554   : > { %v7093_v20 = vpop.eup %7092  ;;  %v1649_v41 = vadd.f32 1.0, %v7091_v1  ;;  %7108 = vrcp.f32 %v1643_v18  ;;  %v1514_v36 = vmul.f32 %v8763_v59, %v1474_v34  ;;  %v1517_v28 = vmul.f32 %v8763_v59, %v1477_v22 }
 0x555   : > { %v7095_v63 = vpop.eup %7094  ;;  %v1652_v57 = vadd.f32 1.0, %v7093_v20  ;;  %7110 = vrcp.f32 %v1646_v26  ;;  %v1520_v47 = vmul.f32 %v8763_v59, %v1480_v25  ;;  %v8926_v38 = vadd.f32 %v8767_v9, %v1499_v48  ;;  %v1799_v20 = vld [vmem:[#allocation2 + $0x8] sm:$0x80] }
 0x556   : > { %v1655_v24 = vadd.f32 1.0, %v7095_v63  ;;  %7112 = vrcp.f32 %v1649_v41  ;;  %v8929_v42 = vadd.f32 %v8767_v9, %v1502_v12  ;;  %v8932_v39 = vadd.f32 %v8767_v9, %v1505_v50 }
 0x557   : > { %7114 = vrcp.f32 %v1652_v57  ;;  %v8935_v34 = vadd.f32 %v8767_v9, %v1508_v15  ;;  %v8938_v22 = vadd.f32 %v8767_v9, %v1511_v23  ;;  %v8941_v59 = vadd.f32 %v8767_v9, %v1514_v36 }
 0x558   : > { %v7097_v55 = vpop.eup %7096  ;;  %7116 = vrcp.f32 %v1655_v24  ;;  %v5631_v25 = vmul.f32 -1.442695, %v8877_v54  ;;  %v8945_v48 = vadd.f32 %v8767_v9, %v1517_v28  ;;  %v8948_v58 = vadd.f32 %v8767_v9, %v1520_v47  ;;  %v1798_v47 = vld [vmem:[#allocation2] sm:$0x80] }
 0x559   : > { %v7099_v18 = vpop.eup %7098  ;;  %7118 = vpow2.f32 %v5622_v45  ;;  %v5634_v12 = vmul.f32 -1.442695, %v8880_v35  ;;  %v11083_v50 = vrot.slane %v8749_v29, 7  ;;  %v11085_v26 = vrot.slane %v8751_v4, 7 }
 0x55a   : > { %11081 = vst [vmem:[#allocation49_spill] sm:$0xff] %v8945_v48  ;;  %11082 = vst [vmem:[#allocation50_spill] sm:$0xff] %v8948_v58  ;;  %v7101_v9 = vpop.eup %7100  ;;  %7120 = vpow2.f32 %v8890_v30  ;;  %v1636_v45 = vadd.f32 1.0, %v7097_v55  ;;  %v11088_v41 = vrot.slane %v8753_v11, 7  ;;  %v11091_v63 = vrot.slane %v8784_v43, 7  ;;  %v8991_v11 = vld [vmem:[#allocation11] sm:$0xff] }
 0x55b   : > { %v8955_v1 = vsel %vm2539_vm3, %v8800_v52, %v11083_v50  ;;  %v11086_v15 = vmov %v11083_v50  ;;  %v11089_v36 = vmov %v11085_v26  ;;  %v7103_v24 = vpop.eup %7102  ;;  %7122 = vpow2.f32 %v8901_v21  ;;  %v1943_v43 = vld [vmem:[#allocation11 + $0x110] sm:$0xff] }
 0x55c   : > { %11084 = vst [vmem:[#allocation51_spill] sm:$0xff] %v8955_v1  ;;  %v8962_v23 = vsel %vm2539_vm3, %v11086_v15, %v11085_v26  ;;  %v8970_v28 = vsel %vm2539_vm3, %v11089_v36, %v11088_v41  ;;  %v11092_v57 = vmov %v11088_v41  ;;  %v1639_v30 = vadd.f32 1.0, %v7099_v18  ;;  %v8993_v15 = vld [vmem:[#allocation11 + $0x8] sm:$0xff]  ;;  %v7105_v41 = vpop.eup %7104 }
 0x55d   : > { %11087 = vst [vmem:[#allocation52_spill] sm:$0xff] %v8962_v23  ;;  %11090 = vst [vmem:[#allocation53_spill] sm:$0xff] %v8970_v28  ;;  %v8977_v29 = vsel %vm2539_vm3, %v11092_v57, %v11091_v63  ;;  %v11094_v55 = vrot.slane %v8786_v44, 7  ;;  %v11095_v50 = vmov %v11091_v63  ;;  %v8989_v26 = vpack.c.bf16 %v8898_v61, %v8886_v10  ;;  %v1944_v63 = vld [vmem:[#allocation11 + $0x118] sm:$0xff]  ;;  %v7107_v57 = vpop.eup %7106 }
 0x55e   : > { %11093 = vst [vmem:[#allocation54_spill] sm:$0xff] %v8977_v29  ;;  %v8996_v36 = vmul.f32 %v7103_v24, %v8818_v17  ;;  %7124 = vpow2.f32 %v5631_v25  ;;  %v1642_v21 = vadd.f32 1.0, %v7101_v9  ;;  %v1883_v18 = vmul.f32 %v8757_v53, %v1799_v20  ;;  %v7109_v17 = vpop.eup %7108  ;;  %v9017_v9 = vld [vmem:[#allocation11 + $0x18] sm:$0xff]  ;;  %v1946_v29 = vld [vmem:[#allocation11 + $0x128] sm:$0xff] }
 0x55f   : > { %v8985_v4 = vsel %vm2539_vm3, %v11095_v50, %v11094_v55  ;;  %v9000_v55 = vmul.f32 %v7105_v41, %v8820_v16  ;;  %7126 = vpow2.f32 %v5634_v12  ;;  %v5612_v10 = vmul.f32 -1.442695, %v8926_v38  ;;  %v9015_v12 = vld [vmem:[#allocation11 + $0x10] sm:$0xff] }
 0x560   : > { %11096 = vst [vmem:[#allocation55_spill] sm:$0xff] %v8985_v4  ;;  %v1882_v50 = vmul.f32 %v8757_v53, %v1798_v47  ;;  %v9006_v4 = vld [vmem:[#allocation11 + $0x98] sm:$0xff]  ;;  %v9009_v25 = vmul.f32 %v7107_v57, %v8822_v8  ;;  %1766 = vst [vmem:[#allocation2 + $0x30] sm:$0xff] %v8996_v36  ;;  %7128 = vrcp.f32 %v1636_v45  ;;  %v5615_v20 = vmul.f32 -1.442695, %v8929_v42  ;;  %v7111_v47 = vpop.eup %7110 }
 0x561   : > { %11097 = vst [vmem:[#allocation56_spill] sm:$0xff] %v9015_v12  ;;  %v9020_v24 = vmul.f32 %v7109_v17, %v8824_v5  ;;  %1769 = vst [vmem:[#allocation2 + $0x48] sm:$0xff] %v9000_v55  ;;  %7130 = vrcp.f32 %v1639_v30  ;;  %v5618_v8 = vmul.f32 -1.442695, %v8932_v39  ;;  %v9024_v41 = vpack.c.bf16 %v1944_v63, %v1943_v43  ;;  %v7113_v45 = vpop.eup %7112  ;;  %v1945_v17 = vld [vmem:[#allocation11 + $0x120] sm:$0xff] }
 0x562   : > { %v9027_v57 = vmul.f32 %v7111_v47, %v8826_v51  ;;  %1772 = vst [vmem:[#allocation2 + $0x60] sm:$0xff] %v9009_v25  ;;  %7132 = vrcp.f32 %v1642_v21  ;;  %v5621_v16 = vmul.f32 -1.442695, %v8935_v34  ;;  %v7115_v53 = vpop.eup %7114  ;;  %v9034_v30 = vmul.f32 %v7113_v45, %v8828_v49  ;;  %v9047_v49 = vld [vmem:[#allocation11 + $0xa0] sm:$0xff]  ;;  %v9049_v45 = vld [vmem:[#allocation11 + $0xa8] sm:$0xff] }
 0x563   : > { %11098 = vst [vmem:[#allocation57_spill] sm:$0xff] %v9020_v24  ;;  %1775 = vst [vmem:[#allocation2 + $0x78] sm:$0xff] %v9020_v24  ;;  %7134 = vpow2.f32 %v5612_v10  ;;  %v5624_v51 = vmul.f32 -1.442695, %v8938_v22  ;;  %v7117_v21 = vpop.eup %7116  ;;  %v9041_v63 = vmul.f32 %v7115_v53, %v8830_v0  ;;  %v9045_v47 = vpack.c.bf16 %v8898_v61, %v1883_v18  ;;  %v9060_v18 = vld [vmem:[#allocation11 + $0x20] sm:$0xff] }
 0x564   : > { %11099 = vst [vmem:[#allocation58_spill] sm:$0xff] %v9027_v57  ;;  %11100 = vst [vmem:[#allocation59_spill] sm:$0xff] %v9034_v30  ;;  %7136 = vpow2.f32 %v5615_v20  ;;  %v1900_v10 = vmul.f32 %v8792_v2, %v9027_v57  ;;  %v7119_v5 = vpop.eup %7118  ;;  %v1727_v43 = vmul.f32 %v7117_v21, %v8832_v19  ;;  %v9056_v53 = vpack.c.bf16 %v8898_v61, %v1882_v50  ;;  %v9062_v20 = vld [vmem:[#allocation11 + $0x28] sm:$0xff]  ;;  %v1947_v19 = vld [vmem:[#allocation11 + $0x130] sm:$0xff] }
 0x565   : > { %11101 = vst [vmem:[#allocation60_spill] sm:$0xff] %v9041_v63  ;;  %1778 = vst [vmem:[#allocation2 + $0x90] sm:$0xff] %v9027_v57  ;;  %7138 = vpow2.f32 %v5618_v8  ;;  %v9058_v0 = vpack.c.bf16 %v1946_v29, %v1945_v17  ;;  %v7121_v44 = vpop.eup %7120  ;;  %v1645_v28 = vadd.f32 1.0, %v7119_v5  ;;  %v2249_v57 = vshrl.u32 %v8989_v26, 16  ;;  %v1948_v21 = vld [vmem:[#allocation11 + $0x138] sm:$0xff] }
 0x566   : > { %11102 = vst [vmem:[#allocation61_spill] sm:$0xff] %v9045_v47  ;;  %11103 = vst [vmem:[#allocation62_spill] sm:$0xff] %v9047_v49  ;;  %7140 = vpow2.f32 %v5621_v16  ;;  %v1903_v8 = vmul.f32 %v8796_v14, %v9034_v30  ;;  %v7123_v61 = vpop.eup %7122  ;;  %v1648_v29 = vadd.f32 1.0, %v7121_v44  ;;  %v2252_v17 = vshll.u32 %v8989_v26, 16 }
 0x567   : > { %11104 = vst [vmem:[#allocation63_spill] sm:$0xff] %v9049_v45  ;;  %1781 = vst [vmem:[#allocation2 + $0xa8] sm:$0xff] %v9034_v30  ;;  %7142 = vpow2.f32 %v5624_v51  ;;  %v9076_v44 = vpack.c.bf16 %v1948_v21, %v1947_v19  ;;  %v5630_v26 = vmul.f32 -1.442695, %v8945_v48  ;;  %v9079_v50 = vrot.slane %v2249_v57, 3  ;;  %v1950_v21 = vld [vmem:[#allocation11 + $0x148] sm:$0xff] }
 0x568   : > { %11105 = vst [vmem:[#allocation64_spill] sm:$0xff] %v9056_v53  ;;  %11106 = vst [vmem:[#allocation65_spill] sm:$0xff] %v9060_v18  ;;  %v7125_v53 = vpop.eup %7124  ;;  %7144 = vrcp.f32 %v1645_v28  ;;  %v9073_v5 = vpack.c.bf16 %v1903_v8, %v1900_v10  ;;  %v5633_v10 = vmul.f32 -1.442695, %v8948_v58  ;;  %v9083_v8 = vrot.slane %v2252_v17, 4 }
 0x569   : > { %11107 = vst [vmem:[#allocation66_spill] sm:$0xff] %v9062_v20  ;;  %1784 = vst [vmem:[#allocation2 + $0xc0] sm:$0xff] %v9041_v63  ;;  %v1651_v63 = vadd.f32 1.0, %v7123_v61  ;;  %v7127_v23 = vpop.eup %7126  ;;  %v1654_v47 = vadd.f32 1.0, %v7125_v53  ;;  %7146 = vrcp.f32 %v1648_v29  ;;  %v9085_v53 = vld [vmem:[#allocation11 + $0xb0] sm:$0xff]  ;;  %v9087_v29 = vld [vmem:[#allocation11 + $0xb8] sm:$0xff]  ;;  %v1894_v57 = vmul.f32 %v8782_v33, %v9009_v25 }
 0x56a   : > { %1787 = vst [vmem:[#allocation2 + $0xd8] sm:$0xff] %v1727_v43  ;;  %v5627_v43 = vmul.f32 -1.442695, %v8941_v59  ;;  %v7129_v51 = vpop.eup %7128  ;;  %v1657_v30 = vadd.f32 1.0, %v7127_v23 }
 0x56b   : > { %7148 = vrcp.f32 %v1651_v63  ;;  %v7131_v28 = vpop.eup %7130  ;;  %v1708_v61 = vmul.f32 %v7129_v51, %v8859_v56  ;;  %v1949_v63 = vld [vmem:[#allocation11 + $0x140] sm:$0xff]  ;;  %v1897_v56 = vmul.f32 %v8789_v31, %v9020_v24  ;;  %v1983_v24 = vpack.c.bf16 %v9087_v29, %v9085_v53  ;;  %v1935_v53 = vld [vmem:[#allocation11 + $0xd0] sm:$0xff]  ;;  %v1936_v29 = vld [vmem:[#allocation11 + $0xd8] sm:$0xff] }
 0x56c   : > { %7150 = vrcp.f32 %v1654_v47  ;;  %v7133_v19 = vpop.eup %7132  ;;  %v1711_v23 = vmul.f32 %v7131_v28, %v8862_v40  ;;  %v1952_v40 = vld [vmem:[#allocation11 + $0x158] sm:$0xff] }
 0x56d   : > { %7152 = vrcp.f32 %v1657_v30  ;;  %v7135_v47 = vpop.eup %7134  ;;  %v1714_v17 = vmul.f32 %v7133_v19, %v8865_v13  ;;  %1768 = vst [vmem:[#allocation2 + $0x40] sm:$0xff] %v1708_v61  ;;  %v1890_v51 = vmul.f32 %v8779_v7, %v1708_v61  ;;  %v2049_v16 = vpack.c.bf16 %v1708_v61, %v8894_v32  ;;  %v1951_v30 = vld [vmem:[#allocation11 + $0x150] sm:$0xff] }
 0x56e   : > { %7154 = vpow2.f32 %v5627_v43  ;;  %v7137_v28 = vpop.eup %7136  ;;  %1771 = vst [vmem:[#allocation2 + $0x58] sm:$0xff] %v1711_v23  ;;  %v1635_v18 = vadd.f32 1.0, %v7135_v47  ;;  %v1893_v20 = vmul.f32 %v8772_v27, %v1711_v23  ;;  %v9100_v19 = vpack.c.bf16 %v1950_v21, %v1949_v63  ;;  %v1954_v47 = vld [vmem:[#allocation11 + $0x168] sm:$0xff] }
 0x56f   : > { %7156 = vpow2.f32 %v5630_v26  ;;  %v7139_v58 = vpop.eup %7138  ;;  %1774 = vst [vmem:[#allocation2 + $0x70] sm:$0xff] %v1714_v17  ;;  %v1638_v13 = vadd.f32 1.0, %v7137_v28  ;;  %6396 = vmatprep.mubr.bf16.mxu1 %v2049_v16  ;;  %v2052_v43 = vpack.c.bf16 %v1714_v17, %v1711_v23  ;;  %v9102_v48 = vpack.c.bf16 %v1952_v40, %v1951_v30  ;;  %v1953_v26 = vld [vmem:[#allocation11 + $0x160] sm:$0xff] }
 0x570   : > { %7158 = vpow2.f32 %v5633_v10  ;;  %v7141_v61 = vpop.eup %7140  ;;  %v1641_v49 = vadd.f32 1.0, %v7139_v58  ;;  %v1962_v45 = vpack.c.bf16 %v1893_v20, %v1890_v51  ;;  %v2255_v10 = vor.u32 %v9083_v8, %v9079_v50 }
 0x571   : > { %7160 = vrcp.f32 %v1635_v18  ;;  %v7143_v62 = vpop.eup %7142  ;;  %v1644_v12 = vadd.f32 1.0, %v7141_v61  ;;  %6397 = vmatmul.mubr.bf16.vlgmr.msra.gmra.mrb[8].mxu1 %v2052_v43  ;;  %v9106_v28 = vpack.c.bf16 %v1897_v56, %v1894_v57  ;;  %v1896_v21 = vmul.f32 %v8782_v33, %v1714_v17 }
 0x572   : > { %7162 = vrcp.f32 %v1638_v13  ;;  %v7145_v16 = vpop.eup %7144  ;;  %v1647_v23 = vadd.f32 1.0, %v7143_v62  ;;  %6405 = vmatpush3.bf16.msra.mxu1 %v8746_v46  ;;  %v2257_v58 = vshrl.u32 %v1962_v45, 16  ;;  %v2260_v18 = vshll.u32 %v1962_v45, 16 }
 0x573   : > { %7164 = vrcp.f32 %v1641_v49  ;;  %v7147_v20 = vpop.eup %7146  ;;  %v1717_v63 = vmul.f32 %v7145_v16, %v8868_v60  ;;  %6406 = vmatprep.subr.bf16.mxu1 %v9024_v41  ;;  %v9112_v51 = vpack.c.bf16 %v1954_v47, %v1953_v26  ;;  %v2047_v60 = vpack.c.bf16 %v8996_v36, %v8894_v32 }
 0x574   : > { %7166 = vrcp.f32 %v1644_v12  ;;  %v1720_v8 = vmul.f32 %v7147_v20, %v8871_v37  ;;  %v2259_v62 = vrot.slane %v2257_v58, 3  ;;  %v2262_v49 = vrot.slane %v2260_v18, 4 }
 0x575   : > { %v7149_v50 = vpop.eup %7148  ;;  %7168 = vrcp.f32 %v1647_v23  ;;  %1777 = vst [vmem:[#allocation2 + $0x88] sm:$0xff] %v1717_v63  ;;  %v1899_v12 = vmul.f32 %v8789_v31, %v1717_v63  ;;  %v2266_v45 = vshrl.u32 %v9106_v28, 16  ;;  %v2269_v26 = vshll.u32 %v9106_v28, 16 }
 0x576   : > { %v7151_v57 = vpop.eup %7150  ;;  %v1723_v46 = vmul.f32 %v7149_v50, %v8874_v6  ;;  %1780 = vst [vmem:[#allocation2 + $0xa0] sm:$0xff] %v1720_v8  ;;  %v1902_v37 = vmul.f32 %v8792_v2, %v1720_v8  ;;  %v2055_v30 = vpack.c.bf16 %v1720_v8, %v1717_v63  ;;  %6407 = vmatpush3.bf16.msra.mxu1 %v9024_v41  ;;  %v2293_v23 = vshrl.u32 %v9073_v5, 16 }
 0x577   : > { %v7153_v56 = vpop.eup %7152  ;;  %v1726_v17 = vmul.f32 %v7151_v57, %v8877_v54  ;;  %v9123_v40 = vor.u32 %v2262_v49, %v2259_v62  ;;  %v1965_v43 = vpack.c.bf16 %v1899_v12, %v1896_v21  ;;  %6408 = vmatprep.subr.bf16.mxu1 %v9058_v0  ;;  %v2268_v28 = vrot.slane %v2266_v45, 3 }
 0x578   : > { %v7155_v6 = vpop.eup %7154  ;;  %v1729_v13 = vmul.f32 %v7153_v56, %v8880_v35  ;;  %1783 = vst [vmem:[#allocation2 + $0xb8] sm:$0xff] %v1723_v46  ;;  %v1905_v61 = vmul.f32 %v8796_v14, %v1723_v46  ;;  %6400 = vmatprep.mubr.bf16.mxu1 %v2055_v30  ;;  %v2296_v8 = vshll.u32 %v9073_v5, 16 }
 0x579   : > { %v7157_v54 = vpop.eup %7156  ;;  %1786 = vst [vmem:[#allocation2 + $0xd0] sm:$0xff] %v1726_v17  ;;  %v1650_v47 = vadd.f32 1.0, %v7155_v6  ;;  %v2058_v16 = vpack.c.bf16 %v1726_v17, %v1723_v46  ;;  %v2264_v41 = vsel %vm2213_vm4, %v2255_v10, %v9123_v40  ;;  %v2284_v18 = vshrl.u32 %v1965_v43, 16 }
 0x57a   : > { %v7159_v58 = vpop.eup %7158  ;;  %1789 = vst [vmem:[#allocation2 + $0xe8] sm:$0xff] %v1729_v13  ;;  %v1653_v35 = vadd.f32 1.0, %v7157_v54  ;;  %v2287_v20 = vshll.u32 %v1965_v43, 16  ;;  %v1968_v63 = vpack.c.bf16 %v1905_v61, %v1902_v37  ;;  %6409 = vmatpush3.bf16.msra.mxu1 %v9058_v0 }
 0x57b   : > { %v7161_v21 = vpop.eup %7160  ;;  %v1656_v50 = vadd.f32 1.0, %v7159_v58  ;;  %7170 = vrcp.f32 %v1650_v47  ;;  %6401 = vmatmul.mubr.bf16.gmra.mrb[12].mxu1 %v2058_v16  ;;  %v2286_v10 = vrot.slane %v2284_v18, 3  ;;  %6410 = vmatprep.subr.bf16.mxu1 %v9076_v44  ;;  %v2490_v47 = vld [vmem:[#allocation2 + $0x28] sm:$0xfe]  ;;  %v2271_v16 = vrot.slane %v2269_v26, 4  ;;  %v9160_v58 = vld [vmem:[#allocation2 + $0x40] sm:$0xff] }
 0x57c   : > { %v7163_v62 = vpop.eup %7162  ;;  %7172 = vrcp.f32 %v1653_v35  ;;  %v1707_v49 = vmul.f32 %v7161_v21, %v8926_v38  ;;  %v2289_v57 = vrot.slane %v2287_v20, 4  ;;  %6420 = vmatprep.mubr.bf16.mxu1 %v2264_v41  ;;  %v2311_v56 = vshrl.u32 %v1968_v63, 16 }
 0x57d   : > { %v7165_v46 = vpop.eup %7164  ;;  %7174 = vrcp.f32 %v1656_v50  ;;  %v1710_v12 = vmul.f32 %v7163_v62, %v8929_v42  ;;  %v2314_v17 = vshll.u32 %v1968_v63, 16  ;;  %v2295_v26 = vrot.slane %v2293_v23, 3  ;;  %v9178_v62 = vld [vmem:[#allocation11 + $0x38] sm:$0xff] }
 0x57e   : > { %v7167_v45 = vpop.eup %7166  ;;  %v1713_v5 = vmul.f32 %v7165_v46, %v8932_v39  ;;  %1767 = vst [vmem:[#allocation2 + $0x38] sm:$0xff] %v1707_v49  ;;  %v1889_v37 = vmul.f32 %v8779_v7, %v1707_v49  ;;  %v2048_v38 = vpack.c.bf16 %v1707_v49, %v8894_v32  ;;  %v2290_v30 = vor.u32 %v2289_v57, %v2286_v10  ;;  %v9189_v49 = vld [vmem:[#allocation11 + $0xc0] sm:$0xff]  ;;  %v9191_v10 = vld [vmem:[#allocation11 + $0xc8] sm:$0xff] }
 0x57f   : > { %v7169_v6 = vpop.eup %7168  ;;  %v9141_v0 = vmul.f32 %v7167_v45, %v8935_v34  ;;  %1770 = vst [vmem:[#allocation2 + $0x50] sm:$0xff] %v1710_v12  ;;  %v1892_v42 = vmul.f32 %v8772_v27, %v1710_v12  ;;  %v2313_v13 = vrot.slane %v2311_v56, 3  ;;  %v2316_v43 = vrot.slane %v2314_v17, 4  ;;  %6411 = vmatpush3.bf16.msra.mxu1 %v9076_v44  ;;  %v11110_v17 = vld [vmem:[#allocation56_spill] sm:$0xff] }
 0x580   : > { %v9145_v61 = vmul.f32 %v7169_v6, %v8938_v22  ;;  %1773 = vst [vmem:[#allocation2 + $0x68] sm:$0xff] %v1713_v5  ;;  %2115 = vmatprep.mubr.bf16.mxu0 %v2048_v38  ;;  %v1895_v39 = vmul.f32 %v8782_v33, %v1713_v5  ;;  %v2051_v54 = vpack.c.bf16 %v1713_v5, %v1710_v12  ;;  %v2298_v35 = vrot.slane %v2296_v8, 4  ;;  %v1824_v21 = vld [vmem:[#allocation2 + $0xd0] sm:$0x7f]  ;;  %v1955_v5 = vld [vmem:[#allocation11 + $0x170] sm:$0xff]  ;;  %v9407_v33 = vld [vmem:[#allocation11 + $0x340] sm:$0xff] }
 0x581   : > { %1776 = vst [vmem:[#allocation2 + $0x80] sm:$0xff] %v9141_v0  ;;  %2116 = vmatmul.mubr.bf16.vlgmr.msra.gmra.mrb[8].mxu0 %v2047_v60  ;;  %v1961_v34 = vpack.c.bf16 %v1892_v42, %v1889_v37  ;;  %v1898_v22 = vmul.f32 %v8789_v31, %v9141_v0  ;;  %6412 = vmatprep.subr.bf16.mxu1 %v9100_v19  ;;  %v1956_v37 = vld [vmem:[#allocation11 + $0x178] sm:$0xff]  ;;  %v11112_v38 = vld [vmem:[#allocation37_spill] sm:$0xff]  ;;  %11146 = vst [vmem:[#allocation67_spill] sm:$0xff] %v9407_v33 }
 0x582   : > { %v9158_v41 = vsel %vm2213_vm4, %v9123_v40, %v2290_v30  ;;  %1779 = vst [vmem:[#allocation2 + $0x98] sm:$0xff] %v9145_v61  ;;  %v11108_v44 = vpack.c.bf16 %v8993_v15, %v8991_v11  ;;  %2123 = vmatprep.mubr.bf16.mxu0 %v2051_v54  ;;  %v2054_v32 = vpack.c.bf16 %v9145_v61, %v9141_v0  ;;  %v9176_v15 = vld [vmem:[#allocation11 + $0x30] sm:$0xff]  ;;  %v11114_v42 = vld [vmem:[#allocation49_spill] sm:$0xff] }
 0x583   : > { %v9168_v60 = vor.u32 %v2316_v43, %v2313_v13  ;;  %v11109_v40 = vpack.c.bf16 %v9006_v4, %v9004_v3  ;;  %v1964_v18 = vpack.c.bf16 %v1898_v22, %v1895_v39  ;;  %v2240_v20 = vshrl.u32 %v1961_v34, 16  ;;  %6413 = vmatpush3.bf16.msra.mxu1 %v9100_v19  ;;  %v9208_v43 = vpop.permute.xlu1 %2534  ;;  %v11116_v39 = vld [vmem:[#allocation62_spill] sm:$0xff]  ;;  %v9405_v31 = vld [vmem:[#allocation11 + $0x3c8] sm:$0xff] }
 0x584   : > { %5816 = vmatpush3.bf16.msra.mxu0 %v11108_v44  ;;  %v2243_v63 = vshll.u32 %v1961_v34, 16  ;;  %v2566_v50 = vmul.f32 %v8800_v52, %v2490_v47  ;;  %v2050_v11 = vpack.c.bf16 %v9009_v25, %v9000_v55  ;;  %v2569_v3 = vmul.f32 %v8955_v1, %v9160_v58  ;;  %6414 = vmatprep.subr.bf16.mxu1 %v9102_v48  ;;  %v9215_v47 = vld [vmem:[#allocation11 + $0x48] sm:$0xff]  ;;  %v11118_v22 = vld [vmem:[#allocation50_spill] sm:$0xff] }
 0x585   : > { %5817 = vmatprep.subr.bf16.mxu0 %v11109_v40  ;;  %v9183_v23 = vsel %vm2213_vm4, %v2290_v30, %v9168_v60  ;;  %v9187_v4 = vor.u32 %v2271_v16, %v2268_v28  ;;  %v7171_v8 = vpop.eup %7170  ;;  %v2242_v25 = vrot.slane %v2240_v20, 3  ;;  %v2275_v46 = vshrl.u32 %v1964_v18, 16  ;;  %v9484_v33 = vld [vmem:[#allocation11 + $0x370] sm:$0xff] }
 0x586   : > { %v2245_v57 = vrot.slane %v2243_v63, 4  ;;  %v2278_v19 = vshll.u32 %v1964_v18, 16  ;;  %v7173_v12 = vpop.eup %7172  ;;  %v9195_v56 = vmul.f32 %v7171_v8, %v8941_v59  ;;  %v11111_v45 = vpack.c.bf16 %v9017_v9, %v11110_v17  ;;  %v11115_v59 = vld [vmem:[#allocation63_spill] sm:$0xff]  ;;  %v9213_v9 = vld [vmem:[#allocation11 + $0x40] sm:$0xff]  ;;  %v11120_v8 = vld [vmem:[#allocation65_spill] sm:$0xff] }
 0x587   : > { %v1901_v28 = vmul.f32 %v8792_v2, %v9145_v61  ;;  %v1908_v30 = vmul.f32 %v11112_v38, %v1824_v21  ;;  %v9203_v6 = vor.u32 %v2298_v35, %v2295_v26  ;;  %v7175_v0 = vpop.eup %7174  ;;  %v9206_v13 = vmul.f32 %v7173_v12, %v11114_v42  ;;  %6415 = vmatpush3.bf16.msra.mxu1 %v9102_v48  ;;  %v2623_v63 = vld [vmem:[#allocation11 + $0x400] sm:$0xff]  ;;  %v11125_v42 = vld [vmem:[#allocation53_spill] sm:$0xff] }
 0x588   : > { %5818 = vmatpush3.bf16.msra.mxu0 %v11111_v45  ;;  %v11117_v54 = vpack.c.bf16 %v11115_v59, %v11116_v39  ;;  %v9217_v61 = vor.u32 %v2245_v57, %v2242_v25  ;;  %v2277_v16 = vrot.slane %v2275_v46, 3  ;;  %v2280_v34 = vrot.slane %v2278_v19, 4  ;;  %1782 = vst [vmem:[#allocation2 + $0xb0] sm:$0xff] %v9195_v56  ;;  %6416 = vmatprep.subr.bf16.mxu1 %v9112_v51  ;;  %v9240_v57 = vld [vmem:[#allocation2 + $0x58] sm:$0xff]  ;;  %v9242_v46 = vld [vmem:[#allocation2 + $0x70] sm:$0xff]  ;;  %v9403_v2 = vld [vmem:[#allocation11 + $0x3c0] sm:$0xff] }
 0x589   : > { %11113 = vst [vmem:[#allocation56_spill] sm:$0xff] %v9203_v6  ;;  %v1728_v44 = vmul.f32 %v7175_v0, %v11118_v22  ;;  %v1975_v26 = vpack.c.bf16 %v9178_v62, %v9176_v15  ;;  %v1984_v35 = vpack.c.bf16 %v9191_v10, %v9189_v49  ;;  %v1904_v40 = vmul.f32 %v8796_v14, %v9195_v56  ;;  %v11119_v62 = vld [vmem:[#allocation66_spill] sm:$0xff]  ;;  %v2624_v10 = vld [vmem:[#allocation11 + $0x408] sm:$0xff] }
 0x58a   : > { %5819 = vmatprep.subr.bf16.mxu0 %v11117_v54  ;;  %1785 = vst [vmem:[#allocation2 + $0xc8] sm:$0xff] %v9206_v13  ;;  %2124 = vmatmul.mubr.bf16.gmra.mrb[12].mxu0 %v2050_v11  ;;  %v2057_v18 = vpack.c.bf16 %v9206_v13, %v9195_v56  ;;  %v1995_v20 = vpack.c.bf16 %v1956_v37, %v1955_v5  ;;  %v2551_v15 = vrot.slane %v9208_v43, 7  ;;  %v11122_v19 = vld [vmem:[#allocation61_spill] sm:$0xff]  ;;  %v2538_v37 = vpop.permute.xlu0 %2537  ;;  %v2625_v13 = vld [vmem:[#allocation11 + $0x410] sm:$0xff] }
 0x58b   : > { %v9232_v21 = vor.u32 %v2280_v34, %v2277_v16  ;;  %1788 = vst [vmem:[#allocation2 + $0xe0] sm:$0xff] %v1728_v44  ;;  %v11121_v49 = vpack.c.bf16 %v11119_v62, %v11120_v8  ;;  %2131 = vmatprep.mubr.bf16.mxu0 %v2054_v32  ;;  %v1976_v48 = vpack.c.bf16 %v9215_v47, %v9213_v9  ;;  %v2232_v12 = vshrl.u32 %v11122_v19, 16  ;;  %v11126_v9 = vld [vmem:[#allocation57_spill] sm:$0xff]  ;;  %v11127_v47 = vld [vmem:[#allocation58_spill] sm:$0xff]  ;;  %v1920_v44 = vld [vmem:[#allocation11 + $0x58] sm:$0xff] }
 0x58c   : > { %v1967_v11 = vpack.c.bf16 %v1904_v40, %v1901_v28  ;;  %v1971_v25 = vpack.c.bf16 %v1908_v30, %v1908_v30  ;;  %v9253_v56 = vpack.c.bf16 %v2569_v3, %v2566_v50  ;;  %v9258_v17 = vsel %vm2213_vm4, %v9187_v4, %v9203_v6  ;;  %6417 = vmatpush3.bf16.msra.mxu1 %v9112_v51  ;;  %v11124_v30 = vld [vmem:[#allocation52_spill] sm:$0xff]  ;;  %v1919_v22 = vld [vmem:[#allocation11 + $0x50] sm:$0xff]  ;;  %v9409_v6 = vld [vmem:[#allocation11 + $0x348] sm:$0xff] }
 0x58d   : > { %5820 = vmatpush3.bf16.msra.mxu0 %v11121_v49  ;;  %v9251_v32 = vsel %vm2213_vm4, %v9217_v61, %v9232_v21  ;;  %11123 = vst [vmem:[#allocation49_spill] sm:$0xff] %v9258_v17  ;;  %v1888_v45 = vmul.f32 %v8779_v7, %v8996_v36  ;;  %v2235_v50 = vshll.u32 %v11122_v19, 16  ;;  %6418 = vmatprep.subr.bf16.mxu1 %v1995_v20  ;;  %v11128_v40 = vld [vmem:[#allocation64_spill] sm:$0xff]  ;;  %v9274_v8 = vrot.slane %v2538_v37, 7  ;;  %v2628_v37 = vld [vmem:[#allocation11 + $0x428] sm:$0xff] }
 0x58e   : > { %5821 = vmatprep.subr.bf16.mxu0 %v1983_v24  ;;  %v1891_v24 = vmul.f32 %v8772_v27, %v9000_v55  ;;  %v2302_v28 = vshrl.u32 %v1967_v11, 16  ;;  %v2305_v5 = vshll.u32 %v1967_v11, 16  ;;  %v2670_v3 = vpack.c.bf16 %v2624_v10, %v2623_v63  ;;  %v2626_v55 = vld [vmem:[#allocation11 + $0x418] sm:$0xff]  ;;  %v1937_v49 = vld [vmem:[#allocation11 + $0xe0] sm:$0xff]  ;;  %v1938_v11 = vld [vmem:[#allocation11 + $0xe8] sm:$0xff]  ;;  %11147 = vst [vmem:[#allocation68_spill] sm:$0xff] %v9409_v6 }
 0x58f   : > { %v2572_v0 = vmul.f32 %v11124_v30, %v9240_v57  ;;  %v2575_v36 = vmul.f32 %v11125_v42, %v9242_v46  ;;  %v2338_v59 = vshrl.u32 %v1971_v25, 16  ;;  %v2341_v39 = vshll.u32 %v1971_v25, 16  ;;  %11129 = vst [vmem:[#allocation63_spill] sm:$0xff] %v9274_v8  ;;  %v2938_v17 = vld [vmem:[#allocation2 + $0x20] sm:$0x80]  ;;  %v9492_v6 = vld [vmem:[#allocation11 + $0x500] sm:$0xff] }
 0x590   : > { %v2304_v54 = vrot.slane %v2302_v28, 3  ;;  %v2307_v51 = vrot.slane %v2305_v5, 4  ;;  %v2053_v16 = vpack.c.bf16 %v11127_v47, %v11126_v9  ;;  %v1985_v34 = vpack.c.bf16 %v1936_v29, %v1935_v53  ;;  %6419 = vmatpush3.bf16.msra.mxu1 %v1995_v20  ;;  %v2489_v28 = vld [vmem:[#allocation2 + $0x20] sm:$0xfe]  ;;  %v2627_v5 = vld [vmem:[#allocation11 + $0x420] sm:$0xff]  ;;  %v9316_v47 = vld [vmem:[#allocation11 + $0x70] sm:$0xff] }
 0x591   : > { %5822 = vmatpush3.bf16.msra.mxu0 %v1975_v26  ;;  %v2215_v63 = vshrl.u32 %v11128_v40, 16  ;;  %v2706_v62 = vshll.u32 %v9253_v56, 16  ;;  %v9276_v26 = vpack.c.bf16 %v1891_v24, %v1888_v45  ;;  %v2218_v10 = vshll.u32 %v11128_v40, 16  ;;  %6428 = vmatprep.subr.bf16.mxu1 %v2670_v3  ;;  %v9314_v9 = vld [vmem:[#allocation11 + $0xf8] sm:$0xff]  ;;  %v9333_v40 = vld [vmem:[#allocation11 + $0x388] sm:$0xff] }
 0x592   : > { %5823 = vmatprep.subr.bf16.mxu0 %v1984_v35  ;;  %v9279_v35 = vor.u32 %v2307_v51, %v2304_v54  ;;  %2132 = vmatmul.mubr.bf16.gmra.mrb[16].mxu0 %v2053_v16  ;;  %v9281_v25 = vrot.slane %v2232_v12, 3  ;;  %v9283_v19 = vrot.slane %v2235_v50, 4  ;;  %v2671_v53 = vpack.c.bf16 %v2626_v55, %v2625_v13  ;;  %v2488_v50 = vld [vmem:[#allocation2 + $0x18] sm:$0xfe]  ;;  %v9303_v13 = vld [vmem:[#allocation11 + $0x60] sm:$0xff]  ;;  %v9305_v55 = vld [vmem:[#allocation11 + $0x68] sm:$0xff] }
 0x593   : > { %v9285_v29 = vpack.c.bf16 %v2575_v36, %v2572_v0  ;;  %2139 = vmatprep.mubr.bf16.mxu0 %v2057_v18  ;;  %v1977_v45 = vpack.c.bf16 %v1920_v44, %v1919_v22  ;;  %v9287_v24 = vrot.slane %v2338_v59, 3  ;;  %v9289_v20 = vrot.slane %v2341_v39, 4  ;;  %v11131_v0 = vld [vmem:[#allocation44_spill] sm:$0xff]  ;;  %v9307_v59 = vld [vmem:[#allocation11 + $0xf0] sm:$0xff]  ;;  %6421 = vmatmul.mubr.bf16.vlgmr.msra.gmra.mrb[8].mxu1 %v9158_v41  ;;  %v9318_v16 = vld [vmem:[#allocation11 + $0x78] sm:$0xff] }
 0x594   : > { %11130 = vst [vmem:[#allocation62_spill] sm:$0xff] %v9279_v35  ;;  %v9294_v12 = vsel %vm2213_vm4, %v9232_v21, %v9279_v35  ;;  %v11132_v36 = vrot.slane %v11131_v0, 7  ;;  %v1986_v18 = vpack.c.bf16 %v1938_v11, %v1937_v49  ;;  %v9310_v21 = vrot.slane %v2215_v63, 3  ;;  %6424 = vmatprep.mubr.bf16.mxu1 %v9183_v23  ;;  %6429 = vmatpush3.bf16.msra.mxu1 %v2670_v3  ;;  %v9331_v44 = vld [vmem:[#allocation11 + $0x380] sm:$0xff]  ;;  %v2629_v11 = vld [vmem:[#allocation11 + $0x430] sm:$0xff] }
 0x595   : > { %5824 = vmatpush3.bf16.msra.mxu0 %v1976_v48  ;;  %v2708_v39 = vrot.slane %v2706_v62, 1  ;;  %v2223_v54 = vshrl.u32 %v9276_v26, 16  ;;  %v2226_v51 = vshll.u32 %v9276_v26, 16  ;;  %v9327_v41 = vsel %vm2539_vm3, %v2551_v15, %v9274_v8  ;;  %6430 = vmatprep.subr.bf16.mxu1 %v2671_v53  ;;  %v2939_v62 = vld [vmem:[#allocation2 + $0x28] sm:$0x80]  ;;  %v9343_v26 = vld [vmem:[#allocation11 + $0x308] sm:$0xff] }
 0x596   : > { %v9301_v48 = vsel %vm2539_vm3, %v11132_v36, %v2551_v15  ;;  %5825 = vmatprep.subr.bf16.mxu0 %v1985_v34  ;;  %v9321_v34 = vrot.slane %v2218_v10, 4  ;;  %11134 = vst [vmem:[#allocation66_spill] sm:$0xff] %v9327_v41  ;;  %v2238_v22 = vor.u32 %v9283_v19, %v9281_v25  ;;  %v9335_v63 = vpack.c.bf16 %v2628_v37, %v2627_v5  ;;  %v9341_v15 = vld [vmem:[#allocation11 + $0x300] sm:$0xff]  ;;  %v2630_v10 = vld [vmem:[#allocation11 + $0x438] sm:$0xff]  ;;  %v9357_v0 = vld [vmem:[#allocation11 + $0x390] sm:$0xff] }
 0x597   : > { %11133 = vst [vmem:[#allocation50_spill] sm:$0xff] %v9301_v48  ;;  %v2704_v23 = vshrl.u32 %v9253_v56, 16  ;;  %v2711_v3 = vshll.u32 %v9285_v29, 16  ;;  %v1978_v43 = vpack.c.bf16 %v9305_v55, %v9303_v13  ;;  %v2344_v49 = vor.u32 %v9289_v20, %v9287_v24  ;;  %v11136_v19 = vld [vmem:[#allocation59_spill] sm:$0xff]  ;;  %v9365_v55 = vld [vmem:[#allocation11 + $0x310] sm:$0xff] }
 0x598   : > { %v9348_v25 = vmul.f32 %v8800_v52, %v2489_v28  ;;  %v9351_v56 = vmul.f32 %v8800_v52, %v2488_v50  ;;  %v1987_v37 = vpack.c.bf16 %v9314_v9, %v9307_v59  ;;  %v9359_v36 = vld [vmem:[#allocation11 + $0x398] sm:$0xff]  ;;  %v2225_v13 = vrot.slane %v2223_v54, 3  ;;  %6431 = vmatpush3.bf16.msra.mxu1 %v2671_v53  ;;  %v9369_v59 = vld [vmem:[#allocation11 + $0x3a0] sm:$0xff]  ;;  %v9371_v9 = vld [vmem:[#allocation11 + $0x3a8] sm:$0xff] }
 0x599   : > { %5826 = vmatpush3.bf16.msra.mxu0 %v1977_v45  ;;  %v11137_v45 = vld [vmem:[#allocation60_spill] sm:$0xff]  ;;  %v2709_v24 = vor.u32 %v2708_v39, %v2704_v23  ;;  %v1822_v20 = vld [vmem:[#allocation2 + $0xc0] sm:$0x7f]  ;;  %v2228_v28 = vrot.slane %v2226_v51, 4  ;;  %v1979_v50 = vpack.c.bf16 %v9318_v16, %v9316_v47  ;;  %v2247_v39 = vsel %vm2213_vm4, %v2238_v22, %v9217_v61  ;;  %6432 = vmatprep.subr.bf16.mxu1 %v9335_v63  ;;  %v9380_v53 = vld [vmem:[#allocation11 + $0x328] sm:$0xff] }
 0x59a   : > { %11135 = vst [vmem:[#allocation65_spill] sm:$0xff] %v9351_v56  ;;  %5827 = vmatprep.subr.bf16.mxu0 %v1986_v18  ;;  %v2056_v5 = vpack.c.bf16 %v11137_v45, %v11136_v19  ;;  %v9367_v19 = vld [vmem:[#allocation11 + $0x318] sm:$0xff]  ;;  %v2631_v45 = vld [vmem:[#allocation11 + $0x440] sm:$0xff]  ;;  %v9376_v54 = vrot.slane %v2711_v3, 1  ;;  %v9382_v47 = vpack.c.bf16 %v2630_v10, %v2629_v11  ;;  %v9384_v16 = vld [vmem:[#allocation11 + $0x3b0] sm:$0xff]  ;;  %v2662_v11 = vpack.c.bf16 %v9333_v40, %v9331_v44 }
 0x59b   : > { %v9378_v51 = vld [vmem:[#allocation11 + $0x320] sm:$0xff]  ;;  %11139 = vst [vmem:[#allocation57_spill] sm:$0xff] %v9384_v16  ;;  %v9386_v23 = vld [vmem:[#allocation11 + $0x3b8] sm:$0xff]  ;;  %v9388_v18 = vld [vmem:[#allocation11 + $0x330] sm:$0xff]  ;;  %v2345_v10 = vsel %vm2213_vm4, %v9168_v60, %v2344_v49  ;;  %v9420_v8 = vor.u32 %v2228_v28, %v2225_v13 }
 0x59c   : > { %2140 = vmatmul.mubr.bf16.gmra.mrb[20].mxu0 %v2056_v5  ;;  %11138 = vst [vmem:[#allocation61_spill] sm:$0xff] %v9376_v54  ;;  %11140 = vst [vmem:[#allocation58_spill] sm:$0xff] %v9388_v18  ;;  %v9390_v5 = vld [vmem:[#allocation11 + $0x338] sm:$0xff]  ;;  %v2632_v52 = vld [vmem:[#allocation11 + $0x448] sm:$0xff]  ;;  %6425 = vmatmul.mubr.bf16.gmra.mrb[12].mxu1 %v2345_v10  ;;  %v2714_v60 = vsel %vm2678_vm5, %v2709_v24, %v9376_v54 }
 0x59d   : > { %11141 = vst [vmem:[#allocation64_spill] sm:$0xff] %v9390_v5  ;;  %v9392_v61 = vld [vmem:[#allocation2 + $0x88] sm:$0xff]  ;;  %v9394_v22 = vld [vmem:[#allocation2 + $0xa0] sm:$0xff]  ;;  %v11144_v3 = vld [vmem:[#allocation38_spill] sm:$0xff]  ;;  %5828 = vmatpush3.bf16.msra.mxu0 %v1978_v43  ;;  %2390 = vmatprep.mubr.bf16.mxu0 %v2247_v39  ;;  %v2654_v43 = vpack.c.bf16 %v9343_v26, %v9341_v15 }
 0x59e   : > { %11142 = vst [vmem:[#allocation44_spill] sm:$0xff] %v9392_v61  ;;  %11143 = vst [vmem:[#allocation59_spill] sm:$0xff] %v9394_v22  ;;  %v9397_v14 = vmul.f32 %v2939_v62, %v11144_v3  ;;  %v1823_v35 = vld [vmem:[#allocation2 + $0xc8] sm:$0x7f]  ;;  %v1906_v62 = vmul.f32 %v11112_v38, %v1822_v20  ;;  %5829 = vmatprep.subr.bf16.mxu0 %v1987_v37  ;;  %v2633_v40 = vld [vmem:[#allocation11 + $0x450] sm:$0xff]  ;;  %6433 = vmatpush3.bf16.msra.mxu1 %v9335_v63 }
 0x59f   : > { %v2634_v49 = vld [vmem:[#allocation11 + $0x458] sm:$0xff]  ;;  %v9418_v39 = vld [vmem:[#allocation11 + $0x3d0] sm:$0xff]  ;;  %6444 = vmatprep.mubr.bf16.mxu1 %v2714_v60  ;;  %6434 = vmatprep.subr.bf16.mxu1 %v9382_v47  ;;  %v2674_v63 = vpack.c.bf16 %v2632_v52, %v2631_v45  ;;  %v1907_v28 = vmul.f32 %v11112_v38, %v1823_v35  ;;  %v2635_v60 = vld [vmem:[#allocation11 + $0x460] sm:$0xff]  ;;  %v9470_v16 = vmul.f32 %v2938_v17, %v11144_v3 }
 0x5a0   : > { %11145 = vst [vmem:[#allocation60_spill] sm:$0xff] %v9397_v14  ;;  %v9423_v37 = vld [vmem:[#allocation11 + $0x3d8] sm:$0xff]  ;;  %v9425_v20 = vld [vmem:[#allocation11 + $0x350] sm:$0xff]  ;;  %v2636_v54 = vld [vmem:[#allocation11 + $0x468] sm:$0xff]  ;;  %v9449_v52 = vpack.c.bf16 %v1906_v62, %v1906_v62  ;;  %v9459_v14 = vpack.c.bf16 %v2634_v49, %v2633_v40 }
 0x5a1   : > { %v9427_v15 = vld [vmem:[#allocation11 + $0x358] sm:$0xff]  ;;  %v11148_v26 = vld [vmem:[#allocation54_spill] sm:$0xff]  ;;  %5830 = vmatpush3.bf16.msra.mxu0 %v1979_v50  ;;  %v9447_v13 = vld [vmem:[#allocation11 + $0x3e8] sm:$0xff]  ;;  %11153 = vst [vmem:[#allocation72_spill] sm:$0xff] %v9470_v16 }
 0x5a2   : > { %v2578_v10 = vmul.f32 %v11148_v26, %v9392_v61  ;;  %v11149_v24 = vld [vmem:[#allocation55_spill] sm:$0xff]  ;;  %v2937_v56 = vld [vmem:[#allocation2 + $0x18] sm:$0x80]  ;;  %v9451_v35 = vld [vmem:[#allocation11 + $0x360] sm:$0xff]  ;;  %5867 = vmatprep.subr.bf16.mxu0 %v2662_v11  ;;  %v11154_v11 = vor.u32 %v9321_v34, %v9310_v21  ;;  %6435 = vmatpush3.bf16.msra.mxu1 %v9382_v47  ;;  %v1970_v21 = vpack.c.bf16 %v1907_v28, %v1907_v28  ;;  %v2320_v49 = vshrl.u32 %v9449_v52, 16 }
 0x5a3   : > { %v2581_v44 = vmul.f32 %v11149_v24, %v9394_v22  ;;  %v9445_v24 = vld [vmem:[#allocation11 + $0x3e0] sm:$0xff]  ;;  %v9453_v45 = vld [vmem:[#allocation11 + $0x368] sm:$0xff]  ;;  %v2637_v50 = vld [vmem:[#allocation11 + $0x470] sm:$0xff]  ;;  %6436 = vmatprep.subr.bf16.mxu1 %v2674_v63  ;;  %v9490_v34 = vpack.c.bf16 %v2636_v54, %v2635_v60  ;;  %v9495_v40 = vmul.f32 %v2937_v56, %v11144_v3  ;;  %v2323_v60 = vshll.u32 %v9449_v52, 16 }
 0x5a4   : > { %v2638_v38 = vld [vmem:[#allocation11 + $0x478] sm:$0xff]  ;;  %v9461_v18 = vld [vmem:[#allocation2 + $0x38] sm:$0xff]  ;;  %v9467_v26 = vld [vmem:[#allocation2 + $0xd0] sm:$0xff]  ;;  %v2230_v61 = vsel %vm2213_vm4, %v11154_v11, %v9420_v8  ;;  %v2332_v52 = vshll.u32 %v1970_v21, 16 }
 0x5a5   : > { %11150 = vst [vmem:[#allocation69_spill] sm:$0xff] %v9461_v18  ;;  %v9463_v5 = vld [vmem:[#allocation11 + $0x3f0] sm:$0xff]  ;;  %11152 = vst [vmem:[#allocation71_spill] sm:$0xff] %v9467_v26  ;;  %v9482_v22 = vld [vmem:[#allocation11 + $0x3f8] sm:$0xff]  ;;  %v9488_v16 = vpack.c.bf16 %v2581_v44, %v2578_v10  ;;  %2391 = vmatmul.mubr.bf16.vlgmr.msra.gmra.mrb[24].mxu0 %v2230_v61  ;;  %v2568_v44 = vmul.f32 %v8955_v1, %v9461_v18  ;;  %v2587_v54 = vmul.f32 %v9327_v41, %v9467_v26 }
 0x5a6   : > { %v9465_v62 = vld [vmem:[#allocation2 + $0xb8] sm:$0xff]  ;;  %v9486_v17 = vld [vmem:[#allocation11 + $0x378] sm:$0xff]  ;;  %v3002_v47 = vld [vmem:[#allocation11 + $0x580] sm:$0xff]  ;;  %11155 = vst [vmem:[#allocation73_spill] sm:$0xff] %v9495_v40  ;;  %5868 = vmatpush3.bf16.msra.mxu0 %v2654_v43  ;;  %2398 = vmatprep.mubr.bf16.mxu0 %v9251_v32  ;;  %v11156_v32 = vpack.c.bf16 %v9359_v36, %v9357_v0  ;;  %v9519_v40 = vpack.c.bf16 %v2638_v38, %v2637_v50  ;;  %v2329_v43 = vshrl.u32 %v1970_v21, 16  ;;  %v9538_v0 = vrot.slane %v2320_v49, 3 }
 0x5a7   : > { %11151 = vst [vmem:[#allocation70_spill] sm:$0xff] %v9465_v62  ;;  %v3003_v11 = vld [vmem:[#allocation11 + $0x588] sm:$0xff]  ;;  %v2584_v61 = vmul.f32 %v9301_v48, %v9465_v62  ;;  %v9507_v28 = vld [vmem:[#allocation11 + $0x480] sm:$0xff]  ;;  %6437 = vmatpush3.bf16.msra.mxu1 %v2674_v63  ;;  %v2735_v36 = vshll.u32 %v9488_v16, 16  ;;  %v3004_v50 = vld [vmem:[#allocation11 + $0x590] sm:$0xff]  ;;  %v11158_v26 = vpack.c.bf16 %v9367_v19, %v9365_v55  ;;  %v9545_v21 = vpack.c.bf16 %v2568_v44, %v9348_v25 }
 0x5a8   : > { %v9505_v10 = vld [vmem:[#allocation11 + $0x508] sm:$0xff]  ;;  %5869 = vmatprep.subr.bf16.mxu0 %v11156_v32  ;;  %v9528_v32 = vpack.c.bf16 %v3003_v11, %v3002_v47  ;;  %6438 = vmatprep.subr.bf16.mxu1 %v9459_v14  ;;  %v3005_v3 = vld [vmem:[#allocation11 + $0x598] sm:$0xff]  ;;  %v9542_v11 = vld [vmem:[#allocation2 + $0x68] sm:$0xff]  ;;  %v11160_v38 = vpack.c.bf16 %v9371_v9, %v9369_v59  ;;  %v9554_v55 = vrot.slane %v2323_v60, 4  ;;  %v2951_v49 = vmul.f32 %v9240_v57, %v8779_v7 }
 0x5a9   : > { %v9509_v56 = vld [vmem:[#allocation11 + $0x488] sm:$0xff]  ;;  %11159 = vst [vmem:[#allocation75_spill] sm:$0xff] %v9542_v11  ;;  %v9547_v62 = vpack.c.bf16 %v2587_v54, %v2584_v61  ;;  %v11161_v19 = vld [vmem:[#allocation40_spill] sm:$0xff]  ;;  %v2954_v25 = vmul.f32 %v9242_v46, %v8772_v27  ;;  %v2731_v44 = vshrl.u32 %v9285_v29, 16  ;;  %v2273_v61 = vsel %vm2213_vm4, %v9420_v8, %v9187_v4  ;;  %v9576_v60 = vld [vmem:[#allocation2 + $0x60] sm:$0xff] }
 0x5aa   : > { %v9521_v18 = vld [vmem:[#allocation2 + $0x30] sm:$0xff]  ;;  %5870 = vmatpush3.bf16.msra.mxu0 %v11158_v26  ;;  %v2948_v26 = vmul.f32 %v9160_v58, %v11161_v19  ;;  %v2737_v59 = vrot.slane %v2735_v36, 1  ;;  %v9567_v9 = vpack.c.bf16 %v3005_v3, %v3004_v50  ;;  %v2331_v54 = vrot.slane %v2329_v43, 3  ;;  %v9574_v29 = vld [vmem:[#allocation2 + $0x48] sm:$0xff]  ;;  %v9590_v50 = vld [vmem:[#allocation2 + $0x98] sm:$0xff] }
 0x5ab   : > { %11157 = vst [vmem:[#allocation74_spill] sm:$0xff] %v9521_v18  ;;  %v9540_v47 = vld [vmem:[#allocation2 + $0x50] sm:$0xff]  ;;  %v2567_v63 = vmul.f32 %v8955_v1, %v9521_v18  ;;  %5871 = vmatprep.subr.bf16.mxu0 %v11160_v38  ;;  %6439 = vmatpush3.bf16.msra.mxu1 %v9459_v14  ;;  %v2334_v58 = vrot.slane %v2332_v52, 4  ;;  %v2574_v46 = vmul.f32 %v11125_v42, %v9542_v11  ;;  %v2514_v4 = vld [vmem:[#allocation2 + $0xe8] sm:$0x1]  ;;  %v2694_v8 = vshll.u32 %v9545_v21, 16 }
 0x5ac   : > { %6440 = vmatprep.subr.bf16.mxu1 %v9490_v34  ;;  %v2571_v57 = vmul.f32 %v11124_v30, %v9540_v47  ;;  %v11162_v14 = vpack.c.bf16 %v9380_v53, %v9378_v51  ;;  %v2755_v3 = vshrl.u32 %v9488_v16, 16  ;;  %v2759_v43 = vshll.u32 %v9547_v62, 16  ;;  %v11163_v36 = vld [vmem:[#allocation65_spill] sm:$0xff]  ;;  %v9588_v38 = vld [vmem:[#allocation2 + $0x80] sm:$0xff]  ;;  %11165 = vst [vmem:[#allocation76_spill] sm:$0xff] %v9590_v50 }
 0x5ad   : > { %2399 = vmatmul.mubr.bf16.gmra.mrb[28].mxu0 %v2273_v61  ;;  %v9586_v52 = vpack.c.bf16 %v2567_v63, %v11163_v36  ;;  %11164 = vst [vmem:[#allocation65_spill] sm:$0xff] %v9588_v38  ;;  %v11166_v61 = vld [vmem:[#allocation61_spill] sm:$0xff]  ;;  %v3023_v18 = vpack.c.bf16 %v2954_v25, %v2951_v49  ;;  %v2570_v36 = vmul.f32 %v11124_v30, %v9574_v29  ;;  %v11173_v49 = vld [vmem:[#allocation64_spill] sm:$0xff]  ;;  %v11174_v25 = vld [vmem:[#allocation58_spill] sm:$0xff] }
 0x5ae   : > { %5872 = vmatpush3.bf16.msra.mxu0 %v11162_v14  ;;  %2406 = vmatprep.mubr.bf16.mxu0 %v9294_v12  ;;  %v2733_v1 = vor.u32 %v2731_v44, %v11166_v61  ;;  %v11167_v51 = vld [vmem:[#allocation57_spill] sm:$0xff]  ;;  %v2326_v12 = vor.u32 %v9554_v55, %v9538_v0  ;;  %v11169_v14 = vld [vmem:[#allocation60_spill] sm:$0xff]  ;;  %v2757_v63 = vor.u32 %v2755_v3, %v2737_v59  ;;  %v11170_v44 = vld [vmem:[#allocation63_spill] sm:$0xff] }
 0x5af   : > { %v11168_v53 = vpack.c.bf16 %v9386_v23, %v11167_v51  ;;  %v3020_v16 = vpack.c.bf16 %v2948_v26, %v11169_v14  ;;  %6441 = vmatpush3.bf16.msra.mxu1 %v9490_v34  ;;  %v2573_v11 = vmul.f32 %v11125_v42, %v9576_v60  ;;  %v2590_v61 = vmul.f32 %v11170_v44, %v2514_v4  ;;  %v11171_v0 = vld [vmem:[#allocation54_spill] sm:$0xff]  ;;  %v11172_v26 = vld [vmem:[#allocation55_spill] sm:$0xff] }
 0x5b0   : > { %v2335_v27 = vor.u32 %v2334_v58, %v2331_v54  ;;  %v9605_v23 = vpack.c.bf16 %v2574_v46, %v2571_v57  ;;  %6442 = vmatprep.subr.bf16.mxu1 %v9519_v40  ;;  %v2577_v55 = vmul.f32 %v11171_v0, %v9588_v38  ;;  %v2580_v34 = vmul.f32 %v11172_v26, %v9590_v50  ;;  %v9617_v58 = vld [vmem:[#allocation2 + $0x78] sm:$0xff]  ;;  %v9619_v57 = vld [vmem:[#allocation2 + $0x90] sm:$0xff] }
 0x5b1   : > { %5873 = vmatprep.subr.bf16.mxu0 %v11168_v53  ;;  %v11175_v3 = vpack.c.bf16 %v11173_v49, %v11174_v25  ;;  %v2692_v51 = vshrl.u32 %v9545_v21, 16  ;;  %v2696_v53 = vrot.slane %v2694_v8, 1  ;;  %v2761_v14 = vrot.slane %v2759_v43, 1  ;;  %v9624_v49 = vld [vmem:[#allocation2 + $0xb0] sm:$0xff]  ;;  %v9626_v25 = vld [vmem:[#allocation2 + $0xc8] sm:$0xff] }
 0x5b2   : > { %v2682_v54 = vshll.u32 %v9586_v52, 16  ;;  %v11176_v46 = vpack.c.bf16 %v9405_v31, %v9403_v2  ;;  %v3092_v4 = vshrl.u32 %v3020_v16, 16  ;;  %v3095_v42 = vshll.u32 %v3020_v16, 16  ;;  %11177 = vst [vmem:[#allocation61_spill] sm:$0xff] %v9624_v49  ;;  %11178 = vst [vmem:[#allocation57_spill] sm:$0xff] %v9626_v25  ;;  %v11179_v38 = vld [vmem:[#allocation49_spill] sm:$0xff] }
 0x5b3   : > { %5874 = vmatpush3.bf16.msra.mxu0 %v11175_v3  ;;  %v3100_v30 = vshrl.u32 %v3023_v18, 16  ;;  %v3103_v50 = vshll.u32 %v3023_v18, 16  ;;  %6443 = vmatpush3.bf16.msra.mxu1 %v9519_v40  ;;  %v2738_v21 = vsel %vm2678_vm5, %v2733_v1, %v2737_v59  ;;  %v2762_v8 = vsel %vm2678_vm5, %v2757_v63, %v2761_v14  ;;  %v11180_v31 = vld [vmem:[#allocation62_spill] sm:$0xff]  ;;  %v11181_v1 = vld [vmem:[#allocation68_spill] sm:$0xff]  ;;  %v11182_v59 = vld [vmem:[#allocation67_spill] sm:$0xff] }
 0x5b4   : > { %5875 = vmatprep.subr.bf16.mxu0 %v11176_v46  ;;  %v9631_v43 = vpack.c.bf16 %v2573_v11, %v2570_v36  ;;  %v2653_v3 = vpack.c.bf16 %v2590_v61, %v2590_v61  ;;  %v2336_v2 = vsel %vm2213_vm4, %v11180_v31, %v2335_v27  ;;  %v2699_v18 = vshll.u32 %v9605_v23, 16  ;;  %6452 = vmatprep.subr.bf16.mxu1 %v9528_v32  ;;  %v3006_v36 = vld [vmem:[#allocation11 + $0x5a0] sm:$0xff] }
 0x5b5   : > { %2407 = vmatmul.mubr.bf16.gmra.mrb[32].mxu0 %v11179_v38  ;;  %v9638_v16 = vpack.c.bf16 %v2580_v34, %v2577_v55  ;;  %v2576_v40 = vmul.f32 %v11171_v0, %v9617_v58  ;;  %v11183_v63 = vpack.c.bf16 %v11181_v1, %v11182_v59  ;;  %v2684_v11 = vrot.slane %v2682_v54, 1  ;;  %v3007_v38 = vld [vmem:[#allocation11 + $0x5a8] sm:$0xff]  ;;  %v11185_v0 = vld [vmem:[#allocation56_spill] sm:$0xff] }
 0x5b6   : > { %2414 = vmatprep.mubr.bf16.mxu0 %v2336_v2  ;;  %v2579_v27 = vmul.f32 %v11172_v26, %v9619_v57  ;;  %v2583_v61 = vmul.f32 %v9301_v48, %v9624_v49  ;;  %v2586_v55 = vmul.f32 %v9327_v41, %v9626_v25  ;;  %v11184_v34 = vpack.c.bf16 %v9423_v37, %v9418_v39  ;;  %v9665_v37 = vld [vmem:[#allocation11 + $0x490] sm:$0xff] }
 0x5b7   : > { %5876 = vmatpush3.bf16.msra.mxu0 %v11183_v63  ;;  %6445 = vmatmul.mubr.bf16.vlgmr.msra.gmra.mrb[8].mxu1 %v2738_v21  ;;  %v3094_v46 = vrot.slane %v3092_v4, 3  ;;  %v3097_v31 = vrot.slane %v3095_v42, 4  ;;  %v3102_v2 = vrot.slane %v3100_v30, 3  ;;  %v3105_v54 = vrot.slane %v3103_v50, 4  ;;  %v9661_v42 = vld [vmem:[#allocation11 + $0x510] sm:$0xff]  ;;  %v9663_v30 = vld [vmem:[#allocation11 + $0x518] sm:$0xff] }
 0x5b8   : > { %5877 = vmatprep.subr.bf16.mxu0 %v11184_v34  ;;  %v2697_v1 = vor.u32 %v2696_v53, %v2692_v51  ;;  %6448 = vmatprep.mubr.bf16.mxu1 %v2762_v8  ;;  %v2687_v59 = vshll.u32 %v9631_v43, 16  ;;  %v2779_v63 = vshrl.u32 %v9547_v62, 16  ;;  %v2783_v26 = vshll.u32 %v2653_v3, 16  ;;  %v3008_v53 = vld [vmem:[#allocation11 + $0x5b0] sm:$0xff]  ;;  %v3009_v4 = vld [vmem:[#allocation11 + $0x5b8] sm:$0xff]  ;;  %v3010_v34 = vld [vmem:[#allocation11 + $0x5c0] sm:$0xff] }
 0x5b9   : > { %6453 = vmatpush3.bf16.msra.mxu1 %v9528_v32  ;;  %v2327_v25 = vsel %vm2213_vm4, %v11185_v0, %v2326_v12  ;;  %v2701_v49 = vrot.slane %v2699_v18, 1  ;;  %v2680_v39 = vshrl.u32 %v9586_v52, 16  ;;  %v3051_v32 = vpack.c.bf16 %v3007_v38, %v3006_v36  ;;  %v9672_v0 = vld [vmem:[#allocation11 + $0x498] sm:$0xff]  ;;  %v9687_v36 = vld [vmem:[#allocation11 + $0x520] sm:$0xff]  ;;  %v9689_v38 = vld [vmem:[#allocation11 + $0x528] sm:$0xff] }
 0x5ba   : > { %6454 = vmatprep.subr.bf16.mxu1 %v9567_v9  ;;  %v11186_v50 = vpack.c.bf16 %v9427_v15, %v9425_v20  ;;  %v2723_v62 = vshrl.u32 %v9605_v23, 16  ;;  %v2727_v12 = vshll.u32 %v9638_v16, 16  ;;  %v2781_v52 = vor.u32 %v2779_v63, %v2761_v14  ;;  %v9719_v63 = vld [vmem:[#allocation11 + $0x538] sm:$0xff] }
 0x5bb   : > { %v9674_v51 = vpack.c.bf16 %v2579_v27, %v2576_v40  ;;  %v11187_v21 = vpack.c.bf16 %v9447_v13, %v9445_v24  ;;  %v2685_v8 = vor.u32 %v2684_v11, %v2680_v39  ;;  %v3098_v3 = vor.u32 %v3097_v31, %v3094_v46  ;;  %v9693_v27 = vld [vmem:[#allocation2 + $0xa8] sm:$0xff]  ;;  %v3011_v46 = vld [vmem:[#allocation11 + $0x5c8] sm:$0xff]  ;;  %v9721_v39 = vld [vmem:[#allocation11 + $0x4b0] sm:$0xff] }
 0x5bc   : > { %5878 = vmatpush3.bf16.msra.mxu0 %v11186_v50  ;;  %v9679_v18 = vor.u32 %v3105_v54, %v3102_v2  ;;  %v9681_v20 = vpack.c.bf16 %v2586_v55, %v2583_v61  ;;  %v2702_v15 = vsel %vm2678_vm5, %v2697_v1, %v2701_v49  ;;  %v2689_v23 = vrot.slane %v2687_v59, 1  ;;  %11188 = vst [vmem:[#allocation60_spill] sm:$0xff] %v9693_v27  ;;  %v9695_v61 = vld [vmem:[#allocation2 + $0xc0] sm:$0xff]  ;;  %v9711_v54 = vld [vmem:[#allocation11 + $0x4a0] sm:$0xff]  ;;  %v9716_v59 = vld [vmem:[#allocation11 + $0x530] sm:$0xff] }
 0x5bd   : > { %5879 = vmatprep.subr.bf16.mxu0 %v11187_v21  ;;  %6455 = vmatpush3.bf16.msra.mxu1 %v9567_v9  ;;  %v2785_v40 = vrot.slane %v2783_v26, 1  ;;  %v2725_v24 = vor.u32 %v2723_v62, %v2701_v49  ;;  %v3052_v11 = vpack.c.bf16 %v3009_v4, %v3008_v53  ;;  %11189 = vst [vmem:[#allocation64_spill] sm:$0xff] %v9695_v61  ;;  %v2729_v9 = vrot.slane %v2727_v12, 1  ;;  %v2513_v12 = vld [vmem:[#allocation2 + $0xe0] sm:$0x1]  ;;  %v9730_v4 = vld [vmem:[#allocation11 + $0x540] sm:$0xff] }
 0x5be   : > { %2415 = vmatmul.mubr.bf16.gmra.mrb[36].mxu0 %v2327_v25  ;;  %6456 = vmatprep.subr.bf16.mxu1 %v3051_v32  ;;  %v11190_v55 = vpack.c.bf16 %v9453_v45, %v9451_v35  ;;  %v2715_v25 = vshrl.u32 %v9631_v43, 16  ;;  %v2719_v49 = vshll.u32 %v9674_v51, 16  ;;  %v11191_v31 = vpack.c.bf16 %v9482_v22, %v9463_v5  ;;  %v9713_v43 = vld [vmem:[#allocation11 + $0x4a8] sm:$0xff]  ;;  %v9728_v53 = vld [vmem:[#allocation11 + $0x4b8] sm:$0xff] }
 0x5bf   : > { %2831 = vmatprep.mubr.bf16.mxu0 %v2702_v15  ;;  %v2786_v26 = vsel %vm2678_vm5, %v2781_v52, %v2785_v40  ;;  %v2690_v2 = vsel %vm2678_vm5, %v2685_v8, %v2689_v23  ;;  %v3107_v45 = vsel %vm2213_vm4, %v3098_v3, %v9679_v18  ;;  %v2751_v1 = vshll.u32 %v9681_v20, 16  ;;  %v11192_v21 = vld [vmem:[#allocation43_spill] sm:$0xff]  ;;  %v11193_v8 = vld [vmem:[#allocation44_spill] sm:$0xff]  ;;  %v11194_v15 = vld [vmem:[#allocation45_spill] sm:$0xff] }
 0x5c0   : > { %5880 = vmatpush3.bf16.msra.mxu0 %v11190_v55  ;;  %6449 = vmatmul.mubr.bf16.gmra.mrb[12].mxu1 %v2786_v26  ;;  %v2717_v5 = vor.u32 %v2715_v25, %v2689_v23  ;;  %v2747_v22 = vshrl.u32 %v9638_v16, 16  ;;  %v2582_v50 = vmul.f32 %v9301_v48, %v9693_v27  ;;  %v2585_v62 = vmul.f32 %v9327_v41, %v9695_v61  ;;  %v9732_v16 = vld [vmem:[#allocation11 + $0x548] sm:$0xff]  ;;  %v11195_v23 = vld [vmem:[#allocation59_spill] sm:$0xff]  ;;  %v3012_v25 = vld [vmem:[#allocation11 + $0x5d0] sm:$0xff] }
 0x5c1   : > { %5881 = vmatprep.subr.bf16.mxu0 %v11191_v31  ;;  %6457 = vmatpush3.bf16.msra.mxu1 %v3051_v32  ;;  %v2730_v52 = vsel %vm2678_vm5, %v2725_v24, %v2729_v9  ;;  %v3053_v32 = vpack.c.bf16 %v3011_v46, %v3010_v34  ;;  %v2957_v3 = vmul.f32 %v11193_v8, %v11192_v21  ;;  %v2721_v26 = vrot.slane %v2719_v49, 1  ;;  %v3013_v31 = vld [vmem:[#allocation11 + $0x5d8] sm:$0xff]  ;;  %v11198_v34 = vld [vmem:[#allocation70_spill] sm:$0xff]  ;;  %v11210_v61 = vld [vmem:[#allocation37_spill] sm:$0xff] }
 0x5c2   : > { %6468 = vmatprep.mubr.bf16.mxu1 %v3107_v45  ;;  %6458 = vmatprep.subr.bf16.mxu1 %v3052_v11  ;;  %v2960_v40 = vmul.f32 %v11195_v23, %v11194_v15  ;;  %v11196_v55 = vpack.c.bf16 %v9486_v17, %v9484_v33  ;;  %v2749_v24 = vor.u32 %v2747_v22, %v2729_v9  ;;  %v11197_v45 = vld [vmem:[#allocation46_spill] sm:$0xff]  ;;  %v11199_v35 = vld [vmem:[#allocation47_spill] sm:$0xff]  ;;  %v2753_v41 = vrot.slane %v2751_v1, 1  ;;  %v9752_v17 = vld [vmem:[#allocation11 + $0x4c0] sm:$0xff] }
 0x5c3   : > { %v2963_v46 = vmul.f32 %v11198_v34, %v11197_v45  ;;  %v11200_v13 = vld [vmem:[#allocation71_spill] sm:$0xff]  ;;  %v11201_v8 = vpack.c.bf16 %v9505_v10, %v9492_v6  ;;  %v9754_v9 = vld [vmem:[#allocation11 + $0x4c8] sm:$0xff]  ;;  %v2589_v49 = vmul.f32 %v11170_v44, %v2513_v12  ;;  %v2722_v22 = vsel %vm2678_vm5, %v2717_v5, %v2721_v26  ;;  %v9764_v1 = vld [vmem:[#allocation11 + $0x550] sm:$0xff] }
 0x5c4   : > { %5882 = vmatpush3.bf16.msra.mxu0 %v11196_v55  ;;  %v2966_v14 = vmul.f32 %v11200_v13, %v11199_v35  ;;  %v9762_v13 = vpack.c.bf16 %v2585_v62, %v2582_v50  ;;  %v9766_v55 = vld [vmem:[#allocation11 + $0x558] sm:$0xff]  ;;  %v2739_v34 = vshrl.u32 %v9674_v51, 16  ;;  %v2771_v12 = vshrl.u32 %v9681_v20, 16  ;;  %v3014_v6 = vld [vmem:[#allocation11 + $0x5e0] sm:$0xff]  ;;  %v3015_v51 = vld [vmem:[#allocation11 + $0x5e8] sm:$0xff] }
 0x5c5   : > { %5919 = vmatprep.subr.bf16.mxu0 %v11201_v8  ;;  %6459 = vmatpush3.bf16.msra.mxu1 %v3052_v11  ;;  %v3054_v5 = vpack.c.bf16 %v3013_v31, %v3012_v25  ;;  %v9770_v11 = vld [vmem:[#allocation11 + $0x4d0] sm:$0xff]  ;;  %v9772_v8 = vld [vmem:[#allocation11 + $0x4d8] sm:$0xff]  ;;  %v3026_v33 = vpack.c.bf16 %v2960_v40, %v2957_v3  ;;  %v11202_v50 = vpack.c.bf16 %v9509_v56, %v9507_v28  ;;  %v9780_v10 = vld [vmem:[#allocation11 + $0x560] sm:$0xff] }
 0x5c6   : > { %6460 = vmatprep.subr.bf16.mxu1 %v3053_v32  ;;  %v2754_v62 = vsel %vm2678_vm5, %v2749_v24, %v2753_v41  ;;  %11203 = vst [vmem:[#allocation58_spill] sm:$0xff] %v9780_v10  ;;  %v9782_v20 = vld [vmem:[#allocation11 + $0x568] sm:$0xff]  ;;  %v3029_v25 = vpack.c.bf16 %v2966_v14, %v2963_v46  ;;  %v11205_v31 = vpack.c.bf16 %v9663_v30, %v9661_v42  ;;  %v2942_v24 = vld [vmem:[#allocation2 + $0xe8] sm:$0x7f]  ;;  %v2512_v23 = vld [vmem:[#allocation2 + $0xd8] sm:$0x1] }
 0x5c7   : > { %2832 = vmatmul.mubr.bf16.vlgmr.msra.gmra.mrb[40].mxu0 %v2690_v2  ;;  %11204 = vst [vmem:[#allocation49_spill] sm:$0xff] %v9782_v20  ;;  %v2741_v3 = vor.u32 %v2739_v34, %v2721_v26  ;;  %v2652_v40 = vpack.c.bf16 %v2589_v49, %v2589_v49  ;;  %v9787_v28 = vor.u32 %v2771_v12, %v2753_v41  ;;  %v11206_v56 = vld [vmem:[#allocation69_spill] sm:$0xff]  ;;  %v11207_v42 = vld [vmem:[#allocation39_spill] sm:$0xff]  ;;  %v9802_v49 = vld [vmem:[#allocation11 + $0x4e0] sm:$0xff]  ;;  %v3127_v12 = vshrl.u32 %v3026_v33, 16 }
 0x5c8   : > { %5920 = vmatpush3.bf16.msra.mxu0 %v11202_v50  ;;  %2839 = vmatprep.mubr.bf16.mxu0 %v2730_v52  ;;  %v2947_v52 = vmul.f32 %v11206_v56, %v11161_v19  ;;  %v2743_v50 = vshll.u32 %v9762_v13, 16  ;;  %v2950_v14 = vmul.f32 %v9540_v47, %v8779_v7  ;;  %v11208_v30 = vld [vmem:[#allocation75_spill] sm:$0xff]  ;;  %v3055_v46 = vpack.c.bf16 %v3015_v51, %v3014_v6  ;;  %v9804_v34 = vld [vmem:[#allocation11 + $0x4e8] sm:$0xff]  ;;  %v3016_v47 = vld [vmem:[#allocation11 + $0x5f0] sm:$0xff] }
 0x5c9   : > { %5921 = vmatprep.subr.bf16.mxu0 %v11205_v31  ;;  %6461 = vmatpush3.bf16.msra.mxu1 %v3053_v32  ;;  %v2953_v26 = vmul.f32 %v11208_v30, %v11207_v42  ;;  %v11209_v31 = vpack.c.bf16 %v9672_v0, %v9665_v37  ;;  %v3017_v56 = vld [vmem:[#allocation11 + $0x5f8] sm:$0xff]  ;;  %v3130_v30 = vshll.u32 %v3026_v33, 16  ;;  %v3154_v2 = vshrl.u32 %v3029_v25, 16  ;;  %v11212_v10 = vld [vmem:[#allocation72_spill] sm:$0xff] }
 0x5ca   : > { %6462 = vmatprep.subr.bf16.mxu1 %v3054_v5  ;;  %v3157_v48 = vshll.u32 %v3029_v25, 16  ;;  %v2969_v41 = vmul.f32 %v2942_v24, %v11210_v61  ;;  %v11211_v6 = vpack.c.bf16 %v9689_v38, %v9687_v36  ;;  %v2775_v51 = vshll.u32 %v2652_v40, 16  ;;  %v11213_v25 = vld [vmem:[#allocation74_spill] sm:$0xff] }
 0x5cb   : > { %v2588_v32 = vmul.f32 %v11170_v44, %v2512_v23  ;;  %v2763_v27 = vshrl.u32 %v9762_v13, 16  ;;  %v3019_v20 = vpack.c.bf16 %v2947_v52, %v11212_v10  ;;  %v9816_v37 = vrot.slane %v2743_v50, 1  ;;  %v3374_v52 = vld [vmem:[#allocation11 + $0x700] sm:$0xff]  ;;  %v3375_v50 = vld [vmem:[#allocation11 + $0x708] sm:$0xff] }
 0x5cc   : > { %5922 = vmatpush3.bf16.msra.mxu0 %v11209_v31  ;;  %v3039_v0 = vpack.c.bf16 %v9804_v34, %v9802_v49  ;;  %v3022_v33 = vpack.c.bf16 %v2953_v26, %v2950_v14  ;;  %v2946_v24 = vmul.f32 %v11213_v25, %v11161_v19  ;;  %v3056_v36 = vpack.c.bf16 %v3017_v56, %v3016_v47  ;;  %v11216_v47 = vld [vmem:[#allocation65_spill] sm:$0xff]  ;;  %v11217_v56 = vld [vmem:[#allocation76_spill] sm:$0xff]  ;;  %v3360_v34 = vld [vmem:[#allocation11 + $0x690] sm:$0xff] }
 0x5cd   : > { %5923 = vmatprep.subr.bf16.mxu0 %v11211_v6  ;;  %6463 = vmatpush3.bf16.msra.mxu1 %v3054_v5  ;;  %v3129_v38 = vrot.slane %v3127_v12, 3  ;;  %v2949_v23 = vmul.f32 %v9574_v29, %v8779_v7  ;;  %v2952_v10 = vmul.f32 %v9576_v60, %v11207_v42  ;;  %v11214_v5 = vpack.c.bf16 %v9713_v43, %v9711_v54  ;;  %v11218_v6 = vld [vmem:[#allocation73_spill] sm:$0xff] }
 0x5ce   : > { %6464 = vmatprep.subr.bf16.mxu1 %v3055_v46  ;;  %v3132_v40 = vrot.slane %v3130_v30, 4  ;;  %v3156_v14 = vrot.slane %v3154_v2, 3  ;;  %v3159_v26 = vrot.slane %v3157_v48, 4  ;;  %v11215_v12 = vpack.c.bf16 %v9719_v63, %v9716_v59  ;;  %v11224_v13 = vld [vmem:[#allocation57_spill] sm:$0xff] }
 0x5cf   : > { %2840 = vmatmul.mubr.bf16.gmra.mrb[44].mxu0 %v2722_v22  ;;  %v3032_v22 = vpack.c.bf16 %v2969_v41, %v2969_v41  ;;  %v2651_v31 = vpack.c.bf16 %v2588_v32, %v2588_v32  ;;  %v3075_v29 = vshrl.u32 %v3019_v20, 16  ;;  %v2956_v60 = vmul.f32 %v11216_v47, %v11192_v21  ;;  %v3378_v47 = vld [vmem:[#allocation11 + $0x720] sm:$0xff] }
 0x5d0   : > { %5924 = vmatpush3.bf16.msra.mxu0 %v11214_v5  ;;  %2847 = vmatprep.mubr.bf16.mxu0 %v2754_v62  ;;  %v2959_v54 = vmul.f32 %v11217_v56, %v11194_v15  ;;  %v3078_v43 = vshll.u32 %v3019_v20, 16  ;;  %v3083_v62 = vshrl.u32 %v3022_v33, 16  ;;  %v3086_v30 = vshll.u32 %v3022_v33, 16  ;;  %v3376_v20 = vld [vmem:[#allocation11 + $0x710] sm:$0xff] }
 0x5d1   : > { %5925 = vmatprep.subr.bf16.mxu0 %v11215_v12  ;;  %6465 = vmatpush3.bf16.msra.mxu1 %v3055_v46  ;;  %v3018_v2 = vpack.c.bf16 %v2946_v24, %v11218_v6  ;;  %v2746_v48 = vsel %vm2678_vm5, %v2741_v3, %v9816_v37  ;;  %v2777_v41 = vrot.slane %v2775_v51, 1  ;;  %v3418_v59 = vpack.c.bf16 %v3375_v50, %v3374_v52  ;;  %v3377_v46 = vld [vmem:[#allocation11 + $0x718] sm:$0xff]  ;;  %v9853_v52 = vld [vmem:[#allocation11 + $0x570] sm:$0xff] }
 0x5d2   : > { %6466 = vmatprep.subr.bf16.mxu1 %v3056_v36  ;;  %v9839_v63 = vpack.c.bf16 %v2952_v10, %v2949_v23  ;;  %v11219_v32 = vpack.c.bf16 %v9728_v53, %v9721_v39  ;;  %v3133_v25 = vor.u32 %v3132_v40, %v3129_v38  ;;  %v9844_v5 = vor.u32 %v3159_v26, %v3156_v14  ;;  %v9855_v50 = vld [vmem:[#allocation11 + $0x578] sm:$0xff] }
 0x5d3   : > { %v3181_v33 = vshrl.u32 %v3032_v22, 16  ;;  %v3184_v12 = vshll.u32 %v3032_v22, 16  ;;  %v11220_v24 = vpack.c.bf16 %v9732_v16, %v9730_v4  ;;  %v2778_v3 = vsel %vm2678_vm5, %v9787_v28, %v2777_v41  ;;  %v11223_v41 = vld [vmem:[#allocation61_spill] sm:$0xff] }
 0x5d4   : > { %5926 = vmatpush3.bf16.msra.mxu0 %v11219_v32  ;;  %v2767_v51 = vshll.u32 %v2651_v31, 16  ;;  %v9851_v23 = vrot.slane %v3075_v29, 3  ;;  %v3025_v10 = vpack.c.bf16 %v2959_v54, %v2956_v60  ;;  %v3080_v39 = vrot.slane %v3078_v43, 4  ;;  %v3379_v60 = vld [vmem:[#allocation11 + $0x728] sm:$0xff] }
 0x5d5   : > { %5927 = vmatprep.subr.bf16.mxu0 %v11220_v24  ;;  %v3085_v53 = vrot.slane %v3083_v62, 3  ;;  %v3088_v38 = vrot.slane %v3086_v30, 4  ;;  %6467 = vmatpush3.bf16.msra.mxu1 %v3056_v36  ;;  %v3058_v40 = vshrl.u32 %v3018_v2, 16  ;;  %v3061_v4 = vshll.u32 %v3018_v2, 16  ;;  %v2984_v2 = vld [vmem:[#allocation11 + $0x4f0] sm:$0xff] }
 0x5d6   : > { %6476 = vmatprep.subr.bf16.mxu1 %v3418_v59  ;;  %v3066_v16 = vshrl.u32 %v9839_v63, 16  ;;  %v3069_v28 = vshll.u32 %v9839_v63, 16  ;;  %v3419_v14 = vpack.c.bf16 %v3377_v46, %v3376_v20  ;;  %v11221_v26 = vpack.c.bf16 %v9754_v9, %v9752_v17  ;;  %v3380_v46 = vld [vmem:[#allocation11 + $0x730] sm:$0xff] }
 0x5d7   : > { %2848 = vmatmul.mubr.bf16.gmra.mrb[48].mxu0 %v2746_v48  ;;  %v3134_v36 = vsel %vm2213_vm4, %v9679_v18, %v3133_v25  ;;  %v3161_v22 = vsel %vm2213_vm4, %v3133_v25, %v9844_v5  ;;  %v3183_v31 = vrot.slane %v3181_v33, 3  ;;  %v3186_v29 = vrot.slane %v3184_v12, 4  ;;  %v2985_v48 = vld [vmem:[#allocation11 + $0x4f8] sm:$0xff]  ;;  %v11226_v12 = vld [vmem:[#allocation49_spill] sm:$0xff]  ;;  %v11227_v24 = vld [vmem:[#allocation58_spill] sm:$0xff] }
 0x5d8   : > { %5928 = vmatpush3.bf16.msra.mxu0 %v11221_v26  ;;  %2855 = vmatprep.mubr.bf16.mxu0 %v2778_v3  ;;  %v11222_v54 = vpack.c.bf16 %v9766_v55, %v9764_v1  ;;  %v3118_v43 = vshrl.u32 %v3025_v10, 16  ;;  %v3121_v62 = vshll.u32 %v3025_v10, 16  ;;  %v2955_v17 = vmul.f32 %v9617_v58, %v11192_v21  ;;  %v3381_v33 = vld [vmem:[#allocation11 + $0x738] sm:$0xff]  ;;  %v7182_v26 = vld [vmem:[#allocation2 + $0x58] sm:$0xff] }
 0x5d9   : > { %6469 = vmatmul.mubr.bf16.vlgmr.msra.gmra.mrb[8].mxu1 %v3134_v36  ;;  %v2958_v18 = vmul.f32 %v9619_v57, %v11194_v15  ;;  %v2765_v9 = vor.u32 %v2763_v27, %v9816_v37  ;;  %v2769_v30 = vrot.slane %v2767_v51, 1  ;;  %v3081_v6 = vor.u32 %v3080_v39, %v9851_v23  ;;  %v3358_v51 = vld [vmem:[#allocation11 + $0x680] sm:$0xff]  ;;  %v3359_v23 = vld [vmem:[#allocation11 + $0x688] sm:$0xff]  ;;  %v3965_v15 = vld [vmem:[#allocation2 + $0x40] sm:$0x80] }
 0x5da   : > { %5929 = vmatprep.subr.bf16.mxu0 %v11222_v54  ;;  %v3048_v1 = vpack.c.bf16 %v9855_v50, %v9853_v52  ;;  %6472 = vmatprep.mubr.bf16.mxu1 %v3161_v22  ;;  %v9879_v55 = vor.u32 %v3088_v38, %v3085_v53  ;;  %v3420_v58 = vpack.c.bf16 %v3379_v60, %v3378_v47  ;;  %v3060_v32 = vrot.slane %v3058_v40, 3  ;;  %v3382_v22 = vld [vmem:[#allocation11 + $0x740] sm:$0xff] }
 0x5db   : > { %6477 = vmatpush3.bf16.msra.mxu1 %v3418_v59  ;;  %v2962_v63 = vmul.f32 %v11223_v41, %v11197_v45  ;;  %v2965_v27 = vmul.f32 %v11224_v13, %v11199_v35  ;;  %v11225_v37 = vpack.c.bf16 %v9772_v8, %v9770_v11  ;;  %v3063_v25 = vrot.slane %v3061_v4, 4  ;;  %v3342_v54 = vld [vmem:[#allocation11 + $0x600] sm:$0xff] }
 0x5dc   : > { %6478 = vmatprep.subr.bf16.mxu1 %v3419_v14  ;;  %v3068_v20 = vrot.slane %v3066_v16, 3  ;;  %v3187_v59 = vor.u32 %v3186_v29, %v3183_v31  ;;  %v11228_v3 = vpack.c.bf16 %v11226_v12, %v11227_v24  ;;  %v3071_v10 = vrot.slane %v3069_v28, 4  ;;  %v3383_v31 = vld [vmem:[#allocation11 + $0x748] sm:$0xff]  ;;  %v2941_v29 = vld [vmem:[#allocation2 + $0xe0] sm:$0x7f] }
 0x5dd   : > { %5930 = vmatpush3.bf16.msra.mxu0 %v11225_v37  ;;  %v3120_v39 = vrot.slane %v3118_v43, 3  ;;  %v3123_v53 = vrot.slane %v3121_v62, 4  ;;  %v3024_v38 = vpack.c.bf16 %v2958_v18, %v2955_v17  ;;  %v2770_v52 = vsel %vm2678_vm5, %v2765_v9, %v2769_v30  ;;  %v3343_v43 = vld [vmem:[#allocation11 + $0x608] sm:$0xff]  ;;  %v11229_v17 = vld [vmem:[#allocation60_spill] sm:$0xff] }
 0x5de   : > { %5931 = vmatprep.subr.bf16.mxu0 %v11228_v3  ;;  %v3040_v11 = vpack.c.bf16 %v2985_v48, %v2984_v2  ;;  %v3090_v40 = vsel %vm2213_vm4, %v3081_v6, %v9879_v55  ;;  %v3028_v50 = vpack.c.bf16 %v2965_v27, %v2962_v63  ;;  %v3421_v4 = vpack.c.bf16 %v3381_v33, %v3380_v46  ;;  %v11230_v9 = vld [vmem:[#allocation64_spill] sm:$0xff]  ;;  %v3385_v27 = vld [vmem:[#allocation11 + $0x758] sm:$0xff]  ;;  %v3363_v33 = vld [vmem:[#allocation11 + $0x6a8] sm:$0xff] }
 0x5df   : > { %6479 = vmatpush3.bf16.msra.mxu1 %v3419_v14  ;;  %2856 = vmatmul.mubr.bf16.gmra.mrb[52].mxu0 %v2770_v52  ;;  %v3410_v16 = vpack.c.bf16 %v3359_v23, %v3358_v51  ;;  %v3188_v28 = vsel %vm2213_vm4, %v9844_v5, %v3187_v59  ;;  %v7181_v14 = vld [vmem:[#allocation2 + $0x40] sm:$0xff]  ;;  %v3064_v47 = vor.u32 %v3063_v25, %v3060_v32  ;;  %v3109_v49 = vshrl.u32 %v3024_v38, 16  ;;  %v3344_v25 = vld [vmem:[#allocation11 + $0x610] sm:$0xff]  ;;  %v3362_v46 = vld [vmem:[#allocation11 + $0x6a0] sm:$0xff] }
 0x5e0   : > { %6480 = vmatprep.subr.bf16.mxu1 %v3420_v58  ;;  %3233 = vmatprep.mubr.bf16.mxu0 %v3090_v40  ;;  %v3392_v36 = vpack.c.bf16 %v7182_v26, %v7181_v14  ;;  %v9901_v60 = vor.u32 %v3071_v10, %v3068_v20  ;;  %v9903_v62 = vor.u32 %v3123_v53, %v3120_v39  ;;  %v3112_v5 = vshll.u32 %v3024_v38, 16  ;;  %v3345_v20 = vld [vmem:[#allocation11 + $0x618] sm:$0xff]  ;;  %v2940_v53 = vld [vmem:[#allocation2 + $0xd8] sm:$0x7f]  ;;  %v3386_v52 = vld [vmem:[#allocation11 + $0x760] sm:$0xff] }
 0x5e1   : > { %5932 = vmatpush3.bf16.msra.mxu0 %v3039_v0  ;;  %6473 = vmatmul.mubr.bf16.gmra.mrb[12].mxu1 %v3188_v28  ;;  %v3361_v0 = vld [vmem:[#allocation11 + $0x698] sm:$0xff]  ;;  %v2961_v18 = vmul.f32 %v11229_v17, %v11197_v45  ;;  %v2964_v30 = vmul.f32 %v11230_v9, %v11199_v35  ;;  %v3148_v2 = vshll.u32 %v3028_v50, 16  ;;  %v3422_v48 = vpack.c.bf16 %v3383_v31, %v3382_v22  ;;  %v3346_v40 = vld [vmem:[#allocation11 + $0x620] sm:$0xff]  ;;  %v9920_v31 = vld [vmem:[#allocation2 + $0x58] sm:$0xff] }
 0x5e2   : > { %5933 = vmatprep.subr.bf16.mxu0 %v3048_v1  ;;  %6492 = vmatprep.mubr.bf16.mxu1 %v3392_v36  ;;  %v3145_v1 = vshrl.u32 %v3028_v50, 16  ;;  %v2968_v63 = vmul.f32 %v2941_v29, %v11210_v61  ;;  %v3402_v13 = vpack.c.bf16 %v3343_v43, %v3342_v54  ;;  %v3073_v37 = vsel %vm2213_vm4, %v3064_v47, %v9901_v60  ;;  %v3347_v50 = vld [vmem:[#allocation11 + $0x628] sm:$0xff]  ;;  %v3566_v22 = vld [vmem:[#allocation2 + $0x40] sm:$0xfe]  ;;  %v10045_v6 = vld [vmem:[#allocation11 + $0x7d0] sm:$0xff] }
 0x5e3   : > { %6481 = vmatpush3.bf16.msra.mxu1 %v3420_v58  ;;  %v3384_v58 = vld [vmem:[#allocation11 + $0x750] sm:$0xff]  ;;  %v3411_v32 = vpack.c.bf16 %v3361_v0, %v3360_v34  ;;  %v3125_v59 = vsel %vm2213_vm4, %v9879_v55, %v9903_v62  ;;  %v3111_v12 = vrot.slane %v3109_v49, 3  ;;  %v3114_v24 = vrot.slane %v3112_v5, 4  ;;  %11231 = vst [vmem:[#allocation62_spill] sm:$0xff] %v9920_v31  ;;  %v3389_v0 = vld [vmem:[#allocation11 + $0x778] sm:$0xff]  ;;  %11248 = vst [vmem:[#allocation74_spill] sm:$0xff] %v10045_v6 }
 0x5e4   : > { %6482 = vmatprep.subr.bf16.mxu1 %v3421_v4  ;;  %v3027_v3 = vpack.c.bf16 %v2964_v30, %v2961_v18  ;;  %v3147_v51 = vrot.slane %v3145_v1, 3  ;;  %v3150_v23 = vrot.slane %v3148_v2, 4  ;;  %v3031_v10 = vpack.c.bf16 %v2968_v63, %v2968_v63  ;;  %v3388_v34 = vld [vmem:[#allocation11 + $0x770] sm:$0xff]  ;;  %v3349_v30 = vld [vmem:[#allocation11 + $0x638] sm:$0xff]  ;;  %v11232_v1 = vld [vmem:[#allocation48_spill] sm:$0xff] }
 0x5e5   : > { %5934 = vmatpush3.bf16.msra.mxu0 %v3040_v11  ;;  %v3423_v39 = vpack.c.bf16 %v3385_v27, %v3384_v58  ;;  %v3403_v38 = vpack.c.bf16 %v3345_v20, %v3344_v25  ;;  %v3387_v11 = vld [vmem:[#allocation11 + $0x768] sm:$0xff]  ;;  %v3412_v55 = vpack.c.bf16 %v3363_v33, %v3362_v46  ;;  %v9917_v28 = vor.u32 %v3114_v24, %v3111_v12  ;;  %v3348_v18 = vld [vmem:[#allocation11 + $0x630] sm:$0xff]  ;;  %v3366_v58 = vld [vmem:[#allocation11 + $0x6c0] sm:$0xff] }
 0x5e6   : > { %5971 = vmatprep.subr.bf16.mxu0 %v3410_v16  ;;  %v3364_v16 = vld [vmem:[#allocation11 + $0x6b0] sm:$0xff]  ;;  %v3136_v14 = vshrl.u32 %v3027_v3, 16  ;;  %v3139_v26 = vshll.u32 %v3027_v3, 16  ;;  %v2967_v36 = vmul.f32 %v2940_v53, %v11210_v61  ;;  %v9922_v29 = vor.u32 %v3150_v23, %v3147_v51  ;;  %v3367_v27 = vld [vmem:[#allocation11 + $0x6c8] sm:$0xff]  ;;  %v3650_v24 = vld [vmem:[#allocation11 + $0x880] sm:$0xff] }
 0x5e7   : > { %6483 = vmatpush3.bf16.msra.mxu1 %v3421_v4  ;;  %v3365_v4 = vld [vmem:[#allocation11 + $0x6b8] sm:$0xff]  ;;  %v3172_v47 = vshrl.u32 %v3031_v10, 16  ;;  %v3175_v54 = vshll.u32 %v3031_v10, 16  ;;  %v3424_v43 = vpack.c.bf16 %v3387_v11, %v3386_v52  ;;  %v3404_v49 = vpack.c.bf16 %v3347_v50, %v3346_v40  ;;  %v9933_v12 = vld [vmem:[#allocation2 + $0x70] sm:$0xff]  ;;  %v9935_v51 = vld [vmem:[#allocation2 + $0x88] sm:$0xff] }
 0x5e8   : > { %3234 = vmatmul.mubr.bf16.vlgmr.msra.gmra.mrb[56].mxu0 %v3073_v37  ;;  %6484 = vmatprep.subr.bf16.mxu1 %v3422_v48  ;;  %v3413_v5 = vpack.c.bf16 %v3365_v4, %v3364_v16  ;;  %v3593_v2 = vmul.f32 %v3566_v22, %v11232_v1  ;;  %v3138_v37 = vrot.slane %v3136_v14, 3  ;;  %v3030_v25 = vpack.c.bf16 %v2967_v36, %v2967_v36  ;;  %v3651_v3 = vld [vmem:[#allocation11 + $0x888] sm:$0xff]  ;;  %v3350_v10 = vld [vmem:[#allocation11 + $0x640] sm:$0xff]  ;;  %v3369_v52 = vld [vmem:[#allocation11 + $0x6d8] sm:$0xff] }
 0x5e9   : > { %5972 = vmatpush3.bf16.msra.mxu0 %v3402_v13  ;;  %3241 = vmatprep.mubr.bf16.mxu0 %v3125_v59  ;;  %v3116_v13 = vsel %vm2213_vm4, %v9901_v60, %v9917_v28  ;;  %v3152_v20 = vsel %vm2213_vm4, %v9903_v62, %v9922_v29  ;;  %v3174_v59 = vrot.slane %v3172_v47, 3  ;;  %v3177_v46 = vrot.slane %v3175_v54, 4  ;;  %11234 = vst [vmem:[#allocation68_spill] sm:$0xff] %v9933_v12  ;;  %v11235_v16 = vld [vmem:[#allocation52_spill] sm:$0xff]  ;;  %v11236_v14 = vld [vmem:[#allocation53_spill] sm:$0xff]  ;;  %v3652_v22 = vld [vmem:[#allocation11 + $0x890] sm:$0xff] }
 0x5ea   : > { %5973 = vmatprep.subr.bf16.mxu0 %v3411_v32  ;;  %v3141_v32 = vrot.slane %v3139_v26, 4  ;;  %v3425_v33 = vpack.c.bf16 %v3389_v0, %v3388_v34  ;;  %v3405_v60 = vpack.c.bf16 %v3349_v30, %v3348_v18  ;;  %v3414_v23 = vpack.c.bf16 %v3367_v27, %v3366_v58  ;;  %v3653_v47 = vld [vmem:[#allocation11 + $0x898] sm:$0xff]  ;;  %v3371_v18 = vld [vmem:[#allocation11 + $0x6e8] sm:$0xff]  ;;  %v3662_v45 = vld [vmem:[#allocation11 + $0x8e0] sm:$0xff] }
 0x5eb   : > { %6485 = vmatpush3.bf16.msra.mxu1 %v3422_v48  ;;  %v11233_v48 = vld [vmem:[#allocation51_spill] sm:$0xff]  ;;  %v3163_v11 = vshrl.u32 %v3030_v25, 16  ;;  %v3178_v40 = vor.u32 %v3177_v46, %v3174_v59  ;;  %v3697_v50 = vpack.c.bf16 %v3651_v3, %v3650_v24  ;;  %v3599_v4 = vmul.f32 %v9933_v12, %v11235_v16  ;;  %v3654_v46 = vld [vmem:[#allocation11 + $0x8a0] sm:$0xff]  ;;  %v3355_v3 = vld [vmem:[#allocation11 + $0x668] sm:$0xff] }
 0x5ec   : > { %6486 = vmatprep.subr.bf16.mxu1 %v3423_v39  ;;  %v3596_v63 = vmul.f32 %v9920_v31, %v11233_v48  ;;  %v9939_v62 = vor.u32 %v3141_v32, %v3138_v37  ;;  %v3602_v26 = vmul.f32 %v9935_v51, %v11236_v14  ;;  %v3353_v34 = vld [vmem:[#allocation11 + $0x658] sm:$0xff]  ;;  %v3698_v37 = vpack.c.bf16 %v3653_v47, %v3652_v22  ;;  %v3354_v24 = vld [vmem:[#allocation11 + $0x660] sm:$0xff]  ;;  %v3356_v22 = vld [vmem:[#allocation11 + $0x670] sm:$0xff] }
 0x5ed   : > { %5974 = vmatpush3.bf16.msra.mxu0 %v3403_v38  ;;  %v3368_v38 = vld [vmem:[#allocation11 + $0x6d0] sm:$0xff]  ;;  %v3165_v30 = vrot.slane %v3163_v11, 3  ;;  %v3179_v27 = vsel %vm2213_vm4, %v9922_v29, %v3178_v40  ;;  %v9955_v40 = vld [vmem:[#allocation2 + $0xe8] sm:$0xff]  ;;  %v3357_v47 = vld [vmem:[#allocation11 + $0x678] sm:$0xff] }
 0x5ee   : > { %5975 = vmatprep.subr.bf16.mxu0 %v3412_v55  ;;  %v9937_v53 = vpack.c.bf16 %v3596_v63, %v3593_v2  ;;  %v3166_v55 = vshll.u32 %v3030_v25, 16  ;;  %v3415_v54 = vpack.c.bf16 %v3369_v52, %v3368_v38  ;;  %v3143_v0 = vsel %vm2213_vm4, %v9917_v28, %v9939_v62  ;;  %v7183_v63 = vld [vmem:[#allocation2 + $0x70] sm:$0xff]  ;;  %v7185_v28 = vld [vmem:[#allocation2 + $0xa0] sm:$0xff]  ;;  %v3372_v29 = vld [vmem:[#allocation11 + $0x6f0] sm:$0xff]  ;;  %11237 = vst [vmem:[#allocation67_spill] sm:$0xff] %v9955_v40 }
 0x5ef   : > { %6487 = vmatpush3.bf16.msra.mxu1 %v3423_v39  ;;  %v3351_v39 = vld [vmem:[#allocation11 + $0x648] sm:$0xff]  ;;  %v9951_v32 = vpack.c.bf16 %v3602_v26, %v3599_v4  ;;  %v3656_v4 = vld [vmem:[#allocation11 + $0x8b0] sm:$0xff]  ;;  %v3657_v26 = vld [vmem:[#allocation11 + $0x8b8] sm:$0xff] }
 0x5f0   : > { %3242 = vmatmul.mubr.bf16.gmra.mrb[60].mxu0 %v3116_v13  ;;  %6488 = vmatprep.subr.bf16.mxu1 %v3424_v43  ;;  %v3406_v36 = vpack.c.bf16 %v3351_v39, %v3350_v10  ;;  %v3168_v2 = vrot.slane %v3166_v55, 4  ;;  %v7184_v13 = vld [vmem:[#allocation2 + $0x88] sm:$0xff]  ;;  %v3373_v39 = vld [vmem:[#allocation11 + $0x6f8] sm:$0xff]  ;;  %v3730_v52 = vshrl.u32 %v9937_v53, 16  ;;  %v3408_v55 = vpack.c.bf16 %v3355_v3, %v3354_v24  ;;  %v9980_v3 = vld [vmem:[#allocation11 + $0x828] sm:$0xff] }
 0x5f1   : > { %5976 = vmatpush3.bf16.msra.mxu0 %v3404_v49  ;;  %3249 = vmatprep.mubr.bf16.mxu0 %v3152_v20  ;;  %v3352_v49 = vld [vmem:[#allocation11 + $0x650] sm:$0xff]  ;;  %v3395_v58 = vpack.c.bf16 %v7184_v13, %v7183_v63  ;;  %v3737_v11 = vshll.u32 %v9951_v32, 16  ;;  %v3700_v13 = vpack.c.bf16 %v3657_v26, %v3656_v4  ;;  %v9978_v24 = vld [vmem:[#allocation11 + $0x820] sm:$0xff]  ;;  %v9996_v4 = vld [vmem:[#allocation11 + $0x7b8] sm:$0xff] }
 0x5f2   : > { %5977 = vmatprep.subr.bf16.mxu0 %v3413_v5  ;;  %v3370_v5 = vld [vmem:[#allocation11 + $0x6e0] sm:$0xff]  ;;  %v3407_v25 = vpack.c.bf16 %v3353_v34, %v3352_v49  ;;  %v7186_v20 = vld [vmem:[#allocation2 + $0xb8] sm:$0xff]  ;;  %v3169_v10 = vor.u32 %v3168_v2, %v3165_v30  ;;  %v7188_v34 = vld [vmem:[#allocation2 + $0x50] sm:$0xff] }
 0x5f3   : > { %6489 = vmatpush3.bf16.msra.mxu1 %v3424_v43  ;;  %v3732_v43 = vshll.u32 %v9937_v53, 16  ;;  %v3398_v59 = vpack.c.bf16 %v7186_v20, %v7185_v28  ;;  %v7187_v49 = vld [vmem:[#allocation2 + $0x38] sm:$0xff]  ;;  %v3634_v53 = vld [vmem:[#allocation11 + $0x800] sm:$0xff]  ;;  %v7189_v30 = vld [vmem:[#allocation2 + $0xd0] sm:$0xff]  ;;  %v9964_v63 = vrot.slane %v3737_v11, 1 }
 0x5f4   : > { %6490 = vmatprep.subr.bf16.mxu1 %v3425_v33  ;;  %v3401_v2 = vpack.c.bf16 %v9955_v40, %v7189_v30  ;;  %v3659_v28 = vld [vmem:[#allocation11 + $0x8c8] sm:$0xff]  ;;  %v9992_v11 = vld [vmem:[#allocation11 + $0x838] sm:$0xff]  ;;  %v10105_v6 = vld [vmem:[#allocation11 + $0x7f0] sm:$0xff] }
 0x5f5   : > { %5978 = vmatpush3.bf16.msra.mxu0 %v3405_v60  ;;  %v3655_v60 = vld [vmem:[#allocation11 + $0x8a8] sm:$0xff]  ;;  %v7193_v30 = vld [vmem:[#allocation2 + $0x80] sm:$0xff] }
 0x5f6   : > { %5979 = vmatprep.subr.bf16.mxu0 %v3414_v23  ;;  %v3734_v23 = vrot.slane %v3732_v43, 1  ;;  %v3699_v38 = vpack.c.bf16 %v3655_v60, %v3654_v46  ;;  %v3391_v43 = vpack.c.bf16 %v7188_v34, %v7187_v49  ;;  %v9970_v20 = vld [vmem:[#allocation2 + $0x50] sm:$0xff]  ;;  %v9974_v60 = vld [vmem:[#allocation11 + $0x790] sm:$0xff]  ;;  %v10003_v49 = vld [vmem:[#allocation11 + $0x840] sm:$0xff] }
 0x5f7   : > { %6491 = vmatpush3.bf16.msra.mxu1 %v3425_v33  ;;  %v3416_v33 = vpack.c.bf16 %v3371_v18, %v3370_v5  ;;  %v9959_v5 = vld [vmem:[#allocation11 + $0x780] sm:$0xff]  ;;  %v9961_v18 = vld [vmem:[#allocation11 + $0x788] sm:$0xff]  ;;  %11238 = vst [vmem:[#allocation56_spill] sm:$0xff] %v9970_v20  ;;  %v3660_v34 = vld [vmem:[#allocation11 + $0x8d0] sm:$0xff] }
 0x5f8   : > { %3250 = vmatmul.mubr.bf16.gmra.mrb[64].mxu0 %v3143_v0  ;;  %6500 = vmatprep.subr.bf16.mxu1 %v3697_v50  ;;  %v3635_v0 = vld [vmem:[#allocation11 + $0x808] sm:$0xff]  ;;  %v10033_v61 = vld [vmem:[#allocation2 + $0xe0] sm:$0xff] }
 0x5f9   : > { %5980 = vmatpush3.bf16.msra.mxu0 %v3406_v36  ;;  %3257 = vmatprep.mubr.bf16.mxu0 %v3179_v27  ;;  %v3417_v36 = vpack.c.bf16 %v3373_v39, %v3372_v29  ;;  %v9966_v27 = vld [vmem:[#allocation11 + $0x810] sm:$0xff]  ;;  %v3689_v46 = vpack.c.bf16 %v3635_v0, %v3634_v53  ;;  %v9986_v29 = vld [vmem:[#allocation11 + $0x7a0] sm:$0xff]  ;;  %v9988_v39 = vld [vmem:[#allocation11 + $0x7a8] sm:$0xff]  ;;  %11245 = vst [vmem:[#allocation69_spill] sm:$0xff] %v10033_v61 }
 0x5fa   : > { %5981 = vmatprep.subr.bf16.mxu0 %v3415_v54  ;;  %6493 = vmatmul.mubr.bf16.vlgmr.msra.gmra.mrb[8].mxu1 %v3395_v58  ;;  %v3735_v54 = vor.u32 %v3734_v23, %v3730_v52  ;;  %v3565_v58 = vld [vmem:[#allocation2 + $0x38] sm:$0xfe]  ;;  %v10005_v53 = vld [vmem:[#allocation2 + $0xd0] sm:$0xff]  ;;  %v7192_v0 = vld [vmem:[#allocation2 + $0x68] sm:$0xff] }
 0x5fb   : > { %6496 = vmatprep.mubr.bf16.mxu1 %v3398_v59  ;;  %6501 = vmatpush3.bf16.msra.mxu1 %v3697_v50  ;;  %v3170_v50 = vsel %vm2213_vm4, %v9939_v62, %v3169_v10  ;;  %v3409_v62 = vpack.c.bf16 %v3357_v47, %v3356_v22  ;;  %v9972_v59 = vld [vmem:[#allocation2 + $0xa0] sm:$0xff]  ;;  %v9984_v10 = vld [vmem:[#allocation2 + $0xb8] sm:$0xff]  ;;  %v7190_v22 = vld [vmem:[#allocation2 + $0x30] sm:$0xff]  ;;  %11241 = vst [vmem:[#allocation70_spill] sm:$0xff] %v10005_v53 }
 0x5fc   : > { %6502 = vmatprep.subr.bf16.mxu1 %v3698_v37  ;;  %11239 = vst [vmem:[#allocation44_spill] sm:$0xff] %v9972_v59  ;;  %v3740_v23 = vsel %vm2678_vm5, %v3735_v54, %v9964_v63  ;;  %11240 = vst [vmem:[#allocation59_spill] sm:$0xff] %v9984_v10  ;;  %v9990_v52 = vld [vmem:[#allocation11 + $0x830] sm:$0xff]  ;;  %v7191_v47 = vld [vmem:[#allocation2 + $0x48] sm:$0xff] }
 0x5fd   : > { %5982 = vmatpush3.bf16.msra.mxu0 %v3407_v25  ;;  %v9968_v25 = vld [vmem:[#allocation11 + $0x818] sm:$0xff]  ;;  %v3390_v54 = vpack.c.bf16 %v7191_v47, %v7190_v22  ;;  %v3564_v47 = vld [vmem:[#allocation2 + $0x30] sm:$0xfe] }
 0x5fe   : > { %5983 = vmatprep.subr.bf16.mxu0 %v3416_v33  ;;  %v9976_v33 = vld [vmem:[#allocation11 + $0x798] sm:$0xff] }
 0x5ff   : > { %6503 = vmatpush3.bf16.msra.mxu1 %v3698_v37  ;;  %v3658_v37 = vld [vmem:[#allocation11 + $0x8c0] sm:$0xff]  ;;  %v10037_v35 = vld [vmem:[#allocation2 + $0x80] sm:$0xff] }
 0x600   : > { %3258 = vmatmul.mubr.bf16.gmra.mrb[68].mxu0 %v3170_v50  ;;  %6504 = vmatprep.subr.bf16.mxu1 %v3699_v38  ;;  %v3701_v26 = vpack.c.bf16 %v3659_v28, %v3658_v37  ;;  %v3681_v50 = vpack.c.bf16 %v9961_v18, %v9959_v5  ;;  %v10011_v37 = vld [vmem:[#allocation11 + $0x7c0] sm:$0xff]  ;;  %v10013_v28 = vld [vmem:[#allocation11 + $0x7c8] sm:$0xff]  ;;  %v11242_v5 = vld [vmem:[#allocation54_spill] sm:$0xff]  ;;  %11247 = vst [vmem:[#allocation72_spill] sm:$0xff] %v10037_v35 }
 0x601   : > { %5984 = vmatpush3.bf16.msra.mxu0 %v3408_v55  ;;  %3458 = vmatprep.mubr.bf16.mxu0 %v3391_v43  ;;  %v9994_v55 = vld [vmem:[#allocation11 + $0x7b0] sm:$0xff]  ;;  %v3661_v43 = vld [vmem:[#allocation11 + $0x8d8] sm:$0xff]  ;;  %v3605_v18 = vmul.f32 %v9972_v59, %v11242_v5  ;;  %v10070_v59 = vld [vmem:[#allocation11 + $0x860] sm:$0xff] }
 0x602   : > { %5985 = vmatprep.subr.bf16.mxu0 %v3417_v36  ;;  %6497 = vmatmul.mubr.bf16.gmra.mrb[12].mxu1 %v3401_v2  ;;  %v3592_v36 = vmul.f32 %v3565_v58, %v11232_v1  ;;  %v3394_v2 = vpack.c.bf16 %v7193_v30, %v7192_v0  ;;  %v3690_v58 = vpack.c.bf16 %v9968_v25, %v9966_v27  ;;  %v10025_v25 = vld [vmem:[#allocation2 + $0x60] sm:$0xff]  ;;  %v10027_v30 = vld [vmem:[#allocation2 + $0x78] sm:$0xff] }
 0x603   : > { %6505 = vmatpush3.bf16.msra.mxu1 %v3699_v38  ;;  %6516 = vmatprep.mubr.bf16.mxu1 %v3740_v23  ;;  %v3595_v38 = vmul.f32 %v9970_v20, %v11233_v48  ;;  %v11243_v23 = vld [vmem:[#allocation55_spill] sm:$0xff]  ;;  %v3682_v0 = vpack.c.bf16 %v9976_v33, %v9974_v60  ;;  %v3691_v27 = vpack.c.bf16 %v9980_v3, %v9978_v24  ;;  %v10035_v20 = vld [vmem:[#allocation2 + $0x68] sm:$0xff]  ;;  %v10041_v24 = vld [vmem:[#allocation11 + $0x850] sm:$0xff] }
 0x604   : > { %6506 = vmatprep.subr.bf16.mxu1 %v3700_v13  ;;  %v3608_v22 = vmul.f32 %v9984_v10, %v11243_v23  ;;  %11246 = vst [vmem:[#allocation75_spill] sm:$0xff] %v10035_v20  ;;  %v3702_v33 = vpack.c.bf16 %v3661_v43, %v3660_v34  ;;  %v10043_v3 = vld [vmem:[#allocation11 + $0x858] sm:$0xff]  ;;  %v3663_v10 = vld [vmem:[#allocation11 + $0x8e8] sm:$0xff]  ;;  %v3598_v21 = vmul.f32 %v10035_v20, %v11235_v16 }
 0x605   : > { %5986 = vmatpush3.bf16.msra.mxu0 %v3409_v62  ;;  %v10009_v62 = vld [vmem:[#allocation11 + $0x848] sm:$0xff]  ;;  %v10047_v8 = vpack.c.bf16 %v3595_v38, %v3592_v36  ;;  %v10056_v43 = vld [vmem:[#allocation11 + $0x7d8] sm:$0xff]  ;;  %v10058_v36 = vld [vmem:[#allocation2 + $0xc8] sm:$0xff]  ;;  %v3601_v38 = vmul.f32 %v10037_v35, %v11236_v14 }
 0x606   : > { %6023 = vmatprep.subr.bf16.mxu0 %v3689_v46  ;;  %v10019_v46 = vld [vmem:[#allocation2 + $0x48] sm:$0xff]  ;;  %11249 = vst [vmem:[#allocation65_spill] sm:$0xff] %v10056_v43  ;;  %11250 = vst [vmem:[#allocation76_spill] sm:$0xff] %v10058_v36  ;;  %v10087_v20 = vld [vmem:[#allocation11 + $0x7e8] sm:$0xff] }
 0x607   : > { %11244 = vst [vmem:[#allocation71_spill] sm:$0xff] %v10019_v46  ;;  %6507 = vmatpush3.bf16.msra.mxu1 %v3700_v13  ;;  %v3757_v13 = vshrl.u32 %v9951_v32, 16  ;;  %v10062_v32 = vld [vmem:[#allocation2 + $0xd8] sm:$0xff]  ;;  %v3720_v35 = vshll.u32 %v10047_v8, 16  ;;  %v10107_v43 = vld [vmem:[#allocation11 + $0x7f8] sm:$0xff] }
 0x608   : > { %3459 = vmatmul.mubr.bf16.vlgmr.msra.gmra.mrb[72].mxu0 %v3390_v54  ;;  %6508 = vmatprep.subr.bf16.mxu1 %v3701_v26  ;;  %11251 = vst [vmem:[#allocation73_spill] sm:$0xff] %v10062_v32  ;;  %v11253_v54 = vld [vmem:[#allocation66_spill] sm:$0xff] }
 0x609   : > { %6024 = vmatpush3.bf16.msra.mxu0 %v3681_v50  ;;  %3466 = vmatprep.mubr.bf16.mxu0 %v3394_v2  ;;  %v10064_v50 = vpack.c.bf16 %v3608_v22, %v3605_v18  ;;  %v11252_v2 = vld [vmem:[#allocation50_spill] sm:$0xff]  ;;  %v3614_v34 = vmul.f32 %v9955_v40, %v11253_v54  ;;  %v3591_v18 = vmul.f32 %v3564_v47, %v11232_v1  ;;  %v3665_v47 = vld [vmem:[#allocation11 + $0x8f8] sm:$0xff] }
 0x60a   : > { %6025 = vmatprep.subr.bf16.mxu0 %v3690_v58  ;;  %v3611_v60 = vmul.f32 %v10005_v53, %v11252_v2  ;;  %v10072_v58 = vld [vmem:[#allocation11 + $0x868] sm:$0xff]  ;;  %v3594_v22 = vmul.f32 %v10019_v46, %v11233_v48  ;;  %v3590_v53 = vld [vmem:[#allocation2 + $0x100] sm:$0x1]  ;;  %v3703_v54 = vpack.c.bf16 %v3663_v10, %v3662_v45  ;;  %v10085_v2 = vld [vmem:[#allocation11 + $0x7e0] sm:$0xff]  ;;  %v3977_v45 = vmul.f32 %v9933_v12, %v8779_v7 }
 0x60b   : > { %6509 = vmatpush3.bf16.msra.mxu1 %v3701_v26  ;;  %v3664_v36 = vld [vmem:[#allocation11 + $0x8f0] sm:$0xff]  ;;  %v10092_v48 = vld [vmem:[#allocation11 + $0x878] sm:$0xff]  ;;  %v3974_v26 = vmul.f32 %v9920_v31, %v11161_v19  ;;  %v3980_v10 = vmul.f32 %v9935_v51, %v11207_v42  ;;  %v3759_v7 = vor.u32 %v3757_v13, %v9964_v63  ;;  %v4029_v13 = vld [vmem:[#allocation11 + $0xa08] sm:$0xff] }
 0x60c   : > { %6510 = vmatprep.subr.bf16.mxu1 %v3702_v33  ;;  %v10090_v1 = vld [vmem:[#allocation11 + $0x870] sm:$0xff]  ;;  %v10110_v19 = vpack.c.bf16 %v3614_v34, %v3611_v60  ;;  %v10121_v40 = vpack.c.bf16 %v3594_v22, %v3591_v18  ;;  %v3704_v60 = vpack.c.bf16 %v3665_v47, %v3664_v36  ;;  %v11256_v34 = vpack.c.bf16 %v9988_v39, %v9986_v29  ;;  %v11288_v31 = vld [vmem:[#allocation67_spill] sm:$0xff] }
 0x60d   : > { %6026 = vmatpush3.bf16.msra.mxu0 %v3682_v0  ;;  %v11254_v46 = vld [vmem:[#allocation38_spill] sm:$0xff]  ;;  %v10117_v0 = vld [vmem:[#allocation2 + $0x60] sm:$0xff]  ;;  %v3722_v18 = vrot.slane %v3720_v35, 1  ;;  %v4049_v22 = vpack.c.bf16 %v3980_v10, %v3977_v45 }
 0x60e   : > { %v3971_v61 = vmul.f32 %v3965_v15, %v11254_v46  ;;  %6027 = vmatprep.subr.bf16.mxu0 %v3691_v27  ;;  %v3761_v15 = vshll.u32 %v10064_v50, 16  ;;  %v10115_v27 = vpack.c.bf16 %v3601_v38, %v3598_v21  ;;  %v10119_v42 = vld [vmem:[#allocation2 + $0x78] sm:$0xff]  ;;  %v11255_v46 = vpack.c.bf16 %v10027_v30, %v10025_v25  ;;  %v10139_v30 = vld [vmem:[#allocation2 + $0xb0] sm:$0xff] }
 0x60f   : > { %6511 = vmatpush3.bf16.msra.mxu1 %v3702_v33  ;;  %v4028_v33 = vld [vmem:[#allocation11 + $0xa00] sm:$0xff]  ;;  %v3617_v21 = vmul.f32 %v3590_v53, %v11170_v44  ;;  %v11257_v38 = vpack.c.bf16 %v11223_v41, %v11217_v56  ;;  %v10137_v25 = vld [vmem:[#allocation2 + $0x98] sm:$0xff]  ;;  %v11258_v53 = vpack.c.bf16 %v9992_v11, %v9990_v52  ;;  %v3785_v39 = vshll.u32 %v10110_v19, 16 }
 0x610   : > { %3467 = vmatmul.mubr.bf16.gmra.mrb[76].mxu0 %v11255_v46  ;;  %6512 = vmatprep.subr.bf16.mxu1 %v3703_v54  ;;  %v4046_v36 = vpack.c.bf16 %v3974_v26, %v3971_v61  ;;  %v3763_v29 = vrot.slane %v3761_v15, 1  ;;  %v3597_v56 = vmul.f32 %v10117_v0, %v11235_v16  ;;  %v3600_v35 = vmul.f32 %v10119_v42, %v11236_v14  ;;  %v10157_v15 = vld [vmem:[#allocation2 + $0x90] sm:$0xff] }
 0x611   : > { %6028 = vmatpush3.bf16.msra.mxu0 %v11256_v34  ;;  %3474 = vmatprep.mubr.bf16.mxu0 %v11257_v38  ;;  %v3718_v41 = vshrl.u32 %v10047_v8, 16  ;;  %v3725_v47 = vshll.u32 %v10115_v27, 16  ;;  %v4075_v61 = vpack.c.bf16 %v4029_v13, %v4028_v33  ;;  %v3708_v26 = vshll.u32 %v10121_v40, 16  ;;  %11259 = vst [vmem:[#allocation61_spill] sm:$0xff] %v10157_v15  ;;  %v4030_v33 = vld [vmem:[#allocation11 + $0xa10] sm:$0xff]  ;;  %v4031_v13 = vld [vmem:[#allocation11 + $0xa18] sm:$0xff] }
 0x612   : > { %6029 = vmatprep.subr.bf16.mxu0 %v11258_v53  ;;  %v3781_v52 = vshrl.u32 %v10064_v50, 16  ;;  %v3604_v11 = vmul.f32 %v10137_v25, %v11242_v5  ;;  %v3607_v45 = vmul.f32 %v10139_v30, %v11243_v23  ;;  %v3680_v10 = vpack.c.bf16 %v3617_v21, %v3617_v21 }
 0x613   : > { %6513 = vmatpush3.bf16.msra.mxu1 %v3703_v54  ;;  %v10159_v54 = vld [vmem:[#allocation2 + $0xa8] sm:$0xff]  ;;  %v11260_v8 = vpack.c.bf16 %v9996_v4, %v9994_v55  ;;  %v4118_v34 = vshrl.u32 %v4046_v36, 16  ;;  %v4121_v38 = vshll.u32 %v4046_v36, 16  ;;  %v4126_v50 = vshrl.u32 %v4049_v22, 16 }
 0x614   : > { %6514 = vmatprep.subr.bf16.mxu1 %v3704_v60  ;;  %v4129_v53 = vshll.u32 %v4049_v22, 16  ;;  %v11261_v46 = vpack.c.bf16 %v10009_v62, %v10003_v49  ;;  %v3723_v63 = vor.u32 %v3722_v18, %v3718_v41  ;;  %v3783_v21 = vor.u32 %v3781_v52, %v3763_v29 }
 0x615   : > { %6030 = vmatpush3.bf16.msra.mxu0 %v11260_v8  ;;  %v3787_v51 = vrot.slane %v3785_v39, 1  ;;  %v10167_v14 = vpack.c.bf16 %v3600_v35, %v3597_v56  ;;  %v3706_v16 = vshrl.u32 %v10121_v40, 16  ;;  %v3710_v55 = vrot.slane %v3708_v26, 1  ;;  %v10182_v40 = vld [vmem:[#allocation2 + $0xc8] sm:$0xff]  ;;  %v11265_v39 = vld [vmem:[#allocation69_spill] sm:$0xff] }
 0x616   : > { %6031 = vmatprep.subr.bf16.mxu0 %v11261_v46  ;;  %v3603_v4 = vmul.f32 %v10157_v15, %v11242_v5  ;;  %v3606_v36 = vmul.f32 %v10159_v54, %v11243_v23  ;;  %v11262_v22 = vpack.c.bf16 %v11229_v17, %v9619_v57  ;;  %v3764_v49 = vsel %vm2678_vm5, %v3759_v7, %v3763_v29  ;;  %v11266_v56 = vld [vmem:[#allocation76_spill] sm:$0xff]  ;;  %v4033_v17 = vld [vmem:[#allocation11 + $0xa28] sm:$0xff]  ;;  %v10310_v23 = vld [vmem:[#allocation11 + $0x9d8] sm:$0xff] }
 0x617   : > { %6515 = vmatpush3.bf16.msra.mxu1 %v3704_v60  ;;  %v10178_v62 = vpack.c.bf16 %v3607_v45, %v3604_v11  ;;  %v4076_v18 = vpack.c.bf16 %v4031_v13, %v4030_v33  ;;  %v10180_v60 = vshll.u32 %v3680_v10, 16  ;;  %11263 = vst [vmem:[#allocation57_spill] sm:$0xff] %v10182_v40  ;;  %v11264_v46 = vpack.c.bf16 %v10013_v28, %v10011_v37  ;;  %v4032_v57 = vld [vmem:[#allocation11 + $0xa20] sm:$0xff]  ;;  %v10198_v28 = vld [vmem:[#allocation11 + $0x988] sm:$0xff]  ;;  %v10269_v33 = vld [vmem:[#allocation11 + $0x9b0] sm:$0xff] }
 0x618   : > { %3475 = vmatmul.mubr.bf16.gmra.mrb[80].mxu0 %v11262_v22  ;;  %6524 = vmatprep.subr.bf16.mxu1 %v4075_v61  ;;  %v11267_v35 = vpack.c.bf16 %v11265_v39, %v11266_v56  ;;  %v10190_v41 = vrot.slane %v4118_v34, 3  ;;  %v4123_v7 = vrot.slane %v4121_v38, 4  ;;  %v4128_v29 = vrot.slane %v4126_v50, 3  ;;  %v10196_v37 = vld [vmem:[#allocation11 + $0x980] sm:$0xff]  ;;  %v10209_v38 = vld [vmem:[#allocation11 + $0x990] sm:$0xff]  ;;  %v10211_v50 = vld [vmem:[#allocation11 + $0x998] sm:$0xff] }
 0x619   : > { %6032 = vmatpush3.bf16.msra.mxu0 %v11264_v46  ;;  %v4131_v26 = vrot.slane %v4129_v53, 4  ;;  %v11268_v52 = vpack.c.bf16 %v10043_v3, %v10041_v24  ;;  %v3788_v11 = vsel %vm2678_vm5, %v3783_v21, %v3787_v51  ;;  %v3713_v45 = vshll.u32 %v10167_v14, 16  ;;  %v10201_v10 = vld [vmem:[#allocation11 + $0x900] sm:$0xff]  ;;  %v10206_v3 = vld [vmem:[#allocation11 + $0x908] sm:$0xff]  ;;  %v10218_v22 = vld [vmem:[#allocation11 + $0x918] sm:$0xff] }
 0x61a   : > { %3482 = vmatprep.mubr.bf16.mxu0 %v11267_v35  ;;  %6517 = vmatmul.mubr.bf16.vlgmr.msra.gmra.mrb[8].mxu1 %v3764_v49  ;;  %v3805_v8 = vshrl.u32 %v10110_v19, 16  ;;  %v3727_v13 = vrot.slane %v3725_v47, 1  ;;  %v3711_v24 = vor.u32 %v3710_v55, %v3706_v16  ;;  %v3749_v34 = vshrl.u32 %v10115_v27, 16  ;;  %v10216_v19 = vld [vmem:[#allocation11 + $0x910] sm:$0xff]  ;;  %v10221_v55 = vld [vmem:[#allocation11 + $0x9a0] sm:$0xff]  ;;  %v11269_v27 = vld [vmem:[#allocation65_spill] sm:$0xff] }
 0x61b   : > { %6033 = vmatprep.subr.bf16.mxu0 %v11268_v52  ;;  %6520 = vmatprep.mubr.bf16.mxu1 %v3788_v11  ;;  %v10213_v53 = vpack.c.bf16 %v3606_v36, %v3603_v4  ;;  %v3753_v21 = vshll.u32 %v10178_v62, 16  ;;  %v3811_v16 = vrot.slane %v10180_v60, 1  ;;  %v11270_v49 = vld [vmem:[#allocation74_spill] sm:$0xff]  ;;  %v10226_v56 = vld [vmem:[#allocation11 + $0x9a8] sm:$0xff]  ;;  %v4124_v4 = vor.u32 %v4123_v7, %v10190_v41 }
 0x61c   : > { %6525 = vmatpush3.bf16.msra.mxu1 %v4075_v61  ;;  %v3807_v47 = vor.u32 %v3805_v8, %v3787_v51  ;;  %v4077_v61 = vpack.c.bf16 %v4033_v17, %v4032_v57  ;;  %v11271_v46 = vpack.c.bf16 %v11269_v27, %v11270_v49  ;;  %v10229_v36 = vor.u32 %v4131_v26, %v4128_v29  ;;  %v11272_v35 = vld [vmem:[#allocation50_spill] sm:$0xff]  ;;  %v4035_v57 = vld [vmem:[#allocation11 + $0xa38] sm:$0xff]  ;;  %v4037_v49 = vld [vmem:[#allocation11 + $0xa48] sm:$0xff] }
 0x61d   : > { %6526 = vmatprep.subr.bf16.mxu1 %v4076_v18  ;;  %v3610_v52 = vmul.f32 %v10182_v40, %v11272_v35  ;;  %v11273_v11 = vld [vmem:[#allocation66_spill] sm:$0xff]  ;;  %v11274_v17 = vpack.c.bf16 %v10072_v58, %v10070_v59  ;;  %v3728_v8 = vsel %vm2678_vm5, %v3723_v63, %v3727_v13  ;;  %v4067_v27 = vpack.c.bf16 %v10198_v28, %v10196_v37  ;;  %v10248_v58 = vld [vmem:[#allocation2 + $0xc0] sm:$0xff] }
 0x61e   : > { %6034 = vmatpush3.bf16.msra.mxu0 %v11271_v46  ;;  %v3613_v51 = vmul.f32 %v11265_v39, %v11273_v11  ;;  %v4034_v60 = vld [vmem:[#allocation11 + $0xa30] sm:$0xff]  ;;  %v3715_v41 = vrot.slane %v3713_v45, 1  ;;  %v3751_v29 = vor.u32 %v3749_v34, %v3727_v13  ;;  %v3745_v59 = vshll.u32 %v10213_v53, 16  ;;  %v10258_v34 = vld [vmem:[#allocation11 + $0x928] sm:$0xff]  ;;  %v4036_v13 = vld [vmem:[#allocation11 + $0xa40] sm:$0xff] }
 0x61f   : > { %6035 = vmatprep.subr.bf16.mxu0 %v11274_v17  ;;  %v3589_v63 = vld [vmem:[#allocation2 + $0xf8] sm:$0x1]  ;;  %v11275_v37 = vpack.c.bf16 %v10062_v32, %v11230_v9  ;;  %v3755_v45 = vrot.slane %v3753_v21, 1  ;;  %v4078_v46 = vpack.c.bf16 %v4035_v57, %v4034_v60  ;;  %v11276_v17 = vpack.c.bf16 %v10087_v20, %v10085_v2  ;;  %v10274_v20 = vld [vmem:[#allocation11 + $0x9b8] sm:$0xff]  ;;  %v10287_v57 = vld [vmem:[#allocation11 + $0x9c0] sm:$0xff] }
 0x620   : > { %6527 = vmatpush3.bf16.msra.mxu1 %v4076_v18  ;;  %v3716_v28 = vsel %vm2678_vm5, %v3711_v24, %v3715_v41  ;;  %v10256_v18 = vld [vmem:[#allocation11 + $0x920] sm:$0xff]  ;;  %v3812_v9 = vsel %vm2678_vm5, %v3807_v47, %v3811_v16  ;;  %v4133_v24 = vsel %vm2213_vm4, %v4124_v4, %v10229_v36  ;;  %v3741_v21 = vshrl.u32 %v10167_v14, 16  ;;  %v10276_v2 = vld [vmem:[#allocation11 + $0x930] sm:$0xff]  ;;  %v10278_v47 = vld [vmem:[#allocation11 + $0x938] sm:$0xff] }
 0x621   : > { %3483 = vmatmul.mubr.bf16.gmra.mrb[84].mxu0 %v11275_v37  ;;  %6528 = vmatprep.subr.bf16.mxu1 %v4077_v61  ;;  %v10267_v37 = vpack.c.bf16 %v3613_v51, %v3610_v52  ;;  %v11277_v60 = vpack.c.bf16 %v10092_v48, %v10090_v1  ;;  %v3609_v14 = vmul.f32 %v10248_v58, %v11272_v35  ;;  %v3747_v48 = vrot.slane %v3745_v59, 1  ;;  %v4043_v40 = vld [vmem:[#allocation11 + $0xa78] sm:$0xff] }
 0x622   : > { %6036 = vmatpush3.bf16.msra.mxu0 %v11276_v17  ;;  %3857 = vmatprep.mubr.bf16.mxu0 %v3728_v8  ;;  %v3612_v16 = vmul.f32 %v10062_v32, %v11273_v11  ;;  %v3616_v4 = vmul.f32 %v3589_v63, %v11170_v44  ;;  %v3756_v52 = vsel %vm2678_vm5, %v3751_v29, %v3755_v45  ;;  %v3773_v51 = vshrl.u32 %v10178_v62, 16  ;;  %v10289_v8 = vld [vmem:[#allocation11 + $0x9c8] sm:$0xff]  ;;  %v10291_v17 = vld [vmem:[#allocation11 + $0x940] sm:$0xff]  ;;  %v4038_v29 = vld [vmem:[#allocation11 + $0xa50] sm:$0xff] }
 0x623   : > { %6037 = vmatprep.subr.bf16.mxu0 %v11277_v60  ;;  %6521 = vmatmul.mubr.bf16.gmra.mrb[12].mxu1 %v3812_v9  ;;  %v3743_v1 = vor.u32 %v3741_v21, %v3715_v41  ;;  %v4079_v60 = vpack.c.bf16 %v4037_v49, %v4036_v13  ;;  %v10295_v63 = vld [vmem:[#allocation11 + $0x948] sm:$0xff]  ;;  %v11279_v41 = vld [vmem:[#allocation44_spill] sm:$0xff]  ;;  %v11281_v62 = vld [vmem:[#allocation59_spill] sm:$0xff]  ;;  %v11282_v7 = vpack.c.bf16 %v10107_v43, %v10105_v6  ;;  %v3777_v35 = vshll.u32 %v10267_v37, 16 }
 0x624   : > { %6529 = vmatpush3.bf16.msra.mxu1 %v4077_v61  ;;  %6540 = vmatprep.mubr.bf16.mxu1 %v4133_v24  ;;  %v4039_v61 = vld [vmem:[#allocation11 + $0xa58] sm:$0xff]  ;;  %v11280_v21 = vld [vmem:[#allocation45_spill] sm:$0xff]  ;;  %v3775_v11 = vor.u32 %v3773_v51, %v3755_v45  ;;  %v3765_v13 = vshrl.u32 %v10213_v53, 16  ;;  %v10308_v9 = vld [vmem:[#allocation11 + $0x9d0] sm:$0xff]  ;;  %v3679_v5 = vpack.c.bf16 %v3616_v4, %v3616_v4 }
 0x625   : > { %6530 = vmatprep.subr.bf16.mxu1 %v4078_v46  ;;  %v11278_v24 = vld [vmem:[#allocation43_spill] sm:$0xff]  ;;  %v3986_v26 = vmul.f32 %v11281_v62, %v11280_v21  ;;  %v10314_v62 = vpack.c.bf16 %v3612_v16, %v3609_v14  ;;  %v4040_v43 = vld [vmem:[#allocation11 + $0xa60] sm:$0xff]  ;;  %v11285_v45 = vld [vmem:[#allocation46_spill] sm:$0xff]  ;;  %v3748_v12 = vsel %vm2678_vm5, %v3743_v1, %v3747_v48  ;;  %v3779_v39 = vrot.slane %v3777_v35, 1 }
 0x626   : > { %v3983_v59 = vmul.f32 %v11279_v41, %v11278_v24  ;;  %6038 = vmatpush3.bf16.msra.mxu0 %v11282_v7  ;;  %v10312_v41 = vld [vmem:[#allocation11 + $0x950] sm:$0xff]  ;;  %v10316_v6 = vld [vmem:[#allocation11 + $0x958] sm:$0xff]  ;;  %v4041_v7 = vld [vmem:[#allocation11 + $0xa68] sm:$0xff]  ;;  %v10327_v14 = vor.u32 %v3765_v13, %v3747_v48 }
 0x627   : > { %11283 = vst [vmem:[#allocation49_spill] sm:$0xff] %v10312_v41  ;;  %6075 = vmatprep.subr.bf16.mxu0 %v4067_v27  ;;  %11284 = vst [vmem:[#allocation58_spill] sm:$0xff] %v10316_v6  ;;  %v11286_v51 = vld [vmem:[#allocation70_spill] sm:$0xff]  ;;  %v11287_v49 = vld [vmem:[#allocation47_spill] sm:$0xff]  ;;  %v4081_v13 = vpack.c.bf16 %v4041_v7, %v4040_v43 }
 0x628   : > { %v3989_v32 = vmul.f32 %v11286_v51, %v11285_v45  ;;  %v3992_v53 = vmul.f32 %v11288_v31, %v11287_v49  ;;  %6531 = vmatpush3.bf16.msra.mxu1 %v4078_v46  ;;  %v3588_v16 = vld [vmem:[#allocation2 + $0xf0] sm:$0x1]  ;;  %v3797_v51 = vshrl.u32 %v10267_v37, 16  ;;  %v4080_v31 = vpack.c.bf16 %v4039_v61, %v4038_v29  ;;  %v3964_v49 = vld [vmem:[#allocation2 + $0x38] sm:$0x80]  ;;  %v10339_v27 = vld [vmem:[#allocation11 + $0x9e0] sm:$0xff] }
 0x629   : > { %3858 = vmatmul.mubr.bf16.vlgmr.msra.gmra.mrb[88].mxu0 %v3716_v28  ;;  %6532 = vmatprep.subr.bf16.mxu1 %v4079_v60  ;;  %v4052_v1 = vpack.c.bf16 %v3986_v26, %v3983_v59  ;;  %v11289_v46 = vpack.c.bf16 %v10206_v3, %v10201_v10  ;;  %11290 = vst [vmem:[#allocation60_spill] sm:$0xff] %v10339_v27  ;;  %v10341_v4 = vld [vmem:[#allocation11 + $0x9e8] sm:$0xff]  ;;  %v3769_v10 = vshll.u32 %v10314_v62, 16  ;;  %v10347_v3 = vshll.u32 %v3679_v5, 16  ;;  %v10352_v29 = vld [vmem:[#allocation11 + $0x960] sm:$0xff]  ;;  %v11293_v59 = vld [vmem:[#allocation38_spill] sm:$0xff] }
 0x62a   : > { %3865 = vmatprep.mubr.bf16.mxu0 %v3756_v52  ;;  %11291 = vst [vmem:[#allocation64_spill] sm:$0xff] %v10341_v4  ;;  %v11292_v26 = vpack.c.bf16 %v10211_v50, %v10209_v38  ;;  %v10350_v35 = vmul.f32 %v3588_v16, %v11170_v44  ;;  %v4055_v37 = vpack.c.bf16 %v3992_v53, %v3989_v32  ;;  %v3968_v52 = vld [vmem:[#allocation2 + $0x100] sm:$0x7f]  ;;  %v10354_v61 = vld [vmem:[#allocation11 + $0x968] sm:$0xff]  ;;  %v11294_v7 = vld [vmem:[#allocation40_spill] sm:$0xff] }
 0x62b   : > { %6076 = vmatpush3.bf16.msra.mxu0 %v11289_v46  ;;  %v3970_v43 = vmul.f32 %v3964_v49, %v11293_v59  ;;  %v11295_v46 = vld [vmem:[#allocation56_spill] sm:$0xff]  ;;  %v11296_v50 = vld [vmem:[#allocation41_spill] sm:$0xff]  ;;  %v11298_v5 = vld [vmem:[#allocation39_spill] sm:$0xff]  ;;  %v3780_v16 = vsel %vm2678_vm5, %v3775_v11, %v3779_v39  ;;  %v11301_v49 = vpack.c.bf16 %v10218_v22, %v10216_v19  ;;  %v11303_v32 = vpack.c.bf16 %v10226_v56, %v10221_v55 }
 0x62c   : > { %6077 = vmatprep.subr.bf16.mxu0 %v11292_v26  ;;  %6533 = vmatpush3.bf16.msra.mxu1 %v4079_v60  ;;  %v3973_v38 = vmul.f32 %v11295_v46, %v11294_v7  ;;  %v11297_v26 = vld [vmem:[#allocation75_spill] sm:$0xff]  ;;  %v11299_v48 = vld [vmem:[#allocation72_spill] sm:$0xff]  ;;  %v4153_v60 = vshrl.u32 %v4052_v1, 16  ;;  %v3799_v46 = vor.u32 %v3797_v51, %v3779_v39  ;;  %v4042_v6 = vld [vmem:[#allocation11 + $0xa70] sm:$0xff]  ;;  %v3771_v27 = vrot.slane %v3769_v10, 1 }
 0x62d   : > { %v3976_v28 = vmul.f32 %v11297_v26, %v11296_v50  ;;  %v3979_v41 = vmul.f32 %v11299_v48, %v11298_v5  ;;  %6534 = vmatprep.subr.bf16.mxu1 %v4080_v31  ;;  %v11300_v53 = vld [vmem:[#allocation71_spill] sm:$0xff]  ;;  %v3789_v26 = vshrl.u32 %v10314_v62, 16  ;;  %v4156_v48 = vshll.u32 %v4052_v1, 16  ;;  %v3963_v45 = vld [vmem:[#allocation2 + $0x30] sm:$0x80] }
 0x62e   : > { %v11302_v11 = vld [vmem:[#allocation37_spill] sm:$0xff]  ;;  %v4065_v44 = vpack.c.bf16 %v10354_v61, %v10352_v29  ;;  %v4180_v4 = vshrl.u32 %v4055_v37, 16  ;;  %v4183_v19 = vshll.u32 %v4055_v37, 16  ;;  %v3803_v39 = vrot.slane %v10347_v3, 1  ;;  %v4400_v3 = vld [vmem:[#allocation11 + $0xb80] sm:$0xff]  ;;  %v4386_v29 = vld [vmem:[#allocation11 + $0xb10] sm:$0xff] }
 0x62f   : > { %6078 = vmatpush3.bf16.msra.mxu0 %v11301_v49  ;;  %v3995_v15 = vmul.f32 %v3968_v52, %v11302_v11  ;;  %v3678_v22 = vpack.c.bf16 %v10350_v35, %v10350_v35  ;;  %v4045_v62 = vpack.c.bf16 %v3973_v38, %v3970_v43  ;;  %v4048_v51 = vpack.c.bf16 %v3979_v41, %v3976_v28  ;;  %v4401_v37 = vld [vmem:[#allocation11 + $0xb88] sm:$0xff]  ;;  %v4402_v38 = vld [vmem:[#allocation11 + $0xb90] sm:$0xff]  ;;  %v11321_v61 = vld [vmem:[#allocation68_spill] sm:$0xff] }
 0x630   : > { %6079 = vmatprep.subr.bf16.mxu0 %v11303_v32  ;;  %6535 = vmatpush3.bf16.msra.mxu1 %v4080_v31  ;;  %v4082_v1 = vpack.c.bf16 %v4043_v40, %v4042_v6  ;;  %v4155_v52 = vrot.slane %v4153_v60, 3  ;;  %v3969_v55 = vmul.f32 %v3963_v45, %v11293_v59  ;;  %v3972_v56 = vmul.f32 %v11300_v53, %v11294_v7 }
 0x631   : > { %3866 = vmatmul.mubr.bf16.gmra.mrb[92].mxu0 %v3748_v12  ;;  %6536 = vmatprep.subr.bf16.mxu1 %v4081_v13  ;;  %v11304_v10 = vpack.c.bf16 %v10258_v34, %v10256_v18  ;;  %v4158_v31 = vrot.slane %v4156_v48, 4  ;;  %v3975_v41 = vmul.f32 %v10117_v0, %v11296_v50  ;;  %v3978_v12 = vmul.f32 %v10119_v42, %v11298_v5  ;;  %v4403_v50 = vld [vmem:[#allocation11 + $0xb98] sm:$0xff] }
 0x632   : > { %3873 = vmatprep.mubr.bf16.mxu0 %v3780_v16  ;;  %v4058_v40 = vpack.c.bf16 %v3995_v15, %v3995_v15  ;;  %v11305_v6 = vpack.c.bf16 %v10274_v20, %v10269_v33  ;;  %v4182_v45 = vrot.slane %v4180_v4, 3  ;;  %v4185_v28 = vrot.slane %v4183_v19, 4 }
 0x633   : > { %6080 = vmatpush3.bf16.msra.mxu0 %v11304_v10  ;;  %v3982_v18 = vmul.f32 %v10137_v25, %v11278_v24  ;;  %v3985_v34 = vmul.f32 %v10139_v30, %v11280_v21  ;;  %v3772_v35 = vsel %vm2678_vm5, %v10327_v14, %v3771_v27  ;;  %v4101_v59 = vshrl.u32 %v4045_v62, 16  ;;  %v4027_v10 = vld [vmem:[#allocation11 + $0x9f8] sm:$0xff] }
 0x634   : > { %6081 = vmatprep.subr.bf16.mxu0 %v11305_v6  ;;  %6537 = vmatpush3.bf16.msra.mxu1 %v4081_v13  ;;  %v4104_v43 = vshll.u32 %v4045_v62, 16  ;;  %v4109_v42 = vshrl.u32 %v4048_v51, 16  ;;  %v4112_v15 = vshll.u32 %v4048_v51, 16  ;;  %v4444_v7 = vpack.c.bf16 %v4401_v37, %v4400_v3 }
 0x635   : > { %6538 = vmatprep.subr.bf16.mxu1 %v4082_v1  ;;  %v4044_v33 = vpack.c.bf16 %v3972_v56, %v3969_v55  ;;  %v4422_v20 = vpack.c.bf16 %v10248_v58, %v10159_v54  ;;  %v11306_v25 = vpack.c.bf16 %v10278_v47, %v10276_v2  ;;  %v4159_v4 = vor.u32 %v4158_v31, %v4155_v52  ;;  %v4026_v56 = vld [vmem:[#allocation11 + $0x9f0] sm:$0xff] }
 0x636   : > { %v4047_v30 = vpack.c.bf16 %v3978_v12, %v3975_v41  ;;  %v4207_v14 = vshrl.u32 %v4058_v40, 16  ;;  %v4210_v13 = vshll.u32 %v4058_v40, 16  ;;  %v11307_v5 = vpack.c.bf16 %v10289_v8, %v10287_v57  ;;  %v11310_v41 = vld [vmem:[#allocation61_spill] sm:$0xff]  ;;  %v4010_v40 = vld [vmem:[#allocation11 + $0x970] sm:$0xff] }
 0x637   : > { %6082 = vmatpush3.bf16.msra.mxu0 %v11306_v25  ;;  %v3791_v16 = vor.u32 %v3789_v26, %v3771_v27  ;;  %v3793_v32 = vshll.u32 %v3678_v22, 16  ;;  %v10408_v60 = vor.u32 %v4185_v28, %v4182_v45  ;;  %v4051_v49 = vpack.c.bf16 %v3985_v34, %v3982_v18  ;;  %v4405_v22 = vld [vmem:[#allocation11 + $0xba8] sm:$0xff]  ;;  %v11311_v45 = vld [vmem:[#allocation46_spill] sm:$0xff]  ;;  %v11313_v34 = vld [vmem:[#allocation47_spill] sm:$0xff] }
 0x638   : > { %6083 = vmatprep.subr.bf16.mxu0 %v11307_v5  ;;  %v3804_v48 = vsel %vm2678_vm5, %v3799_v46, %v3803_v39  ;;  %v4103_v19 = vrot.slane %v4101_v59, 3  ;;  %v4106_v2 = vrot.slane %v4104_v43, 4  ;;  %v4111_v47 = vrot.slane %v4109_v42, 3  ;;  %6539 = vmatpush3.bf16.msra.mxu1 %v4082_v1  ;;  %v4404_v39 = vld [vmem:[#allocation11 + $0xba0] sm:$0xff]  ;;  %v11312_v28 = vld [vmem:[#allocation57_spill] sm:$0xff]  ;;  %v11315_v43 = vld [vmem:[#allocation58_spill] sm:$0xff] }
 0x639   : > { %3874 = vmatmul.mubr.bf16.gmra.mrb[96].mxu0 %v3772_v35  ;;  %v4114_v62 = vrot.slane %v4112_v15, 4  ;;  %6548 = vmatprep.subr.bf16.mxu1 %v4444_v7  ;;  %v4084_v51 = vshrl.u32 %v4044_v33, 16  ;;  %v4087_v52 = vshll.u32 %v4044_v33, 16  ;;  %v4445_v55 = vpack.c.bf16 %v4403_v50, %v4402_v38  ;;  %v11314_v35 = vld [vmem:[#allocation69_spill] sm:$0xff]  ;;  %v11318_v38 = vld [vmem:[#allocation64_spill] sm:$0xff] }
 0x63a   : > { %v11308_v57 = vpack.c.bf16 %v10295_v63, %v10291_v17  ;;  %3881 = vmatprep.mubr.bf16.mxu0 %v3804_v48  ;;  %v4160_v8 = vsel %vm2213_vm4, %v10229_v36, %v4159_v4  ;;  %v4092_v27 = vshrl.u32 %v4047_v30, 16  ;;  %v4209_v46 = vrot.slane %v4207_v14, 3  ;;  %v11316_v42 = vld [vmem:[#allocation49_spill] sm:$0xff]  ;;  %v11319_v50 = vld [vmem:[#allocation60_spill] sm:$0xff] }
 0x63b   : > { %v4212_v26 = vrot.slane %v4210_v13, 4  ;;  %v11309_v1 = vpack.c.bf16 %v10310_v23, %v10308_v9  ;;  %6541 = vmatmul.mubr.bf16.vlgmr.msra.gmra.mrb[8].mxu1 %v4160_v8  ;;  %v4187_v17 = vsel %vm2213_vm4, %v4159_v4, %v10408_v60  ;;  %v4095_v63 = vshll.u32 %v4047_v30, 16  ;;  %v4406_v4 = vld [vmem:[#allocation11 + $0xbb0] sm:$0xff]  ;;  %v4407_v30 = vld [vmem:[#allocation11 + $0xbb8] sm:$0xff]  ;;  %v4384_v13 = vld [vmem:[#allocation11 + $0xb00] sm:$0xff] }
 0x63c   : > { %6084 = vmatpush3.bf16.msra.mxu0 %v11308_v57  ;;  %v4144_v31 = vshrl.u32 %v4051_v49, 16  ;;  %v4147_v3 = vshll.u32 %v4051_v49, 16  ;;  %v3795_v37 = vrot.slane %v3793_v32, 1  ;;  %v4107_v36 = vor.u32 %v4106_v2, %v4103_v19  ;;  %6544 = vmatprep.mubr.bf16.mxu1 %v4187_v17  ;;  %v4385_v5 = vld [vmem:[#allocation11 + $0xb08] sm:$0xff] }
 0x63d   : > { %6085 = vmatprep.subr.bf16.mxu0 %v11309_v1  ;;  %6549 = vmatpush3.bf16.msra.mxu1 %v4444_v7  ;;  %v3981_v12 = vmul.f32 %v11310_v41, %v11278_v24  ;;  %v3984_v23 = vmul.f32 %v10159_v54, %v11280_v21  ;;  %v10425_v9 = vor.u32 %v4114_v62, %v4111_v47  ;;  %v4011_v24 = vld [vmem:[#allocation11 + $0x978] sm:$0xff]  ;;  %v4086_v33 = vrot.slane %v4084_v51, 3  ;;  %v4369_v1 = vld [vmem:[#allocation11 + $0xa88] sm:$0xff] }
 0x63e   : > { %6550 = vmatprep.subr.bf16.mxu1 %v4445_v55  ;;  %v4446_v6 = vpack.c.bf16 %v4405_v22, %v4404_v39  ;;  %v3988_v18 = vmul.f32 %v11312_v28, %v11311_v45  ;;  %v3991_v59 = vmul.f32 %v11314_v35, %v11313_v34  ;;  %v11317_v15 = vpack.c.bf16 %v11315_v43, %v11316_v42  ;;  %v4368_v22 = vld [vmem:[#allocation11 + $0xa80] sm:$0xff]  ;;  %v4411_v28 = vld [vmem:[#allocation11 + $0xbd8] sm:$0xff]  ;;  %v4389_v42 = vld [vmem:[#allocation11 + $0xb28] sm:$0xff] }
 0x63f   : > { %v4074_v7 = vpack.c.bf16 %v4027_v10, %v4026_v56  ;;  %v4089_v25 = vrot.slane %v4087_v52, 4  ;;  %v4213_v21 = vor.u32 %v4212_v26, %v4209_v46  ;;  %v11320_v14 = vpack.c.bf16 %v11318_v38, %v11319_v50  ;;  %v3967_v46 = vld [vmem:[#allocation2 + $0xf8] sm:$0x7f]  ;;  %v4388_v43 = vld [vmem:[#allocation11 + $0xb20] sm:$0xff] }
 0x640   : > { %6086 = vmatpush3.bf16.msra.mxu0 %v11317_v15  ;;  %v4094_v32 = vrot.slane %v4092_v27, 3  ;;  %v4097_v49 = vrot.slane %v4095_v63, 4  ;;  %v4146_v48 = vrot.slane %v4144_v31, 3  ;;  %v4149_v19 = vrot.slane %v4147_v3, 4  ;;  %v11322_v10 = vld [vmem:[#allocation62_spill] sm:$0xff]  ;;  %v11324_v3 = vld [vmem:[#allocation73_spill] sm:$0xff] }
 0x641   : > { %6087 = vmatprep.subr.bf16.mxu0 %v11320_v14  ;;  %v3796_v2 = vsel %vm2678_vm5, %v3791_v16, %v3795_v37  ;;  %6551 = vmatpush3.bf16.msra.mxu1 %v4445_v55  ;;  %v4050_v47 = vpack.c.bf16 %v3984_v23, %v3981_v12  ;;  %v4116_v62 = vsel %vm2213_vm4, %v4107_v36, %v10425_v9  ;;  %v4408_v16 = vld [vmem:[#allocation11 + $0xbc0] sm:$0xff]  ;;  %v4409_v55 = vld [vmem:[#allocation11 + $0xbc8] sm:$0xff] }
 0x642   : > { %3882 = vmatmul.mubr.bf16.gmra.mrb[100].mxu0 %v3796_v2  ;;  %6552 = vmatprep.subr.bf16.mxu1 %v4446_v6  ;;  %v4054_v51 = vpack.c.bf16 %v3991_v59, %v3988_v18  ;;  %v4447_v52 = vpack.c.bf16 %v4407_v30, %v4406_v4  ;;  %v4066_v57 = vpack.c.bf16 %v4011_v24, %v4010_v40  ;;  %v4370_v59 = vld [vmem:[#allocation11 + $0xa90] sm:$0xff]  ;;  %v3966_v30 = vld [vmem:[#allocation2 + $0xf0] sm:$0x7f]  ;;  %v4412_v50 = vld [vmem:[#allocation11 + $0xbe0] sm:$0xff] }
 0x643   : > { %4259 = vmatprep.mubr.bf16.mxu0 %v4116_v62  ;;  %v4436_v8 = vpack.c.bf16 %v4385_v5, %v4384_v13  ;;  %v4214_v27 = vsel %vm2213_vm4, %v10408_v60, %v4213_v21  ;;  %v4090_v26 = vor.u32 %v4089_v25, %v4086_v33  ;;  %v10445_v39 = vor.u32 %v4097_v49, %v4094_v32  ;;  %v4413_v14 = vld [vmem:[#allocation11 + $0xbe8] sm:$0xff]  ;;  %v4372_v13 = vld [vmem:[#allocation11 + $0xaa0] sm:$0xff]  ;;  %v4592_v32 = vld [vmem:[#allocation2 + $0x58] sm:$0xfe] }
 0x644   : > { %6088 = vmatpush3.bf16.msra.mxu0 %v4065_v44  ;;  %v10447_v56 = vor.u32 %v4149_v19, %v4146_v48  ;;  %6545 = vmatmul.mubr.bf16.gmra.mrb[12].mxu1 %v4214_v27  ;;  %v4387_v44 = vld [vmem:[#allocation11 + $0xb18] sm:$0xff]  ;;  %v11323_v17 = vpack.c.bf16 %v11321_v61, %v11322_v10  ;;  %v4135_v60 = vshrl.u32 %v4050_v47, 16  ;;  %v4138_v63 = vshll.u32 %v4050_v47, 16  ;;  %v4373_v5 = vld [vmem:[#allocation11 + $0xaa8] sm:$0xff]  ;;  %v4390_v48 = vld [vmem:[#allocation11 + $0xb30] sm:$0xff] }
 0x645   : > { %6089 = vmatprep.subr.bf16.mxu0 %v4074_v7  ;;  %6553 = vmatpush3.bf16.msra.mxu1 %v4446_v6  ;;  %v3987_v31 = vmul.f32 %v10248_v58, %v11311_v45  ;;  %v3990_v37 = vmul.f32 %v11324_v3, %v11313_v34  ;;  %v4171_v36 = vshrl.u32 %v4054_v51, 16  ;;  %v4174_v41 = vshll.u32 %v4054_v51, 16  ;;  %v4410_v6 = vld [vmem:[#allocation11 + $0xbd0] sm:$0xff]  ;;  %v4371_v45 = vld [vmem:[#allocation11 + $0xa98] sm:$0xff]  ;;  %v4595_v51 = vld [vmem:[#allocation2 + $0x70] sm:$0xff] }
 0x646   : > { %6564 = vmatprep.mubr.bf16.mxu1 %v11323_v17  ;;  %6554 = vmatprep.subr.bf16.mxu1 %v4447_v52  ;;  %v4448_v12 = vpack.c.bf16 %v4409_v55, %v4408_v16  ;;  %v3994_v23 = vmul.f32 %v3967_v46, %v11302_v11  ;;  %v4428_v40 = vpack.c.bf16 %v4369_v1, %v4368_v22  ;;  %v4137_v15 = vrot.slane %v4135_v60, 3  ;;  %v4391_v19 = vld [vmem:[#allocation11 + $0xb38] sm:$0xff]  ;;  %v4414_v55 = vld [vmem:[#allocation11 + $0xbf0] sm:$0xff]  ;;  %v4392_v17 = vld [vmem:[#allocation11 + $0xb40] sm:$0xff] }
 0x647   : > { %v4099_v18 = vsel %vm2213_vm4, %v4090_v26, %v10445_v39  ;;  %v4437_v35 = vpack.c.bf16 %v4387_v44, %v4386_v29  ;;  %v4151_v34 = vsel %vm2213_vm4, %v10425_v9, %v10447_v56  ;;  %v4140_v7 = vrot.slane %v4138_v63, 4  ;;  %v4415_v46 = vld [vmem:[#allocation11 + $0xbf8] sm:$0xff]  ;;  %v4374_v22 = vld [vmem:[#allocation11 + $0xab0] sm:$0xff]  ;;  %v11325_v29 = vld [vmem:[#allocation48_spill] sm:$0xff] }
 0x648   : > { %6090 = vmatpush3.bf16.msra.mxu0 %v4066_v57  ;;  %v4053_v24 = vpack.c.bf16 %v3990_v37, %v3987_v31  ;;  %v4173_v33 = vrot.slane %v4171_v36, 3  ;;  %v4176_v25 = vrot.slane %v4174_v41, 4  ;;  %v4057_v21 = vpack.c.bf16 %v3994_v23, %v3994_v23  ;;  %v4375_v1 = vld [vmem:[#allocation11 + $0xab8] sm:$0xff]  ;;  %v4393_v60 = vld [vmem:[#allocation11 + $0xb48] sm:$0xff]  ;;  %v4598_v23 = vld [vmem:[#allocation2 + $0x88] sm:$0xff] }
 0x649   : > { %6127 = vmatprep.subr.bf16.mxu0 %v4436_v8  ;;  %6555 = vmatpush3.bf16.msra.mxu1 %v4447_v52  ;;  %v4449_v4 = vpack.c.bf16 %v4411_v28, %v4410_v6  ;;  %v4429_v38 = vpack.c.bf16 %v4371_v45, %v4370_v59  ;;  %v4438_v9 = vpack.c.bf16 %v4389_v42, %v4388_v43  ;;  %v11326_v61 = vld [vmem:[#allocation51_spill] sm:$0xff]  ;;  %v4677_v6 = vld [vmem:[#allocation11 + $0xd08] sm:$0xff] }
 0x64a   : > { %6556 = vmatprep.subr.bf16.mxu1 %v4448_v12  ;;  %v10462_v49 = vor.u32 %v4140_v7, %v4137_v15  ;;  %v4162_v2 = vshrl.u32 %v4053_v24, 16  ;;  %v4165_v47 = vshll.u32 %v4053_v24, 16  ;;  %v3993_v62 = vmul.f32 %v3966_v30, %v11302_v11  ;;  %v4601_v28 = vld [vmem:[#allocation2 + $0xa0] sm:$0xff]  ;;  %v4377_v59 = vld [vmem:[#allocation11 + $0xac8] sm:$0xff] }
 0x64b   : > { %4260 = vmatmul.mubr.bf16.vlgmr.msra.gmra.mrb[104].mxu0 %v4099_v18  ;;  %v10465_v52 = vor.u32 %v4176_v25, %v4173_v33  ;;  %v4198_v57 = vshrl.u32 %v4057_v21, 16  ;;  %v4201_v8 = vshll.u32 %v4057_v21, 16  ;;  %v4450_v27 = vpack.c.bf16 %v4413_v14, %v4412_v50  ;;  %v4395_v43 = vld [vmem:[#allocation11 + $0xb58] sm:$0xff]  ;;  %v11327_v33 = vld [vmem:[#allocation52_spill] sm:$0xff]  ;;  %v11328_v21 = vld [vmem:[#allocation53_spill] sm:$0xff] }
 0x64c   : > { %6128 = vmatpush3.bf16.msra.mxu0 %v4428_v40  ;;  %4267 = vmatprep.mubr.bf16.mxu0 %v4151_v34  ;;  %v4430_v16 = vpack.c.bf16 %v4373_v5, %v4372_v13  ;;  %v4439_v26 = vpack.c.bf16 %v4391_v19, %v4390_v48  ;;  %v4619_v44 = vmul.f32 %v4592_v32, %v11325_v29  ;;  %v4164_v63 = vrot.slane %v4162_v2, 3  ;;  %v4679_v50 = vld [vmem:[#allocation11 + $0xd18] sm:$0xff]  ;;  %v4396_v48 = vld [vmem:[#allocation11 + $0xb60] sm:$0xff]  ;;  %v4397_v19 = vld [vmem:[#allocation11 + $0xb68] sm:$0xff] }
 0x64d   : > { %6129 = vmatprep.subr.bf16.mxu0 %v4437_v35  ;;  %6557 = vmatpush3.bf16.msra.mxu1 %v4448_v12  ;;  %v4622_v10 = vmul.f32 %v4595_v51, %v11326_v61  ;;  %v4142_v11 = vsel %vm2213_vm4, %v10445_v39, %v10462_v49  ;;  %v4167_v31 = vrot.slane %v4165_v47, 4  ;;  %v4056_v3 = vpack.c.bf16 %v3993_v62, %v3993_v62  ;;  %v4676_v39 = vld [vmem:[#allocation11 + $0xd00] sm:$0xff]  ;;  %v4379_v13 = vld [vmem:[#allocation11 + $0xad8] sm:$0xff] }
 0x64e   : > { %6558 = vmatprep.subr.bf16.mxu1 %v4449_v4  ;;  %v4178_v37 = vsel %vm2213_vm4, %v10447_v56, %v10465_v52  ;;  %v4200_v36 = vrot.slane %v4198_v57, 3  ;;  %v4203_v41 = vrot.slane %v4201_v8, 4  ;;  %v4451_v12 = vpack.c.bf16 %v4415_v46, %v4414_v55  ;;  %v4376_v35 = vld [vmem:[#allocation11 + $0xac0] sm:$0xff]  ;;  %v4394_v56 = vld [vmem:[#allocation11 + $0xb50] sm:$0xff]  ;;  %v7198_v51 = vld [vmem:[#allocation2 + $0xa0] sm:$0xff] }
 0x64f   : > { %v4431_v40 = vpack.c.bf16 %v4375_v1, %v4374_v22  ;;  %v4440_v18 = vpack.c.bf16 %v4393_v60, %v4392_v17  ;;  %v10475_v45 = vpack.c.bf16 %v4622_v10, %v4619_v44  ;;  %v10477_v34 = vor.u32 %v4167_v31, %v4164_v63  ;;  %v7197_v62 = vld [vmem:[#allocation2 + $0x88] sm:$0xff]  ;;  %v7200_v46 = vld [vmem:[#allocation2 + $0xd0] sm:$0xff]  ;;  %v4398_v63 = vld [vmem:[#allocation11 + $0xb70] sm:$0xff] }
 0x650   : > { %6130 = vmatpush3.bf16.msra.mxu0 %v4429_v38  ;;  %v4189_v42 = vshrl.u32 %v4056_v3, 16  ;;  %v4192_v15 = vshll.u32 %v4056_v3, 16  ;;  %v4204_v7 = vor.u32 %v4203_v41, %v4200_v36  ;;  %v4723_v24 = vpack.c.bf16 %v4677_v6, %v4676_v39  ;;  %v4678_v38 = vld [vmem:[#allocation11 + $0xd10] sm:$0xff]  ;;  %v4680_v22 = vld [vmem:[#allocation11 + $0xd20] sm:$0xff]  ;;  %v4681_v1 = vld [vmem:[#allocation11 + $0xd28] sm:$0xff] }
 0x651   : > { %6131 = vmatprep.subr.bf16.mxu0 %v4438_v9  ;;  %6559 = vmatpush3.bf16.msra.mxu1 %v4449_v4  ;;  %v4625_v25 = vmul.f32 %v4598_v23, %v11327_v33  ;;  %v4628_v4 = vmul.f32 %v4601_v28, %v11328_v21  ;;  %v4432_v30 = vpack.c.bf16 %v4377_v59, %v4376_v35  ;;  %v4378_v9 = vld [vmem:[#allocation11 + $0xad0] sm:$0xff]  ;;  %v4758_v5 = vshll.u32 %v10475_v45, 16  ;;  %v4380_v10 = vld [vmem:[#allocation11 + $0xae0] sm:$0xff]  ;;  %v4399_v31 = vld [vmem:[#allocation11 + $0xb78] sm:$0xff] }
 0x652   : > { %6560 = vmatprep.subr.bf16.mxu1 %v4450_v27  ;;  %v4441_v14 = vpack.c.bf16 %v4395_v43, %v4394_v56  ;;  %v4169_v32 = vsel %vm2213_vm4, %v10462_v49, %v10477_v34  ;;  %v4191_v2 = vrot.slane %v4189_v42, 3  ;;  %v4194_v47 = vrot.slane %v4192_v15, 4  ;;  %v7199_v49 = vld [vmem:[#allocation2 + $0xb8] sm:$0xff]  ;;  %v4683_v6 = vld [vmem:[#allocation11 + $0xd38] sm:$0xff]  ;;  %v7201_v42 = vld [vmem:[#allocation2 + $0x50] sm:$0xff] }
 0x653   : > { %4268 = vmatmul.mubr.bf16.gmra.mrb[108].mxu0 %v4142_v11  ;;  %v4421_v57 = vpack.c.bf16 %v7198_v51, %v7197_v62  ;;  %v4205_v8 = vsel %vm2213_vm4, %v10465_v52, %v4204_v7  ;;  %v4433_v55 = vpack.c.bf16 %v4379_v13, %v4378_v9  ;;  %v4442_v44 = vpack.c.bf16 %v4397_v19, %v4396_v48  ;;  %v4381_v11 = vld [vmem:[#allocation11 + $0xae8] sm:$0xff]  ;;  %v4682_v39 = vld [vmem:[#allocation11 + $0xd30] sm:$0xff]  ;;  %v4383_v59 = vld [vmem:[#allocation11 + $0xaf8] sm:$0xff] }
 0x654   : > { %6132 = vmatpush3.bf16.msra.mxu0 %v4430_v16  ;;  %4275 = vmatprep.mubr.bf16.mxu0 %v4178_v37  ;;  %v10487_v16 = vpack.c.bf16 %v4628_v4, %v4625_v25  ;;  %v4760_v17 = vrot.slane %v4758_v5, 1  ;;  %v5779_v60 = vpop.f32.mrb[8].mxu0  ;;  %v4195_v52 = vor.u32 %v4194_v47, %v4191_v2  ;;  %v4725_v37 = vpack.c.bf16 %v4681_v1, %v4680_v22  ;;  %v4382_v35 = vld [vmem:[#allocation11 + $0xaf0] sm:$0xff]  ;;  %v7202_v15 = vld [vmem:[#allocation2 + $0x68] sm:$0xff]  ;;  %v4661_v25 = vld [vmem:[#allocation11 + $0xc88] sm:$0xff] }
 0x655   : > { %6133 = vmatprep.subr.bf16.mxu0 %v4439_v26  ;;  %6561 = vmatpush3.bf16.msra.mxu1 %v4450_v27  ;;  %v4724_v27 = vpack.c.bf16 %v4679_v50, %v4678_v38  ;;  %v4424_v26 = vpack.c.bf16 %v7200_v46, %v7199_v49  ;;  %v5780_v3 = vpop.f32.mrb[9].mxu0  ;;  %v4756_v36 = vshrl.u32 %v10475_v45, 16  ;;  %v4417_v7 = vpack.c.bf16 %v7202_v15, %v7201_v42  ;;  %v10497_v4 = vld [vmem:[#allocation2] sm:$0xff]  ;;  %v4685_v13 = vld [vmem:[#allocation11 + $0xd48] sm:$0xff]  ;;  %v4604_v2 = vld [vmem:[#allocation2 + $0xb8] sm:$0xff] }
 0x656   : > { %6562 = vmatprep.subr.bf16.mxu1 %v4451_v12  ;;  %v4763_v41 = vshll.u32 %v10487_v16, 16  ;;  %v5782_v23 = vpop.f32.mrb[10].mxu0  ;;  %v4196_v45 = vsel %vm2213_vm4, %v10477_v34, %v4195_v52  ;;  %v4435_v9 = vpack.c.bf16 %v4383_v59, %v4382_v35  ;;  %v4684_v34 = vld [vmem:[#allocation11 + $0xd40] sm:$0xff]  ;;  %v4645_v48 = vld [vmem:[#allocation11 + $0xc08] sm:$0xff]  ;;  %v4662_v62 = vld [vmem:[#allocation11 + $0xc90] sm:$0xff] }
 0x657   : > { %v5783_v28 = vpop.f32.mrb[11].mxu0  ;;  %v4761_v56 = vor.u32 %v4760_v17, %v4756_v36  ;;  %v4663_v51 = vld [vmem:[#allocation11 + $0xc98] sm:$0xff]  ;;  %v11329_v17 = vld [vmem:[#allocation54_spill] sm:$0xff]  ;;  %v4591_v35 = vld [vmem:[#allocation2 + $0x50] sm:$0xfe] }
 0x658   : > { %6134 = vmatpush3.bf16.msra.mxu0 %v4431_v40  ;;  %v4434_v40 = vpack.c.bf16 %v4381_v11, %v4380_v10  ;;  %v10493_v43 = vadd.f32 %v5783_v28, %v5782_v23  ;;  %v10500_v50 = vrot.slane %v4763_v41, 1  ;;  %v4687_v22 = vld [vmem:[#allocation11 + $0xd58] sm:$0xff]  ;;  %v4646_v10 = vld [vmem:[#allocation11 + $0xc10] sm:$0xff]  ;;  %v4664_v41 = vld [vmem:[#allocation11 + $0xca0] sm:$0xff] }
 0x659   : > { %6135 = vmatprep.subr.bf16.mxu0 %v4440_v18  ;;  %6563 = vmatpush3.bf16.msra.mxu1 %v4451_v12  ;;  %v10491_v12 = vadd.f32 %v5780_v3, %v5779_v60  ;;  %v4443_v18 = vpack.c.bf16 %v4399_v31, %v4398_v63  ;;  %v4647_v11 = vld [vmem:[#allocation11 + $0xc18] sm:$0xff]  ;;  %v4631_v60 = vmul.f32 %v4604_v2, %v11329_v17  ;;  %v4665_v23 = vld [vmem:[#allocation11 + $0xca8] sm:$0xff]  ;;  %v4594_v59 = vld [vmem:[#allocation2 + $0x68] sm:$0xff] }
 0x65a   : > { %6572 = vmatprep.subr.bf16.mxu1 %v4723_v24  ;;  %v4766_v19 = vsel %vm2678_vm5, %v4761_v56, %v10500_v50  ;;  %v11330_v52 = vld [vmem:[#allocation55_spill] sm:$0xff]  ;;  %v4689_v28 = vld [vmem:[#allocation11 + $0xd68] sm:$0xff]  ;;  %v4610_v56 = vld [vmem:[#allocation2 + $0xe8] sm:$0xff] }
 0x65b   : > { %4276 = vmatmul.mubr.bf16.gmra.mrb[112].mxu0 %v4169_v32  ;;  %v4644_v32 = vld [vmem:[#allocation11 + $0xc00] sm:$0xff]  ;;  %v7205_v3 = vld [vmem:[#allocation2 + $0x80] sm:$0xff]  ;;  %v4649_v15 = vld [vmem:[#allocation11 + $0xc28] sm:$0xff] }
 0x65c   : > { %6136 = vmatpush3.bf16.msra.mxu0 %v4432_v30  ;;  %4283 = vmatprep.mubr.bf16.mxu0 %v4205_v8  ;;  %v7204_v30 = vld [vmem:[#allocation2 + $0xe8] sm:$0xff]  ;;  %v4707_v46 = vpack.c.bf16 %v4645_v48, %v4644_v32  ;;  %v4597_v2 = vld [vmem:[#allocation2 + $0x80] sm:$0xff] }
 0x65d   : > { %6137 = vmatprep.subr.bf16.mxu0 %v4441_v14  ;;  %6565 = vmatmul.mubr.bf16.vlgmr.msra.gmra.mrb[8].mxu1 %v4421_v57  ;;  %v4427_v38 = vpack.c.bf16 %v10497_v4, %v7204_v30  ;;  %v4726_v14 = vpack.c.bf16 %v4683_v6, %v4682_v39  ;;  %v5785_v47 = vpop.f32.mrb[12].mxu0  ;;  %v4607_v57 = vld [vmem:[#allocation2 + $0xd0] sm:$0xff]  ;;  %v4688_v6 = vld [vmem:[#allocation11 + $0xd60] sm:$0xff] }
 0x65e   : > { %6568 = vmatprep.mubr.bf16.mxu1 %v4424_v26  ;;  %6573 = vmatpush3.bf16.msra.mxu1 %v4723_v24  ;;  %v4660_v24 = vld [vmem:[#allocation11 + $0xc80] sm:$0xff]  ;;  %v5786_v8 = vpop.f32.mrb[13].mxu0  ;;  %v4686_v26 = vld [vmem:[#allocation11 + $0xd50] sm:$0xff]  ;;  %v4634_v63 = vmul.f32 %v4607_v57, %v11330_v52 }
 0x65f   : > { %6574 = vmatprep.subr.bf16.mxu1 %v4724_v27  ;;  %v4715_v5 = vpack.c.bf16 %v4661_v25, %v4660_v24  ;;  %v5788_v49 = vpop.f32.mrb[14].mxu0  ;;  %v4728_v39 = vpack.c.bf16 %v4687_v22, %v4686_v26  ;;  %v4648_v42 = vld [vmem:[#allocation11 + $0xc20] sm:$0xff]  ;;  %v4666_v25 = vld [vmem:[#allocation11 + $0xcb0] sm:$0xff]  ;;  %v4651_v26 = vld [vmem:[#allocation11 + $0xc38] sm:$0xff] }
 0x660   : > { %6138 = vmatpush3.bf16.msra.mxu0 %v4433_v55  ;;  %v10504_v55 = vadd.f32 %v5786_v8, %v5785_v47  ;;  %v5789_v1 = vpop.f32.mrb[15].mxu0  ;;  %v4690_v47 = vld [vmem:[#allocation11 + $0xd70] sm:$0xff]  ;;  %v7208_v8 = vld [vmem:[#allocation2 + $0x90] sm:$0xff] }
 0x661   : > { %6139 = vmatprep.subr.bf16.mxu0 %v4442_v44  ;;  %v4716_v44 = vpack.c.bf16 %v4663_v51, %v4662_v62  ;;  %v10508_v31 = vadd.f32 %v5789_v1, %v5788_v49  ;;  %v4691_v62 = vld [vmem:[#allocation11 + $0xd78] sm:$0xff]  ;;  %v7207_v57 = vld [vmem:[#allocation2 + $0x78] sm:$0xff] }
 0x662   : > { %6575 = vmatpush3.bf16.msra.mxu1 %v4724_v27  ;;  %v4727_v27 = vpack.c.bf16 %v4685_v13, %v4684_v34  ;;  %v11333_v13 = vld [vmem:[#allocation66_spill] sm:$0xff] }
 0x663   : > { %4284 = vmatmul.mubr.bf16.gmra.mrb[116].mxu0 %v4196_v45  ;;  %6576 = vmatprep.subr.bf16.mxu1 %v4725_v37  ;;  %v4717_v45 = vpack.c.bf16 %v4665_v23, %v4664_v41  ;;  %v4616_v1 = vld [vmem:[#allocation2 + $0x118] sm:$0x1]  ;;  %v4730_v41 = vpack.c.bf16 %v4691_v62, %v4690_v47 }
 0x664   : > { %6140 = vmatpush3.bf16.msra.mxu0 %v4434_v40  ;;  %4484 = vmatprep.mubr.bf16.mxu0 %v4417_v7  ;;  %v11331_v40 = vpack.c.bf16 %v10117_v0, %v11300_v53  ;;  %v10513_v7 = vpack.c.bf16 %v4634_v63, %v4631_v60  ;;  %v4667_v0 = vld [vmem:[#allocation11 + $0xcb8] sm:$0xff]  ;;  %v4729_v53 = vpack.c.bf16 %v4689_v28, %v4688_v6  ;;  %v4668_v63 = vld [vmem:[#allocation11 + $0xcc0] sm:$0xff]  ;;  %v5006_v62 = vld [vmem:[#allocation15 + $0x8] sm:$0xff] }
 0x665   : > { %6141 = vmatprep.subr.bf16.mxu0 %v4443_v18  ;;  %6569 = vmatmul.mubr.bf16.gmra.mrb[12].mxu1 %v4427_v38  ;;  %v4708_v18 = vpack.c.bf16 %v4647_v11, %v4646_v10  ;;  %v5791_v24 = vpop.f32.mrb[16].mxu0  ;;  %v4618_v38 = vmul.f32 %v4591_v35, %v11325_v29  ;;  %v4718_v49 = vpack.c.bf16 %v4667_v0, %v4666_v25  ;;  %v7209_v10 = vld [vmem:[#allocation2 + $0xb0] sm:$0xff]  ;;  %v7210_v11 = vld [vmem:[#allocation2 + $0xc8] sm:$0xff]  ;;  %v4593_v6 = vld [vmem:[#allocation2 + $0x60] sm:$0xff]  ;;  %v4783_v25 = vshrl.u32 %v10487_v16, 16 }
 0x666   : > { %6577 = vmatpush3.bf16.msra.mxu1 %v4725_v37  ;;  %6588 = vmatprep.mubr.bf16.mxu1 %v4766_v19  ;;  %v7206_v37 = vld [vmem:[#allocation2 + $0x98] sm:$0xff]  ;;  %v5792_v30 = vpop.f32.mrb[17].mxu0  ;;  %v4709_v19 = vpack.c.bf16 %v4649_v15, %v4648_v42  ;;  %v4787_v22 = vshll.u32 %v10513_v7, 16  ;;  %v4423_v60 = vpack.c.bf16 %v7210_v11, %v7209_v10  ;;  %v4624_v42 = vmul.f32 %v4597_v2, %v11327_v33  ;;  %v5005_v16 = vld [vmem:[#allocation15] sm:$0xff] }
 0x667   : > { %6578 = vmatprep.subr.bf16.mxu1 %v4726_v14  ;;  %v4420_v36 = vpack.c.bf16 %v7206_v37, %v7205_v3  ;;  %v10522_v32 = vadd.f32 %v5792_v30, %v5791_v24  ;;  %v5794_v48 = vpop.f32.mrb[18].mxu0  ;;  %v4669_v3 = vld [vmem:[#allocation11 + $0xcc8] sm:$0xff]  ;;  %v4600_v37 = vld [vmem:[#allocation2 + $0x98] sm:$0xff]  ;;  %v4671_v30 = vld [vmem:[#allocation11 + $0xcd8] sm:$0xff]  ;;  %v4807_v2 = vshrl.u32 %v10513_v7, 16 }
 0x668   : > { %6142 = vmatpush3.bf16.msra.mxu0 %v4435_v9  ;;  %v11332_v9 = vld [vmem:[#allocation50_spill] sm:$0xff]  ;;  %v5795_v51 = vpop.f32.mrb[19].mxu0  ;;  %v4627_v15 = vmul.f32 %v4600_v37, %v11328_v21  ;;  %v4789_v24 = vrot.slane %v4787_v22, 1  ;;  %v7211_v7 = vld [vmem:[#allocation2 + $0xe0] sm:$0xff]  ;;  %v4599_v10 = vld [vmem:[#allocation2 + $0x90] sm:$0xff] }
 0x669   : > { %6179 = vmatprep.subr.bf16.mxu0 %v4715_v5  ;;  %v4637_v34 = vmul.f32 %v4610_v56, %v11332_v9  ;;  %v10520_v5 = vmul.f32 %v10497_v4, %v11333_v13  ;;  %v4653_v56 = vld [vmem:[#allocation11 + $0xc48] sm:$0xff]  ;;  %v4620_v13 = vmul.f32 %v4593_v6, %v11326_v61  ;;  %v4606_v37 = vld [vmem:[#allocation2 + $0xc8] sm:$0xff]  ;;  %v4626_v58 = vmul.f32 %v4599_v10, %v11328_v21  ;;  %v4605_v10 = vld [vmem:[#allocation2 + $0xc0] sm:$0xff] }
 0x66a   : > { %6579 = vmatpush3.bf16.msra.mxu1 %v4726_v14  ;;  %v4621_v14 = vmul.f32 %v4594_v59, %v11326_v61  ;;  %v4719_v59 = vpack.c.bf16 %v4669_v3, %v4668_v63  ;;  %v10552_v61 = vld [vmem:[#allocation11 + $0xce8] sm:$0xff]  ;;  %v10557_v22 = vpack.c.bf16 %v4627_v15, %v4624_v42 }
 0x66b   : > { %4485 = vmatmul.mubr.bf16.vlgmr.msra.gmra.mrb[120].mxu0 %v11331_v40  ;;  %6580 = vmatprep.subr.bf16.mxu1 %v4727_v27  ;;  %v10530_v23 = vpack.c.bf16 %v10520_v5, %v4637_v34  ;;  %v4590_v40 = vld [vmem:[#allocation2 + $0x48] sm:$0xfe]  ;;  %v4603_v3 = vld [vmem:[#allocation2 + $0xb0] sm:$0xff] }
 0x66c   : > { %6180 = vmatpush3.bf16.msra.mxu0 %v4707_v46  ;;  %4492 = vmatprep.mubr.bf16.mxu0 %v4420_v36  ;;  %v4650_v46 = vld [vmem:[#allocation11 + $0xc30] sm:$0xff]  ;;  %v10527_v36 = vpack.c.bf16 %v4621_v14, %v4618_v38  ;;  %v10540_v14 = vld [vmem:[#allocation11 + $0xc58] sm:$0xff]  ;;  %v4617_v34 = vmul.f32 %v4590_v40, %v11325_v29  ;;  %v10550_v29 = vld [vmem:[#allocation11 + $0xce0] sm:$0xff]  ;;  %v6772_v40 = vpack.c.bf16 %v5006_v62, %v5005_v16 }
 0x66d   : > { %6181 = vmatprep.subr.bf16.mxu0 %v4716_v44  ;;  %v10525_v44 = vadd.f32 %v5795_v51, %v5794_v48  ;;  %v4710_v28 = vpack.c.bf16 %v4651_v26, %v4650_v46  ;;  %v10538_v38 = vld [vmem:[#allocation11 + $0xc50] sm:$0xff]  ;;  %v4811_v47 = vshll.u32 %v10530_v23, 16  ;;  %v4785_v51 = vor.u32 %v4783_v25, %v10500_v50  ;;  %v4657_v42 = vld [vmem:[#allocation11 + $0xc68] sm:$0xff] }
 0x66e   : > { %6581 = vmatpush3.bf16.msra.mxu1 %v4727_v27  ;;  %v4419_v27 = vpack.c.bf16 %v7208_v8, %v7207_v57  ;;  %v4426_v46 = vpack.c.bf16 %v10497_v4, %v7211_v7  ;;  %v4809_v50 = vor.u32 %v4807_v2, %v4789_v24  ;;  %v10563_v63 = vpack.c.bf16 %v4620_v13, %v4617_v34  ;;  %v5146_v25 = vld [vmem:[#allocation17 + $0x100] sm:$0xff]  ;;  %v4674_v13 = vld [vmem:[#allocation11 + $0xcf0] sm:$0xff] }
 0x66f   : > { %6582 = vmatprep.subr.bf16.mxu1 %v4728_v39  ;;  %v5797_v0 = vpop.f32.mrb[20].mxu0  ;;  %v4721_v6 = vpack.c.bf16 %v10552_v61, %v10550_v29  ;;  %v4790_v15 = vsel %vm2678_vm5, %v4785_v51, %v4789_v24  ;;  %v4675_v24 = vld [vmem:[#allocation11 + $0xcf8] sm:$0xff]  ;;  %v4831_v21 = vshrl.u32 %v10530_v23, 16  ;;  %v7212_v7 = vld [vmem:[#allocation2 + $0xd8] sm:$0xff] }
 0x670   : > { %6182 = vmatpush3.bf16.msra.mxu0 %v4708_v18  ;;  %v11334_v18 = vld [vmem:[#allocation63_spill] sm:$0xff]  ;;  %v5798_v48 = vpop.f32.mrb[21].mxu0 }
 0x671   : > { %6183 = vmatprep.subr.bf16.mxu0 %v4717_v45  ;;  %v10533_v35 = vmul.f32 %v4616_v1, %v11334_v18  ;;  %v4670_v45 = vld [vmem:[#allocation11 + $0xcd0] sm:$0xff]  ;;  %v10548_v57 = vadd.f32 %v5798_v48, %v5797_v0 }
 0x672   : > { %6583 = vmatpush3.bf16.msra.mxu1 %v4728_v39  ;;  %v4652_v39 = vld [vmem:[#allocation11 + $0xc40] sm:$0xff]  ;;  %v4720_v26 = vpack.c.bf16 %v4671_v30, %v4670_v45  ;;  %v4596_v1 = vld [vmem:[#allocation2 + $0x78] sm:$0xff] }
 0x673   : > { %4493 = vmatmul.mubr.bf16.gmra.mrb[124].mxu0 %v4419_v27  ;;  %6584 = vmatprep.subr.bf16.mxu1 %v4729_v53  ;;  %v4711_v8 = vpack.c.bf16 %v4653_v56, %v4652_v39  ;;  %v4706_v27 = vpack.c.bf16 %v10533_v35, %v10533_v35  ;;  %v4744_v35 = vshrl.u32 %v10527_v36, 16  ;;  %v4813_v39 = vrot.slane %v4811_v47, 1  ;;  %v5008_v45 = vld [vmem:[#allocation15 + $0x18] sm:$0xff]  ;;  %v5147_v0 = vld [vmem:[#allocation17 + $0x108] sm:$0xff] }
 0x674   : > { %6184 = vmatpush3.bf16.msra.mxu0 %v4709_v19  ;;  %4500 = vmatprep.mubr.bf16.mxu0 %v4423_v60  ;;  %v4746_v19 = vshll.u32 %v10527_v36, 16  ;;  %v4712_v60 = vpack.c.bf16 %v10540_v14, %v10538_v38  ;;  %v11335_v56 = vmov 0.0|0.0   ;;  %v4623_v54 = vmul.f32 %v4596_v1, %v11327_v33 }
 0x675   : > { %6185 = vmatprep.subr.bf16.mxu0 %v4718_v49  ;;  %v4751_v36 = vshll.u32 %v10557_v22, 16  ;;  %v4814_v30 = vsel %vm2678_vm5, %v4809_v50, %v4813_v39  ;;  %v4630_v38 = vmul.f32 %v4603_v3, %v11329_v17  ;;  %v4633_v14 = vmul.f32 %v4606_v37, %v11330_v52  ;;  %v5130_v37 = vld [vmem:[#allocation17 + $0x80] sm:$0xff] }
 0x676   : > { %6585 = vmatpush3.bf16.msra.mxu1 %v4729_v53  ;;  %v5800_v53 = vpop.f32.mrb[22].mxu0  ;;  %v4734_v33 = vshll.u32 %v10563_v63, 16  ;;  %v10585_v16 = vpack.c.bf16 %v5147_v0, %v5146_v25  ;;  %v10587_v29 = vpack.c.bf16 %v4626_v58, %v4623_v54  ;;  %v4833_v61 = vor.u32 %v4831_v21, %v4813_v39  ;;  %v5114_v54 = vld [vmem:[#allocation17] sm:$0xff]  ;;  %v5115_v58 = vld [vmem:[#allocation17 + $0x8] sm:$0xff]  ;;  %v5132_v0 = vld [vmem:[#allocation17 + $0x90] sm:$0xff] }
 0x677   : > { %6586 = vmatprep.subr.bf16.mxu1 %v4730_v41  ;;  %v5801_v49 = vpop.f32.mrb[23].mxu0  ;;  %v4722_v50 = vpack.c.bf16 %v4675_v24, %v4674_v13  ;;  %v10590_v1 = vpack.c.bf16 %v4633_v14, %v4630_v38  ;;  %v4732_v39 = vshrl.u32 %v10563_v63, 16  ;;  %v4775_v63 = vshrl.u32 %v10557_v22, 16  ;;  %v5116_v38 = vld [vmem:[#allocation17 + $0x10] sm:$0xff]  ;;  %v4615_v14 = vld [vmem:[#allocation2 + $0x110] sm:$0x1] }
 0x678   : > { %6186 = vmatpush3.bf16.msra.mxu0 %v4710_v28  ;;  %v10559_v11 = vadd.f32 %v5801_v49, %v5800_v53  ;;  %v10570_v28 = vld [vmem:[#allocation11 + $0xc60] sm:$0xff]  ;;  %v5831_v34 = vpop.f32.mrb[24].mxu0  ;;  %v4658_v53 = vld [vmem:[#allocation11 + $0xc70] sm:$0xff]  ;;  %v5162_v24 = vpack.c.bf16 %v5115_v58, %v5114_v54 }
 0x679   : > { %6187 = vmatprep.subr.bf16.mxu0 %v4719_v59  ;;  %v4748_v59 = vrot.slane %v4746_v19, 1  ;;  %v5832_v19 = vpop.f32.mrb[25].mxu0  ;;  %v4713_v2 = vpack.c.bf16 %v4657_v42, %v10570_v28  ;;  %v4602_v49 = vld [vmem:[#allocation2 + $0xa8] sm:$0xff]  ;;  %v4736_v28 = vrot.slane %v4734_v33, 1  ;;  %v4632_v42 = vmul.f32 %v4605_v10, %v11330_v52  ;;  %v5136_v54 = vld [vmem:[#allocation17 + $0xb0] sm:$0xff] }
 0x67a   : > { %6587 = vmatpush3.bf16.msra.mxu1 %v4730_v41  ;;  %v5007_v41 = vld [vmem:[#allocation15 + $0x10] sm:$0xff]  ;;  %v5833_v62 = vadd.f32 %v5832_v19, %v5831_v34  ;;  %v5834_v51 = vpop.f32.mrb[26].mxu0  ;;  %v5117_v33 = vld [vmem:[#allocation17 + $0x18] sm:$0xff] }
 0x67b   : > { %4501 = vmatmul.mubr.bf16.gmra.mrb[128].mxu0 %v4422_v20  ;;  %6771 = vmatprep.subr.bf16.mxu1 %v11335_v56  ;;  %v4835_v20 = vshll.u32 %v4706_v27, 16  ;;  %v6775_v48 = vpack.c.bf16 %v5008_v45, %v5007_v41  ;;  %v4749_v47 = vor.u32 %v4748_v59, %v4744_v35  ;;  %v5835_v23 = vpop.f32.mrb[27].mxu0  ;;  %v4609_v35 = vld [vmem:[#allocation2 + $0xe0] sm:$0xff]  ;;  %v4737_v25 = vor.u32 %v4736_v28, %v4732_v39 }
 0x67c   : > { %6188 = vmatpush3.bf16.msra.mxu0 %v4711_v8  ;;  %4508 = vmatprep.mubr.bf16.mxu0 %v4426_v46  ;;  %v4659_v8 = vld [vmem:[#allocation11 + $0xc78] sm:$0xff]  ;;  %v4425_v46 = vpack.c.bf16 %v10497_v4, %v7212_v7  ;;  %v5836_v3 = vadd.f32 %v5835_v23, %v5834_v51  ;;  %v4608_v51 = vld [vmem:[#allocation2 + $0xd8] sm:$0xff]  ;;  %v7213_v7 = vld [vmem:[%s8149_s21 + $0x10] sm:$0xff]  ;;  %v5163_v10 = vpack.c.bf16 %v5117_v33, %v5116_v38 }
 0x67d   : > { %6189 = vmatprep.subr.bf16.mxu0 %v4720_v26  ;;  %6589 = vmatmul.mubr.bf16.vlgmr.msra.gmra.mrb[8].mxu1 %v4790_v15  ;;  %v4837_v27 = vrot.slane %v4835_v20, 1  ;;  %v4753_v26 = vrot.slane %v4751_v36, 1  ;;  %v4714_v59 = vpack.c.bf16 %v4659_v8, %v4658_v53  ;;  %v5133_v36 = vld [vmem:[#allocation17 + $0x98] sm:$0xff]  ;;  %v5004_v23 = vld [vmem:[%s578_s20] sm:$0x1]  ;;  %s5647_s20 = sshll.u32 %s7801_s19, 10 }
 0x67e   : > { %6592 = vmatprep.mubr.bf16.mxu1 %v4814_v30  ;;  %6773 = vmatpush3.bf16.msra.mxu1 %v6772_v40  ;;  %v5131_v40 = vld [vmem:[#allocation17 + $0x88] sm:$0xff]  ;;  %v10600_v41 = vadd.f32 %v5836_v3, %v10493_v43  ;;  %v4636_v43 = vmul.f32 %v4609_v35, %v11332_v9  ;;  %v5149_v19 = vld [vmem:[#allocation17 + $0x118] sm:$0xff]  ;;  %v4642_v3 = vmul.f32 %v4615_v14, %v11334_v18  ;;  %s10716_s18 = scalar_lea.hbm %s11337_s27, %s5647_s20 }
 0x67f   : > { %6774 = vmatprep.subr.bf16.mxu1 %v11335_v56  ;;  %v4629_v56 = vmul.f32 %v4602_v49, %v11329_v17  ;;  %v4838_v45 = vsel %vm2678_vm5, %v4833_v61, %v4837_v27  ;;  %v5170_v15 = vpack.c.bf16 %v5131_v40, %v5130_v37  ;;  %v4779_v17 = vshll.u32 %v10590_v1, 16  ;;  %v5134_v27 = vld [vmem:[#allocation17 + $0xa0] sm:$0xff]  ;;  %v5135_v49 = vld [vmem:[#allocation17 + $0xa8] sm:$0xff] }
 0x680   : > { %6190 = vmatpush3.bf16.msra.mxu0 %v4712_v60  ;;  %v10593_v60 = vadd.f32 %v5833_v62, %v10491_v12  ;;  %v4739_v12 = vshll.u32 %v10587_v29, 16  ;;  %v5837_v20 = vpop.f32.mrb[28].mxu0  ;;  %v4777_v52 = vor.u32 %v4775_v63, %v4753_v26  ;;  %v10613_v62 = vpack.c.bf16 %v10520_v5, %v4636_v43  ;;  %v4614_v43 = vld [vmem:[#allocation2 + $0x108] sm:$0x1] }
 0x681   : > { %6191 = vmatprep.subr.bf16.mxu0 %v4721_v6  ;;  %v4754_v6 = vsel %vm2678_vm5, %v4749_v47, %v4753_v26  ;;  %v5838_v30 = vpop.f32.mrb[29].mxu0  ;;  %v10610_v21 = vpack.c.bf16 %v4632_v42, %v4629_v56  ;;  %v5171_v47 = vpack.c.bf16 %v5133_v36, %v5132_v0  ;;  %v4767_v40 = vshrl.u32 %v10587_v29, 16  ;;  %v5118_v56 = vld [vmem:[#allocation17 + $0x20] sm:$0xff]  ;;  %v5137_v29 = vld [vmem:[#allocation17 + $0xb8] sm:$0xff] }
 0x682   : > { %6776 = vmatpush3.bf16.msra.mxu1 %v6775_v48  ;;  %v5839_v34 = vadd.f32 %v5838_v30, %v5837_v20  ;;  %v5840_v13 = vpop.f32.mrb[30].mxu0  ;;  %v4741_v22 = vrot.slane %v4739_v12, 1  ;;  %v5148_v48 = vld [vmem:[#allocation17 + $0x110] sm:$0xff]  ;;  %v4635_v35 = vmul.f32 %v4608_v51, %v11332_v9  ;;  %v5172_v39 = vpack.c.bf16 %v5135_v49, %v5134_v27  ;;  %v5119_v12 = vld [vmem:[#allocation17 + $0x28] sm:$0xff]  ;;  %v5154_v27 = vld [vmem:[#allocation17 + $0x140] sm:$0xff] }
 0x683   : > { %4509 = vmatmul.mubr.bf16.gmra.mrb[132].mxu0 %v4425_v46  ;;  %6607 = vmatprep.subr.bf16.mxu1 %v10585_v16  ;;  %v7214_v46 = vld [vmem:[%s8149_s21 + $0x28] sm:$0xff]  ;;  %v5179_v37 = vpack.c.bf16 %v5149_v19, %v5148_v48  ;;  %v4771_v28 = vshll.u32 %v10610_v21, 16  ;;  %v4803_v42 = vshll.u32 %v10613_v62, 16  ;;  %v4705_v63 = vpack.c.bf16 %v4642_v3, %v4642_v3  ;;  %v5152_v30 = vld [vmem:[#allocation17 + $0x130] sm:$0xff]  ;;  %v5139_v19 = vld [vmem:[#allocation17 + $0xc8] sm:$0xff] }
 0x684   : > { %6192 = vmatpush3.bf16.msra.mxu0 %v4713_v2  ;;  %4883 = vmatprep.mubr.bf16.mxu0 %v4754_v6  ;;  %v5841_v2 = vpop.f32.mrb[31].mxu0  ;;  %v10616_v53 = vadd.f32 %v5839_v34, %v10504_v55  ;;  %v4742_v61 = vsel %vm2678_vm5, %v4737_v25, %v4741_v22  ;;  %v5104_v26 = vpack.c.bf16 %v7214_v46, %v7213_v7  ;;  %v5150_v6 = vld [vmem:[#allocation17 + $0x120] sm:$0xff]  ;;  %v5120_v34 = vld [vmem:[#allocation17 + $0x30] sm:$0xff]  ;;  %v5155_v49 = vld [vmem:[#allocation17 + $0x148] sm:$0xff]  ;;  %v4823_v46 = vshrl.u32 %v10613_v62, 16 }
 0x685   : > { %6193 = vmatprep.subr.bf16.mxu0 %v4722_v50  ;;  %6593 = vmatmul.mubr.bf16.gmra.mrb[12].mxu1 %v4838_v45  ;;  %v5842_v8 = vadd.f32 %v5841_v2, %v5840_v13  ;;  %v4799_v45 = vshrl.u32 %v10590_v1, 16  ;;  %v4773_v25 = vrot.slane %v4771_v28, 1  ;;  %v5164_v0 = vpack.c.bf16 %v5119_v12, %v5118_v56  ;;  %v5121_v13 = vld [vmem:[#allocation17 + $0x38] sm:$0xff]  ;;  %v5138_v48 = vld [vmem:[#allocation17 + $0xc0] sm:$0xff]  ;;  %v5123_v7 = vld [vmem:[#allocation17 + $0x48] sm:$0xff] }
 0x686   : > { %6604 = vmatprep.mubr.msk.f32.mxu1 %vm7697_vm0, %v10497_v4  ;;  %v4781_v4 = vrot.slane %v4779_v17, 1  ;;  %v10636_v36 = vpack.c.bf16 %v10520_v5, %v4635_v35  ;;  %v5173_v14 = vpack.c.bf16 %v5137_v29, %v5136_v54  ;;  %v4641_v5 = vmul.f32 %v4614_v43, %v11334_v18  ;;  %v5156_v56 = vld [vmem:[#allocation17 + $0x150] sm:$0xff]  ;;  %v5157_v12 = vld [vmem:[#allocation17 + $0x158] sm:$0xff] }
 0x687   : > { %v10626_v55 = vadd.f32 %v5842_v8, %v10508_v31  ;;  %v4791_v8 = vshrl.u32 %v10610_v21, 16  ;;  %v5174_v18 = vpack.c.bf16 %v5139_v19, %v5138_v48  ;;  %v5182_v21 = vpack.c.bf16 %v5155_v49, %v5154_v27  ;;  %v5128_v27 = vld [vmem:[#allocation17 + $0x70] sm:$0xff]  ;;  %v5129_v49 = vld [vmem:[#allocation17 + $0x78] sm:$0xff] }
 0x688   : > { %6194 = vmatpush3.bf16.msra.mxu0 %v4714_v59  ;;  %v4782_v50 = vsel %vm2678_vm5, %v4777_v52, %v4781_v4  ;;  %v5151_v59 = vld [vmem:[#allocation17 + $0x128] sm:$0xff]  ;;  %v5843_v31 = vpop.f32.mrb[32].mxu0  ;;  %v4801_v58 = vor.u32 %v4799_v45, %v4781_v4  ;;  %v5153_v52 = vld [vmem:[#allocation17 + $0x138] sm:$0xff]  ;;  %v4827_v4 = vshll.u32 %v4705_v63, 16  ;;  %v4704_v3 = vpack.c.bf16 %v4641_v5, %v4641_v5 }
 0x689   : > { %6236 = vmatprep.subr.bf16.mxu0 %v5170_v15  ;;  %v4769_v15 = vor.u32 %v4767_v40, %v4741_v22  ;;  %v5844_v9 = vpop.f32.mrb[33].mxu0  ;;  %v5180_v17 = vpack.c.bf16 %v5151_v59, %v5150_v6  ;;  %v5183_v43 = vpack.c.bf16 %v5157_v12, %v5156_v56  ;;  %v7215_v5 = vld [vmem:[%s8149_s21 + $0x8] sm:$0xff] }
 0x68a   : > { %v5845_v20 = vadd.f32 %v5844_v9, %v5843_v31  ;;  %v5846_v1 = vpop.f32.mrb[34].mxu0  ;;  %v4829_v28 = vrot.slane %v4827_v4, 1  ;;  %v5125_v31 = vld [vmem:[#allocation17 + $0x58] sm:$0xff]  ;;  %v5142_v9 = vld [vmem:[#allocation17 + $0xe0] sm:$0xff]  ;;  %v4819_v63 = vshll.u32 %v4704_v3, 16  ;;  %v7218_v3 = vld [vmem:[%s8149_s21 + $0x18] sm:$0xff] }
 0x68b   : > { %4884 = vmatmul.mubr.bf16.vlgmr.msra.gmra.mrb[136].mxu0 %v4742_v61  ;;  %v5847_v38 = vpop.f32.mrb[35].mxu0  ;;  %v4774_v33 = vsel %vm2678_vm5, %v4769_v15, %v4773_v25  ;;  %v4795_v61 = vshll.u32 %v10636_v36, 16 }
 0x68c   : > { %6237 = vmatpush3.bf16.msra.mxu0 %v5162_v24  ;;  %4891 = vmatprep.mubr.bf16.mxu0 %v4782_v50  ;;  %v10639_v22 = vadd.f32 %v5845_v20, %v10522_v32  ;;  %v5848_v24 = vadd.f32 %v5847_v38, %v5846_v1  ;;  %v5165_v32 = vpack.c.bf16 %v5121_v13, %v5120_v34  ;;  %v5127_v38 = vld [vmem:[#allocation17 + $0x68] sm:$0xff]  ;;  %v4821_v34 = vrot.slane %v4819_v63, 1  ;;  %v5144_v13 = vld [vmem:[#allocation17 + $0xf0] sm:$0xff] }
 0x68d   : > { %6238 = vmatprep.subr.bf16.mxu0 %v5171_v47  ;;  %6605 = vmatmul.mubr.msk.f32.vlgmr.msra.gmra.mrb[16].mxu1 %vm915_vm1, %v5004_v23  ;;  %v5181_v47 = vpack.c.bf16 %v5153_v52, %v5152_v30  ;;  %v5122_v23 = vld [vmem:[#allocation17 + $0x40] sm:$0xff]  ;;  %v4793_v50 = vor.u32 %v4791_v8, %v4773_v25  ;;  %v4797_v59 = vrot.slane %v4795_v61, 1 }
 0x68e   : > { %6608 = vmatpush3.bf16.msra.mxu1 %v10585_v16  ;;  %6623 = vmatprep.mubr.bf16.mxu1 %v5104_v26  ;;  %v4805_v16 = vrot.slane %v4803_v42, 1  ;;  %v10645_v51 = vadd.f32 %v5848_v24, %v10525_v44  ;;  %v5141_v44 = vld [vmem:[#allocation17 + $0xd8] sm:$0xff]  ;;  %v5124_v42 = vld [vmem:[#allocation17 + $0x50] sm:$0xff]  ;;  %v5158_v25 = vld [vmem:[#allocation17 + $0x160] sm:$0xff] }
 0x68f   : > { %6609 = vmatprep.subr.bf16.mxu1 %v5179_v37  ;;  %v4798_v29 = vsel %vm2678_vm5, %v4793_v50, %v4797_v59  ;;  %v5167_v1 = vpack.c.bf16 %v5125_v31, %v5124_v42  ;;  %v5126_v52 = vld [vmem:[#allocation17 + $0x60] sm:$0xff]  ;;  %v5145_v24 = vld [vmem:[#allocation17 + $0xf8] sm:$0xff]  ;;  %v5169_v50 = vpack.c.bf16 %v5129_v49, %v5128_v27 }
 0x690   : > { %6239 = vmatpush3.bf16.msra.mxu0 %v5163_v10  ;;  %v4806_v2 = vsel %vm2678_vm5, %v4801_v58, %v4805_v16  ;;  %v5140_v10 = vld [vmem:[#allocation17 + $0xd0] sm:$0xff]  ;;  %v4825_v40 = vor.u32 %v4823_v46, %v4805_v16  ;;  %v5143_v58 = vld [vmem:[#allocation17 + $0xe8] sm:$0xff]  ;;  %v5168_v19 = vpack.c.bf16 %v5127_v38, %v5126_v52  ;;  %v5177_v61 = vpack.c.bf16 %v5145_v24, %v5144_v13  ;;  %v7224_v42 = vld [vmem:[%s8149_s21 + $0x88] sm:$0xff] }
 0x691   : > { %6240 = vmatprep.subr.bf16.mxu0 %v5172_v39  ;;  %v5849_v26 = vpop.f32.mrb[36].mxu0  ;;  %v5166_v39 = vpack.c.bf16 %v5123_v7, %v5122_v23  ;;  %v5175_v62 = vpack.c.bf16 %v5141_v44, %v5140_v10  ;;  %v5176_v30 = vpack.c.bf16 %v5143_v58, %v5142_v9  ;;  %v7217_v44 = vld [vmem:[%s8149_s21] sm:$0xff]  ;;  %v7225_v58 = vld [vmem:[%s8149_s21 + $0x30] sm:$0xff]  ;;  %v7236_v27 = vld [vmem:[%s8149_s21 + $0xa8] sm:$0xff] }
 0x692   : > { %6610 = vmatpush3.bf16.msra.mxu1 %v5179_v37  ;;  %v5850_v37 = vpop.f32.mrb[37].mxu0  ;;  %v7231_v24 = vld [vmem:[%s8149_s21 + $0x60] sm:$0xff] }
 0x693   : > { %4892 = vmatmul.mubr.bf16.gmra.mrb[140].mxu0 %v4774_v33  ;;  %6611 = vmatprep.subr.bf16.mxu1 %v5180_v17  ;;  %v5851_v35 = vadd.f32 %v5850_v37, %v5849_v26  ;;  %v5852_v6 = vpop.f32.mrb[38].mxu0  ;;  %v5102_v37 = vpack.c.bf16 %v7218_v3, %v7217_v44 }
 0x694   : > { %6241 = vmatpush3.bf16.msra.mxu0 %v5164_v0  ;;  %4899 = vmatprep.mubr.bf16.mxu0 %v4806_v2  ;;  %v5853_v45 = vpop.f32.mrb[39].mxu0  ;;  %v5159_v0 = vld [vmem:[#allocation17 + $0x168] sm:$0xff]  ;;  %v7216_v2 = vld [vmem:[%s8149_s21 + $0x20] sm:$0xff] }
 0x695   : > { %6242 = vmatprep.subr.bf16.mxu0 %v5173_v14  ;;  %v10651_v15 = vadd.f32 %v5851_v35, %v10548_v57  ;;  %v5854_v54 = vadd.f32 %v5853_v45, %v5852_v6  ;;  %v4815_v57 = vshrl.u32 %v10636_v36, 16  ;;  %v5184_v33 = vpack.c.bf16 %v5159_v0, %v5158_v25 }
 0x696   : > { %6612 = vmatpush3.bf16.msra.mxu1 %v5180_v17  ;;  %v4830_v17 = vsel %vm2678_vm5, %v4825_v40, %v4829_v28  ;;  %v5103_v4 = vpack.c.bf16 %v7216_v2, %v7215_v5  ;;  %v7219_v28 = vld [vmem:[%s8149_s21 + $0x38] sm:$0xff]  ;;  %v7234_v5 = vld [vmem:[%s8149_s21 + $0xb0] sm:$0xff] }
 0x697   : > { %6613 = vmatprep.subr.bf16.mxu1 %v5181_v47  ;;  %v10656_v20 = vadd.f32 %v5854_v54, %v10559_v11  ;;  %v4817_v14 = vor.u32 %v4815_v57, %v4797_v59  ;;  %v7221_v59 = vld [vmem:[%s8149_s21 + $0x40] sm:$0xff] }
 0x698   : > { %6243 = vmatpush3.bf16.msra.mxu0 %v5165_v32  ;;  %v5161_v32 = vld [vmem:[#allocation17 + $0x178] sm:$0xff] }
 0x699   : > { %6244 = vmatprep.subr.bf16.mxu0 %v5174_v18  ;;  %v4822_v7 = vsel %vm2678_vm5, %v4817_v14, %v4821_v34  ;;  %v7228_v57 = vld [vmem:[%s8149_s21 + $0x80] sm:$0xff] }
 0x69a   : > { %6614 = vmatpush3.bf16.msra.mxu1 %v5181_v47  ;;  %v5883_v16 = vpop.f32.mrb[40].mxu0  ;;  %v5160_v47 = vld [vmem:[#allocation17 + $0x170] sm:$0xff] }
 0x69b   : > { %4900 = vmatmul.mubr.bf16.gmra.mrb[144].mxu0 %v4798_v29  ;;  %6615 = vmatprep.subr.bf16.mxu1 %v5182_v21  ;;  %v5884_v11 = vpop.f32.mrb[41].mxu0  ;;  %v5185_v46 = vpack.c.bf16 %v5161_v32, %v5160_v47 }
 0x69c   : > { %6245 = vmatpush3.bf16.msra.mxu0 %v5166_v39  ;;  %4907 = vmatprep.mubr.bf16.mxu0 %v4830_v17  ;;  %v5885_v48 = vadd.f32 %v5884_v11, %v5883_v16  ;;  %v5886_v36 = vpop.f32.mrb[42].mxu0  ;;  %v7222_v39 = vld [vmem:[%s8149_s21 + $0x58] sm:$0xff] }
 0x69d   : > { %6246 = vmatprep.subr.bf16.mxu0 %v5175_v62  ;;  %v5887_v8 = vpop.f32.mrb[43].mxu0  ;;  %v5107_v56 = vpack.c.bf16 %v7222_v39, %v7221_v59  ;;  %v7223_v62 = vld [vmem:[%s8149_s21 + $0x70] sm:$0xff]  ;;  %v7232_v11 = vld [vmem:[%s8149_s21 + $0x78] sm:$0xff] }
 0x69e   : > { %6616 = vmatpush3.bf16.msra.mxu1 %v5182_v21  ;;  %v10662_v18 = vadd.f32 %v10593_v60, %v5885_v48  ;;  %v5888_v23 = vadd.f32 %v5887_v8, %v5886_v36  ;;  %v7220_v21 = vld [vmem:[%s8149_s21 + $0x50] sm:$0xff]  ;;  %v5110_v31 = vpack.c.bf16 %v7224_v42, %v7223_v62 }
 0x69f   : > { %6617 = vmatprep.subr.bf16.mxu1 %v5183_v43  ;;  %v5106_v35 = vpack.c.bf16 %v7220_v21, %v7219_v28 }
 0x6a0   : > { %6247 = vmatpush3.bf16.msra.mxu0 %v5167_v1  ;;  %v10666_v26 = vadd.f32 %v10600_v41, %v5888_v23  ;;  %v7227_v1 = vld [vmem:[%s8149_s21 + $0x68] sm:$0xff] }
 0x6a1   : > { %6248 = vmatprep.subr.bf16.mxu0 %v5176_v30  ;;  %v5109_v25 = vpack.c.bf16 %v7228_v57, %v7227_v1  ;;  %v7229_v30 = vld [vmem:[%s8149_s21 + $0xa0] sm:$0xff] }
 0x6a2   : > { %6618 = vmatpush3.bf16.msra.mxu1 %v5183_v43  ;;  %v5889_v60 = vpop.f32.mrb[44].mxu0 }
 0x6a3   : > { %4908 = vmatmul.mubr.bf16.gmra.mrb[148].mxu0 %v4822_v7  ;;  %6619 = vmatprep.subr.bf16.mxu1 %v5184_v33  ;;  %v5890_v10 = vpop.f32.mrb[45].mxu0 }
 0x6a4   : > { %6249 = vmatpush3.bf16.msra.mxu0 %v5168_v19  ;;  %5225 = vmatprep.mubr.bf16.mxu0 %v5103_v4  ;;  %v5891_v40 = vadd.f32 %v5890_v10, %v5889_v60  ;;  %v5892_v41 = vpop.f32.mrb[46].mxu0  ;;  %v7233_v19 = vld [vmem:[%s8149_s21 + $0x98] sm:$0xff] }
 0x6a5   : > { %6250 = vmatprep.subr.bf16.mxu0 %v5177_v61  ;;  %v5893_v6 = vpop.f32.mrb[47].mxu0  ;;  %v5112_v2 = vpack.c.bf16 %v7234_v5, %v7233_v19  ;;  %v7235_v61 = vld [vmem:[%s8149_s21 + $0x90] sm:$0xff] }
 0x6a6   : > { %6620 = vmatpush3.bf16.msra.mxu1 %v5184_v33  ;;  %v10675_v12 = vadd.f32 %v10616_v53, %v5891_v40  ;;  %v5894_v45 = vadd.f32 %v5893_v6, %v5892_v41  ;;  %v7226_v53 = vld [vmem:[%s8149_s21 + $0x48] sm:$0xff]  ;;  %v5108_v33 = vpack.c.bf16 %v7232_v11, %v7231_v24  ;;  %v5111_v49 = vpack.c.bf16 %v7236_v27, %v7235_v61 }
 0x6a7   : > { %6621 = vmatprep.subr.bf16.mxu1 %v5185_v46  ;;  %v5105_v63 = vpack.c.bf16 %v7226_v53, %v7225_v58 }
 0x6a8   : > { %6251 = vmatpush3.bf16.msra.mxu0 %v5169_v50  ;;  %v6796_v54 = vadd.f32 %v10626_v55, %v5894_v45  ;;  %v7230_v55 = vld [vmem:[%s8149_s21 + $0xb8] sm:$0xff]  ;;  %s5605_s21 = sshll.u32 %s8146_s24, 6 }
 0x6a9   : > { %v5113_v52 = vpack.c.bf16 %v7230_v55, %v7229_v30  ;;  %s10703_s25 = scalar_lea.vmem [#allocation20], %s5605_s21 }
 0x6aa   : > { %6622 = vmatpush3.bf16.msra.mxu1 %v5185_v46  ;;  %v5895_v29 = vpop.f32.mrb[48].mxu0  ;;  %s5358_s23 = sshll.u32 %s10703_s25, 4  ;;  %s10718_s23 = int_to_ptr.vmem [resolvable:$true] %s5358_s23 }
 0x6ab   : > { %5226 = vmatmul.mubr.bf16.vlgmr.msra.gmra.mrb[152].mxu0 %v5102_v37  ;;  %v5896_v9 = vpop.f32.mrb[49].mxu0  ;;  %s7549_s0 = scalar_lea.vmem %s10718_s23, 1024  ;;  %p7556_p7 = scmp.lt.s32.totalorder %s10718_s23, %s7554_s1 }
 0x6ac   : > { %5233 = vmatprep.mubr.bf16.mxu0 %v5106_v35  ;;  %v5897_v17 = vadd.f32 %v5896_v9, %v5895_v29  ;;  %v5898_v43 = vpop.f32.mrb[50].mxu0  ;;  %p7550_p10 = scmp.ne.s32.totalorder %s10718_s23, %s7549_s0  ;;  %p7557_p11 = scmp.lt.s32.totalorder %s7555_s9, %s7549_s0 }
 0x6ad   : > { %6624 = vmatmul.mubr.bf16.vlgmr.msra.gmra.mrb[20].mxu1 %v5107_v56  ;;  %v5899_v0 = vpop.f32.mrb[51].mxu0 }
 0x6ae   : > { %6627 = vmatprep.mubr.bf16.mxu1 %v5110_v31  ;;  %v6823_v38 = vadd.f32 %v10639_v22, %v5897_v17  ;;  %v5900_v16 = vadd.f32 %v5899_v0, %v5898_v43  ;;  %p7551_p0 = pnand %p7550_p10, %p11338_p1  ;;  %p7558_p6 = por %p7557_p11, %p7556_p7 }
 0x6b0   : > { %v6841_v14 = vadd.f32 %v10645_v51, %v5900_v16  ;;  %p7552_p5 = pneg %p7551_p0 }
 0x6b2   : > { %v5901_v34 = vpop.f32.mrb[52].mxu0  ;;  %p7559_p8 = pnand %p7558_p6, %p7552_p5 }
 0x6b3   : > { %5234 = vmatmul.mubr.bf16.gmra.mrb[156].mxu0 %v5105_v63  ;;  %v5902_v13 = vpop.f32.mrb[53].mxu0 }
 0x6b4   : > { %5241 = vmatprep.mubr.bf16.mxu0 %v5109_v25  ;;  %v5903_v48 = vadd.f32 %v5902_v13, %v5901_v34  ;;  %v5904_v36 = vpop.f32.mrb[54].mxu0 }
 0x6b5   : > { %6628 = vmatmul.mubr.bf16.gmra.mrb[24].mxu1 %v5113_v52  ;;  %v5905_v4 = vpop.f32.mrb[55].mxu0 }
 0x6b6   : > { %v6814_v22 = vadd.f32 %v10651_v15, %v5903_v48  ;;  %v5906_v47 = vadd.f32 %v5905_v4, %v5904_v36 }
 0x6b8   : > { %v6832_v51 = vadd.f32 %v10656_v20, %v5906_v47 }
 0x6bb   : > { %5242 = vmatmul.mubr.bf16.gmra.mrb[160].mxu0 %v5108_v33  ;;  %v5935_v32 = vpop.f32.mrb[56].mxu0 }
 0x6bc   : > { %5249 = vmatprep.mubr.bf16.mxu0 %v5112_v2  ;;  %v5936_v8 = vpop.f32.mrb[57].mxu0 }
 0x6bd   : > { %v5937_v23 = vadd.f32 %v5936_v8, %v5935_v32  ;;  %v5938_v7 = vpop.f32.mrb[58].mxu0 }
 0x6be   : > { %v5939_v46 = vpop.f32.mrb[59].mxu0 }
 0x6bf   : > { %v6788_v50 = vadd.f32 %v10662_v18, %v5937_v23  ;;  %v5940_v60 = vadd.f32 %v5939_v46, %v5938_v7 }
 0x6c1   : > { %v6806_v10 = vadd.f32 %v10666_v26, %v5940_v60 }
 0x6c3   : > { %5250 = vmatmul.mubr.bf16.gmra.mrb[164].mxu0 %v5111_v49  ;;  %v5941_v15 = vpop.f32.mrb[60].mxu0 }
 0x6c4   : > { %v5942_v44 = vpop.f32.mrb[61].mxu0 }
 0x6c5   : > { %v5943_v3 = vadd.f32 %v5942_v44, %v5941_v15  ;;  %v5944_v37 = vpop.f32.mrb[62].mxu0 }
 0x6c6   : > { %v5945_v20 = vpop.f32.mrb[63].mxu0 }
 0x6c7   : > { %v6779_v40 = vadd.f32 %v10675_v12, %v5943_v3  ;;  %v5946_v41 = vadd.f32 %v5945_v20, %v5944_v37 }
 0x6c9   : > { %v6797_v28 = vadd.f32 %v6796_v54, %v5946_v41 }
 0x6cb   : > { %v5947_v21 = vpop.f32.mrb[64].mxu0 }
 0x6cc   : > { %v5948_v35 = vpop.f32.mrb[65].mxu0 }
 0x6cd   : > { %v5949_v6 = vadd.f32 %v5948_v35, %v5947_v21  ;;  %v5950_v59 = vpop.f32.mrb[66].mxu0 }
 0x6ce   : > { %v5951_v39 = vpop.f32.mrb[67].mxu0 }
 0x6cf   : > { %v6824_v56 = vadd.f32 %v6823_v38, %v5949_v6  ;;  %v5952_v18 = vadd.f32 %v5951_v39, %v5950_v59 }
 0x6d1   : > { %v6842_v45 = vadd.f32 %v6841_v14, %v5952_v18 }
 0x6d3   : > { %v5953_v62 = vpop.f32.mrb[68].mxu0 }
 0x6d4   : > { %v5954_v42 = vpop.f32.mrb[69].mxu0 }
 0x6d5   : > { %v5955_v26 = vadd.f32 %v5954_v42, %v5953_v62  ;;  %v5956_v31 = vpop.f32.mrb[70].mxu0 }
 0x6d6   : > { %v5957_v29 = vpop.f32.mrb[71].mxu0 }
 0x6d7   : > { %v6815_v9 = vadd.f32 %v6814_v22, %v5955_v26  ;;  %v5958_v58 = vadd.f32 %v5957_v29, %v5956_v31 }
 0x6d9   : > { %v6833_v53 = vadd.f32 %v6832_v51, %v5958_v58 }
 0x6db   : > { %v5987_v63 = vpop.f32.mrb[72].mxu0 }
 0x6dc   : > { %v5988_v12 = vpop.f32.mrb[73].mxu0 }
 0x6dd   : > { %v5989_v17 = vadd.f32 %v5988_v12, %v5987_v63  ;;  %v5990_v54 = vpop.f32.mrb[74].mxu0 }
 0x6de   : > { %v5991_v43 = vpop.f32.mrb[75].mxu0 }
 0x6df   : > { %v6789_v1 = vadd.f32 %v6788_v50, %v5989_v17  ;;  %v5992_v57 = vadd.f32 %v5991_v43, %v5990_v54 }
 0x6e1   : > { %v6807_v25 = vadd.f32 %v6806_v10, %v5992_v57 }
 0x6e3   : > { %v5993_v0 = vpop.f32.mrb[76].mxu0 }
 0x6e4   : > { %v5994_v30 = vpop.f32.mrb[77].mxu0 }
 0x6e5   : > { %v5995_v55 = vadd.f32 %v5994_v30, %v5993_v0  ;;  %v5996_v52 = vpop.f32.mrb[78].mxu0 }
 0x6e6   : > { %v5997_v38 = vpop.f32.mrb[79].mxu0 }
 0x6e7   : > { %v6780_v16 = vadd.f32 %v6779_v40, %v5995_v55  ;;  %v5998_v14 = vadd.f32 %v5997_v38, %v5996_v52 }
 0x6e9   : > { %v6798_v34 = vadd.f32 %v6797_v28, %v5998_v14 }
 0x6eb   : > { %v5999_v13 = vpop.f32.mrb[80].mxu0 }
 0x6ec   : > { %v6000_v24 = vpop.f32.mrb[81].mxu0 }
 0x6ed   : > { %v6001_v11 = vadd.f32 %v6000_v24, %v5999_v13  ;;  %v6002_v33 = vpop.f32.mrb[82].mxu0 }
 0x6ee   : > { %v6003_v48 = vpop.f32.mrb[83].mxu0 }
 0x6ef   : > { %v6825_v36 = vadd.f32 %v6824_v56, %v6001_v11  ;;  %v6004_v19 = vadd.f32 %v6003_v48, %v6002_v33 }
 0x6f1   : > { %v6843_v5 = vadd.f32 %v6842_v45, %v6004_v19 }
 0x6f4   : > { %v6005_v2 = vpop.f32.mrb[84].mxu0 }
 0x6f5   : > { %v6006_v4 = vpop.f32.mrb[85].mxu0 }
 0x6f6   : > { %v6007_v22 = vadd.f32 %v6006_v4, %v6005_v2  ;;  %v6008_v47 = vpop.f32.mrb[86].mxu0 }
 0x6f7   : > { %v6009_v51 = vpop.f32.mrb[87].mxu0 }
 0x6f8   : > { %v6816_v32 = vadd.f32 %v6815_v9, %v6007_v22  ;;  %v6010_v8 = vadd.f32 %v6009_v51, %v6008_v47 }
 0x6fa   : > { %v6834_v61 = vadd.f32 %v6833_v53, %v6010_v8 }
 0x6fc   : > { %v6039_v27 = vpop.f32.mrb[88].mxu0 }
 0x6fd   : > { %v6040_v49 = vpop.f32.mrb[89].mxu0 }
 0x6fe   : > { %v6041_v23 = vadd.f32 %v6040_v49, %v6039_v27  ;;  %v6042_v7 = vpop.f32.mrb[90].mxu0 }
 0x6ff   : > { %v6043_v46 = vpop.f32.mrb[91].mxu0 }
 0x700   : > { %v6790_v50 = vadd.f32 %v6789_v1, %v6041_v23  ;;  %v6044_v60 = vadd.f32 %v6043_v46, %v6042_v7 }
 0x702   : > { %v6808_v10 = vadd.f32 %v6807_v25, %v6044_v60 }
 0x704   : > { %v6045_v15 = vpop.f32.mrb[92].mxu0 }
 0x705   : > { %v6046_v44 = vpop.f32.mrb[93].mxu0 }
 0x706   : > { %v6047_v3 = vadd.f32 %v6046_v44, %v6045_v15  ;;  %v6048_v37 = vpop.f32.mrb[94].mxu0 }
 0x707   : > { %v6049_v20 = vpop.f32.mrb[95].mxu0 }
 0x708   : > { %v6781_v40 = vadd.f32 %v6780_v16, %v6047_v3  ;;  %v6050_v41 = vadd.f32 %v6049_v20, %v6048_v37 }
 0x70a   : > { %v6799_v28 = vadd.f32 %v6798_v34, %v6050_v41 }
 0x70c   : > { %v6051_v21 = vpop.f32.mrb[96].mxu0 }
 0x70d   : > { %v6052_v35 = vpop.f32.mrb[97].mxu0 }
 0x70e   : > { %v6053_v6 = vadd.f32 %v6052_v35, %v6051_v21  ;;  %v6054_v59 = vpop.f32.mrb[98].mxu0 }
 0x70f   : > { %v6055_v39 = vpop.f32.mrb[99].mxu0 }
 0x710   : > { %v6826_v56 = vadd.f32 %v6825_v36, %v6053_v6  ;;  %v6056_v18 = vadd.f32 %v6055_v39, %v6054_v59 }
 0x712   : > { %v6844_v45 = vadd.f32 %v6843_v5, %v6056_v18 }
 0x715   : > { %v6057_v62 = vpop.f32.mrb[100].mxu0 }
 0x716   : > { %v6058_v42 = vpop.f32.mrb[101].mxu0 }
 0x717   : > { %v6059_v26 = vadd.f32 %v6058_v42, %v6057_v62  ;;  %v6060_v31 = vpop.f32.mrb[102].mxu0 }
 0x718   : > { %v6061_v29 = vpop.f32.mrb[103].mxu0 }
 0x719   : > { %v6817_v9 = vadd.f32 %v6816_v32, %v6059_v26  ;;  %v6062_v58 = vadd.f32 %v6061_v29, %v6060_v31 }
 0x71b   : > { %v6835_v53 = vadd.f32 %v6834_v61, %v6062_v58 }
 0x71e   : > { %v6091_v63 = vpop.f32.mrb[104].mxu0 }
 0x71f   : > { %v6092_v12 = vpop.f32.mrb[105].mxu0 }
 0x720   : > { %v6093_v17 = vadd.f32 %v6092_v12, %v6091_v63  ;;  %v6094_v54 = vpop.f32.mrb[106].mxu0 }
 0x721   : > { %v6095_v43 = vpop.f32.mrb[107].mxu0 }
 0x722   : > { %v6791_v1 = vadd.f32 %v6790_v50, %v6093_v17  ;;  %v6096_v57 = vadd.f32 %v6095_v43, %v6094_v54 }
 0x724   : > { %v6809_v25 = vadd.f32 %v6808_v10, %v6096_v57 }
 0x726   : > { %v6097_v0 = vpop.f32.mrb[108].mxu0 }
 0x727   : > { %v6098_v30 = vpop.f32.mrb[109].mxu0 }
 0x728   : > { %v6099_v55 = vadd.f32 %v6098_v30, %v6097_v0  ;;  %v6100_v52 = vpop.f32.mrb[110].mxu0  ;;  %v5009_v30 = vld [vmem:[#allocation16] sm:$0x1] }
 0x729   : > { %v6101_v38 = vpop.f32.mrb[111].mxu0 }
 0x72a   : > { %v6782_v16 = vadd.f32 %v6781_v40, %v6099_v55  ;;  %v6102_v14 = vadd.f32 %v6101_v38, %v6100_v52 }
 0x72c   : > { %v6800_v34 = vadd.f32 %v6799_v28, %v6102_v14 }
 0x72e   : > { %v6103_v13 = vpop.f32.mrb[112].mxu0 }
 0x72f   : > { %v6104_v24 = vpop.f32.mrb[113].mxu0 }
 0x730   : > { %v6105_v11 = vadd.f32 %v6104_v24, %v6103_v13  ;;  %v6106_v33 = vpop.f32.mrb[114].mxu0 }
 0x731   : > { %v6107_v48 = vpop.f32.mrb[115].mxu0 }
 0x732   : > { %v6827_v36 = vadd.f32 %v6826_v56, %v6105_v11  ;;  %v6108_v19 = vadd.f32 %v6107_v48, %v6106_v33 }
 0x734   : > { %v6845_v5 = vadd.f32 %v6844_v45, %v6108_v19 }
 0x736   : > { %v6109_v2 = vpop.f32.mrb[116].mxu0 }
 0x737   : > { %v6110_v4 = vpop.f32.mrb[117].mxu0 }
 0x738   : > { %v6111_v22 = vadd.f32 %v6110_v4, %v6109_v2  ;;  %v6112_v47 = vpop.f32.mrb[118].mxu0 }
 0x739   : > { %v6113_v51 = vpop.f32.mrb[119].mxu0 }
 0x73a   : > { %v6818_v32 = vadd.f32 %v6817_v9, %v6111_v22  ;;  %v6114_v8 = vadd.f32 %v6113_v51, %v6112_v47 }
 0x73c   : > { %v6836_v61 = vadd.f32 %v6835_v53, %v6114_v8 }
 0x73e   : > { %v6143_v27 = vpop.f32.mrb[120].mxu0 }
 0x73f   : > { %v6144_v49 = vpop.f32.mrb[121].mxu0 }
 0x740   : > { %v6145_v23 = vadd.f32 %v6144_v49, %v6143_v27  ;;  %v6146_v7 = vpop.f32.mrb[122].mxu0 }
 0x741   : > { %v6147_v46 = vpop.f32.mrb[123].mxu0 }
 0x742   : > { %v6792_v50 = vadd.f32 %v6791_v1, %v6145_v23  ;;  %v6148_v60 = vadd.f32 %v6147_v46, %v6146_v7 }
 0x744   : > { %v6810_v10 = vadd.f32 %v6809_v25, %v6148_v60 }
 0x746   : > { %v6149_v15 = vpop.f32.mrb[124].mxu0 }
 0x747   : > { %v6150_v44 = vpop.f32.mrb[125].mxu0 }
 0x748   : > { %v6151_v3 = vadd.f32 %v6150_v44, %v6149_v15  ;;  %v6152_v37 = vpop.f32.mrb[126].mxu0 }
 0x749   : > { %v6153_v20 = vpop.f32.mrb[127].mxu0 }
 0x74a   : > { %v6783_v40 = vadd.f32 %v6782_v16, %v6151_v3  ;;  %v6154_v41 = vadd.f32 %v6153_v20, %v6152_v37 }
 0x74c   : > { %v6801_v28 = vadd.f32 %v6800_v34, %v6154_v41 }
 0x74e   : > { %v6155_v21 = vpop.f32.mrb[128].mxu0 }
 0x74f   : > { %v6156_v35 = vpop.f32.mrb[129].mxu0 }
 0x750   : > { %v6157_v6 = vadd.f32 %v6156_v35, %v6155_v21  ;;  %v6158_v59 = vpop.f32.mrb[130].mxu0  ;;  %v6590_v39 = vpop.f32.mrb[8].mxu1 }
 0x751   : > { %v6159_v56 = vpop.f32.mrb[131].mxu0  ;;  %v4950_v18 = vpop.f32.mrb[9].mxu1 }
 0x752   : > { %v6828_v45 = vadd.f32 %v6827_v36, %v6157_v6  ;;  %v6160_v62 = vadd.f32 %v6159_v56, %v6158_v59  ;;  %v6591_v42 = vpop.f32.mrb[10].mxu1 }
 0x753   : > { %v4953_v26 = vpop.f32.mrb[11].mxu1 }
 0x754   : > { %v6846_v31 = vadd.f32 %v6845_v5, %v6160_v62 }
 0x756   : > { %v6161_v29 = vpop.f32.mrb[132].mxu0 }
 0x757   : > { %v6162_v9 = vpop.f32.mrb[133].mxu0 }
 0x758   : > { %v6163_v58 = vadd.f32 %v6162_v9, %v6161_v29  ;;  %v6164_v53 = vpop.f32.mrb[134].mxu0  ;;  %v6594_v63 = vpop.f32.mrb[12].mxu1 }
 0x759   : > { %v6165_v12 = vpop.f32.mrb[135].mxu0  ;;  %v4966_v17 = vpop.f32.mrb[13].mxu1 }
 0x75a   : > { %v6819_v54 = vadd.f32 %v6818_v32, %v6163_v58  ;;  %v6166_v43 = vadd.f32 %v6165_v12, %v6164_v53  ;;  %v6595_v1 = vpop.f32.mrb[14].mxu1  ;;  %v11336_v53 = vld [vmem:[#allocation42_spill] sm:$0xff] }
 0x75b   : > { %v4969_v57 = vpop.f32.mrb[15].mxu1 }
 0x75c   : > { %v6837_v25 = vadd.f32 %v6836_v61, %v6166_v43 }
 0x75e   : > { %v6195_v0 = vpop.f32.mrb[136].mxu0 }
 0x75f   : > { %v6196_v55 = vpop.f32.mrb[137].mxu0 }
 0x760   : > { %v6197_v52 = vadd.f32 %v6196_v55, %v6195_v0  ;;  %v6198_v38 = vpop.f32.mrb[138].mxu0  ;;  %v5079_v16 = vpop.f32.mrb[16].mxu1 }
 0x761   : > { %v6199_v14 = vpop.f32.mrb[139].mxu0  ;;  %v5080_v34 = vadd.f32 %v5079_v16, %v5009_v30  ;;  %v6606_v13 = vpop.f32.mrb[17].mxu1 }
 0x762   : > { %v6793_v24 = vadd.f32 %v6792_v50, %v6197_v52  ;;  %v6200_v11 = vadd.f32 %v6199_v14, %v6198_v38 }
 0x763   : > { %v5637_v33 = vmul.f32 -1.442695, %v5080_v34 }
 0x764   : > { %v6794_v48 = vadd.f32 %v6793_v24, %v4950_v18  ;;  %v6811_v36 = vadd.f32 %v6810_v10, %v6200_v11 }
 0x765   : > { %7176 = vpow2.f32 %v5637_v33 }
 0x766   : > { %v6812_v19 = vadd.f32 %v6811_v36, %v4953_v26  ;;  %v6201_v5 = vpop.f32.mrb[140].mxu0 }
 0x767   : > { %v6202_v2 = vpop.f32.mrb[141].mxu0 }
 0x768   : > { %v6203_v4 = vadd.f32 %v6202_v2, %v6201_v5  ;;  %v6204_v22 = vpop.f32.mrb[142].mxu0 }
 0x769   : > { %v6205_v47 = vpop.f32.mrb[143].mxu0 }
 0x76a   : > { %v6784_v51 = vadd.f32 %v6783_v40, %v6203_v4  ;;  %v6206_v32 = vadd.f32 %v6205_v47, %v6204_v22 }
 0x76c   : > { %v6785_v8 = vadd.f32 %v6784_v51, %v6590_v39  ;;  %v6802_v61 = vadd.f32 %v6801_v28, %v6206_v32  ;;  %v5635_v39 = vld [vmem:[#allocation12] ss:$0 sm:$0xff] }
 0x76d   : > { %v4997_v26 = vadd.f32 %v6812_v19, %v5635_v39 }
 0x76e   : > { %v6803_v27 = vadd.f32 %v6802_v61, %v6591_v42  ;;  %v6207_v49 = vpop.f32.mrb[144].mxu0  ;;  %v4998_v9 = vadd.f32 %v6785_v8, %v5635_v39 }
 0x76f   : > { %v7177_v23 = vpop.eup %7176  ;;  %v6208_v7 = vpop.f32.mrb[145].mxu0 }
 0x770   : > { %v5086_v46 = vadd.f32 1.0, %v7177_v23  ;;  %v6209_v50 = vadd.f32 %v6208_v7, %v6207_v49  ;;  %v6210_v60 = vpop.f32.mrb[146].mxu0  ;;  %v4999_v58 = vadd.f32 %v6803_v27, %v5635_v39 }
 0x771   : > { %v6211_v10 = vpop.f32.mrb[147].mxu0 }
 0x772   : > { %7178 = vrcp.f32 %v5086_v46  ;;  %v6829_v15 = vadd.f32 %v6828_v45, %v6209_v50  ;;  %v6212_v44 = vadd.f32 %v6211_v10, %v6210_v60  ;;  %v4996_v45 = vadd.f32 %v6794_v48, %v5635_v39 }
 0x774   : > { %v6830_v3 = vadd.f32 %v6829_v15, %v4966_v17  ;;  %v6847_v37 = vadd.f32 %v6846_v31, %v6212_v44 }
 0x776   : > { %v6848_v20 = vadd.f32 %v6847_v37, %v4969_v57  ;;  %v6213_v41 = vpop.f32.mrb[148].mxu0  ;;  %v5000_v17 = vadd.f32 %v6830_v3, %v5635_v39 }
 0x777   : > { %v6214_v40 = vpop.f32.mrb[149].mxu0 }
 0x778   : > { %v6215_v21 = vadd.f32 %v6214_v40, %v6213_v41  ;;  %v6216_v28 = vpop.f32.mrb[150].mxu0 }
 0x779   : > { %v6217_v35 = vpop.f32.mrb[151].mxu0 }
 0x77a   : > { %v6820_v6 = vadd.f32 %v6819_v54, %v6215_v21  ;;  %v6218_v59 = vadd.f32 %v6217_v35, %v6216_v28 }
 0x77c   : > { %v7179_v56 = vpop.eup %7178  ;;  %v6821_v18 = vadd.f32 %v6820_v6, %v6594_v63  ;;  %v6838_v62 = vadd.f32 %v6837_v25, %v6218_v59  ;;  %v5001_v63 = vadd.f32 %v6848_v20, %v5635_v39 }
 0x77d   : > { %v5089_v42 = vmul.f32 %v7179_v56, %v5080_v34 }
 0x77e   : > { %v6839_v29 = vadd.f32 %v6838_v62, %v6595_v1  ;;  %v6252_v31 = vpop.f32.mrb[152].mxu0  ;;  %v5002_v43 = vadd.f32 %v6821_v18, %v5635_v39  ;;  %v10707_v1 = vld [vmem:[#allocation18] ss:$0 sm:$0xff] }
 0x77f   : > { %v5093_v12 = vrot.slane %v5089_v42, %v11336_v53  ;;  %v6253_v54 = vpop.f32.mrb[153].mxu0 }
 0x780   : > { %v5003_v57 = vadd.f32 %v6839_v29, %v5635_v39  ;;  %v6254_v25 = vadd.f32 %v6253_v54, %v6252_v31  ;;  %v6255_v0 = vpop.f32.mrb[154].mxu0  ;;  %v10709_v30 = vpop.f32.mrb[20].mxu1 }
 0x781   : > { %v5094_v55 = vadd.f32 %v5093_v12, %v4996_v45  ;;  %v5095_v52 = vadd.f32 %v5093_v12, %v4997_v26  ;;  %v5096_v38 = vadd.f32 %v5093_v12, %v4998_v9  ;;  %v5097_v16 = vadd.f32 %v5093_v12, %v4999_v58  ;;  %v6256_v14 = vpop.f32.mrb[155].mxu0  ;;  %v5292_v34 = vpop.f32.mrb[21].mxu1 }
 0x782   : > { %v5098_v13 = vadd.f32 %v5093_v12, %v5000_v17  ;;  %v5099_v24 = vadd.f32 %v5093_v12, %v5001_v63  ;;  %v5100_v11 = vadd.f32 %v5093_v12, %v5002_v43  ;;  %v5101_v33 = vadd.f32 %v5093_v12, %v5003_v57  ;;  %v6626_v48 = vpop.f32.mrb[22].mxu1 }
 0x783   : > { %5331 = vst [vmem:[%s10703_s25] sm:$0xff] %v5094_v55  ;;  %5332 = vst [vmem:[%s10703_s25 + $0x8] sm:$0xff] %v5095_v52  ;;  %v6257_v36 = vadd.f32 %v6256_v14, %v6255_v0  ;;  %v5228_v19 = vadd.f32 %v6254_v25, %v10707_v1  ;;  %v5295_v5 = vpop.f32.mrb[23].mxu1 }
 0x784   : > { %5333 = vst [vmem:[%s10703_s25 + $0x10] sm:$0xff] %v5096_v38  ;;  %5334 = vst [vmem:[%s10703_s25 + $0x18] sm:$0xff] %v5097_v16 }
 0x785   : > { %5335 = vst [vmem:[%s10703_s25 + $0x20] sm:$0xff] %v5098_v13  ;;  %5336 = vst [vmem:[%s10703_s25 + $0x28] sm:$0xff] %v5099_v24  ;;  %v5293_v2 = vadd.f32 %v5292_v34, %v5228_v19  ;;  %v5231_v4 = vadd.f32 %v6257_v36, %v10707_v1 }
 0x786   : > { %5337 = vst [vmem:[%s10703_s25 + $0x30] sm:$0xff] %v5100_v11  ;;  %5338 = vst [vmem:[%s10703_s25 + $0x38] sm:$0xff] %v5101_v33 }
 0x787   : > { %7562 = shalt.err (!%p7559_p8)
}
 0x788   : > { %s7563_s10 = scalar_lea.hbm %s10716_s18, 1024  ;;  %s7567_s22 = scalar_lea.hbm %s11337_s27, 2048 }
 0x789   : > { %p7564_p4 = scmp.ne.s32.totalorder %s10716_s18, %s7563_s10  ;;  %p7568_p13 = scmp.lt.u32.totalorder %s10716_s18, %s11337_s27 }
 0x78a   : > { %p7569_p3 = scmp.lt.u32.totalorder %s7567_s22, %s7563_s10  ;;  %p7571_p10 = scmp.lt.u32.totalorder %s7563_s10, %s10716_s18 }
 0x78b   : > { %p7565_p2 = pnand %p7564_p4, %p11338_p1 }
 0x78c   : > { %p7570_p9 = por %p7569_p3, %p7568_p13 }
 0x78d   : > { %p7566_p12 = pneg %p7565_p2 }
 0x78e   : > { %p7572_p0 = por %p7571_p10, %p7570_p9 }
 0x790   : > { %p7573_p5 = pnand %p7572_p0, %p7566_p12 }
 0x792   : > { %7576 = shalt.err (!%p7573_p5)
}
 0x793   : > { %s7702_s25 = smov 128   ;;  %s7703_s28 = smov 8   ;;  %v6258_v22 = vpop.f32.mrb[156].mxu0  ;;  %v5296_v51 = vadd.f32 %v5295_v5, %v5231_v4  ;;  %v6629_v61 = vpop.f32.mrb[24].mxu1 }
 0x794   : > { %6956 = dma.vmem_to_hbm [thread:$0]  (%p11338_p1), %s10718_s23, 1024, %s10716_s18, %s5340_s6, %s7702_s25, %s7702_s25, %s7703_s28   ;;  %v6259_v47 = vpop.f32.mrb[157].mxu0  ;;  %v5308_v49 = vpop.f32.mrb[25].mxu1 }
 0x795   : > { %s10759_s7 = scalar_lea.vmem [#allocation21], %s5605_s21  ;;  %v6260_v32 = vadd.f32 %v6259_v47, %v6258_v22  ;;  %v6261_v8 = vpop.f32.mrb[158].mxu0  ;;  %v6630_v46 = vpop.f32.mrb[26].mxu1  ;;  %s11339_s6 = sld [smem:[#allocation88_spill]] }
 0x796   : > { %5323 = vst [vmem:[%s10759_s7] sm:$0xff] %v5293_v2  ;;  %v6262_v27 = vpop.f32.mrb[159].mxu0  ;;  %5324 = vst [vmem:[%s10759_s7 + $0x8] sm:$0xff] %v5296_v51  ;;  %v5311_v50 = vpop.f32.mrb[27].mxu1  ;;  %s5374_s21 = sshll.u32 %s10759_s7, 4  ;;  %s5345_s2 = scalar_lea.sflag [#allocation22], %s8146_s24  ;;  %s10775_s21 = int_to_ptr.vmem [resolvable:$true] %s5374_s21 }
 0x797   : > { %v6263_v23 = vadd.f32 %v6262_v27, %v6261_v8  ;;  %v5236_v7 = vadd.f32 %v6260_v32, %v10707_v1  ;;  %v6264_v44 = vpop.f32.mrb[160].mxu0  ;;  %s7577_s1 = scalar_lea.vmem %s10775_s21, 1024  ;;  %s7704_s9 = smov [#allocation21]  }
 0x798   : > { %v6265_v3 = vpop.f32.mrb[161].mxu0  ;;  %p7578_p7 = scmp.ne.s32.totalorder %s10775_s21, %s7577_s1  ;;  %s7581_s10 = sshll.u32 %s7704_s9, 4  ;;  %s7582_s10 = int_to_ptr.vmem [resolvable:$false] %s7581_s10 }
 0x799   : > { %v5301_v60 = vadd.f32 %v10709_v30, %v5236_v7  ;;  %v5239_v10 = vadd.f32 %v6263_v23, %v10707_v1  ;;  %v6266_v37 = vadd.f32 %v6265_v3, %v6264_v44  ;;  %v6267_v20 = vpop.f32.mrb[162].mxu0  ;;  %s7583_s14 = scalar_lea.vmem %s7582_s10, 2048  ;;  %p7584_p8 = scmp.lt.s32.totalorder %s10775_s21, %s7582_s10 }
 0x79a   : > { %v6268_v41 = vpop.f32.mrb[163].mxu0  ;;  %p7579_p11 = pnand %p7578_p7, %p11338_p1  ;;  %p7585_p4 = scmp.lt.s32.totalorder %s7583_s14, %s7577_s1 }
 0x79b   : > { %5325 = vst [vmem:[%s10759_s7 + $0x10] sm:$0xff] %v5301_v60  ;;  %v5304_v15 = vadd.f32 %v6626_v48, %v5239_v10  ;;  %v6269_v40 = vadd.f32 %v6268_v41, %v6267_v20  ;;  %v5244_v21 = vadd.f32 %v6266_v37, %v10707_v1  ;;  %v6270_v6 = vpop.f32.mrb[164].mxu0  ;;  %s10783_s0 = scalar_lea.hbm %s11339_s6, %s5647_s20 }
 0x79c   : > { %v6271_v39 = vpop.f32.mrb[165].mxu0  ;;  %p7580_p6 = pneg %p7579_p11  ;;  %p7586_p2 = por %p7585_p4, %p7584_p8 }
 0x79d   : > { %5326 = vst [vmem:[%s10759_s7 + $0x18] sm:$0xff] %v5304_v15  ;;  %v5309_v28 = vadd.f32 %v5308_v49, %v5244_v21  ;;  %v5247_v35 = vadd.f32 %v6269_v40, %v10707_v1  ;;  %v6272_v56 = vadd.f32 %v6271_v39, %v6270_v6  ;;  %v6273_v18 = vpop.f32.mrb[166].mxu0 }
 0x79e   : > { %v6274_v62 = vpop.f32.mrb[167].mxu0  ;;  %p7587_p12 = pnand %p7586_p2, %p7580_p6 }
 0x79f   : > { %5327 = vst [vmem:[%s10759_s7 + $0x20] sm:$0xff] %v5309_v28  ;;  %v5312_v59 = vadd.f32 %v5311_v50, %v5247_v35  ;;  %v5252_v42 = vadd.f32 %v6272_v56, %v10707_v1  ;;  %v6275_v45 = vadd.f32 %v6274_v62, %v6273_v18 }
 0x7a1   : > { %5328 = vst [vmem:[%s10759_s7 + $0x28] sm:$0xff] %v5312_v59  ;;  %v5317_v26 = vadd.f32 %v6629_v61, %v5252_v42  ;;  %v5255_v29 = vadd.f32 %v6275_v45, %v10707_v1 }
 0x7a3   : > { %5329 = vst [vmem:[%s10759_s7 + $0x30] sm:$0xff] %v5317_v26  ;;  %v5320_v31 = vadd.f32 %v6630_v46, %v5255_v29 }
 0x7a5   : > { %5330 = vst [vmem:[%s10759_s7 + $0x38] sm:$0xff] %v5320_v31 }
 0x7a6   : > { %7590 = shalt.err (!%p7587_p12)
}
 0x7a7   : > { %s7591_s19 = scalar_lea.hbm %s10783_s0, 1024  ;;  %s7595_s22 = scalar_lea.hbm %s11339_s6, 2048 }
 0x7a8   : > { %p7592_p13 = scmp.ne.s32.totalorder %s10783_s0, %s7591_s19  ;;  %p7596_p10 = scmp.lt.u32.totalorder %s10783_s0, %s11339_s6 }
 0x7a9   : > { %p7597_p0 = scmp.lt.u32.totalorder %s7595_s22, %s7591_s19  ;;  %p7599_p7 = scmp.lt.u32.totalorder %s7591_s19, %s10783_s0 }
 0x7aa   : > { %p7593_p3 = pnand %p7592_p13, %p11338_p1 }
 0x7ab   : > { %p7598_p5 = por %p7597_p0, %p7596_p10 }
 0x7ac   : > { %p7594_p9 = pneg %p7593_p3 }
 0x7ad   : > { %p7600_p11 = por %p7599_p7, %p7598_p5 }
 0x7af   : > { %p7601_p6 = pnand %p7600_p11, %p7594_p9 }
 0x7b1   : > { %7604 = shalt.err (!%p7601_p6)
}
 0x7b2   : > { %6957 = dma.vmem_to_hbm [thread:$0]  (%p11338_p1), %s10775_s21, 1024, %s10783_s0, %s5345_s2, %s7702_s25, %s7702_s25, %s7703_s28  }
 0x7b3 PF: > { %s11340_s7 = sld [smem:[#allocation36_spill]]  ;;  %s5389_s23 = sand.u32 1, %s7667_s29  }
 0x7b4   : > { %p11342_p4 = scmp.ge.s32.totalorder %s7679_s16, 2  ;;  %s5390_s18 = scalar_lea.sflag [#allocation5], %s5389_s23 }
 0x7b9   : > { %p11341_p8 = scmp.ne.s32.totalorder %s11340_s7, 0 }
 0x7bb   : > { %p6996_p2 = pnand %p11342_p4, %p11341_p8 }
 0x7bd   : > { %7658 = dma.done.wait (!%p6996_p2), %s5390_s18, 1024  }
 0x7be   : > { %7660 = vsyncadd (!%p6996_p2), %s5390_s18, 4294966272  ;;  %s5399_s13 = scalar_lea.sflag [#allocation22], %s5389_s23 }
 0x7bf   : > { %7662 = dma.done.wait (!%p6996_p2), %s5399_s13, 1024  }
 0x7c0   : > { %7664 = vsyncadd (!%p6996_p2), %s5399_s13, 4294966272  ;;  %s11343_s16 = sld [smem:[#allocation34_spill]]  ;;  %s11344_s24 = sld [smem:[#allocation35_spill]] }
 0x7c1   : > { %s11345_s29 = smov %s7671_s30  ;;  %s11346_s30 = smov %s7675_s15 }
 0x7c6   : > { %p35_p1 = scmp.ge.s32.totalorder %s11343_s16, 4   ;;  %s11347_s15 = smov %s11344_s24 }
 0x7c8   :  { %37 = sbr.rel (!%p35_p1) target bundleno = 24 (0x18), region = 181 }
 0x7cf   :  { %5404 = vsyncpa [#allocation4], 1 }
 0x7d0   :  { %5406 = vsyncpa [#allocation4 + $0x1], 1 }
 0x7d1   :  { %5407 = vsyncpa [#allocation7], 1 }
 0x7d2   :  { %5408 = vsyncpa [#allocation10], 1 }
 0x7d3   :  { %5409 = vsyncpa [#allocation13], 1 }
 0x7d4   :  { %5410 = vsyncpa [#allocation19], 1 }
 0x7d5   :  { %5411 = vsyncpa [#allocation5], 1 }
 0x7d6   :  { %5413 = vsyncpa [#allocation5 + $0x1], 1 }
 0x7d7   :  { %5414 = vsyncpa [#allocation22], 1 }
 0x7d8   :  { %5416 = vsyncpa [#allocation22 + $0x1], 1 }

</bundles_post_ra>
